<compile_context>
chip_gen: v7x
topology: tpu7x:2x2x1
jax: 0.10.0
libtpu: 0.0.40
codegen_flags: <defaults>
</compile_context>

<pallas_src>
import jax
import jax.numpy as jnp
import numpy as np
from jax.experimental import pallas as pl
from jax.experimental.pallas import tpu as pltpu

NCLASSES = 20


# ----------------------------- fused kernel --------------------------------

def _net_kernel(x_ref, w1_ref, b1_ref, s1_ref, w2_ref, b2_ref, s2_ref,
                w3_ref, b3_ref, s3_ref, fw1_ref, fb1_ref, fw2_ref, fb2_ref,
                o_ref):
    # Processes one image per grid step.  Activations are kept as 2-D slabs
    # [H, W*C] (rows = height, lanes = width*channels) so every conv is a set
    # of plain 2-D MXU matmuls and no in-kernel transpose is ever needed.

    def conv_pool_relu(x2d, w_ref, b_ref, sel_ref):
        # x2d: [H, W*C] f32.  w_ref: [2, K, W*C, PW*OC] bf16 banded-Toeplitz
        # weights (parity-split over output columns).  sel_ref: [PH, OH-1]
        # 0/1 row-pool selection.  b_ref: [1, PW*OC] bias tiled over PW.
        k = w_ref.shape[1]
        h = x2d.shape[0]
        oh = h - k + 1
        acc_even = None
        acc_odd = None
        for ki in range(k):                      # K shifted matmuls, unrolled
            lhs = x2d[ki:ki + oh, :].astype(jnp.bfloat16)
            p_even = jnp.dot(lhs, w_ref[0, ki],
                             preferred_element_type=jnp.float32)
            p_odd = jnp.dot(lhs, w_ref[1, ki],
                            preferred_element_type=jnp.float32)
            acc_even = p_even if acc_even is None else acc_even + p_even
            acc_odd = p_odd if acc_odd is None else acc_odd + p_odd
        # 2x2 max-pool: columns via the parity split, rows via pairwise max +
        # a 0/1 selection matmul (compacts rows 0,2,4,... on the MXU).  Odd
        # trailing rows/cols are dropped, matching F.max_pool2d semantics.
        colmax = jnp.maximum(acc_even, acc_odd)              # [OH, PW*OC]
        rowmax = jnp.maximum(colmax[:oh - 1, :], colmax[1:, :])
        pooled = jnp.dot(sel_ref[...], rowmax,
                         preferred_element_type=jnp.float32)  # [PH, PW*OC]
        return jnp.maximum(pooled + b_ref[...], 0.0)

    x = x_ref[0]                                              # [64, 192]
    x = conv_pool_relu(x, w1_ref, b1_ref, s1_ref)             # [30, 300]
    x = conv_pool_relu(x, w2_ref, b2_ref, s2_ref)             # [13, 260]
    x = conv_pool_relu(x, w3_ref, b3_ref, s3_ref)             # [ 4,  80]

    # fc1 (+ReLU) + fc2, fused.  fw1 rows are pre-permuted so the contraction
    # over (c, h, w) matches PyTorch's x.view(-1, 320) exactly; looping over
    # the 4 spatial rows avoids a lane<->sublane reshape of the activation.
    h1 = fb1_ref[...]                                         # [1, 50]
    for hh in range(x.shape[0]):
        h1 = h1 + jnp.dot(x[hh:hh + 1, :], fw1_ref[hh],
                          preferred_element_type=jnp.float32)
    h1 = jnp.maximum(h1, 0.0)
    logits = jnp.dot(h1, fw2_ref[...],
                     preferred_element_type=jnp.float32) + fb2_ref[...]
    o_ref[0] = logits                                         # [1, NCLASSES]


# ------------------------- one-time weight prep -----------------------------

def _toeplitz_conv_weight(w, w_in):
    """PyTorch conv weight [OC, C, K, K] -> [2, K, W*C, PW*OC] bf16.

    T[s, ki, w'*C + c, pw*OC + oc] = w[oc, c, ki, w' - (2*pw + s)] (banded),
    so  sum_{w',c} x[oh+ki, w'*C+c] * T[s, ki]  gives the conv output at
    (oh, ow=2*pw+s, oc); summing over ki completes the conv and the two
    parities s feed the 2x2 column max directly.
    """
    oc, c, k, _ = w.shape
    ow = w_in - k + 1
    pw = ow // 2
    wp = np.arange(w_in).reshape(1, 1, w_in, 1)
    pwi = np.arange(pw).reshape(1, 1, 1, pw)
    kj = np.arange(k).reshape(1, k, 1, 1)
    s = np.arange(2).reshape(2, 1, 1, 1)
    e = (wp == 2 * pwi + s + kj).astype(np.float32)      # [2, K, W, PW]
    t = jnp.einsum("skwp,ocik->siwcpo", jnp.asarray(e), w)
    return t.reshape(2, k, w_in * c, pw * oc).astype(jnp.bfloat16)


def _pool_select(oh):
    """[PH, OH-1] 0/1 matrix selecting rows 0,2,4,... of the pairwise row max."""
    ph = oh // 2
    return (np.arange(oh - 1).reshape(1, -1)
            == (2 * np.arange(ph)).reshape(-1, 1)).astype(np.float32)


def prepare_params(params, input_hw=64):
    """Build all kernel-layout arrays once (hoisted out of the per-call path)."""
    kp = {}
    h = w = input_hw
    convs = [(params["conv1_w"], params["conv1_b"]),
             (params["conv2_w"], params["conv2_b"]),
             (params["con3_w"] if "conv3_w" not in params else params["conv3_w"],
              params["conv3_b"])]
    for idx, (cw, cb) in enumerate(convs, start=1):
        oc, _, k, _ = cw.shape
        oh, ow = h - k + 1, w - k + 1
        ph, pw = oh // 2, ow // 2
        kp[f"w{idx}"] = _toeplitz_conv_weight(cw, w)
        kp[f"b{idx}"] = jnp.tile(cb, pw).reshape(1, pw * oc).astype(jnp.float32)
        kp[f"s{idx}"] = jnp.asarray(_pool_select(oh), jnp.float32)
        h, w = ph, pw
    c3 = params["conv3_w"].shape[0]
    ph3, pw3 = h, w
    # fc1_w[j, c*ph3*pw3 + h*pw3 + w] -> fw1[h, w*c3 + c, j]
    fw1 = params["fc1_w"].reshape(-1, c3, ph3, pw3)
    fw1 = jnp.transpose(fw1, (2, 3, 1, 0)).reshape(ph3, pw3 * c3, -1)
    kp["fw1"] = fw1.astype(jnp.float32)
    kp["fb1"] = params["fc1_b"].reshape(1, -1).astype(jnp.float32)
    kp["fw2"] = params["fc2_w"].T.astype(jnp.float32)
    kp["fb2"] = params["fc2_b"].reshape(1, -1).astype(jnp.float32)
    return kp


# ------------------------------- forward ------------------------------------

def net_forward(x_nchw, kp):
    n, c_in, hw, _ = x_nchw.shape
    # NCHW -> [N, H, W*C] slab (cheap, ~100 KB); everything else is in-kernel.
    x = jnp.transpose(x_nchw, (0, 2, 3, 1)).reshape(n, hw, hw * c_in)

    ordered = [kp["w1"], kp["b1"], kp["s1"],
               kp["w2"], kp["b2"], kp["s2"],
               kp["w3"], kp["b3"], kp["s3"],
               kp["fw1"], kp["fb1"], kp["fw2"], kp["fb2"]]

    def _bcast_spec(a):
        nd = a.ndim
        return pl.BlockSpec(a.shape, lambda i, _nd=nd: (0,) * _nd)

    in_specs = [pl.BlockSpec((1, hw, hw * c_in), lambda i: (i, 0, 0))]
    in_specs += [_bcast_spec(a) for a in ordered]

    out = pl.pallas_call(
        _net_kernel,
        out_shape=jax.ShapeDtypeStruct((n, 1, NCLASSES), jnp.float32),
        grid_spec=pltpu.PrefetchScalarGridSpec(
            num_scalar_prefetch=0,
            grid=(n,),                       # one image per step; v7x megacore
            in_specs=in_specs,
            out_specs=pl.BlockSpec((1, 1, NCLASSES), lambda i: (i, 0, 0)),
        ),
        compiler_params=pltpu.CompilerParams(
            dimension_semantics=("parallel",),
            vmem_limit_bytes=32 * 1024 * 1024,
        ),
    )(x, *ordered)
    return out.reshape(n, NCLASSES)


# --------------------------------- main --------------------------------------

if __name__ == "__main__":
    key = jax.random.PRNGKey(0)
    keys = jax.random.split(key, 11)

    def u(k, shape, fan_in):
        bound = 1.0 / (fan_in ** 0.5)
        return jax.random.uniform(k, shape, jnp.float32, -bound, bound)

    params = {
        "conv1_w": u(keys[0], (10, 3, 5, 5), 3 * 25),
        "conv1_b": u(keys[1], (10,), 3 * 25),
        "conv2_w": u(keys[2], (20, 10, 5, 5), 10 * 25),
        "conv2_b": u(keys[3], (20,), 10 * 25),
        "conv3_w": u(keys[4], (20, 20, 5, 5), 20 * 25),
        "conv3_b": u(keys[5], (20,), 20 * 25),
        "fc1_w": u(keys[6], (50, 320), 320),
        "fc1_b": u(keys[7], (50,), 320),
        "fc2_w": u(keys[8], (NCLASSES, 50), 50),
        "fc2_b": u(keys[9], (NCLASSES,), 50),
    }

    # Kernel-layout weights (Toeplitz conv weights, pool selectors, permuted
    # fc weights) are built exactly once, outside the per-forward path.
    kp = prepare_params(params, input_hw=64)

    # input_size=64 => fc1_input=320, batch=2, channels=3.
    x = jax.random.normal(keys[10], (2, 3, 64, 64), jnp.float32)

    out = jax.jit(net_forward)(x, kp)
    jax.block_until_ready(out)
    assert out.shape == (2, NCLASSES), out.shape
    print("KERNEL_OK")
</pallas_src>

<mosaic_0001>
module attributes {stable_mosaic.version = 11 : i64} {
  func.func @_net_kernel(%arg0: i32, %arg1: memref<1x64x192xf32, #tpu.memory_space<vmem>>, %arg2: memref<2x5x192x300xbf16, #tpu.memory_space<vmem>>, %arg3: memref<1x300xf32, #tpu.memory_space<vmem>>, %arg4: memref<30x59xf32, #tpu.memory_space<vmem>>, %arg5: memref<2x5x300x260xbf16, #tpu.memory_space<vmem>>, %arg6: memref<1x260xf32, #tpu.memory_space<vmem>>, %arg7: memref<13x25xf32, #tpu.memory_space<vmem>>, %arg8: memref<2x5x260x80xbf16, #tpu.memory_space<vmem>>, %arg9: memref<1x80xf32, #tpu.memory_space<vmem>>, %arg10: memref<4x8xf32, #tpu.memory_space<vmem>>, %arg11: memref<4x80x50xf32, #tpu.memory_space<vmem>>, %arg12: memref<1x50xf32, #tpu.memory_space<vmem>>, %arg13: memref<50x20xf32, #tpu.memory_space<vmem>>, %arg14: memref<1x20xf32, #tpu.memory_space<vmem>>, %arg15: memref<1x1x20xf32, #tpu.memory_space<vmem>>) attributes {dimension_semantics = [#tpu.dimension_semantics<parallel>], iteration_bounds = array<i64: 2>, scalar_prefetch = 0 : i64, scratch_operands = 0 : i64, tpu.core_type = #tpu.core_type<tc>, window_params = [{transform_indices = @transform_0, window_bounds = array<i64: 1, 64, 192>}, {pipeline_mode = #tpu.pipeline_mode<synchronous>, transform_indices = @transform_1, window_bounds = array<i64: 2, 5, 192, 300>}, {pipeline_mode = #tpu.pipeline_mode<synchronous>, transform_indices = @transform_2, window_bounds = array<i64: 1, 300>}, {pipeline_mode = #tpu.pipeline_mode<synchronous>, transform_indices = @transform_3, window_bounds = array<i64: 30, 59>}, {pipeline_mode = #tpu.pipeline_mode<synchronous>, transform_indices = @transform_4, window_bounds = array<i64: 2, 5, 300, 260>}, {pipeline_mode = #tpu.pipeline_mode<synchronous>, transform_indices = @transform_5, window_bounds = array<i64: 1, 260>}, {pipeline_mode = #tpu.pipeline_mode<synchronous>, transform_indices = @transform_6, window_bounds = array<i64: 13, 25>}, {pipeline_mode = #tpu.pipeline_mode<synchronous>, transform_indices = @transform_7, window_bounds = array<i64: 2, 5, 260, 80>}, {pipeline_mode = #tpu.pipeline_mode<synchronous>, transform_indices = @transform_8, window_bounds = array<i64: 1, 80>}, {pipeline_mode = #tpu.pipeline_mode<synchronous>, transform_indices = @transform_9, window_bounds = array<i64: 4, 8>}, {pipeline_mode = #tpu.pipeline_mode<synchronous>, transform_indices = @transform_10, window_bounds = array<i64: 4, 80, 50>}, {pipeline_mode = #tpu.pipeline_mode<synchronous>, transform_indices = @transform_11, window_bounds = array<i64: 1, 50>}, {pipeline_mode = #tpu.pipeline_mode<synchronous>, transform_indices = @transform_12, window_bounds = array<i64: 50, 20>}, {pipeline_mode = #tpu.pipeline_mode<synchronous>, transform_indices = @transform_13, window_bounds = array<i64: 1, 20>}, {transform_indices = @transform_14, window_bounds = array<i64: 1, 1, 20>}]} {
    %c0 = arith.constant 0 : index
    %c0_0 = arith.constant 0 : index
    %c0_1 = arith.constant 0 : index
    %0 = vector.load %arg1[%c0, %c0_0, %c0_1] : memref<1x64x192xf32, #tpu.memory_space<vmem>>, vector<1x64x192xf32>
    %1 = vector.shape_cast %0 : vector<1x64x192xf32> to vector<64x192xf32>
    %2 = vector.extract_strided_slice %1 {offsets = [0, 0], sizes = [60, 192], strides = [1, 1]} : vector<64x192xf32> to vector<60x192xf32>
    %3 = arith.truncf %2 : vector<60x192xf32> to vector<60x192xbf16>
    %c0_2 = arith.constant 0 : index
    %c0_3 = arith.constant 0 : index
    %c0_4 = arith.constant 0 : index
    %c0_5 = arith.constant 0 : index
    %4 = vector.load %arg2[%c0_2, %c0_3, %c0_4, %c0_5] : memref<2x5x192x300xbf16, #tpu.memory_space<vmem>>, vector<1x1x192x300xbf16>
    %5 = vector.shape_cast %4 : vector<1x1x192x300xbf16> to vector<192x300xbf16>
    %cst = arith.constant dense<0.000000e+00> : vector<60x300xf32>
    %6 = tpu.matmul %3, %5, %cst {dimension_numbers = #tpu.dot_dimension_numbers<[1], [0], [0], [1], [0, 0, 1, 1], [], []>} : vector<60x192xbf16>, vector<192x300xbf16>, vector<60x300xf32> -> vector<60x300xf32>
    %c1 = arith.constant 1 : index
    %c0_6 = arith.constant 0 : index
    %c0_7 = arith.constant 0 : index
    %c0_8 = arith.constant 0 : index
    %7 = vector.load %arg2[%c1, %c0_6, %c0_7, %c0_8] : memref<2x5x192x300xbf16, #tpu.memory_space<vmem>>, vector<1x1x192x300xbf16>
    %8 = vector.shape_cast %7 : vector<1x1x192x300xbf16> to vector<192x300xbf16>
    %cst_9 = arith.constant dense<0.000000e+00> : vector<60x300xf32>
    %9 = tpu.matmul %3, %8, %cst_9 {dimension_numbers = #tpu.dot_dimension_numbers<[1], [0], [0], [1], [0, 0, 1, 1], [], []>} : vector<60x192xbf16>, vector<192x300xbf16>, vector<60x300xf32> -> vector<60x300xf32>
    %10 = vector.extract_strided_slice %1 {offsets = [1, 0], sizes = [60, 192], strides = [1, 1]} : vector<64x192xf32> to vector<60x192xf32>
    %11 = arith.truncf %10 : vector<60x192xf32> to vector<60x192xbf16>
    %c0_10 = arith.constant 0 : index
    %c1_11 = arith.constant 1 : index
    %c0_12 = arith.constant 0 : index
    %c0_13 = arith.constant 0 : index
    %12 = vector.load %arg2[%c0_10, %c1_11, %c0_12, %c0_13] : memref<2x5x192x300xbf16, #tpu.memory_space<vmem>>, vector<1x1x192x300xbf16>
    %13 = vector.shape_cast %12 : vector<1x1x192x300xbf16> to vector<192x300xbf16>
    %cst_14 = arith.constant dense<0.000000e+00> : vector<60x300xf32>
    %14 = tpu.matmul %11, %13, %cst_14 {dimension_numbers = #tpu.dot_dimension_numbers<[1], [0], [0], [1], [0, 0, 1, 1], [], []>} : vector<60x192xbf16>, vector<192x300xbf16>, vector<60x300xf32> -> vector<60x300xf32>
    %c1_15 = arith.constant 1 : index
    %c1_16 = arith.constant 1 : index
    %c0_17 = arith.constant 0 : index
    %c0_18 = arith.constant 0 : index
    %15 = vector.load %arg2[%c1_15, %c1_16, %c0_17, %c0_18] : memref<2x5x192x300xbf16, #tpu.memory_space<vmem>>, vector<1x1x192x300xbf16>
    %16 = vector.shape_cast %15 : vector<1x1x192x300xbf16> to vector<192x300xbf16>
    %cst_19 = arith.constant dense<0.000000e+00> : vector<60x300xf32>
    %17 = tpu.matmul %11, %16, %cst_19 {dimension_numbers = #tpu.dot_dimension_numbers<[1], [0], [0], [1], [0, 0, 1, 1], [], []>} : vector<60x192xbf16>, vector<192x300xbf16>, vector<60x300xf32> -> vector<60x300xf32>
    %18 = arith.addf %6, %14 : vector<60x300xf32>
    %19 = arith.addf %9, %17 : vector<60x300xf32>
    %20 = vector.extract_strided_slice %1 {offsets = [2, 0], sizes = [60, 192], strides = [1, 1]} : vector<64x192xf32> to vector<60x192xf32>
    %21 = arith.truncf %20 : vector<60x192xf32> to vector<60x192xbf16>
    %c0_20 = arith.constant 0 : index
    %c2 = arith.constant 2 : index
    %c0_21 = arith.constant 0 : index
    %c0_22 = arith.constant 0 : index
    %22 = vector.load %arg2[%c0_20, %c2, %c0_21, %c0_22] : memref<2x5x192x300xbf16, #tpu.memory_space<vmem>>, vector<1x1x192x300xbf16>
    %23 = vector.shape_cast %22 : vector<1x1x192x300xbf16> to vector<192x300xbf16>
    %cst_23 = arith.constant dense<0.000000e+00> : vector<60x300xf32>
    %24 = tpu.matmul %21, %23, %cst_23 {dimension_numbers = #tpu.dot_dimension_numbers<[1], [0], [0], [1], [0, 0, 1, 1], [], []>} : vector<60x192xbf16>, vector<192x300xbf16>, vector<60x300xf32> -> vector<60x300xf32>
    %c1_24 = arith.constant 1 : index
    %c2_25 = arith.constant 2 : index
    %c0_26 = arith.constant 0 : index
    %c0_27 = arith.constant 0 : index
    %25 = vector.load %arg2[%c1_24, %c2_25, %c0_26, %c0_27] : memref<2x5x192x300xbf16, #tpu.memory_space<vmem>>, vector<1x1x192x300xbf16>
    %26 = vector.shape_cast %25 : vector<1x1x192x300xbf16> to vector<192x300xbf16>
    %cst_28 = arith.constant dense<0.000000e+00> : vector<60x300xf32>
    %27 = tpu.matmul %21, %26, %cst_28 {dimension_numbers = #tpu.dot_dimension_numbers<[1], [0], [0], [1], [0, 0, 1, 1], [], []>} : vector<60x192xbf16>, vector<192x300xbf16>, vector<60x300xf32> -> vector<60x300xf32>
    %28 = arith.addf %18, %24 : vector<60x300xf32>
    %29 = arith.addf %19, %27 : vector<60x300xf32>
    %30 = vector.extract_strided_slice %1 {offsets = [3, 0], sizes = [60, 192], strides = [1, 1]} : vector<64x192xf32> to vector<60x192xf32>
    %31 = arith.truncf %30 : vector<60x192xf32> to vector<60x192xbf16>
    %c0_29 = arith.constant 0 : index
    %c3 = arith.constant 3 : index
    %c0_30 = arith.constant 0 : index
    %c0_31 = arith.constant 0 : index
    %32 = vector.load %arg2[%c0_29, %c3, %c0_30, %c0_31] : memref<2x5x192x300xbf16, #tpu.memory_space<vmem>>, vector<1x1x192x300xbf16>
    %33 = vector.shape_cast %32 : vector<1x1x192x300xbf16> to vector<192x300xbf16>
    %cst_32 = arith.constant dense<0.000000e+00> : vector<60x300xf32>
    %34 = tpu.matmul %31, %33, %cst_32 {dimension_numbers = #tpu.dot_dimension_numbers<[1], [0], [0], [1], [0, 0, 1, 1], [], []>} : vector<60x192xbf16>, vector<192x300xbf16>, vector<60x300xf32> -> vector<60x300xf32>
    %c1_33 = arith.constant 1 : index
    %c3_34 = arith.constant 3 : index
    %c0_35 = arith.constant 0 : index
    %c0_36 = arith.constant 0 : index
    %35 = vector.load %arg2[%c1_33, %c3_34, %c0_35, %c0_36] : memref<2x5x192x300xbf16, #tpu.memory_space<vmem>>, vector<1x1x192x300xbf16>
    %36 = vector.shape_cast %35 : vector<1x1x192x300xbf16> to vector<192x300xbf16>
    %cst_37 = arith.constant dense<0.000000e+00> : vector<60x300xf32>
    %37 = tpu.matmul %31, %36, %cst_37 {dimension_numbers = #tpu.dot_dimension_numbers<[1], [0], [0], [1], [0, 0, 1, 1], [], []>} : vector<60x192xbf16>, vector<192x300xbf16>, vector<60x300xf32> -> vector<60x300xf32>
    %38 = arith.addf %28, %34 : vector<60x300xf32>
    %39 = arith.addf %29, %37 : vector<60x300xf32>
    %40 = vector.extract_strided_slice %1 {offsets = [4, 0], sizes = [60, 192], strides = [1, 1]} : vector<64x192xf32> to vector<60x192xf32>
    %41 = arith.truncf %40 : vector<60x192xf32> to vector<60x192xbf16>
    %c0_38 = arith.constant 0 : index
    %c4 = arith.constant 4 : index
    %c0_39 = arith.constant 0 : index
    %c0_40 = arith.constant 0 : index
    %42 = vector.load %arg2[%c0_38, %c4, %c0_39, %c0_40] : memref<2x5x192x300xbf16, #tpu.memory_space<vmem>>, vector<1x1x192x300xbf16>
    %43 = vector.shape_cast %42 : vector<1x1x192x300xbf16> to vector<192x300xbf16>
    %cst_41 = arith.constant dense<0.000000e+00> : vector<60x300xf32>
    %44 = tpu.matmul %41, %43, %cst_41 {dimension_numbers = #tpu.dot_dimension_numbers<[1], [0], [0], [1], [0, 0, 1, 1], [], []>} : vector<60x192xbf16>, vector<192x300xbf16>, vector<60x300xf32> -> vector<60x300xf32>
    %c1_42 = arith.constant 1 : index
    %c4_43 = arith.constant 4 : index
    %c0_44 = arith.constant 0 : index
    %c0_45 = arith.constant 0 : index
    %45 = vector.load %arg2[%c1_42, %c4_43, %c0_44, %c0_45] : memref<2x5x192x300xbf16, #tpu.memory_space<vmem>>, vector<1x1x192x300xbf16>
    %46 = vector.shape_cast %45 : vector<1x1x192x300xbf16> to vector<192x300xbf16>
    %cst_46 = arith.constant dense<0.000000e+00> : vector<60x300xf32>
    %47 = tpu.matmul %41, %46, %cst_46 {dimension_numbers = #tpu.dot_dimension_numbers<[1], [0], [0], [1], [0, 0, 1, 1], [], []>} : vector<60x192xbf16>, vector<192x300xbf16>, vector<60x300xf32> -> vector<60x300xf32>
    %48 = arith.addf %38, %44 : vector<60x300xf32>
    %49 = arith.addf %39, %47 : vector<60x300xf32>
    %50 = arith.maximumf %48, %49 : vector<60x300xf32>
    %51 = vector.extract_strided_slice %50 {offsets = [0, 0], sizes = [59, 300], strides = [1, 1]} : vector<60x300xf32> to vector<59x300xf32>
    %52 = vector.extract_strided_slice %50 {offsets = [1, 0], sizes = [59, 300], strides = [1, 1]} : vector<60x300xf32> to vector<59x300xf32>
    %53 = arith.maximumf %51, %52 : vector<59x300xf32>
    %c0_47 = arith.constant 0 : index
    %c0_48 = arith.constant 0 : index
    %54 = vector.load %arg4[%c0_47, %c0_48] : memref<30x59xf32, #tpu.memory_space<vmem>>, vector<30x59xf32>
    %cst_49 = arith.constant dense<0.000000e+00> : vector<30x300xf32>
    %55 = tpu.matmul %54, %53, %cst_49 {dimension_numbers = #tpu.dot_dimension_numbers<[1], [0], [0], [1], [0, 0, 1, 1], [], []>} : vector<30x59xf32>, vector<59x300xf32>, vector<30x300xf32> -> vector<30x300xf32>
    %c0_50 = arith.constant 0 : index
    %c0_51 = arith.constant 0 : index
    %56 = vector.load %arg3[%c0_50, %c0_51] : memref<1x300xf32, #tpu.memory_space<vmem>>, vector<1x300xf32>
    %57 = vector.broadcast %56 : vector<1x300xf32> to vector<30x300xf32>
    %58 = arith.addf %55, %57 : vector<30x300xf32>
    %cst_52 = arith.constant 0.000000e+00 : f32
    %59 = vector.broadcast %cst_52 : f32 to vector<30x300xf32>
    %60 = arith.maximumf %58, %59 : vector<30x300xf32>
    %61 = vector.extract_strided_slice %60 {offsets = [0, 0], sizes = [26, 300], strides = [1, 1]} : vector<30x300xf32> to vector<26x300xf32>
    %62 = arith.truncf %61 : vector<26x300xf32> to vector<26x300xbf16>
    %c0_53 = arith.constant 0 : index
    %c0_54 = arith.constant 0 : index
    %c0_55 = arith.constant 0 : index
    %c0_56 = arith.constant 0 : index
    %63 = vector.load %arg5[%c0_53, %c0_54, %c0_55, %c0_56] : memref<2x5x300x260xbf16, #tpu.memory_space<vmem>>, vector<1x1x300x260xbf16>
    %64 = vector.shape_cast %63 : vector<1x1x300x260xbf16> to vector<300x260xbf16>
    %cst_57 = arith.constant dense<0.000000e+00> : vector<26x260xf32>
    %65 = tpu.matmul %62, %64, %cst_57 {dimension_numbers = #tpu.dot_dimension_numbers<[1], [0], [0], [1], [0, 0, 1, 1], [], []>} : vector<26x300xbf16>, vector<300x260xbf16>, vector<26x260xf32> -> vector<26x260xf32>
    %c1_58 = arith.constant 1 : index
    %c0_59 = arith.constant 0 : index
    %c0_60 = arith.constant 0 : index
    %c0_61 = arith.constant 0 : index
    %66 = vector.load %arg5[%c1_58, %c0_59, %c0_60, %c0_61] : memref<2x5x300x260xbf16, #tpu.memory_space<vmem>>, vector<1x1x300x260xbf16>
    %67 = vector.shape_cast %66 : vector<1x1x300x260xbf16> to vector<300x260xbf16>
    %cst_62 = arith.constant dense<0.000000e+00> : vector<26x260xf32>
    %68 = tpu.matmul %62, %67, %cst_62 {dimension_numbers = #tpu.dot_dimension_numbers<[1], [0], [0], [1], [0, 0, 1, 1], [], []>} : vector<26x300xbf16>, vector<300x260xbf16>, vector<26x260xf32> -> vector<26x260xf32>
    %69 = vector.extract_strided_slice %60 {offsets = [1, 0], sizes = [26, 300], strides = [1, 1]} : vector<30x300xf32> to vector<26x300xf32>
    %70 = arith.truncf %69 : vector<26x300xf32> to vector<26x300xbf16>
    %c0_63 = arith.constant 0 : index
    %c1_64 = arith.constant 1 : index
    %c0_65 = arith.constant 0 : index
    %c0_66 = arith.constant 0 : index
    %71 = vector.load %arg5[%c0_63, %c1_64, %c0_65, %c0_66] : memref<2x5x300x260xbf16, #tpu.memory_space<vmem>>, vector<1x1x300x260xbf16>
    %72 = vector.shape_cast %71 : vector<1x1x300x260xbf16> to vector<300x260xbf16>
    %cst_67 = arith.constant dense<0.000000e+00> : vector<26x260xf32>
    %73 = tpu.matmul %70, %72, %cst_67 {dimension_numbers = #tpu.dot_dimension_numbers<[1], [0], [0], [1], [0, 0, 1, 1], [], []>} : vector<26x300xbf16>, vector<300x260xbf16>, vector<26x260xf32> -> vector<26x260xf32>
    %c1_68 = arith.constant 1 : index
    %c1_69 = arith.constant 1 : index
    %c0_70 = arith.constant 0 : index
    %c0_71 = arith.constant 0 : index
    %74 = vector.load %arg5[%c1_68, %c1_69, %c0_70, %c0_71] : memref<2x5x300x260xbf16, #tpu.memory_space<vmem>>, vector<1x1x300x260xbf16>
    %75 = vector.shape_cast %74 : vector<1x1x300x260xbf16> to vector<300x260xbf16>
    %cst_72 = arith.constant dense<0.000000e+00> : vector<26x260xf32>
    %76 = tpu.matmul %70, %75, %cst_72 {dimension_numbers = #tpu.dot_dimension_numbers<[1], [0], [0], [1], [0, 0, 1, 1], [], []>} : vector<26x300xbf16>, vector<300x260xbf16>, vector<26x260xf32> -> vector<26x260xf32>
    %77 = arith.addf %65, %73 : vector<26x260xf32>
    %78 = arith.addf %68, %76 : vector<26x260xf32>
    %79 = vector.extract_strided_slice %60 {offsets = [2, 0], sizes = [26, 300], strides = [1, 1]} : vector<30x300xf32> to vector<26x300xf32>
    %80 = arith.truncf %79 : vector<26x300xf32> to vector<26x300xbf16>
    %c0_73 = arith.constant 0 : index
    %c2_74 = arith.constant 2 : index
    %c0_75 = arith.constant 0 : index
    %c0_76 = arith.constant 0 : index
    %81 = vector.load %arg5[%c0_73, %c2_74, %c0_75, %c0_76] : memref<2x5x300x260xbf16, #tpu.memory_space<vmem>>, vector<1x1x300x260xbf16>
    %82 = vector.shape_cast %81 : vector<1x1x300x260xbf16> to vector<300x260xbf16>
    %cst_77 = arith.constant dense<0.000000e+00> : vector<26x260xf32>
    %83 = tpu.matmul %80, %82, %cst_77 {dimension_numbers = #tpu.dot_dimension_numbers<[1], [0], [0], [1], [0, 0, 1, 1], [], []>} : vector<26x300xbf16>, vector<300x260xbf16>, vector<26x260xf32> -> vector<26x260xf32>
    %c1_78 = arith.constant 1 : index
    %c2_79 = arith.constant 2 : index
    %c0_80 = arith.constant 0 : index
    %c0_81 = arith.constant 0 : index
    %84 = vector.load %arg5[%c1_78, %c2_79, %c0_80, %c0_81] : memref<2x5x300x260xbf16, #tpu.memory_space<vmem>>, vector<1x1x300x260xbf16>
    %85 = vector.shape_cast %84 : vector<1x1x300x260xbf16> to vector<300x260xbf16>
    %cst_82 = arith.constant dense<0.000000e+00> : vector<26x260xf32>
    %86 = tpu.matmul %80, %85, %cst_82 {dimension_numbers = #tpu.dot_dimension_numbers<[1], [0], [0], [1], [0, 0, 1, 1], [], []>} : vector<26x300xbf16>, vector<300x260xbf16>, vector<26x260xf32> -> vector<26x260xf32>
    %87 = arith.addf %77, %83 : vector<26x260xf32>
    %88 = arith.addf %78, %86 : vector<26x260xf32>
    %89 = vector.extract_strided_slice %60 {offsets = [3, 0], sizes = [26, 300], strides = [1, 1]} : vector<30x300xf32> to vector<26x300xf32>
    %90 = arith.truncf %89 : vector<26x300xf32> to vector<26x300xbf16>
    %c0_83 = arith.constant 0 : index
    %c3_84 = arith.constant 3 : index
    %c0_85 = arith.constant 0 : index
    %c0_86 = arith.constant 0 : index
    %91 = vector.load %arg5[%c0_83, %c3_84, %c0_85, %c0_86] : memref<2x5x300x260xbf16, #tpu.memory_space<vmem>>, vector<1x1x300x260xbf16>
    %92 = vector.shape_cast %91 : vector<1x1x300x260xbf16> to vector<300x260xbf16>
    %cst_87 = arith.constant dense<0.000000e+00> : vector<26x260xf32>
    %93 = tpu.matmul %90, %92, %cst_87 {dimension_numbers = #tpu.dot_dimension_numbers<[1], [0], [0], [1], [0, 0, 1, 1], [], []>} : vector<26x300xbf16>, vector<300x260xbf16>, vector<26x260xf32> -> vector<26x260xf32>
    %c1_88 = arith.constant 1 : index
    %c3_89 = arith.constant 3 : index
    %c0_90 = arith.constant 0 : index
    %c0_91 = arith.constant 0 : index
    %94 = vector.load %arg5[%c1_88, %c3_89, %c0_90, %c0_91] : memref<2x5x300x260xbf16, #tpu.memory_space<vmem>>, vector<1x1x300x260xbf16>
    %95 = vector.shape_cast %94 : vector<1x1x300x260xbf16> to vector<300x260xbf16>
    %cst_92 = arith.constant dense<0.000000e+00> : vector<26x260xf32>
    %96 = tpu.matmul %90, %95, %cst_92 {dimension_numbers = #tpu.dot_dimension_numbers<[1], [0], [0], [1], [0, 0, 1, 1], [], []>} : vector<26x300xbf16>, vector<300x260xbf16>, vector<26x260xf32> -> vector<26x260xf32>
    %97 = arith.addf %87, %93 : vector<26x260xf32>
    %98 = arith.addf %88, %96 : vector<26x260xf32>
    %99 = vector.extract_strided_slice %60 {offsets = [4, 0], sizes = [26, 300], strides = [1, 1]} : vector<30x300xf32> to vector<26x300xf32>
    %100 = arith.truncf %99 : vector<26x300xf32> to vector<26x300xbf16>
    %c0_93 = arith.constant 0 : index
    %c4_94 = arith.constant 4 : index
    %c0_95 = arith.constant 0 : index
    %c0_96 = arith.constant 0 : index
    %101 = vector.load %arg5[%c0_93, %c4_94, %c0_95, %c0_96] : memref<2x5x300x260xbf16, #tpu.memory_space<vmem>>, vector<1x1x300x260xbf16>
    %102 = vector.shape_cast %101 : vector<1x1x300x260xbf16> to vector<300x260xbf16>
    %cst_97 = arith.constant dense<0.000000e+00> : vector<26x260xf32>
    %103 = tpu.matmul %100, %102, %cst_97 {dimension_numbers = #tpu.dot_dimension_numbers<[1], [0], [0], [1], [0, 0, 1, 1], [], []>} : vector<26x300xbf16>, vector<300x260xbf16>, vector<26x260xf32> -> vector<26x260xf32>
    %c1_98 = arith.constant 1 : index
    %c4_99 = arith.constant 4 : index
    %c0_100 = arith.constant 0 : index
    %c0_101 = arith.constant 0 : index
    %104 = vector.load %arg5[%c1_98, %c4_99, %c0_100, %c0_101] : memref<2x5x300x260xbf16, #tpu.memory_space<vmem>>, vector<1x1x300x260xbf16>
    %105 = vector.shape_cast %104 : vector<1x1x300x260xbf16> to vector<300x260xbf16>
    %cst_102 = arith.constant dense<0.000000e+00> : vector<26x260xf32>
    %106 = tpu.matmul %100, %105, %cst_102 {dimension_numbers = #tpu.dot_dimension_numbers<[1], [0], [0], [1], [0, 0, 1, 1], [], []>} : vector<26x300xbf16>, vector<300x260xbf16>, vector<26x260xf32> -> vector<26x260xf32>
    %107 = arith.addf %97, %103 : vector<26x260xf32>
    %108 = arith.addf %98, %106 : vector<26x260xf32>
    %109 = arith.maximumf %107, %108 : vector<26x260xf32>
    %110 = vector.extract_strided_slice %109 {offsets = [0, 0], sizes = [25, 260], strides = [1, 1]} : vector<26x260xf32> to vector<25x260xf32>
    %111 = vector.extract_strided_slice %109 {offsets = [1, 0], sizes = [25, 260], strides = [1, 1]} : vector<26x260xf32> to vector<25x260xf32>
    %112 = arith.maximumf %110, %111 : vector<25x260xf32>
    %c0_103 = arith.constant 0 : index
    %c0_104 = arith.constant 0 : index
    %113 = vector.load %arg7[%c0_103, %c0_104] : memref<13x25xf32, #tpu.memory_space<vmem>>, vector<13x25xf32>
    %cst_105 = arith.constant dense<0.000000e+00> : vector<13x260xf32>
    %114 = tpu.matmul %113, %112, %cst_105 {dimension_numbers = #tpu.dot_dimension_numbers<[1], [0], [0], [1], [0, 0, 1, 1], [], []>} : vector<13x25xf32>, vector<25x260xf32>, vector<13x260xf32> -> vector<13x260xf32>
    %c0_106 = arith.constant 0 : index
    %c0_107 = arith.constant 0 : index
    %115 = vector.load %arg6[%c0_106, %c0_107] : memref<1x260xf32, #tpu.memory_space<vmem>>, vector<1x260xf32>
    %116 = vector.broadcast %115 : vector<1x260xf32> to vector<13x260xf32>
    %117 = arith.addf %114, %116 : vector<13x260xf32>
    %cst_108 = arith.constant 0.000000e+00 : f32
    %118 = vector.broadcast %cst_108 : f32 to vector<13x260xf32>
    %119 = arith.maximumf %117, %118 : vector<13x260xf32>
    %120 = vector.extract_strided_slice %119 {offsets = [0, 0], sizes = [9, 260], strides = [1, 1]} : vector<13x260xf32> to vector<9x260xf32>
    %121 = arith.truncf %120 : vector<9x260xf32> to vector<9x260xbf16>
    %c0_109 = arith.constant 0 : index
    %c0_110 = arith.constant 0 : index
    %c0_111 = arith.constant 0 : index
    %c0_112 = arith.constant 0 : index
    %122 = vector.load %arg8[%c0_109, %c0_110, %c0_111, %c0_112] : memref<2x5x260x80xbf16, #tpu.memory_space<vmem>>, vector<1x1x260x80xbf16>
    %123 = vector.shape_cast %122 : vector<1x1x260x80xbf16> to vector<260x80xbf16>
    %cst_113 = arith.constant dense<0.000000e+00> : vector<9x80xf32>
    %124 = tpu.matmul %121, %123, %cst_113 {dimension_numbers = #tpu.dot_dimension_numbers<[1], [0], [0], [1], [0, 0, 1, 1], [], []>} : vector<9x260xbf16>, vector<260x80xbf16>, vector<9x80xf32> -> vector<9x80xf32>
    %c1_114 = arith.constant 1 : index
    %c0_115 = arith.constant 0 : index
    %c0_116 = arith.constant 0 : index
    %c0_117 = arith.constant 0 : index
    %125 = vector.load %arg8[%c1_114, %c0_115, %c0_116, %c0_117] : memref<2x5x260x80xbf16, #tpu.memory_space<vmem>>, vector<1x1x260x80xbf16>
    %126 = vector.shape_cast %125 : vector<1x1x260x80xbf16> to vector<260x80xbf16>
    %cst_118 = arith.constant dense<0.000000e+00> : vector<9x80xf32>
    %127 = tpu.matmul %121, %126, %cst_118 {dimension_numbers = #tpu.dot_dimension_numbers<[1], [0], [0], [1], [0, 0, 1, 1], [], []>} : vector<9x260xbf16>, vector<260x80xbf16>, vector<9x80xf32> -> vector<9x80xf32>
    %128 = vector.extract_strided_slice %119 {offsets = [1, 0], sizes = [9, 260], strides = [1, 1]} : vector<13x260xf32> to vector<9x260xf32>
    %129 = arith.truncf %128 : vector<9x260xf32> to vector<9x260xbf16>
    %c0_119 = arith.constant 0 : index
    %c1_120 = arith.constant 1 : index
    %c0_121 = arith.constant 0 : index
    %c0_122 = arith.constant 0 : index
    %130 = vector.load %arg8[%c0_119, %c1_120, %c0_121, %c0_122] : memref<2x5x260x80xbf16, #tpu.memory_space<vmem>>, vector<1x1x260x80xbf16>
    %131 = vector.shape_cast %130 : vector<1x1x260x80xbf16> to vector<260x80xbf16>
    %cst_123 = arith.constant dense<0.000000e+00> : vector<9x80xf32>
    %132 = tpu.matmul %129, %131, %cst_123 {dimension_numbers = #tpu.dot_dimension_numbers<[1], [0], [0], [1], [0, 0, 1, 1], [], []>} : vector<9x260xbf16>, vector<260x80xbf16>, vector<9x80xf32> -> vector<9x80xf32>
    %c1_124 = arith.constant 1 : index
    %c1_125 = arith.constant 1 : index
    %c0_126 = arith.constant 0 : index
    %c0_127 = arith.constant 0 : index
    %133 = vector.load %arg8[%c1_124, %c1_125, %c0_126, %c0_127] : memref<2x5x260x80xbf16, #tpu.memory_space<vmem>>, vector<1x1x260x80xbf16>
    %134 = vector.shape_cast %133 : vector<1x1x260x80xbf16> to vector<260x80xbf16>
    %cst_128 = arith.constant dense<0.000000e+00> : vector<9x80xf32>
    %135 = tpu.matmul %129, %134, %cst_128 {dimension_numbers = #tpu.dot_dimension_numbers<[1], [0], [0], [1], [0, 0, 1, 1], [], []>} : vector<9x260xbf16>, vector<260x80xbf16>, vector<9x80xf32> -> vector<9x80xf32>
    %136 = arith.addf %124, %132 : vector<9x80xf32>
    %137 = arith.addf %127, %135 : vector<9x80xf32>
    %138 = vector.extract_strided_slice %119 {offsets = [2, 0], sizes = [9, 260], strides = [1, 1]} : vector<13x260xf32> to vector<9x260xf32>
    %139 = arith.truncf %138 : vector<9x260xf32> to vector<9x260xbf16>
    %c0_129 = arith.constant 0 : index
    %c2_130 = arith.constant 2 : index
    %c0_131 = arith.constant 0 : index
    %c0_132 = arith.constant 0 : index
    %140 = vector.load %arg8[%c0_129, %c2_130, %c0_131, %c0_132] : memref<2x5x260x80xbf16, #tpu.memory_space<vmem>>, vector<1x1x260x80xbf16>
    %141 = vector.shape_cast %140 : vector<1x1x260x80xbf16> to vector<260x80xbf16>
    %cst_133 = arith.constant dense<0.000000e+00> : vector<9x80xf32>
    %142 = tpu.matmul %139, %141, %cst_133 {dimension_numbers = #tpu.dot_dimension_numbers<[1], [0], [0], [1], [0, 0, 1, 1], [], []>} : vector<9x260xbf16>, vector<260x80xbf16>, vector<9x80xf32> -> vector<9x80xf32>
    %c1_134 = arith.constant 1 : index
    %c2_135 = arith.constant 2 : index
    %c0_136 = arith.constant 0 : index
    %c0_137 = arith.constant 0 : index
    %143 = vector.load %arg8[%c1_134, %c2_135, %c0_136, %c0_137] : memref<2x5x260x80xbf16, #tpu.memory_space<vmem>>, vector<1x1x260x80xbf16>
    %144 = vector.shape_cast %143 : vector<1x1x260x80xbf16> to vector<260x80xbf16>
    %cst_138 = arith.constant dense<0.000000e+00> : vector<9x80xf32>
    %145 = tpu.matmul %139, %144, %cst_138 {dimension_numbers = #tpu.dot_dimension_numbers<[1], [0], [0], [1], [0, 0, 1, 1], [], []>} : vector<9x260xbf16>, vector<260x80xbf16>, vector<9x80xf32> -> vector<9x80xf32>
    %146 = arith.addf %136, %142 : vector<9x80xf32>
    %147 = arith.addf %137, %145 : vector<9x80xf32>
    %148 = vector.extract_strided_slice %119 {offsets = [3, 0], sizes = [9, 260], strides = [1, 1]} : vector<13x260xf32> to vector<9x260xf32>
    %149 = arith.truncf %148 : vector<9x260xf32> to vector<9x260xbf16>
    %c0_139 = arith.constant 0 : index
    %c3_140 = arith.constant 3 : index
    %c0_141 = arith.constant 0 : index
    %c0_142 = arith.constant 0 : index
    %150 = vector.load %arg8[%c0_139, %c3_140, %c0_141, %c0_142] : memref<2x5x260x80xbf16, #tpu.memory_space<vmem>>, vector<1x1x260x80xbf16>
    %151 = vector.shape_cast %150 : vector<1x1x260x80xbf16> to vector<260x80xbf16>
    %cst_143 = arith.constant dense<0.000000e+00> : vector<9x80xf32>
    %152 = tpu.matmul %149, %151, %cst_143 {dimension_numbers = #tpu.dot_dimension_numbers<[1], [0], [0], [1], [0, 0, 1, 1], [], []>} : vector<9x260xbf16>, vector<260x80xbf16>, vector<9x80xf32> -> vector<9x80xf32>
    %c1_144 = arith.constant 1 : index
    %c3_145 = arith.constant 3 : index
    %c0_146 = arith.constant 0 : index
    %c0_147 = arith.constant 0 : index
    %153 = vector.load %arg8[%c1_144, %c3_145, %c0_146, %c0_147] : memref<2x5x260x80xbf16, #tpu.memory_space<vmem>>, vector<1x1x260x80xbf16>
    %154 = vector.shape_cast %153 : vector<1x1x260x80xbf16> to vector<260x80xbf16>
    %cst_148 = arith.constant dense<0.000000e+00> : vector<9x80xf32>
    %155 = tpu.matmul %149, %154, %cst_148 {dimension_numbers = #tpu.dot_dimension_numbers<[1], [0], [0], [1], [0, 0, 1, 1], [], []>} : vector<9x260xbf16>, vector<260x80xbf16>, vector<9x80xf32> -> vector<9x80xf32>
    %156 = arith.addf %146, %152 : vector<9x80xf32>
    %157 = arith.addf %147, %155 : vector<9x80xf32>
    %158 = vector.extract_strided_slice %119 {offsets = [4, 0], sizes = [9, 260], strides = [1, 1]} : vector<13x260xf32> to vector<9x260xf32>
    %159 = arith.truncf %158 : vector<9x260xf32> to vector<9x260xbf16>
    %c0_149 = arith.constant 0 : index
    %c4_150 = arith.constant 4 : index
    %c0_151 = arith.constant 0 : index
    %c0_152 = arith.constant 0 : index
    %160 = vector.load %arg8[%c0_149, %c4_150, %c0_151, %c0_152] : memref<2x5x260x80xbf16, #tpu.memory_space<vmem>>, vector<1x1x260x80xbf16>
    %161 = vector.shape_cast %160 : vector<1x1x260x80xbf16> to vector<260x80xbf16>
    %cst_153 = arith.constant dense<0.000000e+00> : vector<9x80xf32>
    %162 = tpu.matmul %159, %161, %cst_153 {dimension_numbers = #tpu.dot_dimension_numbers<[1], [0], [0], [1], [0, 0, 1, 1], [], []>} : vector<9x260xbf16>, vector<260x80xbf16>, vector<9x80xf32> -> vector<9x80xf32>
    %c1_154 = arith.constant 1 : index
    %c4_155 = arith.constant 4 : index
    %c0_156 = arith.constant 0 : index
    %c0_157 = arith.constant 0 : index
    %163 = vector.load %arg8[%c1_154, %c4_155, %c0_156, %c0_157] : memref<2x5x260x80xbf16, #tpu.memory_space<vmem>>, vector<1x1x260x80xbf16>
    %164 = vector.shape_cast %163 : vector<1x1x260x80xbf16> to vector<260x80xbf16>
    %cst_158 = arith.constant dense<0.000000e+00> : vector<9x80xf32>
    %165 = tpu.matmul %159, %164, %cst_158 {dimension_numbers = #tpu.dot_dimension_numbers<[1], [0], [0], [1], [0, 0, 1, 1], [], []>} : vector<9x260xbf16>, vector<260x80xbf16>, vector<9x80xf32> -> vector<9x80xf32>
    %166 = arith.addf %156, %162 : vector<9x80xf32>
    %167 = arith.addf %157, %165 : vector<9x80xf32>
    %168 = arith.maximumf %166, %167 : vector<9x80xf32>
    %169 = vector.extract_strided_slice %168 {offsets = [0, 0], sizes = [8, 80], strides = [1, 1]} : vector<9x80xf32> to vector<8x80xf32>
    %170 = vector.extract_strided_slice %168 {offsets = [1, 0], sizes = [8, 80], strides = [1, 1]} : vector<9x80xf32> to vector<8x80xf32>
    %171 = arith.maximumf %169, %170 : vector<8x80xf32>
    %c0_159 = arith.constant 0 : index
    %c0_160 = arith.constant 0 : index
    %172 = vector.load %arg10[%c0_159, %c0_160] : memref<4x8xf32, #tpu.memory_space<vmem>>, vector<4x8xf32>
    %cst_161 = arith.constant dense<0.000000e+00> : vector<4x80xf32>
    %173 = tpu.matmul %172, %171, %cst_161 {dimension_numbers = #tpu.dot_dimension_numbers<[1], [0], [0], [1], [0, 0, 1, 1], [], []>} : vector<4x8xf32>, vector<8x80xf32>, vector<4x80xf32> -> vector<4x80xf32>
    %c0_162 = arith.constant 0 : index
    %c0_163 = arith.constant 0 : index
    %174 = vector.load %arg9[%c0_162, %c0_163] : memref<1x80xf32, #tpu.memory_space<vmem>>, vector<1x80xf32>
    %175 = vector.broadcast %174 : vector<1x80xf32> to vector<4x80xf32>
    %176 = arith.addf %173, %175 : vector<4x80xf32>
    %cst_164 = arith.constant 0.000000e+00 : f32
    %177 = vector.broadcast %cst_164 : f32 to vector<4x80xf32>
    %178 = arith.maximumf %176, %177 : vector<4x80xf32>
    %c0_165 = arith.constant 0 : index
    %c0_166 = arith.constant 0 : index
    %179 = vector.load %arg12[%c0_165, %c0_166] : memref<1x50xf32, #tpu.memory_space<vmem>>, vector<1x50xf32>
    %180 = vector.extract_strided_slice %178 {offsets = [0, 0], sizes = [1, 80], strides = [1, 1]} : vector<4x80xf32> to vector<1x80xf32>
    %c0_167 = arith.constant 0 : index
    %c0_168 = arith.constant 0 : index
    %c0_169 = arith.constant 0 : index
    %181 = vector.load %arg11[%c0_167, %c0_168, %c0_169] : memref<4x80x50xf32, #tpu.memory_space<vmem>>, vector<1x80x50xf32>
    %182 = vector.shape_cast %181 : vector<1x80x50xf32> to vector<80x50xf32>
    %cst_170 = arith.constant dense<0.000000e+00> : vector<1x50xf32>
    %183 = tpu.matmul %180, %182, %cst_170 {dimension_numbers = #tpu.dot_dimension_numbers<[1], [0], [0], [1], [0, 0, 1, 1], [], []>} : vector<1x80xf32>, vector<80x50xf32>, vector<1x50xf32> -> vector<1x50xf32>
    %184 = arith.addf %179, %183 : vector<1x50xf32>
    %185 = vector.extract_strided_slice %178 {offsets = [1, 0], sizes = [1, 80], strides = [1, 1]} : vector<4x80xf32> to vector<1x80xf32>
    %c1_171 = arith.constant 1 : index
    %c0_172 = arith.constant 0 : index
    %c0_173 = arith.constant 0 : index
    %186 = vector.load %arg11[%c1_171, %c0_172, %c0_173] : memref<4x80x50xf32, #tpu.memory_space<vmem>>, vector<1x80x50xf32>
    %187 = vector.shape_cast %186 : vector<1x80x50xf32> to vector<80x50xf32>
    %cst_174 = arith.constant dense<0.000000e+00> : vector<1x50xf32>
    %188 = tpu.matmul %185, %187, %cst_174 {dimension_numbers = #tpu.dot_dimension_numbers<[1], [0], [0], [1], [0, 0, 1, 1], [], []>} : vector<1x80xf32>, vector<80x50xf32>, vector<1x50xf32> -> vector<1x50xf32>
    %189 = arith.addf %184, %188 : vector<1x50xf32>
    %190 = vector.extract_strided_slice %178 {offsets = [2, 0], sizes = [1, 80], strides = [1, 1]} : vector<4x80xf32> to vector<1x80xf32>
    %c2_175 = arith.constant 2 : index
    %c0_176 = arith.constant 0 : index
    %c0_177 = arith.constant 0 : index
    %191 = vector.load %arg11[%c2_175, %c0_176, %c0_177] : memref<4x80x50xf32, #tpu.memory_space<vmem>>, vector<1x80x50xf32>
    %192 = vector.shape_cast %191 : vector<1x80x50xf32> to vector<80x50xf32>
    %cst_178 = arith.constant dense<0.000000e+00> : vector<1x50xf32>
    %193 = tpu.matmul %190, %192, %cst_178 {dimension_numbers = #tpu.dot_dimension_numbers<[1], [0], [0], [1], [0, 0, 1, 1], [], []>} : vector<1x80xf32>, vector<80x50xf32>, vector<1x50xf32> -> vector<1x50xf32>
    %194 = arith.addf %189, %193 : vector<1x50xf32>
    %195 = vector.extract_strided_slice %178 {offsets = [3, 0], sizes = [1, 80], strides = [1, 1]} : vector<4x80xf32> to vector<1x80xf32>
    %c3_179 = arith.constant 3 : index
    %c0_180 = arith.constant 0 : index
    %c0_181 = arith.constant 0 : index
    %196 = vector.load %arg11[%c3_179, %c0_180, %c0_181] : memref<4x80x50xf32, #tpu.memory_space<vmem>>, vector<1x80x50xf32>
    %197 = vector.shape_cast %196 : vector<1x80x50xf32> to vector<80x50xf32>
    %cst_182 = arith.constant dense<0.000000e+00> : vector<1x50xf32>
    %198 = tpu.matmul %195, %197, %cst_182 {dimension_numbers = #tpu.dot_dimension_numbers<[1], [0], [0], [1], [0, 0, 1, 1], [], []>} : vector<1x80xf32>, vector<80x50xf32>, vector<1x50xf32> -> vector<1x50xf32>
    %199 = arith.addf %194, %198 : vector<1x50xf32>
    %cst_183 = arith.constant 0.000000e+00 : f32
    %200 = vector.broadcast %cst_183 : f32 to vector<1x50xf32>
    %201 = arith.maximumf %199, %200 : vector<1x50xf32>
    %c0_184 = arith.constant 0 : index
    %c0_185 = arith.constant 0 : index
    %202 = vector.load %arg13[%c0_184, %c0_185] : memref<50x20xf32, #tpu.memory_space<vmem>>, vector<50x20xf32>
    %cst_186 = arith.constant dense<0.000000e+00> : vector<1x20xf32>
    %203 = tpu.matmul %201, %202, %cst_186 {dimension_numbers = #tpu.dot_dimension_numbers<[1], [0], [0], [1], [0, 0, 1, 1], [], []>} : vector<1x50xf32>, vector<50x20xf32>, vector<1x20xf32> -> vector<1x20xf32>
    %c0_187 = arith.constant 0 : index
    %c0_188 = arith.constant 0 : index
    %204 = vector.load %arg14[%c0_187, %c0_188] : memref<1x20xf32, #tpu.memory_space<vmem>>, vector<1x20xf32>
    %205 = arith.addf %203, %204 : vector<1x20xf32>
    %c0_189 = arith.constant 0 : index
    %c0_190 = arith.constant 0 : index
    %c0_191 = arith.constant 0 : index
    %206 = vector.load %arg15[%c0_189, %c0_190, %c0_191] : memref<1x1x20xf32, #tpu.memory_space<vmem>>, vector<1x1x20xf32>
    %207 = vector.shape_cast %206 : vector<1x1x20xf32> to vector<1x20xf32>
    %208 = vector.shape_cast %205 : vector<1x20xf32> to vector<1x1x20xf32>
    tpu.vector_store %arg15[%c0_189, %c0_190, %c0_191], %208 {strides = array<i32>} : memref<1x1x20xf32, #tpu.memory_space<vmem>>, vector<1x1x20xf32>,
    return
  }
  func.func @transform_0(%arg0: i32) -> (i32, i32, i32) {
    %c0_i32 = arith.constant 0 : i32
    %c0_i32_0 = arith.constant 0 : i32
    %c0_i32_1 = arith.constant 0 : i32
    return %arg0, %c0_i32, %c0_i32_0 : i32, i32, i32
  }
  func.func @transform_1(%arg0: i32) -> (i32, i32, i32, i32) {
    %c0_i32 = arith.constant 0 : i32
    %c0_i32_0 = arith.constant 0 : i32
    %c0_i32_1 = arith.constant 0 : i32
    %c0_i32_2 = arith.constant 0 : i32
    %c0_i32_3 = arith.constant 0 : i32
    return %c0_i32, %c0_i32_0, %c0_i32_1, %c0_i32_2 : i32, i32, i32, i32
  }
  func.func @transform_2(%arg0: i32) -> (i32, i32) {
    %c0_i32 = arith.constant 0 : i32
    %c0_i32_0 = arith.constant 0 : i32
    %c0_i32_1 = arith.constant 0 : i32
    return %c0_i32, %c0_i32_0 : i32, i32
  }
  func.func @transform_3(%arg0: i32) -> (i32, i32) {
    %c0_i32 = arith.constant 0 : i32
    %c0_i32_0 = arith.constant 0 : i32
    %c0_i32_1 = arith.constant 0 : i32
    return %c0_i32, %c0_i32_0 : i32, i32
  }
  func.func @transform_4(%arg0: i32) -> (i32, i32, i32, i32) {
    %c0_i32 = arith.constant 0 : i32
    %c0_i32_0 = arith.constant 0 : i32
    %c0_i32_1 = arith.constant 0 : i32
    %c0_i32_2 = arith.constant 0 : i32
    %c0_i32_3 = arith.constant 0 : i32
    return %c0_i32, %c0_i32_0, %c0_i32_1, %c0_i32_2 : i32, i32, i32, i32
  }
  func.func @transform_5(%arg0: i32) -> (i32, i32) {
    %c0_i32 = arith.constant 0 : i32
    %c0_i32_0 = arith.constant 0 : i32
    %c0_i32_1 = arith.constant 0 : i32
    return %c0_i32, %c0_i32_0 : i32, i32
  }
  func.func @transform_6(%arg0: i32) -> (i32, i32) {
    %c0_i32 = arith.constant 0 : i32
    %c0_i32_0 = arith.constant 0 : i32
    %c0_i32_1 = arith.constant 0 : i32
    return %c0_i32, %c0_i32_0 : i32, i32
  }
  func.func @transform_7(%arg0: i32) -> (i32, i32, i32, i32) {
    %c0_i32 = arith.constant 0 : i32
    %c0_i32_0 = arith.constant 0 : i32
    %c0_i32_1 = arith.constant 0 : i32
    %c0_i32_2 = arith.constant 0 : i32
    %c0_i32_3 = arith.constant 0 : i32
    return %c0_i32, %c0_i32_0, %c0_i32_1, %c0_i32_2 : i32, i32, i32, i32
  }
  func.func @transform_8(%arg0: i32) -> (i32, i32) {
    %c0_i32 = arith.constant 0 : i32
    %c0_i32_0 = arith.constant 0 : i32
    %c0_i32_1 = arith.constant 0 : i32
    return %c0_i32, %c0_i32_0 : i32, i32
  }
  func.func @transform_9(%arg0: i32) -> (i32, i32) {
    %c0_i32 = arith.constant 0 : i32
    %c0_i32_0 = arith.constant 0 : i32
    %c0_i32_1 = arith.constant 0 : i32
    return %c0_i32, %c0_i32_0 : i32, i32
  }
  func.func @transform_10(%arg0: i32) -> (i32, i32, i32) {
    %c0_i32 = arith.constant 0 : i32
    %c0_i32_0 = arith.constant 0 : i32
    %c0_i32_1 = arith.constant 0 : i32
    %c0_i32_2 = arith.constant 0 : i32
    return %c0_i32, %c0_i32_0, %c0_i32_1 : i32, i32, i32
  }
  func.func @transform_11(%arg0: i32) -> (i32, i32) {
    %c0_i32 = arith.constant 0 : i32
    %c0_i32_0 = arith.constant 0 : i32
    %c0_i32_1 = arith.constant 0 : i32
    return %c0_i32, %c0_i32_0 : i32, i32
  }
  func.func @transform_12(%arg0: i32) -> (i32, i32) {
    %c0_i32 = arith.constant 0 : i32
    %c0_i32_0 = arith.constant 0 : i32
    %c0_i32_1 = arith.constant 0 : i32
    return %c0_i32, %c0_i32_0 : i32, i32
  }
  func.func @transform_13(%arg0: i32) -> (i32, i32) {
    %c0_i32 = arith.constant 0 : i32
    %c0_i32_0 = arith.constant 0 : i32
    %c0_i32_1 = arith.constant 0 : i32
    return %c0_i32, %c0_i32_0 : i32, i32
  }
  func.func @transform_14(%arg0: i32) -> (i32, i32, i32) {
    %c0_i32 = arith.constant 0 : i32
    %c0_i32_0 = arith.constant 0 : i32
    %c0_i32_1 = arith.constant 0 : i32
    return %arg0, %c0_i32, %c0_i32_0 : i32, i32, i32
  }
}

</mosaic_0001>

<bundles_post_ra>
// kernel: net_forward.1
= control target key start
LH: loop header
LB: loop body
LE: loop exit
PB: predicated region body
PF: predicated region fallthrough
CT: control target
= control target key end

     0   :  { %19 = vsyncpa [#allocation3], 0  ;;  %s25080_s0 = inlined_call_operand.vmem [shape: f32[2,64,192], index: 0, kind: input, shape index: {}]   ;;  %s25081_s1 = inlined_call_operand.vmem [shape: bf16[2,5,192,300], index: 1, kind: input, shape index: {}]   ;;  %s25082_s2 = inlined_call_operand.vmem [shape: f32[1,300], index: 2, kind: input, shape index: {}]   ;;  %s25083_s3 = inlined_call_operand.vmem [shape: f32[30,59], index: 3, kind: input, shape index: {}]   ;;  %s25084_s4 = inlined_call_operand.vmem [shape: bf16[2,5,300,260], index: 4, kind: input, shape index: {}]   ;;  %s25085_s5 = inlined_call_operand.vmem [shape: f32[1,260], index: 5, kind: input, shape index: {}]   ;;  %s25086_s6 = inlined_call_operand.vmem [shape: f32[13,25], index: 6, kind: input, shape index: {}]   ;;  %s25087_s7 = inlined_call_operand.vmem [shape: bf16[2,5,260,80], index: 7, kind: input, shape index: {}]   ;;  %s25088_s8 = inlined_call_operand.vmem [shape: f32[1,80], index: 8, kind: input, shape index: {}]   ;;  %s25089_s9 = inlined_call_operand.vmem [shape: f32[4,8], index: 9, kind: input, shape index: {}]   ;;  %s25090_s10 = inlined_call_operand.vmem [shape: f32[4,80,50], index: 10, kind: input, shape index: {}]   ;;  %s25091_s11 = inlined_call_operand.vmem [shape: f32[1,50], index: 11, kind: input, shape index: {}]   ;;  %s25092_s12 = inlined_call_operand.vmem [shape: f32[50,20], index: 12, kind: input, shape index: {}]   ;;  %s25093_s13 = inlined_call_operand.vmem [shape: f32[1,20], index: 13, kind: input, shape index: {}]   ;;  %s25094_s14 = inlined_call_operand.hbm [shape: f32[2,1,20], index: 14, kind: output, shape index: {}]  }
   0x1   :  { %21 = vsyncpa [#allocation3 + $0x1], 0  ;;  %s20163_s29 = smov 0   ;;  %s20165_s30 = smov 0  }
   0x2   :  { %s20167_s15 = smov 0   ;;  %s20169_s16 = smov 0  }
   0x3 LB: > { %25099 = sst [smem:[#allocation5_spill]] %s20076_s15  ;;  %s20184_s17 = sadd.s32 4294967295, %s20080_s16   ;;  %s20080_s16 = sphi %s20169_s16, %s25108_s16   ;;  %s20076_s15 = sphi %s20167_s15, %s25110_s15   ;;  %s20072_s30 = sphi %s20165_s30, %s25112_s30   ;;  %s20068_s29 = sphi %s20163_s29, %s25111_s29  }
   0x4   : > { %s14232_s18 = sadd.s32 4294967294, %s20080_s16   ;;  %s20188_s19 = sadd.s32 1, %s20080_s16  }
   0x5   : > { %25100 = sst [smem:[#allocation6_spill]] %s20188_s19  ;;  %s333_s20 = sadd.s32 1, %s20076_s15 }
   0x6   : > { %s330_s21 = ssub.s32 %s20080_s16, %s20188_s19  ;;  %p343_p0 = scmp.ne.s32.totalorder %s20076_s15, %s20072_s30 }
   0x7   : > { %p331_p1 = scmp.eq.s32.totalorder %s330_s21, 0  ;;  %p344_p2 = scmp.eq.s32.totalorder %s20184_s17, 1 }
   0x8   : > { %p349_p3 = scmp.ne.s32.totalorder %s20072_s30, %s20068_s29  ;;  %p350_p4 = scmp.eq.s32.totalorder %s14232_s18, 1 }
   0x9   : > { %s20199_s22 = scalar_select %p331_p1, %s20076_s15, %s333_s20  }
   0xa   : > { %p20201_p5 = por %p344_p2, %p343_p0  ;;  %p20205_p6 = por %p350_p4, %p349_p3 }
   0xb   : > { %25101 = sst [smem:[#allocation7_spill]] %s20199_s22  ;;  %p14235_p7 = scmp.ge.s32.totalorder %s20080_s16, 1 }
   0xc   : > { %s25103_s24 = scalar_select %p20205_p6, 1, 0 }
   0xd   : > { %p415_p8 = scmp.lt.s32.totalorder %s20080_s16, 3 }
   0xe   : > { %25104 = sst [smem:[#allocation8_spill]] %s25103_s24 }
   0xf   : > { %p416_p9 = pnand %p14235_p7, %p415_p8 }
  0x10   : > { %v18608_v0 = vld [vmem:[%s25081_s1 + $0x124] ss:$12 sps:$4 sm:$0xff] (!%p416_p9)   ;;  %v20082_v1 = vmov (!%p416_p9), 0   ;;  %v18610_v2 = vld [vmem:[%s25081_s1 + $0x128] ss:$12 sps:$4 sm:$0xff] (!%p416_p9)   ;;  %p460_p10 = scmp.lt.s32.totalorder (!%p416_p9), %s20184_s17, 1 }
  0x11   : > { %419 = sbr.rel (%p416_p9) target bundleno = 3218 (0xc92), region = 76  ;;  %981 = vmatprep.subr.bf16.mxu1 (!%p416_p9), %v20082_v1  ;;  %908 = vmatprep.subr.bf16.mxu0 (!%p416_p9), %v18608_v0  ;;  %v18611_v3 = vld [vmem:[%s25081_s1 + $0x120] ss:$12 sps:$4 sm:$0xff] (!%p416_p9)   ;;  %v18612_v4 = vld [vmem:[%s25081_s1 + $0x13c] ss:$12 sps:$4 sm:$0xff] (!%p416_p9)   ;;  %vm895_vm1 = vcmask (!%p416_p9), 523264  }
  0x12   : > { %982 = vmatpush1.bf16.msra.mxu1 (!%p416_p9), %v18610_v2  ;;  %909 = vmatpush1.bf16.msra.mxu0 (!%p416_p9), %v18611_v3  ;;  %v18614_v5 = vld [vmem:[%s25081_s1 + $0x140] ss:$12 sps:$4 sm:$0xff] (!%p416_p9)   ;;  %v18615_v6 = vld [vmem:[%s25081_s1 + $0x138] ss:$12 sps:$4 sm:$0xff] (!%p416_p9)   ;;  %v18619_v9 = vld [vmem:[%s25081_s1 + $0x150] ss:$12 sps:$4 sm:$0xff] (!%p416_p9)  }
  0x13   : > { %983 = vmatprep.subr.bf16.mxu1 (!%p416_p9), %v20082_v1  ;;  %910 = vmatprep.subr.bf16.mxu0 (!%p416_p9), %v18612_v4  ;;  %v18616_v7 = vld [vmem:[%s25081_s1 + $0x154] ss:$12 sps:$4 sm:$0xff] (!%p416_p9)   ;;  %v18618_v8 = vld [vmem:[%s25081_s1 + $0x158] ss:$12 sps:$4 sm:$0xff] (!%p416_p9)   ;;  %v18622_v11 = vld [vmem:[%s25081_s1 + $0x170] ss:$12 sps:$4 sm:$0xff] (!%p416_p9)  }
  0x14   : > { %v18620_v10 = vld [vmem:[%s25081_s1 + $0x16c] ss:$12 sps:$4 sm:$0xff] (!%p416_p9)   ;;  %v18623_v12 = vld [vmem:[%s25081_s1 + $0x168] ss:$12 sps:$4 sm:$0xff] (!%p416_p9)   ;;  %v18624_v13 = vld [vmem:[%s25081_s1 + $0x184] ss:$12 sps:$4 sm:$0xff] (!%p416_p9)  }
  0x15   : > { %v18626_v14 = vld [vmem:[%s25081_s1 + $0x188] ss:$12 sps:$4 sm:$0xff] (!%p416_p9)   ;;  %v18627_v15 = vld [vmem:[%s25081_s1 + $0x180] ss:$12 sps:$4 sm:$0xff] (!%p416_p9)   ;;  %v18631_v18 = vld [vmem:[%s25081_s1 + $0x198] ss:$12 sps:$4 sm:$0xff] (!%p416_p9)  }
  0x16   : > { %984 = vmatpush1.bf16.msra.mxu1 (!%p416_p9), %v18614_v5  ;;  %911 = vmatpush1.bf16.msra.mxu0 (!%p416_p9), %v18615_v6  ;;  %v18628_v16 = vld [vmem:[%s25081_s1 + $0x19c] ss:$12 sps:$4 sm:$0xff] (!%p416_p9)   ;;  %v18630_v17 = vld [vmem:[%s25081_s1 + $0x1a0] ss:$12 sps:$4 sm:$0xff] (!%p416_p9)   ;;  %v18634_v20 = vld [vmem:[%s25081_s1 + $0x1b8] ss:$12 sps:$4 sm:$0xff] (!%p416_p9)  }
  0x17   : > { %985 = vmatprep.subr.bf16.mxu1 (!%p416_p9), %v20082_v1  ;;  %912 = vmatprep.subr.bf16.mxu0 (!%p416_p9), %v18616_v7  ;;  %v18632_v19 = vld [vmem:[%s25081_s1 + $0x1b4] ss:$12 sps:$4 sm:$0xff] (!%p416_p9)   ;;  %v18635_v21 = vld [vmem:[%s25081_s1 + $0x1b0] ss:$12 sps:$4 sm:$0xff] (!%p416_p9)   ;;  %v18636_v22 = vld [vmem:[%s25081_s1 + $0x1cc] ss:$12 sps:$4 sm:$0xff] (!%p416_p9)  }
  0x18   : > { %s461_s22 = scalar_select %p460_p10, %s20184_s17, 1  ;;  %v18638_v23 = vld [vmem:[%s25081_s1 + $0x1d0] ss:$12 sps:$4 sm:$0xff]   ;;  %v18639_v24 = vld [vmem:[%s25081_s1 + $0x1c8] ss:$12 sps:$4 sm:$0xff]   ;;  %vm2150_vm3 = vcmask 1046528  }
  0x19   : > { %v18640_v25 = vld [vmem:[%s25081_s1 + $0x1e4] ss:$12 sps:$4 sm:$0xff]   ;;  %v18642_v33 = vld [vmem:[%s25081_s1 + $0x1e8] ss:$12 sps:$4 sm:$0xff]   ;;  %v18643_v34 = vld [vmem:[%s25081_s1 + $0x1e0] ss:$12 sps:$4 sm:$0xff]  }
  0x1a   : > { %986 = vmatpush1.bf16.msra.mxu1 %v18618_v8  ;;  %913 = vmatpush1.bf16.msra.mxu0 %v18619_v9  ;;  %s16950_s28 = sshll.u32 %s461_s22, 7  ;;  %v18644_v36 = vld [vmem:[%s25081_s1 + $0x1fc] ss:$12 sps:$4 sm:$0xff]   ;;  %vm636_vm0 = vsmask.f32 7424  ;;  %vm3840_vm4 = vcmask 1045504  }
  0x1b   : > { %987 = vmatprep.subr.bf16.mxu1 %v20082_v1  ;;  %914 = vmatprep.subr.bf16.mxu0 %v18620_v10  ;;  %s20289_s22 = scalar_lea.vmem %s25080_s0, %s16950_s28  ;;  %v18646_v45 = vld [vmem:[%s25081_s1 + $0x200] ss:$12 sps:$4 sm:$0xff]   ;;  %v18647_v49 = vld [vmem:[%s25081_s1 + $0x1f8] ss:$12 sps:$4 sm:$0xff]   ;;  %v18651_v56 = vld [vmem:[%s25081_s1 + $0x210] ss:$12 sps:$4 sm:$0xff]  }
  0x1c   : > { %v467_v26 = vld [vmem:[%s20289_s22 + $0x8] sm:$0xff]  ;;  %v469_v27 = vld [vmem:[%s20289_s22 + $0x18] sm:$0xff]  ;;  %v466_v31 = vld [vmem:[%s20289_s22] sm:$0xff]  ;;  %vm2987_vm2 = vsmask.f32 6400  ;;  %vm4804_vm5 = vcmask 1042432  }
  0x1d   : > { %v471_v28 = vld [vmem:[%s20289_s22 + $0x28] sm:$0xff]  ;;  %v473_v29 = vld [vmem:[%s20289_s22 + $0x38] sm:$0xff]  ;;  %v20305_v30 = vpack.c.bf16 %v469_v27, %v467_v26  ;;  %v468_v32 = vld [vmem:[%s20289_s22 + $0x10] sm:$0xff]  ;;  %vm20084_vm6 = vmmov 1   ;;  %vm4791_vm8 = vcmask 482304   ;;  %vm5586_vm9 = vcmask 359424  }
  0x1e   : > { %988 = vmatpush1.bf16.msra.mxu1 %v18622_v11  ;;  %915 = vmatpush1.bf16.msra.mxu0 %v18623_v12  ;;  %v20315_v35 = vpack.c.bf16 %v473_v29, %v471_v28  ;;  %v20322_v39 = vpack.c.bf16 %v468_v32, %v466_v31  ;;  %v470_v41 = vld [vmem:[%s20289_s22 + $0x20] sm:$0xff]  ;;  %v472_v42 = vld [vmem:[%s20289_s22 + $0x30] sm:$0xff]  ;;  %v18652_v57 = vld [vmem:[%s25081_s1 + $0x22c] ss:$12 sps:$4 sm:$0xff]   ;;  %vm11218_vm10 = vcmask 1040384   ;;  %vm11211_vm12 = vcmask 203776  }
  0x1f   : > { %989 = vmatprep.subr.bf16.mxu1 %v20082_v1  ;;  %916 = vmatprep.subr.bf16.mxu0 %v18624_v13  ;;  %v650_v37 = vshrl.u32 %v20305_v30, 16  ;;  %v652_v38 = vshll.u32 %v20305_v30, 16  ;;  %v20337_v47 = vpack.c.bf16 %v472_v42, %v470_v41  ;;  %v18648_v50 = vld [vmem:[%s25081_s1 + $0x214] ss:$12 sps:$4 sm:$0xff]   ;;  %v18650_v52 = vld [vmem:[%s25081_s1 + $0x218] ss:$12 sps:$4 sm:$0xff]   ;;  %vm21988_vm7 = vmpackc.low %vm4804_vm5, %vm20084_vm6 }
  0x20   : > { %v657_v40 = vshll.u32 %v20315_v35, 16  ;;  %v640_v48 = vshll.u32 %v20322_v39, 16  ;;  %v638_v53 = vshrl.u32 %v20322_v39, 16  ;;  %v18654_v58 = vld [vmem:[%s25081_s1 + $0x230] ss:$12 sps:$4 sm:$0xff]   ;;  %v669_v0 = vshrl.u32 %v20315_v35, 16  ;;  %vm17941_vm11 = vmpackc.low %vm11218_vm10, %vm20084_vm6 }
  0x21   : > { %v654_v43 = vrot.slane %v652_v38, 1  ;;  %v645_v55 = vshll.u32 %v20337_v47, 16  ;;  %v18655_v61 = vld [vmem:[%s25081_s1 + $0x228] ss:$12 sps:$4 sm:$0xff]   ;;  %v18658_v62 = vld [vmem:[%s25081_s1 + $0x6c4] ss:$12 sps:$4 sm:$0xff]  }
  0x22   : > { %990 = vmatpush1.bf16.msra.mxu1 %v18626_v14  ;;  %917 = vmatpush1.bf16.msra.mxu0 %v18627_v15  ;;  %v659_v44 = vrot.slane %v657_v40, 1  ;;  %v642_v54 = vrot.slane %v640_v48, 1  ;;  %v18659_v63 = vld [vmem:[%s25081_s1 + $0x6c8] ss:$12 sps:$4 sm:$0xff]   ;;  %v477_v3 = vld [vmem:[%s20289_s22 + $0x58] sm:$0xff]  ;;  %v474_v4 = vld [vmem:[%s20289_s22 + $0x40] sm:$0xff] }
  0x23   : > { %991 = vmatprep.subr.bf16.mxu1 %v20082_v1  ;;  %918 = vmatprep.subr.bf16.mxu0 %v18628_v16  ;;  %v655_v46 = vor.u32 %v654_v43, %v650_v37  ;;  %v647_v60 = vrot.slane %v645_v55, 1  ;;  %v475_v2 = vld [vmem:[%s20289_s22 + $0x48] sm:$0xff]  ;;  %v476_v7 = vld [vmem:[%s20289_s22 + $0x50] sm:$0xff]  ;;  %v661_v8 = vshrl.u32 %v20337_v47, 16  ;;  %v18660_v14 = vld [vmem:[%s25081_s1 + $0x6d8] ss:$12 sps:$4 sm:$0xff]  }
  0x24   : > { %v643_v59 = vor.u32 %v642_v54, %v638_v53  ;;  %v20392_v6 = vpack.c.bf16 %v477_v3, %v475_v2  ;;  %v18656_v9 = vld [vmem:[%s25081_s1 + $0x6c0] ss:$12 sps:$4 sm:$0xff]   ;;  %v20400_v10 = vpack.c.bf16 %v476_v7, %v474_v4  ;;  %v18662_v11 = vld [vmem:[%s25081_s1 + $0x6dc] ss:$12 sps:$4 sm:$0xff]   ;;  %v671_v12 = vor.u32 %v669_v0, %v659_v44  ;;  %v480_v27 = vld [vmem:[%s20289_s22 + $0x70] sm:$0xff]  ;;  %s458_s26 = sand.u32 1, %s20072_s30  }
  0x25   : > { %v20348_v51 = vsel %vm636_vm0, %v655_v46, %v659_v44  ;;  %v18663_v15 = vld [vmem:[%s25081_s1 + $0x6e0] ss:$12 sps:$4 sm:$0xff]   ;;  %v18667_v31 = vld [vmem:[%s25081_s1 + $0x6f8] ss:$12 sps:$4 sm:$0xff]   ;;  %v18671_v44 = vld [vmem:[%s25081_s1 + $0x710] ss:$12 sps:$4 sm:$0xff]  }
  0x26   : > { %992 = vmatpush1.bf16.msra.mxu1 %v18630_v17  ;;  %919 = vmatpush1.bf16.msra.mxu0 %v18631_v18  ;;  %v20390_v5 = vsel %vm636_vm0, %v643_v59, %v647_v60  ;;  %v673_v13 = vshll.u32 %v20392_v6, 16  ;;  %v665_v16 = vshll.u32 %v20400_v10, 16  ;;  %v663_v18 = vor.u32 %v661_v8, %v647_v60  ;;  %v18670_v41 = vld [vmem:[%s25081_s1 + $0x70c] ss:$12 sps:$4 sm:$0xff]   ;;  %v18674_v59 = vld [vmem:[%s25081_s1 + $0x724] ss:$12 sps:$4 sm:$0xff]  }
  0x27   : > { %993 = vmatprep.subr.bf16.mxu1 %v20082_v1  ;;  %920 = vmatprep.subr.bf16.mxu0 %v18632_v19  ;;  %v479_v19 = vld [vmem:[%s20289_s22 + $0x68] sm:$0xff]  ;;  %v677_v29 = vshrl.u32 %v20400_v10, 16  ;;  %vm11616_vm13 = vcmask 1041408   ;;  %vm20085_vm14 = vmmov 0   ;;  %vm11612_vm15 = vcmask 31744   ;;  %s16947_s18 = sshll.u32 %s20184_s17, 4 }
  0x28   : > { %14374 = vmatprep.mubr.msk.bf16.mxu1 %vm895_vm1, %v20348_v51  ;;  %14370 = vmatprep.mubr.msk.bf16.mxu0 %vm895_vm1, %v20348_v51  ;;  %v675_v17 = vrot.slane %v673_v13, 1  ;;  %v18672_v3 = vld [vmem:[%s25081_s1 + $0x720] ss:$12 sps:$4 sm:$0xff]   ;;  %v18678_v4 = vld [vmem:[%s25081_s1 + $0x73c] ss:$12 sps:$4 sm:$0xff]   ;;  %s459_s20 = scalar_lea.vmem [#allocation2], %s458_s26  ;;  %s25038_s24 = scalar_lea.hbm %s25094_s14, %s16947_s18 }
  0x29   : > { %s14165_s28 = scalar_lea.sflag [#allocation3], %s458_s26  ;;  %s20087_s17 = smov [#allocation2]  }
  0x2a   : > { %994 = vmatpush1.bf16.msra.mxu1 %v18634_v20  ;;  %921 = vmatpush1.bf16.msra.mxu0 %v18635_v21  ;;  %v18666_v20 = vld [vmem:[%s25081_s1 + $0x6f4] ss:$12 sps:$4 sm:$0xff]   ;;  %v667_v21 = vrot.slane %v665_v16, 1  ;;  %s20022_s27 = sshll.u32 %s20087_s17, 4  ;;  %s20023_s27 = int_to_ptr.vmem [resolvable:$false] %s20022_s27 }
  0x2b   : > { %995 = vmatprep.subr.bf16.mxu1 %v20082_v1  ;;  %922 = vmatprep.subr.bf16.mxu0 %v18636_v22  ;;  %v481_v22 = vld [vmem:[%s20289_s22 + $0x78] sm:$0xff]  ;;  %s20024_s19 = scalar_lea.vmem %s20023_s27, 32 }
  0x2c   : > { %v20434_v26 = vpack.c.bf16 %v481_v22, %v479_v19  ;;  %v20448_v32 = vsel %vm636_vm0, %v663_v18, %v667_v21  ;;  %v679_v46 = vor.u32 %v677_v29, %v667_v21  ;;  %v18686_v18 = vld [vmem:[%s25081_s1 + $0x76c] ss:$12 sps:$4 sm:$0xff]   ;;  %v18687_v19 = vld [vmem:[%s25081_s1 + $0x770] ss:$12 sps:$4 sm:$0xff]   ;;  %v18691_v22 = vld [vmem:[%s25081_s1 + $0x788] ss:$12 sps:$4 sm:$0xff]  }
  0x2d   : > { %v18690_v21 = vld [vmem:[%s25081_s1 + $0x784] ss:$12 sps:$4 sm:$0xff]  }
  0x2e   : > { %996 = vmatpush1.bf16.msra.mxu1 %v18638_v23  ;;  %923 = vmatpush1.bf16.msra.mxu0 %v18639_v24  ;;  %v685_v23 = vshrl.u32 %v20392_v6, 16  ;;  %v478_v24 = vld [vmem:[%s20289_s22 + $0x60] sm:$0xff]  ;;  %s14177_s22 = sshll.u32 %s459_s20, 4  ;;  %s25040_s22 = int_to_ptr.vmem [resolvable:$true] %s14177_s22 }
  0x2f   : > { %997 = vmatprep.subr.bf16.mxu1 %v20082_v1  ;;  %924 = vmatprep.subr.bf16.mxu0 %v18640_v25  ;;  %v20432_v25 = vsel %vm636_vm0, %v671_v12, %v675_v17  ;;  %v20441_v28 = vpack.c.bf16 %v480_v27, %v478_v24  ;;  %v18682_v12 = vld [vmem:[%s25081_s1 + $0x754] ss:$12 sps:$4 sm:$0xff]   ;;  %v18694_v27 = vld [vmem:[%s25081_s1 + $0x79c] ss:$12 sps:$4 sm:$0xff]   ;;  %s20018_s15 = scalar_lea.vmem %s25040_s22, 16  ;;  %p20025_p0 = scmp.lt.s32.totalorder %s25040_s22, %s20023_s27 }
  0x30   : > { %v18688_v24 = vld [vmem:[%s25081_s1 + $0x780] ss:$12 sps:$4 sm:$0xff]   ;;  %p20019_p11 = scmp.ne.s32.totalorder %s25040_s22, %s20018_s15  ;;  %p20026_p1 = scmp.lt.s32.totalorder %s20024_s19, %s20018_s15 }
  0x31   : > { %v681_v42 = vshll.u32 %v20441_v28, 16 }
  0x32   : > { %998 = vmatpush1.bf16.msra.mxu1 %v18642_v33  ;;  %925 = vmatpush1.bf16.msra.mxu0 %v18643_v34  ;;  %v687_v33 = vor.u32 %v685_v23, %v675_v17  ;;  %v689_v34 = vshll.u32 %v20434_v26, 16  ;;  %v18680_v17 = vld [vmem:[%s25081_s1 + $0x750] ss:$12 sps:$4 sm:$0xff]   ;;  %p20020_p12 = pnand %p20019_p11, %p20201_p5  ;;  %p20027_p2 = por %p20026_p1, %p20025_p0 }
  0x33   : > { %999 = vmatprep.subr.bf16.mxu1 %v20082_v1  ;;  %926 = vmatprep.subr.bf16.mxu0 %v18644_v36  ;;  %v18664_v36 = vld [vmem:[%s25081_s1 + $0x6f0] ss:$12 sps:$4 sm:$0xff]   ;;  %v3011_v54 = vrot.slane %v681_v42, 2 }
  0x34   : > { %v691_v43 = vrot.slane %v689_v34, 1  ;;  %p20021_p13 = pneg %p20020_p12 }
  0x36   : > { %1000 = vmatpush1.bf16.msra.mxu1 %v18646_v45  ;;  %927 = vmatpush1.bf16.msra.mxu0 %v18647_v49  ;;  %v3015_v45 = vrot.slane %v689_v34, 2  ;;  %v696_v49 = vshrl.u32 %v20434_v26, 16  ;;  %v18699_v34 = vld [vmem:[%s25081_s1 + $0x7b8] ss:$12 sps:$4 sm:$0xff]   ;;  %p20028_p3 = pnand %p20027_p2, %p20021_p13 }
  0x37   : > { %1001 = vmatprep.subr.bf16.mxu1 %v20082_v1  ;;  %928 = vmatprep.subr.bf16.mxu0 %v18648_v50  ;;  %v20470_v50 = vsel %vm636_vm0, %v687_v33, %v691_v43  ;;  %v18698_v33 = vld [vmem:[%s25081_s1 + $0x7b4] ss:$12 sps:$4 sm:$0xff]  }
  0x38   : > { %v20501_v7 = vor.u32 %v696_v49, %v691_v43  ;;  %v18700_v43 = vld [vmem:[%s25081_s1 + $0x7c8] ss:$12 sps:$4 sm:$0xff]  }
  0x3a   : > { %1002 = vmatpush1.bf16.msra.mxu1 %v18650_v52  ;;  %929 = vmatpush1.bf16.msra.mxu0 %v18651_v56  ;;  %v683_v52 = vrot.slane %v681_v42, 1  ;;  %v693_v56 = vshrl.u32 %v20441_v28, 16  ;;  %v18703_v42 = vld [vmem:[%s25081_s1 + $0x7d0] ss:$12 sps:$4 sm:$0xff]  }
  0x3b   : > { %1003 = vmatprep.subr.bf16.mxu1 %v20082_v1  ;;  %930 = vmatprep.subr.bf16.mxu0 %v18652_v57  ;;  %v18668_v57 = vld [vmem:[%s25081_s1 + $0x708] ss:$12 sps:$4 sm:$0xff]  }
  0x3c   : > { %v3010_v60 = vrot.slane %v693_v56, 1 }
  0x3e   : > { %1004 = vmatpush1.bf16.msra.mxu1 %v18654_v58  ;;  %931 = vmatpush1.bf16.msra.mxu0 %v18655_v61  ;;  %v3014_v58 = vrot.slane %v696_v49, 1  ;;  %v20492_v2 = vor.u32 %v3011_v54, %v3010_v60  ;;  %v18710_v49 = vld [vmem:[%s25081_s1 + $0x1c] ss:$12 sps:$4 sm:$0xff]   ;;  %v18708_v54 = vld [vmem:[%s25081_s1 + $0x18] ss:$12 sps:$4 sm:$0xff]  }
  0x3f   : > { %1360 = vmatprep.subr.bf16.mxu1 %v20082_v1  ;;  %1287 = vmatprep.subr.bf16.mxu0 %v18658_v62  ;;  %v18675_v62 = vld [vmem:[%s25081_s1 + $0x728] ss:$12 sps:$4 sm:$0xff]   ;;  %v18722_v60 = vld [vmem:[%s25081_s1 + $0x64] ss:$12 sps:$4 sm:$0xff]  }
  0x40   : > { %v20484_v61 = vor.u32 %v3015_v45, %v3014_v58  ;;  %v18707_v45 = vld [vmem:[%s25081_s1 + $0x8] ss:$12 sps:$4 sm:$0xff]   ;;  %v18718_v58 = vld [vmem:[%s25081_s1 + $0x4c] ss:$12 sps:$4 sm:$0xff]  }
  0x41   : > { %1014 = vmatmul.mubr.bf16.vlgmr.msra.gmra.mrb[0].mxu1 %v20390_v5  ;;  %941 = vmatmul.mubr.bf16.vlgmr.msra.gmra.mrb[0].mxu0 %v20390_v5 }
  0x42   : > { %1361 = vmatpush1.bf16.msra.mxu1 %v18659_v63  ;;  %1288 = vmatpush1.bf16.msra.mxu0 %v18656_v9  ;;  %v20490_v63 = vsel %vm636_vm0, %v679_v46, %v683_v52  ;;  %v18679_v9 = vld [vmem:[%s25081_s1 + $0x740] ss:$12 sps:$4 sm:$0xff]  }
  0x43   : > { %1362 = vmatprep.subr.bf16.mxu1 %v20082_v1  ;;  %1289 = vmatprep.subr.bf16.mxu0 %v18662_v11  ;;  %v18676_v11 = vld [vmem:[%s25081_s1 + $0x738] ss:$12 sps:$4 sm:$0xff]   ;;  %v18704_v46 = vld [vmem:[%s25081_s1] ss:$12 sps:$4 sm:$0xff]  }
  0x44   : > { %14375 = vmatprep.mubr.msk.bf16.mxu1 %vm895_vm1, %v20432_v25  ;;  %14371 = vmatprep.mubr.msk.bf16.mxu0 %vm895_vm1, %v20432_v25 }
  0x46   : > { %1363 = vmatpush1.bf16.msra.mxu1 %v18663_v15  ;;  %1290 = vmatpush1.bf16.msra.mxu0 %v18660_v14  ;;  %v20519_v14 = vor.u32 %v693_v56, %v683_v52  ;;  %v18683_v15 = vld [vmem:[%s25081_s1 + $0x758] ss:$12 sps:$4 sm:$0xff]   ;;  %v18711_v52 = vld [vmem:[%s25081_s1 + $0x20] ss:$12 sps:$4 sm:$0xff]  }
  0x47   : > { %1364 = vmatprep.subr.bf16.mxu1 %v20082_v1  ;;  %1291 = vmatprep.subr.bf16.mxu0 %v18666_v20  ;;  %v18684_v20 = vld [vmem:[%s25081_s1 + $0x768] ss:$12 sps:$4 sm:$0xff]  }
  0x48   : > { %v18714_v56 = vld [vmem:[%s25081_s1 + $0x34] ss:$12 sps:$4 sm:$0xff]  }
  0x49   : > { %1022 = vmatmul.mubr.bf16.gmra.mrb[4].mxu1 %v20448_v32  ;;  %951 = vmatmul.mubr.bf16.gmra.mrb[4].mxu0 %v20448_v32 }
  0x4a   : > { %1365 = vmatpush1.bf16.msra.mxu1 %v18667_v31  ;;  %1292 = vmatpush1.bf16.msra.mxu0 %v18664_v36  ;;  %v18692_v31 = vld [vmem:[%s25081_s1 + $0x798] ss:$12 sps:$4 sm:$0xff]   ;;  %v18696_v36 = vld [vmem:[%s25081_s1 + $0x7b0] ss:$12 sps:$4 sm:$0xff]  }
  0x4b   : > { %1366 = vmatprep.subr.bf16.mxu1 %v20082_v1  ;;  %1293 = vmatprep.subr.bf16.mxu0 %v18670_v41  ;;  %v18702_v41 = vld [vmem:[%s25081_s1 + $0x7cc] ss:$12 sps:$4 sm:$0xff]  }
  0x4c   : > { %14376 = vmatprep.mubr.msk.bf16.mxu1 %vm895_vm1, %v20470_v50  ;;  %14372 = vmatprep.mubr.msk.bf16.mxu0 %vm895_vm1, %v20470_v50 }
  0x4e   : > { %1367 = vmatpush1.bf16.msra.mxu1 %v18671_v44  ;;  %1294 = vmatpush1.bf16.msra.mxu0 %v18668_v57  ;;  %v18706_v44 = vld [vmem:[%s25081_s1 + $0x4] ss:$12 sps:$4 sm:$0xff]  }
  0x4f   : > { %1368 = vmatprep.subr.bf16.mxu1 %v20082_v1  ;;  %1295 = vmatprep.subr.bf16.mxu0 %v18674_v59  ;;  %v18712_v57 = vld [vmem:[%s25081_s1 + $0x30] ss:$12 sps:$4 sm:$0xff]   ;;  %v18716_v59 = vld [vmem:[%s25081_s1 + $0x48] ss:$12 sps:$4 sm:$0xff]  }
  0x51   : > { %1030 = vmatmul.mubr.bf16.gmra.mrb[8].mxu1 %v20490_v63  ;;  %961 = vmatmul.mubr.bf16.gmra.mrb[8].mxu0 %v20490_v63 }
  0x52   : > { %1369 = vmatpush1.bf16.msra.mxu1 %v18675_v62  ;;  %1296 = vmatpush1.bf16.msra.mxu0 %v18672_v3  ;;  %v18720_v62 = vld [vmem:[%s25081_s1 + $0x60] ss:$12 sps:$4 sm:$0xff]   ;;  %v18726_v3 = vld [vmem:[%s25081_s1 + $0x7c] ss:$12 sps:$4 sm:$0xff]  }
  0x53   : > { %1370 = vmatprep.subr.bf16.mxu1 %v20082_v1  ;;  %1297 = vmatprep.subr.bf16.mxu0 %v18678_v4  ;;  %v18724_v4 = vld [vmem:[%s25081_s1 + $0x78] ss:$12 sps:$4 sm:$0xff]  }
  0x54   : > { %14377 = vmatprep.mubr.msk.bf16.mxu1 %vm895_vm1, %v20501_v7  ;;  %14373 = vmatprep.mubr.msk.bf16.mxu0 %vm895_vm1, %v20501_v7 }
  0x56   : > { %1371 = vmatpush1.bf16.msra.mxu1 %v18679_v9  ;;  %1298 = vmatpush1.bf16.msra.mxu0 %v18676_v11  ;;  %v18730_v9 = vld [vmem:[%s25081_s1 + $0x94] ss:$12 sps:$4 sm:$0xff]   ;;  %v18728_v11 = vld [vmem:[%s25081_s1 + $0x90] ss:$12 sps:$4 sm:$0xff]  }
  0x57   : > { %1372 = vmatprep.subr.bf16.mxu1 %v20082_v1  ;;  %1299 = vmatprep.subr.bf16.mxu0 %v18682_v12  ;;  %v18734_v12 = vld [vmem:[%s25081_s1 + $0xac] ss:$12 sps:$4 sm:$0xff]  }
  0x59   : > { %1038 = vmatmul.mubr.bf16.gmra.mrb[12].mxu1 %v20519_v14  ;;  %971 = vmatmul.mubr.bf16.gmra.mrb[12].mxu0 %v20519_v14 }
  0x5a   : > { %1373 = vmatpush1.bf16.msra.mxu1 %v18683_v15  ;;  %1300 = vmatpush1.bf16.msra.mxu0 %v18680_v17  ;;  %v18732_v15 = vld [vmem:[%s25081_s1 + $0xa8] ss:$12 sps:$4 sm:$0xff]   ;;  %v18738_v17 = vld [vmem:[%s25081_s1 + $0xc4] ss:$12 sps:$4 sm:$0xff]  }
  0x5b   : > { %1374 = vmatprep.subr.bf16.mxu1 %v20082_v1  ;;  %1301 = vmatprep.subr.bf16.mxu0 %v18686_v18  ;;  %v18736_v18 = vld [vmem:[%s25081_s1 + $0xc0] ss:$12 sps:$4 sm:$0xff]  }
  0x5c   : > { %14466 = vmatprep.mubr.msk.bf16.mxu1 %vm895_vm1, %v20348_v51  ;;  %14462 = vmatprep.mubr.msk.bf16.mxu0 %vm895_vm1, %v20348_v51  ;;  %v18695_v51 = vld [vmem:[%s25081_s1 + $0x7a0] ss:$12 sps:$4 sm:$0xff]  }
  0x5e   : > { %1375 = vmatpush1.bf16.msra.mxu1 %v18687_v19  ;;  %1302 = vmatpush1.bf16.msra.mxu0 %v18684_v20  ;;  %v18742_v19 = vld [vmem:[%s25081_s1 + $0xdc] ss:$12 sps:$4 sm:$0xff]   ;;  %v18743_v20 = vld [vmem:[%s25081_s1 + $0xe0] ss:$12 sps:$4 sm:$0xff]  }
  0x5f   : > { %1376 = vmatprep.subr.bf16.mxu1 %v20082_v1  ;;  %1303 = vmatprep.subr.bf16.mxu0 %v18690_v21  ;;  %v18740_v21 = vld [vmem:[%s25081_s1 + $0xd8] ss:$12 sps:$4 sm:$0xff]  }
  0x62   : > { %1377 = vmatpush1.bf16.msra.mxu1 %v18691_v22  ;;  %1304 = vmatpush1.bf16.msra.mxu0 %v18688_v24  ;;  %v18746_v22 = vld [vmem:[%s25081_s1 + $0xf4] ss:$12 sps:$4 sm:$0xff]   ;;  %v18747_v24 = vld [vmem:[%s25081_s1 + $0xf8] ss:$12 sps:$4 sm:$0xff]  }
  0x63   : > { %1378 = vmatprep.subr.bf16.mxu1 %v20082_v1  ;;  %1305 = vmatprep.subr.bf16.mxu0 %v18694_v27  ;;  %v18744_v27 = vld [vmem:[%s25081_s1 + $0xf0] ss:$12 sps:$4 sm:$0xff]  }
  0x66   : > { %1379 = vmatpush1.bf16.msra.mxu1 %v18695_v51  ;;  %1306 = vmatpush1.bf16.msra.mxu0 %v18692_v31  ;;  %v18750_v51 = vld [vmem:[%s25081_s1 + $0x10c] ss:$12 sps:$4 sm:$0xff]   ;;  %v18751_v31 = vld [vmem:[%s25081_s1 + $0x110] ss:$12 sps:$4 sm:$0xff]  }
  0x67   : > { %1380 = vmatprep.subr.bf16.mxu1 %v20082_v1  ;;  %1307 = vmatprep.subr.bf16.mxu0 %v18698_v33  ;;  %v18748_v33 = vld [vmem:[%s25081_s1 + $0x108] ss:$12 sps:$4 sm:$0xff]  }
  0x6a   : > { %1381 = vmatpush1.bf16.msra.mxu1 %v18699_v34  ;;  %1308 = vmatpush1.bf16.msra.mxu0 %v18696_v36  ;;  %v18754_v34 = vld [vmem:[%s25081_s1 + $0x5a4] ss:$12 sps:$4 sm:$0xff]   ;;  %v18755_v36 = vld [vmem:[%s25081_s1 + $0x5a8] ss:$12 sps:$4 sm:$0xff]  }
  0x6b   : > { %1382 = vmatprep.subr.bf16.mxu1 %v20082_v1  ;;  %1309 = vmatprep.subr.bf16.mxu0 %v18702_v41  ;;  %v18752_v41 = vld [vmem:[%s25081_s1 + $0x5a0] ss:$12 sps:$4 sm:$0xff]  }
  0x6e   : > { %1383 = vmatpush1.bf16.msra.mxu1 %v18703_v42  ;;  %1310 = vmatpush1.bf16.msra.mxu0 %v18700_v43  ;;  %v18758_v42 = vld [vmem:[%s25081_s1 + $0x5bc] ss:$12 sps:$4 sm:$0xff]   ;;  %v18759_v43 = vld [vmem:[%s25081_s1 + $0x5c0] ss:$12 sps:$4 sm:$0xff]  }
  0x6f   : > { %1698 = vmatprep.subr.bf16.mxu1 %v20082_v1  ;;  %1625 = vmatprep.subr.bf16.mxu0 %v18706_v44  ;;  %v18756_v44 = vld [vmem:[%s25081_s1 + $0x5b8] ss:$12 sps:$4 sm:$0xff]  }
  0x71   : > { %1393 = vmatmul.mubr.bf16.vlgmr.msra.gmra.mrb[16].mxu1 %v20390_v5  ;;  %1320 = vmatmul.mubr.bf16.vlgmr.msra.gmra.mrb[16].mxu0 %v20390_v5  ;;  %v18715_v5 = vld [vmem:[%s25081_s1 + $0x38] ss:$12 sps:$4 sm:$0xff]  }
  0x72   : > { %1699 = vmatpush1.bf16.msra.mxu1 %v18707_v45  ;;  %1626 = vmatpush1.bf16.msra.mxu0 %v18704_v46  ;;  %v18762_v45 = vld [vmem:[%s25081_s1 + $0x5d4] ss:$12 sps:$4 sm:$0xff]   ;;  %v18763_v46 = vld [vmem:[%s25081_s1 + $0x5d8] ss:$12 sps:$4 sm:$0xff]  }
  0x73   : > { %1700 = vmatprep.subr.bf16.mxu1 %v20082_v1  ;;  %1627 = vmatprep.subr.bf16.mxu0 %v18710_v49  ;;  %v18760_v49 = vld [vmem:[%s25081_s1 + $0x5d0] ss:$12 sps:$4 sm:$0xff]  }
  0x74   : > { %14467 = vmatprep.mubr.msk.bf16.mxu1 %vm895_vm1, %v20432_v25  ;;  %14463 = vmatprep.mubr.msk.bf16.mxu0 %vm895_vm1, %v20432_v25  ;;  %v18719_v25 = vld [vmem:[%s25081_s1 + $0x50] ss:$12 sps:$4 sm:$0xff]  }
  0x76   : > { %1701 = vmatpush1.bf16.msra.mxu1 %v18711_v52  ;;  %1628 = vmatpush1.bf16.msra.mxu0 %v18708_v54  ;;  %v18766_v52 = vld [vmem:[%s25081_s1 + $0x5ec] ss:$12 sps:$4 sm:$0xff]   ;;  %v18767_v54 = vld [vmem:[%s25081_s1 + $0x5f0] ss:$12 sps:$4 sm:$0xff]  }
  0x77   : > { %1702 = vmatprep.subr.bf16.mxu1 %v20082_v1  ;;  %1629 = vmatprep.subr.bf16.mxu0 %v18714_v56  ;;  %v18764_v56 = vld [vmem:[%s25081_s1 + $0x5e8] ss:$12 sps:$4 sm:$0xff]  }
  0x79   : > { %1401 = vmatmul.mubr.bf16.gmra.mrb[20].mxu1 %v20448_v32  ;;  %1330 = vmatmul.mubr.bf16.gmra.mrb[20].mxu0 %v20448_v32  ;;  %v18723_v32 = vld [vmem:[%s25081_s1 + $0x68] ss:$12 sps:$4 sm:$0xff]  }
  0x7a   : > { %1703 = vmatpush1.bf16.msra.mxu1 %v18715_v5  ;;  %1630 = vmatpush1.bf16.msra.mxu0 %v18712_v57  ;;  %v18770_v5 = vld [vmem:[%s25081_s1 + $0x604] ss:$12 sps:$4 sm:$0xff]   ;;  %v18771_v57 = vld [vmem:[%s25081_s1 + $0x608] ss:$12 sps:$4 sm:$0xff]  }
  0x7b   : > { %1704 = vmatprep.subr.bf16.mxu1 %v20082_v1  ;;  %1631 = vmatprep.subr.bf16.mxu0 %v18718_v58  ;;  %v18768_v58 = vld [vmem:[%s25081_s1 + $0x600] ss:$12 sps:$4 sm:$0xff]  }
  0x7c   : > { %14468 = vmatprep.mubr.msk.bf16.mxu1 %vm895_vm1, %v20470_v50  ;;  %14464 = vmatprep.mubr.msk.bf16.mxu0 %vm895_vm1, %v20470_v50  ;;  %v18727_v50 = vld [vmem:[%s25081_s1 + $0x80] ss:$12 sps:$4 sm:$0xff]  }
  0x7e   : > { %1705 = vmatpush1.bf16.msra.mxu1 %v18719_v25  ;;  %1632 = vmatpush1.bf16.msra.mxu0 %v18716_v59  ;;  %v18774_v25 = vld [vmem:[%s25081_s1 + $0x61c] ss:$12 sps:$4 sm:$0xff]   ;;  %v18775_v59 = vld [vmem:[%s25081_s1 + $0x620] ss:$12 sps:$4 sm:$0xff]  }
  0x7f   : > { %1706 = vmatprep.subr.bf16.mxu1 %v20082_v1  ;;  %1633 = vmatprep.subr.bf16.mxu0 %v18722_v60  ;;  %v18772_v60 = vld [vmem:[%s25081_s1 + $0x618] ss:$12 sps:$4 sm:$0xff]  }
  0x81   : > { %1409 = vmatmul.mubr.bf16.gmra.mrb[24].mxu1 %v20490_v63  ;;  %1340 = vmatmul.mubr.bf16.gmra.mrb[24].mxu0 %v20490_v63  ;;  %v18731_v63 = vld [vmem:[%s25081_s1 + $0x98] ss:$12 sps:$4 sm:$0xff]  }
  0x82   : > { %1707 = vmatpush1.bf16.msra.mxu1 %v18723_v32  ;;  %1634 = vmatpush1.bf16.msra.mxu0 %v18720_v62  ;;  %v18778_v32 = vld [vmem:[%s25081_s1 + $0x634] ss:$12 sps:$4 sm:$0xff]   ;;  %v18779_v62 = vld [vmem:[%s25081_s1 + $0x638] ss:$12 sps:$4 sm:$0xff]  }
  0x83   : > { %1708 = vmatprep.subr.bf16.mxu1 %v20082_v1  ;;  %1635 = vmatprep.subr.bf16.mxu0 %v18726_v3  ;;  %v18776_v3 = vld [vmem:[%s25081_s1 + $0x630] ss:$12 sps:$4 sm:$0xff]  }
  0x84   : > { %14469 = vmatprep.mubr.msk.bf16.mxu1 %vm895_vm1, %v20501_v7  ;;  %14465 = vmatprep.mubr.msk.bf16.mxu0 %vm895_vm1, %v20501_v7  ;;  %v18735_v7 = vld [vmem:[%s25081_s1 + $0xb0] ss:$12 sps:$4 sm:$0xff]  }
  0x86   : > { %1709 = vmatpush1.bf16.msra.mxu1 %v18727_v50  ;;  %1636 = vmatpush1.bf16.msra.mxu0 %v18724_v4  ;;  %v18782_v50 = vld [vmem:[%s25081_s1 + $0x64c] ss:$12 sps:$4 sm:$0xff]   ;;  %v18783_v4 = vld [vmem:[%s25081_s1 + $0x650] ss:$12 sps:$4 sm:$0xff]  }
  0x87   : > { %1710 = vmatprep.subr.bf16.mxu1 %v20082_v1  ;;  %1637 = vmatprep.subr.bf16.mxu0 %v18730_v9  ;;  %v18780_v9 = vld [vmem:[%s25081_s1 + $0x648] ss:$12 sps:$4 sm:$0xff]  }
  0x89   : > { %1417 = vmatmul.mubr.bf16.gmra.mrb[28].mxu1 %v20519_v14  ;;  %1350 = vmatmul.mubr.bf16.gmra.mrb[28].mxu0 %v20519_v14  ;;  %v18739_v14 = vld [vmem:[%s25081_s1 + $0xc8] ss:$12 sps:$4 sm:$0xff]  }
  0x8a   : > { %1711 = vmatpush1.bf16.msra.mxu1 %v18731_v63  ;;  %1638 = vmatpush1.bf16.msra.mxu0 %v18728_v11  ;;  %v18786_v63 = vld [vmem:[%s25081_s1 + $0x664] ss:$12 sps:$4 sm:$0xff]   ;;  %v18787_v11 = vld [vmem:[%s25081_s1 + $0x668] ss:$12 sps:$4 sm:$0xff]  }
  0x8b   : > { %1712 = vmatprep.subr.bf16.mxu1 %v20082_v1  ;;  %1639 = vmatprep.subr.bf16.mxu0 %v18734_v12  ;;  %v18784_v12 = vld [vmem:[%s25081_s1 + $0x660] ss:$12 sps:$4 sm:$0xff]  }
  0x8c   : > { %14510 = vmatprep.mubr.msk.bf16.mxu1 %vm895_vm1, %v20305_v30  ;;  %14506 = vmatprep.mubr.msk.bf16.mxu0 %vm895_vm1, %v20305_v30 }
  0x8e   : > { %1713 = vmatpush1.bf16.msra.mxu1 %v18735_v7  ;;  %1640 = vmatpush1.bf16.msra.mxu0 %v18732_v15  ;;  %v18790_v7 = vld [vmem:[%s25081_s1 + $0x67c] ss:$12 sps:$4 sm:$0xff]   ;;  %v18791_v15 = vld [vmem:[%s25081_s1 + $0x680] ss:$12 sps:$4 sm:$0xff]  }
  0x8f   : > { %1714 = vmatprep.subr.bf16.mxu1 %v20082_v1  ;;  %1641 = vmatprep.subr.bf16.mxu0 %v18738_v17  ;;  %v18788_v17 = vld [vmem:[%s25081_s1 + $0x678] ss:$12 sps:$4 sm:$0xff]  }
  0x92   : > { %1715 = vmatpush1.bf16.msra.mxu1 %v18739_v14  ;;  %1642 = vmatpush1.bf16.msra.mxu0 %v18736_v18  ;;  %v18794_v14 = vld [vmem:[%s25081_s1 + $0x694] ss:$12 sps:$4 sm:$0xff]   ;;  %v18795_v18 = vld [vmem:[%s25081_s1 + $0x698] ss:$12 sps:$4 sm:$0xff]  }
  0x93   : > { %1716 = vmatprep.subr.bf16.mxu1 %v20082_v1  ;;  %1643 = vmatprep.subr.bf16.mxu0 %v18742_v19  ;;  %v18792_v19 = vld [vmem:[%s25081_s1 + $0x690] ss:$12 sps:$4 sm:$0xff]  }
  0x96   : > { %1717 = vmatpush1.bf16.msra.mxu1 %v18743_v20  ;;  %1644 = vmatpush1.bf16.msra.mxu0 %v18740_v21  ;;  %v18798_v20 = vld [vmem:[%s25081_s1 + $0x6ac] ss:$12 sps:$4 sm:$0xff]   ;;  %v18799_v21 = vld [vmem:[%s25081_s1 + $0x6b0] ss:$12 sps:$4 sm:$0xff]  }
  0x97   : > { %1718 = vmatprep.subr.bf16.mxu1 %v20082_v1  ;;  %1645 = vmatprep.subr.bf16.mxu0 %v18746_v22  ;;  %v18796_v22 = vld [vmem:[%s25081_s1 + $0x6a8] ss:$12 sps:$4 sm:$0xff]  }
  0x9a   : > { %1719 = vmatpush1.bf16.msra.mxu1 %v18747_v24  ;;  %1646 = vmatpush1.bf16.msra.mxu0 %v18744_v27  ;;  %v18802_v24 = vld [vmem:[%s25081_s1 + $0x244] ss:$12 sps:$4 sm:$0xff]   ;;  %v18803_v27 = vld [vmem:[%s25081_s1 + $0x248] ss:$12 sps:$4 sm:$0xff]  }
  0x9b   : > { %1720 = vmatprep.subr.bf16.mxu1 %v20082_v1  ;;  %1647 = vmatprep.subr.bf16.mxu0 %v18750_v51  ;;  %v18800_v51 = vld [vmem:[%s25081_s1 + $0x240] ss:$12 sps:$4 sm:$0xff]  }
  0x9e   : > { %1721 = vmatpush1.bf16.msra.mxu1 %v18751_v31  ;;  %1648 = vmatpush1.bf16.msra.mxu0 %v18748_v33  ;;  %v18806_v31 = vld [vmem:[%s25081_s1 + $0x25c] ss:$12 sps:$4 sm:$0xff]   ;;  %v18807_v33 = vld [vmem:[%s25081_s1 + $0x260] ss:$12 sps:$4 sm:$0xff]  }
  0x9f   : > { %2028 = vmatprep.subr.bf16.mxu1 %v20082_v1  ;;  %1955 = vmatprep.subr.bf16.mxu0 %v18754_v34  ;;  %v18804_v34 = vld [vmem:[%s25081_s1 + $0x258] ss:$12 sps:$4 sm:$0xff]  }
  0xa1   : > { %1731 = vmatmul.mubr.bf16.vlgmr.msra.gmra.mrb[0].mxu1 %v20322_v39  ;;  %1658 = vmatmul.mubr.bf16.vlgmr.msra.gmra.mrb[0].mxu0 %v20322_v39 }
  0xa2   : > { %2029 = vmatpush1.bf16.msra.mxu1 %v18755_v36  ;;  %1956 = vmatpush1.bf16.msra.mxu0 %v18752_v41  ;;  %v18810_v36 = vld [vmem:[%s25081_s1 + $0x274] ss:$12 sps:$4 sm:$0xff]   ;;  %v18811_v41 = vld [vmem:[%s25081_s1 + $0x278] ss:$12 sps:$4 sm:$0xff]  }
  0xa3   : > { %2030 = vmatprep.subr.bf16.mxu1 %v20082_v1  ;;  %1957 = vmatprep.subr.bf16.mxu0 %v18758_v42  ;;  %v18808_v42 = vld [vmem:[%s25081_s1 + $0x270] ss:$12 sps:$4 sm:$0xff]  }
  0xa4   : > { %14511 = vmatprep.mubr.msk.bf16.mxu1 %vm895_vm1, %v20315_v35  ;;  %14507 = vmatprep.mubr.msk.bf16.mxu0 %vm895_vm1, %v20315_v35 }
  0xa6   : > { %2031 = vmatpush1.bf16.msra.mxu1 %v18759_v43  ;;  %1958 = vmatpush1.bf16.msra.mxu0 %v18756_v44  ;;  %v18814_v43 = vld [vmem:[%s25081_s1 + $0x28c] ss:$12 sps:$4 sm:$0xff]   ;;  %v18815_v44 = vld [vmem:[%s25081_s1 + $0x290] ss:$12 sps:$4 sm:$0xff]  }
  0xa7   : > { %2032 = vmatprep.subr.bf16.mxu1 %v20082_v1  ;;  %1959 = vmatprep.subr.bf16.mxu0 %v18762_v45  ;;  %v2988_v45 = vrot.slane %v638_v53, 1  ;;  %v18819_v53 = vld [vmem:[%s25081_s1 + $0x2a8] ss:$12 sps:$4 sm:$0xff]  }
  0xa9   : > { %1739 = vmatmul.mubr.bf16.gmra.mrb[4].mxu1 %v20337_v47  ;;  %1668 = vmatmul.mubr.bf16.gmra.mrb[4].mxu0 %v20337_v47 }
  0xaa   : > { %2033 = vmatpush1.bf16.msra.mxu1 %v18763_v46  ;;  %1960 = vmatpush1.bf16.msra.mxu0 %v18760_v49  ;;  %v2992_v46 = vrot.slane %v645_v55, 2  ;;  %v2991_v49 = vrot.slane %v661_v8, 1  ;;  %v18816_v55 = vld [vmem:[%s25081_s1 + $0x2a0] ss:$12 sps:$4 sm:$0xff]   ;;  %v2989_v8 = vrot.slane %v640_v48, 2 }
  0xab   : > { %2034 = vmatprep.subr.bf16.mxu1 %v20082_v1  ;;  %1961 = vmatprep.subr.bf16.mxu0 %v18766_v52  ;;  %v18812_v52 = vld [vmem:[%s25081_s1 + $0x288] ss:$12 sps:$4 sm:$0xff]  }
  0xac   : > { %14512 = vmatprep.mubr.msk.bf16.mxu1 %vm895_vm1, %v20392_v6  ;;  %14508 = vmatprep.mubr.msk.bf16.mxu0 %vm895_vm1, %v20392_v6 }
  0xae   : > { %2035 = vmatpush1.bf16.msra.mxu1 %v18767_v54  ;;  %1962 = vmatpush1.bf16.msra.mxu0 %v18764_v56  ;;  %v18818_v54 = vld [vmem:[%s25081_s1 + $0x2a4] ss:$12 sps:$4 sm:$0xff]   ;;  %v2990_v56 = vor.u32 %v2989_v8, %v2988_v45  ;;  %v2157_v45 = vrot.slane %v20400_v10, 1  ;;  %v18862_v8 = vld [vmem:[%s25081_s1 + $0x82c] ss:$12 sps:$4 sm:$0xff]  }
  0xaf   : > { %2036 = vmatprep.subr.bf16.mxu1 %v20082_v1  ;;  %1963 = vmatprep.subr.bf16.mxu0 %v18770_v5  ;;  %v20942_v5 = vor.u32 %v2992_v46, %v2991_v49  ;;  %v18852_v46 = vld [vmem:[%s25081_s1 + $0x7f8] ss:$12 sps:$4 sm:$0xff]   ;;  %v18858_v49 = vld [vmem:[%s25081_s1 + $0x814] ss:$12 sps:$4 sm:$0xff]  }
  0xb1   : > { %1747 = vmatmul.mubr.bf16.gmra.mrb[8].mxu1 %v20400_v10  ;;  %1678 = vmatmul.mubr.bf16.gmra.mrb[8].mxu0 %v20400_v10  ;;  %v20953_v48 = vsel %vm2987_vm2, %v2990_v56, %v20942_v5  ;;  %v18863_v56 = vld [vmem:[%s25081_s1 + $0x830] ss:$12 sps:$4 sm:$0xff]  }
  0xb2   : > { %2037 = vmatpush1.bf16.msra.mxu1 %v18771_v57  ;;  %1964 = vmatpush1.bf16.msra.mxu0 %v18768_v58  ;;  %v18822_v57 = vld [vmem:[%s25081_s1 + $0x2bc] ss:$12 sps:$4 sm:$0xff]   ;;  %v18823_v58 = vld [vmem:[%s25081_s1 + $0x2c0] ss:$12 sps:$4 sm:$0xff]  }
  0xb3   : > { %2038 = vmatprep.subr.bf16.mxu1 %v20082_v1  ;;  %1965 = vmatprep.subr.bf16.mxu0 %v18774_v25  ;;  %v18820_v25 = vld [vmem:[%s25081_s1 + $0x2b8] ss:$12 sps:$4 sm:$0xff]  }
  0xb4   : > { %14513 = vmatprep.mubr.msk.bf16.mxu1 %vm895_vm1, %v20434_v26  ;;  %14509 = vmatprep.mubr.msk.bf16.mxu0 %vm895_vm1, %v20434_v26 }
  0xb6   : > { %2039 = vmatpush1.bf16.msra.mxu1 %v18775_v59  ;;  %1966 = vmatpush1.bf16.msra.mxu0 %v18772_v60  ;;  %v18826_v59 = vld [vmem:[%s25081_s1 + $0x2d4] ss:$12 sps:$4 sm:$0xff]   ;;  %v18827_v60 = vld [vmem:[%s25081_s1 + $0x2d8] ss:$12 sps:$4 sm:$0xff]  }
  0xb7   : > { %2040 = vmatprep.subr.bf16.mxu1 %v20082_v1  ;;  %1967 = vmatprep.subr.bf16.mxu0 %v18778_v32  ;;  %v2154_v32 = vrot.slane %v20305_v30, 1 }
  0xb9   : > { %1755 = vmatmul.mubr.bf16.gmra.mrb[12].mxu1 %v20441_v28  ;;  %1688 = vmatmul.mubr.bf16.gmra.mrb[12].mxu0 %v20441_v28 }
  0xba   : > { %2041 = vmatpush1.bf16.msra.mxu1 %v18779_v62  ;;  %1968 = vmatpush1.bf16.msra.mxu0 %v18776_v3  ;;  %v2155_v62 = vrot.slane %v20315_v35, 1  ;;  %v18824_v3 = vld [vmem:[%s25081_s1 + $0x2d0] ss:$12 sps:$4 sm:$0xff]  }
  0xbb   : > { %2042 = vmatprep.subr.bf16.mxu1 %v20082_v1  ;;  %1969 = vmatprep.subr.bf16.mxu0 %v18782_v50  ;;  %v18830_v50 = vld [vmem:[%s25081_s1 + $0x2ec] ss:$12 sps:$4 sm:$0xff]  }
  0xbc   : > { %14554 = vmatprep.mubr.msk.bf16.mxu1 %vm895_vm1, %v20305_v30  ;;  %14550 = vmatprep.mubr.msk.bf16.mxu0 %vm895_vm1, %v20305_v30 }
  0xbe   : > { %2043 = vmatpush1.bf16.msra.mxu1 %v18783_v4  ;;  %1970 = vmatpush1.bf16.msra.mxu0 %v18780_v9  ;;  %v18831_v4 = vld [vmem:[%s25081_s1 + $0x2f0] ss:$12 sps:$4 sm:$0xff]   ;;  %v20984_v9 = vsel %vm2150_vm3, %v2154_v32, %v2155_v62  ;;  %v18864_v32 = vld [vmem:[%s25081_s1 + $0x840] ss:$12 sps:$4 sm:$0xff]  }
  0xbf   : > { %2044 = vmatprep.subr.bf16.mxu1 %v20082_v1  ;;  %1971 = vmatprep.subr.bf16.mxu0 %v18786_v63  ;;  %v18828_v63 = vld [vmem:[%s25081_s1 + $0x2e8] ss:$12 sps:$4 sm:$0xff]  }
  0xc2   : > { %2045 = vmatpush1.bf16.msra.mxu1 %v18787_v11  ;;  %1972 = vmatpush1.bf16.msra.mxu0 %v18784_v12  ;;  %v18834_v11 = vld [vmem:[%s25081_s1 + $0x304] ss:$12 sps:$4 sm:$0xff]   ;;  %v18835_v12 = vld [vmem:[%s25081_s1 + $0x308] ss:$12 sps:$4 sm:$0xff]  }
  0xc3   : > { %2046 = vmatprep.subr.bf16.mxu1 %v20082_v1  ;;  %1973 = vmatprep.subr.bf16.mxu0 %v18790_v7  ;;  %v18832_v7 = vld [vmem:[%s25081_s1 + $0x300] ss:$12 sps:$4 sm:$0xff]  }
  0xc6   : > { %2047 = vmatpush1.bf16.msra.mxu1 %v18791_v15  ;;  %1974 = vmatpush1.bf16.msra.mxu0 %v18788_v17  ;;  %v18838_v15 = vld [vmem:[%s25081_s1 + $0x31c] ss:$12 sps:$4 sm:$0xff]   ;;  %v18839_v17 = vld [vmem:[%s25081_s1 + $0x320] ss:$12 sps:$4 sm:$0xff]  }
  0xc7   : > { %2048 = vmatprep.subr.bf16.mxu1 %v20082_v1  ;;  %1975 = vmatprep.subr.bf16.mxu0 %v18794_v14  ;;  %v18836_v14 = vld [vmem:[%s25081_s1 + $0x318] ss:$12 sps:$4 sm:$0xff]  }
  0xca   : > { %2049 = vmatpush1.bf16.msra.mxu1 %v18795_v18  ;;  %1976 = vmatpush1.bf16.msra.mxu0 %v18792_v19  ;;  %v18842_v18 = vld [vmem:[%s25081_s1 + $0x334] ss:$12 sps:$4 sm:$0xff]   ;;  %v18843_v19 = vld [vmem:[%s25081_s1 + $0x338] ss:$12 sps:$4 sm:$0xff]  }
  0xcb   : > { %2050 = vmatprep.subr.bf16.mxu1 %v20082_v1  ;;  %1977 = vmatprep.subr.bf16.mxu0 %v18798_v20  ;;  %v18840_v20 = vld [vmem:[%s25081_s1 + $0x330] ss:$12 sps:$4 sm:$0xff]  }
  0xce   : > { %2051 = vmatpush1.bf16.msra.mxu1 %v18799_v21  ;;  %1978 = vmatpush1.bf16.msra.mxu0 %v18796_v22  ;;  %v18846_v21 = vld [vmem:[%s25081_s1 + $0x34c] ss:$12 sps:$4 sm:$0xff]   ;;  %v18847_v22 = vld [vmem:[%s25081_s1 + $0x350] ss:$12 sps:$4 sm:$0xff]  }
  0xcf   : > { %2446 = vmatprep.subr.bf16.mxu1 %v20082_v1  ;;  %2373 = vmatprep.subr.bf16.mxu0 %v18802_v24  ;;  %v2151_v24 = vrot.slane %v20322_v39, 1 }
  0xd1   : > { %2061 = vmatmul.mubr.bf16.vlgmr.msra.gmra.mrb[16].mxu1 %v20322_v39  ;;  %1988 = vmatmul.mubr.bf16.vlgmr.msra.gmra.mrb[16].mxu0 %v20322_v39 }
  0xd2   : > { %2447 = vmatpush1.bf16.msra.mxu1 %v18803_v27  ;;  %2374 = vmatpush1.bf16.msra.mxu0 %v18800_v51  ;;  %v2152_v27 = vrot.slane %v20337_v47, 1  ;;  %v18844_v51 = vld [vmem:[%s25081_s1 + $0x348] ss:$12 sps:$4 sm:$0xff]  }
  0xd3   : > { %2448 = vmatprep.subr.bf16.mxu1 %v20082_v1  ;;  %2375 = vmatprep.subr.bf16.mxu0 %v18806_v31  ;;  %v18850_v31 = vld [vmem:[%s25081_s1 + $0x7e4] ss:$12 sps:$4 sm:$0xff]  }
  0xd4   : > { %14555 = vmatprep.mubr.msk.bf16.mxu1 %vm895_vm1, %v20315_v35  ;;  %14551 = vmatprep.mubr.msk.bf16.mxu0 %vm895_vm1, %v20315_v35 }
  0xd6   : > { %2449 = vmatpush1.bf16.msra.mxu1 %v18807_v33  ;;  %2376 = vmatpush1.bf16.msra.mxu0 %v18804_v34  ;;  %v18851_v33 = vld [vmem:[%s25081_s1 + $0x7e8] ss:$12 sps:$4 sm:$0xff]   ;;  %v2159_v34 = vrot.slane %v20392_v6, 1 }
  0xd7   : > { %2450 = vmatprep.subr.bf16.mxu1 %v20082_v1  ;;  %2377 = vmatprep.subr.bf16.mxu0 %v18810_v36  ;;  %v21045_v36 = vsel %vm2150_vm3, %v2151_v24, %v2152_v27  ;;  %v18891_v24 = vld [vmem:[%s25081_s1 + $0x8d8] ss:$12 sps:$4 sm:$0xff]  }
  0xd9   : > { %2069 = vmatmul.mubr.bf16.gmra.mrb[20].mxu1 %v20337_v47  ;;  %1998 = vmatmul.mubr.bf16.gmra.mrb[20].mxu0 %v20337_v47 }
  0xda   : > { %2451 = vmatpush1.bf16.msra.mxu1 %v18811_v41  ;;  %2378 = vmatpush1.bf16.msra.mxu0 %v18808_v42  ;;  %v18848_v41 = vld [vmem:[%s25081_s1 + $0x7e0] ss:$12 sps:$4 sm:$0xff]   ;;  %v18854_v42 = vld [vmem:[%s25081_s1 + $0x7fc] ss:$12 sps:$4 sm:$0xff]  }
  0xdb   : > { %2452 = vmatprep.subr.bf16.mxu1 %v20082_v1  ;;  %2379 = vmatprep.subr.bf16.mxu0 %v18814_v43  ;;  %v18855_v43 = vld [vmem:[%s25081_s1 + $0x800] ss:$12 sps:$4 sm:$0xff]  }
  0xdc   : > { %14556 = vmatprep.mubr.msk.bf16.mxu1 %vm895_vm1, %v20392_v6  ;;  %14552 = vmatprep.mubr.msk.bf16.mxu0 %vm895_vm1, %v20392_v6 }
  0xde   : > { %2453 = vmatpush1.bf16.msra.mxu1 %v18815_v44  ;;  %2380 = vmatpush1.bf16.msra.mxu0 %v18812_v52  ;;  %v21059_v44 = vsel %vm2150_vm3, %v2155_v62, %v2159_v34  ;;  %v18859_v52 = vld [vmem:[%s25081_s1 + $0x818] ss:$12 sps:$4 sm:$0xff]  }
  0xdf   : > { %2454 = vmatprep.subr.bf16.mxu1 %v20082_v1  ;;  %2381 = vmatprep.subr.bf16.mxu0 %v18818_v54  ;;  %v21078_v54 = vrot.slane %v20434_v26, 1 }
  0xe1   : > { %2077 = vmatmul.mubr.bf16.gmra.mrb[24].mxu1 %v20400_v10  ;;  %2008 = vmatmul.mubr.bf16.gmra.mrb[24].mxu0 %v20400_v10 }
  0xe2   : > { %2455 = vmatpush1.bf16.msra.mxu1 %v18819_v53  ;;  %2382 = vmatpush1.bf16.msra.mxu0 %v18816_v55  ;;  %v21081_v53 = vsel %vm2150_vm3, %v2152_v27, %v2157_v45  ;;  %v18856_v55 = vld [vmem:[%s25081_s1 + $0x810] ss:$12 sps:$4 sm:$0xff]  }
  0xe3   : > { %2456 = vmatprep.subr.bf16.mxu1 %v20082_v1  ;;  %2383 = vmatprep.subr.bf16.mxu0 %v18822_v57  ;;  %v21096_v57 = vsel %vm2150_vm3, %v2159_v34, %v21078_v54  ;;  %v18888_v27 = vld [vmem:[%s25081_s1 + $0x8d0] ss:$12 sps:$4 sm:$0xff]  }
  0xe4   : > { %14557 = vmatprep.mubr.msk.bf16.mxu1 %vm895_vm1, %v20434_v26  ;;  %14553 = vmatprep.mubr.msk.bf16.mxu0 %vm895_vm1, %v20434_v26  ;;  %v18898_v34 = vld [vmem:[%s25081_s1 + $0x364] ss:$12 sps:$4 sm:$0xff]  }
  0xe6   : > { %2457 = vmatpush1.bf16.msra.mxu1 %v18823_v58  ;;  %2384 = vmatpush1.bf16.msra.mxu0 %v18820_v25  ;;  %v21100_v58 = vrot.slane %v20441_v28, 1  ;;  %v18860_v25 = vld [vmem:[%s25081_s1 + $0x828] ss:$12 sps:$4 sm:$0xff]  }
  0xe7   : > { %2458 = vmatprep.subr.bf16.mxu1 %v20082_v1  ;;  %2385 = vmatprep.subr.bf16.mxu0 %v18826_v59  ;;  %v18866_v59 = vld [vmem:[%s25081_s1 + $0x844] ss:$12 sps:$4 sm:$0xff]  }
  0xe8   : > { %v21121_v62 = vsel %vm2150_vm3, %v2157_v45, %v21100_v58  ;;  %v18903_v45 = vld [vmem:[%s25081_s1 + $0x380] ss:$12 sps:$4 sm:$0xff]  }
  0xe9   : > { %2085 = vmatmul.mubr.bf16.gmra.mrb[28].mxu1 %v20441_v28  ;;  %2018 = vmatmul.mubr.bf16.gmra.mrb[28].mxu0 %v20441_v28 }
  0xea   : > { %2459 = vmatpush1.bf16.msra.mxu1 %v18827_v60  ;;  %2386 = vmatpush1.bf16.msra.mxu0 %v18824_v3  ;;  %v18867_v60 = vld [vmem:[%s25081_s1 + $0x848] ss:$12 sps:$4 sm:$0xff]  }
  0xeb   : > { %2460 = vmatprep.subr.bf16.mxu1 %v20082_v1  ;;  %2387 = vmatprep.subr.bf16.mxu0 %v18830_v50  ;;  %v18870_v3 = vld [vmem:[%s25081_s1 + $0x85c] ss:$12 sps:$4 sm:$0xff]   ;;  %v18871_v50 = vld [vmem:[%s25081_s1 + $0x860] ss:$12 sps:$4 sm:$0xff]  }
  0xec   : > { %14646 = vmatprep.mubr.msk.bf16.mxu1 %vm895_vm1, %v20984_v9  ;;  %14642 = vmatprep.mubr.msk.bf16.mxu0 %vm895_vm1, %v20984_v9 }
  0xee   : > { %2461 = vmatpush1.bf16.msra.mxu1 %v18831_v4  ;;  %2388 = vmatpush1.bf16.msra.mxu0 %v18828_v63  ;;  %v18868_v4 = vld [vmem:[%s25081_s1 + $0x858] ss:$12 sps:$4 sm:$0xff]   ;;  %v18874_v63 = vld [vmem:[%s25081_s1 + $0x874] ss:$12 sps:$4 sm:$0xff]  }
  0xef   : > { %2462 = vmatprep.subr.bf16.mxu1 %v20082_v1  ;;  %2389 = vmatprep.subr.bf16.mxu0 %v18834_v11  ;;  %v18875_v11 = vld [vmem:[%s25081_s1 + $0x878] ss:$12 sps:$4 sm:$0xff]  }
  0xf2   : > { %2463 = vmatpush1.bf16.msra.mxu1 %v18835_v12  ;;  %2390 = vmatpush1.bf16.msra.mxu0 %v18832_v7  ;;  %v18872_v12 = vld [vmem:[%s25081_s1 + $0x870] ss:$12 sps:$4 sm:$0xff]   ;;  %v18878_v7 = vld [vmem:[%s25081_s1 + $0x88c] ss:$12 sps:$4 sm:$0xff]  }
  0xf3   : > { %2464 = vmatprep.subr.bf16.mxu1 %v20082_v1  ;;  %2391 = vmatprep.subr.bf16.mxu0 %v18838_v15  ;;  %v18879_v15 = vld [vmem:[%s25081_s1 + $0x890] ss:$12 sps:$4 sm:$0xff]  }
  0xf6   : > { %2465 = vmatpush1.bf16.msra.mxu1 %v18839_v17  ;;  %2392 = vmatpush1.bf16.msra.mxu0 %v18836_v14  ;;  %v18876_v17 = vld [vmem:[%s25081_s1 + $0x888] ss:$12 sps:$4 sm:$0xff]   ;;  %v18882_v14 = vld [vmem:[%s25081_s1 + $0x8a4] ss:$12 sps:$4 sm:$0xff]  }
  0xf7   : > { %2466 = vmatprep.subr.bf16.mxu1 %v20082_v1  ;;  %2393 = vmatprep.subr.bf16.mxu0 %v18842_v18  ;;  %v18883_v18 = vld [vmem:[%s25081_s1 + $0x8a8] ss:$12 sps:$4 sm:$0xff]  }
  0xfa   : > { %2467 = vmatpush1.bf16.msra.mxu1 %v18843_v19  ;;  %2394 = vmatpush1.bf16.msra.mxu0 %v18840_v20  ;;  %v18880_v19 = vld [vmem:[%s25081_s1 + $0x8a0] ss:$12 sps:$4 sm:$0xff]   ;;  %v18886_v20 = vld [vmem:[%s25081_s1 + $0x8bc] ss:$12 sps:$4 sm:$0xff]  }
  0xfb   : > { %2468 = vmatprep.subr.bf16.mxu1 %v20082_v1  ;;  %2395 = vmatprep.subr.bf16.mxu0 %v18846_v21  ;;  %v18887_v21 = vld [vmem:[%s25081_s1 + $0x8c0] ss:$12 sps:$4 sm:$0xff]  }
  0xfe   : > { %2469 = vmatpush1.bf16.msra.mxu1 %v18847_v22  ;;  %2396 = vmatpush1.bf16.msra.mxu0 %v18844_v51  ;;  %v18890_v22 = vld [vmem:[%s25081_s1 + $0x8d4] ss:$12 sps:$4 sm:$0xff]   ;;  %v18894_v51 = vld [vmem:[%s25081_s1 + $0x8ec] ss:$12 sps:$4 sm:$0xff]  }
  0xff   : > { %2825 = vmatprep.subr.bf16.mxu1 %v20082_v1  ;;  %2752 = vmatprep.subr.bf16.mxu0 %v18850_v31  ;;  %v18895_v31 = vld [vmem:[%s25081_s1 + $0x8f0] ss:$12 sps:$4 sm:$0xff]  }
 0x101   : > { %2479 = vmatmul.mubr.bf16.vlgmr.msra.gmra.mrb[0].mxu1 %v21045_v36  ;;  %2406 = vmatmul.mubr.bf16.vlgmr.msra.gmra.mrb[0].mxu0 %v21045_v36 }
 0x102   : > { %2826 = vmatpush1.bf16.msra.mxu1 %v18851_v33  ;;  %2753 = vmatpush1.bf16.msra.mxu0 %v18848_v41  ;;  %v18892_v33 = vld [vmem:[%s25081_s1 + $0x8e8] ss:$12 sps:$4 sm:$0xff]  }
 0x103   : > { %2827 = vmatprep.subr.bf16.mxu1 %v20082_v1  ;;  %2754 = vmatprep.subr.bf16.mxu0 %v18854_v42  ;;  %v18899_v41 = vld [vmem:[%s25081_s1 + $0x368] ss:$12 sps:$4 sm:$0xff]   ;;  %v18896_v42 = vld [vmem:[%s25081_s1 + $0x360] ss:$12 sps:$4 sm:$0xff]  }
 0x104   : > { %14647 = vmatprep.mubr.msk.bf16.mxu1 %vm895_vm1, %v21059_v44  ;;  %14643 = vmatprep.mubr.msk.bf16.mxu0 %vm895_vm1, %v21059_v44 }
 0x106   : > { %2828 = vmatpush1.bf16.msra.mxu1 %v18855_v43  ;;  %2755 = vmatpush1.bf16.msra.mxu0 %v18852_v46  ;;  %v18902_v43 = vld [vmem:[%s25081_s1 + $0x37c] ss:$12 sps:$4 sm:$0xff]   ;;  %v18900_v46 = vld [vmem:[%s25081_s1 + $0x378] ss:$12 sps:$4 sm:$0xff]  }
 0x107   : > { %2829 = vmatprep.subr.bf16.mxu1 %v20082_v1  ;;  %2756 = vmatprep.subr.bf16.mxu0 %v18858_v49  ;;  %v18906_v49 = vld [vmem:[%s25081_s1 + $0x394] ss:$12 sps:$4 sm:$0xff]  }
 0x109   : > { %2487 = vmatmul.mubr.bf16.gmra.mrb[4].mxu1 %v21081_v53  ;;  %2416 = vmatmul.mubr.bf16.gmra.mrb[4].mxu0 %v21081_v53 }
 0x10a   : > { %2830 = vmatpush1.bf16.msra.mxu1 %v18859_v52  ;;  %2757 = vmatpush1.bf16.msra.mxu0 %v18856_v55  ;;  %v18907_v52 = vld [vmem:[%s25081_s1 + $0x398] ss:$12 sps:$4 sm:$0xff]  }
 0x10b   : > { %2831 = vmatprep.subr.bf16.mxu1 %v20082_v1  ;;  %2758 = vmatprep.subr.bf16.mxu0 %v18862_v8  ;;  %v18910_v55 = vld [vmem:[%s25081_s1 + $0x3ac] ss:$12 sps:$4 sm:$0xff]   ;;  %v18911_v8 = vld [vmem:[%s25081_s1 + $0x3b0] ss:$12 sps:$4 sm:$0xff]  }
 0x10c   : > { %14648 = vmatprep.mubr.msk.bf16.mxu1 %vm895_vm1, %v21096_v57  ;;  %14644 = vmatprep.mubr.msk.bf16.mxu0 %vm895_vm1, %v21096_v57 }
 0x10e   : > { %2832 = vmatpush1.bf16.msra.mxu1 %v18863_v56  ;;  %2759 = vmatpush1.bf16.msra.mxu0 %v18860_v25  ;;  %v18914_v56 = vld [vmem:[%s25081_s1 + $0x3c4] ss:$12 sps:$4 sm:$0xff]   ;;  %v18915_v25 = vld [vmem:[%s25081_s1 + $0x3c8] ss:$12 sps:$4 sm:$0xff]  }
 0x10f   : > { %2833 = vmatprep.subr.bf16.mxu1 %v20082_v1  ;;  %2760 = vmatprep.subr.bf16.mxu0 %v18866_v59  ;;  %v18918_v59 = vld [vmem:[%s25081_s1 + $0x3dc] ss:$12 sps:$4 sm:$0xff]  }
 0x111   : > { %2495 = vmatmul.mubr.bf16.gmra.mrb[8].mxu1 %v21121_v62  ;;  %2426 = vmatmul.mubr.bf16.gmra.mrb[8].mxu0 %v21121_v62 }
 0x112   : > { %2834 = vmatpush1.bf16.msra.mxu1 %v18867_v60  ;;  %2761 = vmatpush1.bf16.msra.mxu0 %v18864_v32  ;;  %v18919_v60 = vld [vmem:[%s25081_s1 + $0x3e0] ss:$12 sps:$4 sm:$0xff]   ;;  %v2995_v32 = vrot.slane %v650_v37, 1  ;;  %v18916_v37 = vld [vmem:[%s25081_s1 + $0x3d8] ss:$12 sps:$4 sm:$0xff]  }
 0x113   : > { %2835 = vmatprep.subr.bf16.mxu1 %v20082_v1  ;;  %2762 = vmatprep.subr.bf16.mxu0 %v18870_v3  ;;  %v2996_v3 = vrot.slane %v652_v38, 2  ;;  %v18922_v38 = vld [vmem:[%s25081_s1 + $0x3f4] ss:$12 sps:$4 sm:$0xff]  }
 0x114   : > { %14649 = vmatprep.mubr.msk.bf16.mxu1 %vm895_vm1, %v21078_v54  ;;  %14645 = vmatprep.mubr.msk.bf16.mxu0 %vm895_vm1, %v21078_v54 }
 0x116   : > { %2836 = vmatpush1.bf16.msra.mxu1 %v18871_v50  ;;  %2763 = vmatpush1.bf16.msra.mxu0 %v18868_v4  ;;  %v2999_v50 = vrot.slane %v657_v40, 2  ;;  %v18920_v40 = vld [vmem:[%s25081_s1 + $0x3f0] ss:$12 sps:$4 sm:$0xff]  }
 0x117   : > { %2837 = vmatprep.subr.bf16.mxu1 %v20082_v1  ;;  %2764 = vmatprep.subr.bf16.mxu0 %v18874_v63  ;;  %v18926_v63 = vld [vmem:[%s25081_s1 + $0x40c] ss:$12 sps:$4 sm:$0xff]  }
 0x119   : > { %2503 = vmatmul.mubr.bf16.gmra.mrb[12].mxu1 %v21100_v58  ;;  %2436 = vmatmul.mubr.bf16.gmra.mrb[12].mxu0 %v21100_v58 }
 0x11a   : > { %2838 = vmatpush1.bf16.msra.mxu1 %v18875_v11  ;;  %2765 = vmatpush1.bf16.msra.mxu0 %v18872_v12  ;;  %v18927_v11 = vld [vmem:[%s25081_s1 + $0x410] ss:$12 sps:$4 sm:$0xff]  }
 0x11b   : > { %2839 = vmatprep.subr.bf16.mxu1 %v20082_v1  ;;  %2766 = vmatprep.subr.bf16.mxu0 %v18878_v7  ;;  %v18930_v7 = vld [vmem:[%s25081_s1 + $0x424] ss:$12 sps:$4 sm:$0xff]  }
 0x11c   : > { %14738 = vmatprep.mubr.msk.bf16.mxu1 %vm895_vm1, %v20984_v9  ;;  %14734 = vmatprep.mubr.msk.bf16.mxu0 %vm895_vm1, %v20984_v9  ;;  %v18884_v9 = vld [vmem:[%s25081_s1 + $0x8b8] ss:$12 sps:$4 sm:$0xff]  }
 0x11e   : > { %2840 = vmatpush1.bf16.msra.mxu1 %v18879_v15  ;;  %2767 = vmatpush1.bf16.msra.mxu0 %v18876_v17  ;;  %v18931_v15 = vld [vmem:[%s25081_s1 + $0x428] ss:$12 sps:$4 sm:$0xff]  }
 0x11f   : > { %2841 = vmatprep.subr.bf16.mxu1 %v20082_v1  ;;  %2768 = vmatprep.subr.bf16.mxu0 %v18882_v14  ;;  %v18934_v17 = vld [vmem:[%s25081_s1 + $0x43c] ss:$12 sps:$4 sm:$0xff]   ;;  %v18935_v14 = vld [vmem:[%s25081_s1 + $0x440] ss:$12 sps:$4 sm:$0xff]  }
 0x122   : > { %2842 = vmatpush1.bf16.msra.mxu1 %v18883_v18  ;;  %2769 = vmatpush1.bf16.msra.mxu0 %v18880_v19  ;;  %v18932_v18 = vld [vmem:[%s25081_s1 + $0x438] ss:$12 sps:$4 sm:$0xff]   ;;  %v18938_v19 = vld [vmem:[%s25081_s1 + $0x454] ss:$12 sps:$4 sm:$0xff]  }
 0x123   : > { %2843 = vmatprep.subr.bf16.mxu1 %v20082_v1  ;;  %2770 = vmatprep.subr.bf16.mxu0 %v18886_v20  ;;  %v18939_v20 = vld [vmem:[%s25081_s1 + $0x458] ss:$12 sps:$4 sm:$0xff]  }
 0x126   : > { %2844 = vmatpush1.bf16.msra.mxu1 %v18887_v21  ;;  %2771 = vmatpush1.bf16.msra.mxu0 %v18884_v9  ;;  %v18936_v21 = vld [vmem:[%s25081_s1 + $0x450] ss:$12 sps:$4 sm:$0xff]   ;;  %v18942_v9 = vld [vmem:[%s25081_s1 + $0x46c] ss:$12 sps:$4 sm:$0xff]  }
 0x127   : > { %2845 = vmatprep.subr.bf16.mxu1 %v20082_v1  ;;  %2772 = vmatprep.subr.bf16.mxu0 %v18890_v22  ;;  %v18943_v22 = vld [vmem:[%s25081_s1 + $0x470] ss:$12 sps:$4 sm:$0xff]  }
 0x12a   : > { %2846 = vmatpush1.bf16.msra.mxu1 %v18891_v24  ;;  %2773 = vmatpush1.bf16.msra.mxu0 %v18888_v27  ;;  %v3006_v24 = vrot.slane %v685_v23, 1  ;;  %v3007_v27 = vrot.slane %v673_v13, 2  ;;  %v18947_v23 = vld [vmem:[%s25081_s1 + $0x908] ss:$12 sps:$4 sm:$0xff]   ;;  %v3002_v13 = vrot.slane %v677_v29, 1 }
 0x12b   : > { %2847 = vmatprep.subr.bf16.mxu1 %v20082_v1  ;;  %2774 = vmatprep.subr.bf16.mxu0 %v18894_v51  ;;  %v18940_v51 = vld [vmem:[%s25081_s1 + $0x468] ss:$12 sps:$4 sm:$0xff]  }
 0x12e   : > { %2848 = vmatpush1.bf16.msra.mxu1 %v18895_v31  ;;  %2775 = vmatpush1.bf16.msra.mxu0 %v18892_v33  ;;  %v18946_v31 = vld [vmem:[%s25081_s1 + $0x904] ss:$12 sps:$4 sm:$0xff]   ;;  %v3008_v33 = vor.u32 %v3007_v27, %v3006_v24  ;;  %v19002_v27 = vld [vmem:[%s25081_s1 + $0x4b4] ss:$12 sps:$4 sm:$0xff]  }
 0x12f   : > { %3299 = vmatprep.subr.bf16.mxu1 %v20082_v1  ;;  %3226 = vmatprep.subr.bf16.mxu0 %v18898_v34  ;;  %v3003_v34 = vrot.slane %v665_v16, 2  ;;  %v18996_v24 = vld [vmem:[%s25081_s1 + $0x498] ss:$12 sps:$4 sm:$0xff]  }
 0x131   : > { %2858 = vmatmul.mubr.bf16.vlgmr.msra.gmra.mrb[16].mxu1 %v21045_v36  ;;  %2785 = vmatmul.mubr.bf16.vlgmr.msra.gmra.mrb[16].mxu0 %v21045_v36  ;;  %v18904_v36 = vld [vmem:[%s25081_s1 + $0x390] ss:$12 sps:$4 sm:$0xff]   ;;  %v3004_v29 = vor.u32 %v3003_v34, %v3002_v13  ;;  %v19011_v34 = vld [vmem:[%s25081_s1 + $0x4e8] ss:$12 sps:$4 sm:$0xff]  }
 0x132   : > { %3300 = vmatpush1.bf16.msra.mxu1 %v18899_v41  ;;  %3227 = vmatpush1.bf16.msra.mxu0 %v18896_v42  ;;  %v18944_v41 = vld [vmem:[%s25081_s1 + $0x900] ss:$12 sps:$4 sm:$0xff]   ;;  %v18950_v42 = vld [vmem:[%s25081_s1 + $0x91c] ss:$12 sps:$4 sm:$0xff]   ;;  %v19010_v13 = vld [vmem:[%s25081_s1 + $0x4e4] ss:$12 sps:$4 sm:$0xff]  }
 0x133   : > { %3301 = vmatprep.subr.bf16.mxu1 %v20082_v1  ;;  %3228 = vmatprep.subr.bf16.mxu0 %v18902_v43  ;;  %v18951_v43 = vld [vmem:[%s25081_s1 + $0x920] ss:$12 sps:$4 sm:$0xff]  }
 0x134   : > { %14739 = vmatprep.mubr.msk.bf16.mxu1 %vm895_vm1, %v21059_v44  ;;  %14735 = vmatprep.mubr.msk.bf16.mxu0 %vm895_vm1, %v21059_v44  ;;  %v18908_v44 = vld [vmem:[%s25081_s1 + $0x3a8] ss:$12 sps:$4 sm:$0xff]  }
 0x136   : > { %3302 = vmatpush1.bf16.msra.mxu1 %v18903_v45  ;;  %3229 = vmatpush1.bf16.msra.mxu0 %v18900_v46  ;;  %v18948_v45 = vld [vmem:[%s25081_s1 + $0x918] ss:$12 sps:$4 sm:$0xff]   ;;  %v18954_v46 = vld [vmem:[%s25081_s1 + $0x934] ss:$12 sps:$4 sm:$0xff]  }
 0x137   : > { %3303 = vmatprep.subr.bf16.mxu1 %v20082_v1  ;;  %3230 = vmatprep.subr.bf16.mxu0 %v18906_v49  ;;  %v18955_v49 = vld [vmem:[%s25081_s1 + $0x938] ss:$12 sps:$4 sm:$0xff]  }
 0x139   : > { %2866 = vmatmul.mubr.bf16.gmra.mrb[20].mxu1 %v21081_v53  ;;  %2795 = vmatmul.mubr.bf16.gmra.mrb[20].mxu0 %v21081_v53  ;;  %v18912_v53 = vld [vmem:[%s25081_s1 + $0x3c0] ss:$12 sps:$4 sm:$0xff]  }
 0x13a   : > { %3304 = vmatpush1.bf16.msra.mxu1 %v18907_v52  ;;  %3231 = vmatpush1.bf16.msra.mxu0 %v18904_v36  ;;  %v21406_v52 = vsel %vm2987_vm2, %v20942_v5, %v3004_v29  ;;  %v18952_v36 = vld [vmem:[%s25081_s1 + $0x930] ss:$12 sps:$4 sm:$0xff]   ;;  %v21421_v5 = vsel %vm2987_vm2, %v3008_v33, %v20484_v61 }
 0x13b   : > { %3305 = vmatprep.subr.bf16.mxu1 %v20082_v1  ;;  %3232 = vmatprep.subr.bf16.mxu0 %v18910_v55  ;;  %v18958_v55 = vld [vmem:[%s25081_s1 + $0x94c] ss:$12 sps:$4 sm:$0xff]  }
 0x13c   : > { %14740 = vmatprep.mubr.msk.bf16.mxu1 %vm895_vm1, %v21096_v57  ;;  %14736 = vmatprep.mubr.msk.bf16.mxu0 %vm895_vm1, %v21096_v57  ;;  %v2998_v57 = vrot.slane %v669_v0, 1  ;;  %v18923_v0 = vld [vmem:[%s25081_s1 + $0x3f8] ss:$12 sps:$4 sm:$0xff]  }
 0x13e   : > { %3306 = vmatpush1.bf16.msra.mxu1 %v18911_v8  ;;  %3233 = vmatpush1.bf16.msra.mxu0 %v18908_v44  ;;  %v3000_v4 = vor.u32 %v2999_v50, %v2998_v57  ;;  %v18959_v8 = vld [vmem:[%s25081_s1 + $0x950] ss:$12 sps:$4 sm:$0xff]   ;;  %v18956_v44 = vld [vmem:[%s25081_s1 + $0x948] ss:$12 sps:$4 sm:$0xff]   ;;  %v18971_v50 = vld [vmem:[%s25081_s1 + $0x998] ss:$12 sps:$4 sm:$0xff]  }
 0x13f   : > { %3307 = vmatprep.subr.bf16.mxu1 %v20082_v1  ;;  %3234 = vmatprep.subr.bf16.mxu0 %v18914_v56  ;;  %v18962_v56 = vld [vmem:[%s25081_s1 + $0x964] ss:$12 sps:$4 sm:$0xff]   ;;  %v18970_v57 = vld [vmem:[%s25081_s1 + $0x994] ss:$12 sps:$4 sm:$0xff]  }
 0x140   : > { %v21387_v16 = vsel %vm2987_vm2, %v3000_v4, %v3008_v33  ;;  %v19004_v33 = vld [vmem:[%s25081_s1 + $0x4c8] ss:$12 sps:$4 sm:$0xff]  }
 0x141   : > { %2874 = vmatmul.mubr.bf16.gmra.mrb[24].mxu1 %v21121_v62  ;;  %2805 = vmatmul.mubr.bf16.gmra.mrb[24].mxu0 %v21121_v62  ;;  %v2997_v62 = vor.u32 %v2996_v3, %v2995_v32  ;;  %v18967_v32 = vld [vmem:[%s25081_s1 + $0x980] ss:$12 sps:$4 sm:$0xff]   ;;  %v18964_v3 = vld [vmem:[%s25081_s1 + $0x978] ss:$12 sps:$4 sm:$0xff]  }
 0x142   : > { %3308 = vmatpush1.bf16.msra.mxu1 %v18915_v25  ;;  %3235 = vmatpush1.bf16.msra.mxu0 %v18912_v53  ;;  %v18963_v25 = vld [vmem:[%s25081_s1 + $0x968] ss:$12 sps:$4 sm:$0xff]   ;;  %v18960_v53 = vld [vmem:[%s25081_s1 + $0x960] ss:$12 sps:$4 sm:$0xff]  }
 0x143   : > { %3309 = vmatprep.subr.bf16.mxu1 %v20082_v1  ;;  %3236 = vmatprep.subr.bf16.mxu0 %v18918_v59  ;;  %v21310_v12 = vsel %vm2987_vm2, %v2997_v62, %v3000_v4  ;;  %v18966_v59 = vld [vmem:[%s25081_s1 + $0x97c] ss:$12 sps:$4 sm:$0xff]   ;;  %v18978_v62 = vld [vmem:[%s25081_s1 + $0x9c4] ss:$12 sps:$4 sm:$0xff]  }
 0x144   : > { %14741 = vmatprep.mubr.msk.bf16.mxu1 %vm895_vm1, %v21078_v54  ;;  %14737 = vmatprep.mubr.msk.bf16.mxu0 %vm895_vm1, %v21078_v54  ;;  %v18924_v54 = vld [vmem:[%s25081_s1 + $0x408] ss:$12 sps:$4 sm:$0xff]  }
 0x145   : > { %v18979_v4 = vld [vmem:[%s25081_s1 + $0x9c8] ss:$12 sps:$4 sm:$0xff]  }
 0x146   : > { %3310 = vmatpush1.bf16.msra.mxu1 %v18919_v60  ;;  %3237 = vmatpush1.bf16.msra.mxu0 %v18916_v37  ;;  %v21446_v60 = vsel %vm2987_vm2, %v3004_v29, %v20492_v2  ;;  %v18968_v37 = vld [vmem:[%s25081_s1 + $0x990] ss:$12 sps:$4 sm:$0xff]   ;;  %v19018_v29 = vld [vmem:[%s25081_s1 + $0x514] ss:$12 sps:$4 sm:$0xff]  }
 0x147   : > { %3311 = vmatprep.subr.bf16.mxu1 %v20082_v1  ;;  %3238 = vmatprep.subr.bf16.mxu0 %v18922_v38  ;;  %v18974_v38 = vld [vmem:[%s25081_s1 + $0x9ac] ss:$12 sps:$4 sm:$0xff]  }
 0x149   : > { %2882 = vmatmul.mubr.bf16.gmra.mrb[28].mxu1 %v21100_v58  ;;  %2815 = vmatmul.mubr.bf16.gmra.mrb[28].mxu0 %v21100_v58  ;;  %v18928_v58 = vld [vmem:[%s25081_s1 + $0x420] ss:$12 sps:$4 sm:$0xff]  }
 0x14a   : > { %3312 = vmatpush1.bf16.msra.mxu1 %v18923_v0  ;;  %3239 = vmatpush1.bf16.msra.mxu0 %v18920_v40  ;;  %v18975_v0 = vld [vmem:[%s25081_s1 + $0x9b0] ss:$12 sps:$4 sm:$0xff]   ;;  %v18972_v40 = vld [vmem:[%s25081_s1 + $0x9a8] ss:$12 sps:$4 sm:$0xff]  }
 0x14b   : > { %3313 = vmatprep.subr.bf16.mxu1 %v20082_v1  ;;  %3240 = vmatprep.subr.bf16.mxu0 %v18926_v63  ;;  %v18976_v63 = vld [vmem:[%s25081_s1 + $0x9c0] ss:$12 sps:$4 sm:$0xff]  }
 0x14c   : > { %14830 = vmatprep.mubr.msk.bf16.mxu1 %vm895_vm1, %v21310_v12  ;;  %14826 = vmatprep.mubr.msk.bf16.mxu0 %vm895_vm1, %v21310_v12 }
 0x14e   : > { %3314 = vmatpush1.bf16.msra.mxu1 %v18927_v11  ;;  %3241 = vmatpush1.bf16.msra.mxu0 %v18924_v54  ;;  %v18982_v11 = vld [vmem:[%s25081_s1 + $0x9dc] ss:$12 sps:$4 sm:$0xff]   ;;  %v18983_v54 = vld [vmem:[%s25081_s1 + $0x9e0] ss:$12 sps:$4 sm:$0xff]  }
 0x14f   : > { %3315 = vmatprep.subr.bf16.mxu1 %v20082_v1  ;;  %3242 = vmatprep.subr.bf16.mxu0 %v18930_v7  ;;  %v18980_v7 = vld [vmem:[%s25081_s1 + $0x9d8] ss:$12 sps:$4 sm:$0xff]  }
 0x152   : > { %3316 = vmatpush1.bf16.msra.mxu1 %v18931_v15  ;;  %3243 = vmatpush1.bf16.msra.mxu0 %v18928_v58  ;;  %v18987_v15 = vld [vmem:[%s25081_s1 + $0x9f8] ss:$12 sps:$4 sm:$0xff]   ;;  %v18984_v58 = vld [vmem:[%s25081_s1 + $0x9f0] ss:$12 sps:$4 sm:$0xff]  }
 0x153   : > { %3317 = vmatprep.subr.bf16.mxu1 %v20082_v1  ;;  %3244 = vmatprep.subr.bf16.mxu0 %v18934_v17  ;;  %v18990_v17 = vld [vmem:[%s25081_s1 + $0xa0c] ss:$12 sps:$4 sm:$0xff]  }
 0x156   : > { %3318 = vmatpush1.bf16.msra.mxu1 %v18935_v14  ;;  %3245 = vmatpush1.bf16.msra.mxu0 %v18932_v18  ;;  %v18991_v14 = vld [vmem:[%s25081_s1 + $0xa10] ss:$12 sps:$4 sm:$0xff]   ;;  %v18988_v18 = vld [vmem:[%s25081_s1 + $0xa08] ss:$12 sps:$4 sm:$0xff]  }
 0x157   : > { %3319 = vmatprep.subr.bf16.mxu1 %v20082_v1  ;;  %3246 = vmatprep.subr.bf16.mxu0 %v18938_v19  ;;  %v18994_v19 = vld [vmem:[%s25081_s1 + $0x484] ss:$12 sps:$4 sm:$0xff]  }
 0x15a   : > { %3320 = vmatpush1.bf16.msra.mxu1 %v18939_v20  ;;  %3247 = vmatpush1.bf16.msra.mxu0 %v18936_v21  ;;  %v18995_v20 = vld [vmem:[%s25081_s1 + $0x488] ss:$12 sps:$4 sm:$0xff]   ;;  %v18992_v21 = vld [vmem:[%s25081_s1 + $0x480] ss:$12 sps:$4 sm:$0xff]  }
 0x15b   : > { %3321 = vmatprep.subr.bf16.mxu1 %v20082_v1  ;;  %3248 = vmatprep.subr.bf16.mxu0 %v18942_v9  ;;  %v18998_v9 = vld [vmem:[%s25081_s1 + $0x49c] ss:$12 sps:$4 sm:$0xff]  }
 0x15e   : > { %3322 = vmatpush1.bf16.msra.mxu1 %v18943_v22  ;;  %3249 = vmatpush1.bf16.msra.mxu0 %v18940_v51  ;;  %v18999_v22 = vld [vmem:[%s25081_s1 + $0x4a0] ss:$12 sps:$4 sm:$0xff]   ;;  %v19003_v51 = vld [vmem:[%s25081_s1 + $0x4b8] ss:$12 sps:$4 sm:$0xff]  }
 0x15f   : > { %3678 = vmatprep.subr.bf16.mxu1 %v20082_v1  ;;  %3605 = vmatprep.subr.bf16.mxu0 %v18946_v31  ;;  %v19000_v31 = vld [vmem:[%s25081_s1 + $0x4b0] ss:$12 sps:$4 sm:$0xff]  }
 0x161   : > { %3332 = vmatmul.mubr.bf16.vlgmr.msra.gmra.mrb[0].mxu1 %v20953_v48  ;;  %3259 = vmatmul.mubr.bf16.vlgmr.msra.gmra.mrb[0].mxu0 %v20953_v48 }
 0x162   : > { %3679 = vmatpush1.bf16.msra.mxu1 %v18947_v23  ;;  %3606 = vmatpush1.bf16.msra.mxu0 %v18944_v41  ;;  %v19007_v23 = vld [vmem:[%s25081_s1 + $0x4d0] ss:$12 sps:$4 sm:$0xff]   ;;  %v19008_v41 = vld [vmem:[%s25081_s1 + $0x4e0] ss:$12 sps:$4 sm:$0xff]  }
 0x163   : > { %3680 = vmatprep.subr.bf16.mxu1 %v20082_v1  ;;  %3607 = vmatprep.subr.bf16.mxu0 %v18950_v42  ;;  %v19014_v42 = vld [vmem:[%s25081_s1 + $0x4fc] ss:$12 sps:$4 sm:$0xff]  }
 0x164   : > { %14831 = vmatprep.mubr.msk.bf16.mxu1 %vm895_vm1, %v21387_v16  ;;  %14827 = vmatprep.mubr.msk.bf16.mxu0 %vm895_vm1, %v21387_v16 }
 0x166   : > { %3681 = vmatpush1.bf16.msra.mxu1 %v18951_v43  ;;  %3608 = vmatpush1.bf16.msra.mxu0 %v18948_v45  ;;  %v19015_v43 = vld [vmem:[%s25081_s1 + $0x500] ss:$12 sps:$4 sm:$0xff]   ;;  %v19019_v45 = vld [vmem:[%s25081_s1 + $0x518] ss:$12 sps:$4 sm:$0xff]  }
 0x167   : > { %3682 = vmatprep.subr.bf16.mxu1 %v20082_v1  ;;  %3609 = vmatprep.subr.bf16.mxu0 %v18954_v46  ;;  %v3844_v46 = vrot.slane %v20305_v30, 2  ;;  %v19023_v30 = vld [vmem:[%s25081_s1 + $0x530] ss:$12 sps:$4 sm:$0xff]  }
 0x169   : > { %3340 = vmatmul.mubr.bf16.gmra.mrb[4].mxu1 %v21406_v52  ;;  %3269 = vmatmul.mubr.bf16.gmra.mrb[4].mxu0 %v21406_v52 }
 0x16a   : > { %3683 = vmatpush1.bf16.msra.mxu1 %v18955_v49  ;;  %3610 = vmatpush1.bf16.msra.mxu0 %v18952_v36  ;;  %v19016_v49 = vld [vmem:[%s25081_s1 + $0x510] ss:$12 sps:$4 sm:$0xff]   ;;  %v19022_v36 = vld [vmem:[%s25081_s1 + $0x52c] ss:$12 sps:$4 sm:$0xff]  }
 0x16b   : > { %3684 = vmatprep.subr.bf16.mxu1 %v20082_v1  ;;  %3611 = vmatprep.subr.bf16.mxu0 %v18958_v55  ;;  %v19026_v55 = vld [vmem:[%s25081_s1 + $0x544] ss:$12 sps:$4 sm:$0xff]  }
 0x16c   : > { %14832 = vmatprep.mubr.msk.bf16.mxu1 %vm895_vm1, %v21421_v5  ;;  %14828 = vmatprep.mubr.msk.bf16.mxu0 %vm895_vm1, %v21421_v5 }
 0x16e   : > { %3685 = vmatpush1.bf16.msra.mxu1 %v18959_v8  ;;  %3612 = vmatpush1.bf16.msra.mxu0 %v18956_v44  ;;  %v19027_v8 = vld [vmem:[%s25081_s1 + $0x548] ss:$12 sps:$4 sm:$0xff]   ;;  %v19031_v44 = vld [vmem:[%s25081_s1 + $0x560] ss:$12 sps:$4 sm:$0xff]  }
 0x16f   : > { %3686 = vmatprep.subr.bf16.mxu1 %v20082_v1  ;;  %3613 = vmatprep.subr.bf16.mxu0 %v18962_v56  ;;  %v19028_v56 = vld [vmem:[%s25081_s1 + $0x558] ss:$12 sps:$4 sm:$0xff]  }
 0x171   : > { %3348 = vmatmul.mubr.bf16.gmra.mrb[8].mxu1 %v21446_v60  ;;  %3279 = vmatmul.mubr.bf16.gmra.mrb[8].mxu0 %v21446_v60 }
 0x172   : > { %3687 = vmatpush1.bf16.msra.mxu1 %v18963_v25  ;;  %3614 = vmatpush1.bf16.msra.mxu0 %v18960_v53  ;;  %v19034_v25 = vld [vmem:[%s25081_s1 + $0x574] ss:$12 sps:$4 sm:$0xff]   ;;  %v19035_v53 = vld [vmem:[%s25081_s1 + $0x578] ss:$12 sps:$4 sm:$0xff]  }
 0x173   : > { %3688 = vmatprep.subr.bf16.mxu1 %v20082_v1  ;;  %3615 = vmatprep.subr.bf16.mxu0 %v18966_v59  ;;  %v19032_v59 = vld [vmem:[%s25081_s1 + $0x570] ss:$12 sps:$4 sm:$0xff]  }
 0x174   : > { %14833 = vmatprep.mubr.msk.bf16.mxu1 %vm895_vm1, %v20484_v61  ;;  %14829 = vmatprep.mubr.msk.bf16.mxu0 %vm895_vm1, %v20484_v61 }
 0x176   : > { %3689 = vmatpush1.bf16.msra.mxu1 %v18967_v32  ;;  %3616 = vmatpush1.bf16.msra.mxu0 %v18964_v3  ;;  %v19039_v32 = vld [vmem:[%s25081_s1 + $0x590] ss:$12 sps:$4 sm:$0xff]   ;;  %v19036_v3 = vld [vmem:[%s25081_s1 + $0x588] ss:$12 sps:$4 sm:$0xff]  }
 0x177   : > { %3690 = vmatprep.subr.bf16.mxu1 %v20082_v1  ;;  %3617 = vmatprep.subr.bf16.mxu0 %v18970_v57  ;;  %v3841_v57 = vrot.slane %v20322_v39, 2  ;;  %v3849_v39 = vrot.slane %v20392_v6, 2  ;;  %v19044_v6 = vld [vmem:[%s25081_s1 + $0xa38] ss:$12 sps:$4 sm:$0xff]  }
 0x179   : > { %3356 = vmatmul.mubr.bf16.gmra.mrb[12].mxu1 %v20492_v2  ;;  %3289 = vmatmul.mubr.bf16.gmra.mrb[12].mxu0 %v20492_v2 }
 0x17a   : > { %3691 = vmatpush1.bf16.msra.mxu1 %v18971_v50  ;;  %3618 = vmatpush1.bf16.msra.mxu0 %v18968_v37  ;;  %v3842_v50 = vrot.slane %v20337_v47, 2  ;;  %v19042_v37 = vld [vmem:[%s25081_s1 + $0xa24] ss:$12 sps:$4 sm:$0xff]  }
 0x17b   : > { %3692 = vmatprep.subr.bf16.mxu1 %v20082_v1  ;;  %3619 = vmatprep.subr.bf16.mxu0 %v18974_v38  ;;  %v19043_v38 = vld [vmem:[%s25081_s1 + $0xa28] ss:$12 sps:$4 sm:$0xff]  }
 0x17c   : > { %14922 = vmatprep.mubr.msk.bf16.mxu1 %vm895_vm1, %v21310_v12  ;;  %14918 = vmatprep.mubr.msk.bf16.mxu0 %vm895_vm1, %v21310_v12  ;;  %v18986_v12 = vld [vmem:[%s25081_s1 + $0x9f4] ss:$12 sps:$4 sm:$0xff]   ;;  %v21690_v47 = vsel %vm3840_vm4, %v3841_v57, %v3842_v50  ;;  %v19115_v57 = vld [vmem:[%s25084_s4 + $0x290] ss:$12 sps:$4 sm:$0xff]  }
 0x17e   : > { %3693 = vmatpush1.bf16.msra.mxu1 %v18975_v0  ;;  %3620 = vmatpush1.bf16.msra.mxu0 %v18972_v40  ;;  %v19040_v0 = vld [vmem:[%s25081_s1 + $0xa20] ss:$12 sps:$4 sm:$0xff]   ;;  %v19046_v40 = vld [vmem:[%s25081_s1 + $0xa3c] ss:$12 sps:$4 sm:$0xff]  }
 0x17f   : > { %3694 = vmatprep.subr.bf16.mxu1 %v20082_v1  ;;  %3621 = vmatprep.subr.bf16.mxu0 %v18978_v62  ;;  %v19047_v62 = vld [vmem:[%s25081_s1 + $0xa40] ss:$12 sps:$4 sm:$0xff]  }
 0x182   : > { %3695 = vmatpush1.bf16.msra.mxu1 %v18979_v4  ;;  %3622 = vmatpush1.bf16.msra.mxu0 %v18976_v63  ;;  %v3847_v63 = vrot.slane %v20400_v10, 2  ;;  %v19048_v10 = vld [vmem:[%s25081_s1 + $0xa50] ss:$12 sps:$4 sm:$0xff]  }
 0x183   : > { %3696 = vmatprep.subr.bf16.mxu1 %v20082_v1  ;;  %3623 = vmatprep.subr.bf16.mxu0 %v18982_v11  ;;  %v19050_v11 = vld [vmem:[%s25081_s1 + $0xa54] ss:$12 sps:$4 sm:$0xff]  }
 0x186   : > { %3697 = vmatpush1.bf16.msra.mxu1 %v18983_v54  ;;  %3624 = vmatpush1.bf16.msra.mxu0 %v18980_v7  ;;  %v19051_v54 = vld [vmem:[%s25081_s1 + $0xa58] ss:$12 sps:$4 sm:$0xff]   ;;  %v21723_v7 = vrot.slane %v20434_v26, 2  ;;  %v19052_v26 = vld [vmem:[%s25081_s1 + $0xa68] ss:$12 sps:$4 sm:$0xff]  }
 0x187   : > { %3698 = vmatprep.subr.bf16.mxu1 %v20082_v1  ;;  %3625 = vmatprep.subr.bf16.mxu0 %v18986_v12  ;;  %v21726_v12 = vsel %vm3840_vm4, %v3842_v50, %v3847_v63 }
 0x18a   : > { %3699 = vmatpush1.bf16.msra.mxu1 %v18987_v15  ;;  %3626 = vmatpush1.bf16.msra.mxu0 %v18984_v58  ;;  %v19054_v15 = vld [vmem:[%s25081_s1 + $0xa6c] ss:$12 sps:$4 sm:$0xff]   ;;  %v19055_v58 = vld [vmem:[%s25081_s1 + $0xa70] ss:$12 sps:$4 sm:$0xff]  }
 0x18b   : > { %3700 = vmatprep.subr.bf16.mxu1 %v20082_v1  ;;  %3627 = vmatprep.subr.bf16.mxu0 %v18990_v17  ;;  %v21741_v17 = vsel %vm3840_vm4, %v3849_v39, %v21723_v7 }
 0x18e   : > { %3701 = vmatpush1.bf16.msra.mxu1 %v18991_v14  ;;  %3628 = vmatpush1.bf16.msra.mxu0 %v18988_v18  ;;  %v21745_v14 = vrot.slane %v20441_v28, 2  ;;  %v19058_v18 = vld [vmem:[%s25081_s1 + $0xa84] ss:$12 sps:$4 sm:$0xff]   ;;  %v19056_v28 = vld [vmem:[%s25081_s1 + $0xa80] ss:$12 sps:$4 sm:$0xff]  }
 0x18f   : > { %4136 = vmatprep.subr.bf16.mxu1 %v20082_v1  ;;  %4063 = vmatprep.subr.bf16.mxu0 %v18994_v19  ;;  %v19059_v19 = vld [vmem:[%s25081_s1 + $0xa88] ss:$12 sps:$4 sm:$0xff]  }
 0x191   : > { %3711 = vmatmul.mubr.bf16.vlgmr.msra.gmra.mrb[16].mxu1 %v20953_v48  ;;  %3638 = vmatmul.mubr.bf16.vlgmr.msra.gmra.mrb[16].mxu0 %v20953_v48  ;;  %v19006_v48 = vld [vmem:[%s25081_s1 + $0x4cc] ss:$12 sps:$4 sm:$0xff]  }
 0x192   : > { %4137 = vmatpush1.bf16.msra.mxu1 %v18995_v20  ;;  %4064 = vmatpush1.bf16.msra.mxu0 %v18992_v21  ;;  %v21763_v20 = vsel %vm3840_vm4, %v3847_v63, %v21745_v14  ;;  %v19062_v21 = vld [vmem:[%s25081_s1 + $0xa9c] ss:$12 sps:$4 sm:$0xff]  }
 0x193   : > { %4138 = vmatprep.subr.bf16.mxu1 %v20082_v1  ;;  %4065 = vmatprep.subr.bf16.mxu0 %v18998_v9  ;;  %v19063_v9 = vld [vmem:[%s25081_s1 + $0xaa0] ss:$12 sps:$4 sm:$0xff]  }
 0x194   : > { %14923 = vmatprep.mubr.msk.bf16.mxu1 %vm895_vm1, %v21387_v16  ;;  %14919 = vmatprep.mubr.msk.bf16.mxu0 %vm895_vm1, %v21387_v16  ;;  %v19012_v16 = vld [vmem:[%s25081_s1 + $0x4f8] ss:$12 sps:$4 sm:$0xff]  }
 0x196   : > { %4139 = vmatpush1.bf16.msra.mxu1 %v18999_v22  ;;  %4066 = vmatpush1.bf16.msra.mxu0 %v18996_v24  ;;  %v19060_v22 = vld [vmem:[%s25081_s1 + $0xa98] ss:$12 sps:$4 sm:$0xff]   ;;  %v19066_v24 = vld [vmem:[%s25081_s1 + $0xab4] ss:$12 sps:$4 sm:$0xff]  }
 0x197   : > { %4140 = vmatprep.subr.bf16.mxu1 %v20082_v1  ;;  %4067 = vmatprep.subr.bf16.mxu0 %v19002_v27  ;;  %v19067_v27 = vld [vmem:[%s25081_s1 + $0xab8] ss:$12 sps:$4 sm:$0xff]  }
 0x199   : > { %3719 = vmatmul.mubr.bf16.gmra.mrb[20].mxu1 %v21406_v52  ;;  %3648 = vmatmul.mubr.bf16.gmra.mrb[20].mxu0 %v21406_v52  ;;  %v3845_v52 = vrot.slane %v20315_v35, 2 }
 0x19a   : > { %4141 = vmatpush1.bf16.msra.mxu1 %v19003_v51  ;;  %4068 = vmatpush1.bf16.msra.mxu0 %v19000_v31  ;;  %v19064_v51 = vld [vmem:[%s25081_s1 + $0xab0] ss:$12 sps:$4 sm:$0xff]   ;;  %v19070_v31 = vld [vmem:[%s25081_s1 + $0xacc] ss:$12 sps:$4 sm:$0xff]  }
 0x19b   : > { %4142 = vmatprep.subr.bf16.mxu1 %v20082_v1  ;;  %4069 = vmatprep.subr.bf16.mxu0 %v19006_v48  ;;  %v21629_v35 = vsel %vm3840_vm4, %v3844_v46, %v3845_v52  ;;  %v21704_v4 = vsel %vm3840_vm4, %v3845_v52, %v3849_v39  ;;  %v19071_v48 = vld [vmem:[%s25081_s1 + $0xad0] ss:$12 sps:$4 sm:$0xff]   ;;  %v19086_v46 = vld [vmem:[%s25081_s1 + $0xb2c] ss:$12 sps:$4 sm:$0xff]   ;;  %v19084_v52 = vld [vmem:[%s25081_s1 + $0xb28] ss:$12 sps:$4 sm:$0xff]  }
 0x19c   : > { %14924 = vmatprep.mubr.msk.bf16.mxu1 %vm895_vm1, %v21421_v5  ;;  %14920 = vmatprep.mubr.msk.bf16.mxu0 %vm895_vm1, %v21421_v5  ;;  %v19024_v5 = vld [vmem:[%s25081_s1 + $0x540] ss:$12 sps:$4 sm:$0xff]  }
 0x19e   : > { %4143 = vmatpush1.bf16.msra.mxu1 %v19007_v23  ;;  %4070 = vmatpush1.bf16.msra.mxu0 %v19004_v33  ;;  %v19068_v23 = vld [vmem:[%s25081_s1 + $0xac8] ss:$12 sps:$4 sm:$0xff]   ;;  %v19074_v33 = vld [vmem:[%s25081_s1 + $0xae4] ss:$12 sps:$4 sm:$0xff]  }
 0x19f   : > { %4144 = vmatprep.subr.bf16.mxu1 %v20082_v1  ;;  %4071 = vmatprep.subr.bf16.mxu0 %v19010_v13  ;;  %v19075_v13 = vld [vmem:[%s25081_s1 + $0xae8] ss:$12 sps:$4 sm:$0xff]  }
 0x1a1   : > { %3727 = vmatmul.mubr.bf16.gmra.mrb[24].mxu1 %v21446_v60  ;;  %3658 = vmatmul.mubr.bf16.gmra.mrb[24].mxu0 %v21446_v60  ;;  %v19038_v60 = vld [vmem:[%s25081_s1 + $0x58c] ss:$12 sps:$4 sm:$0xff]  }
 0x1a2   : > { %4145 = vmatpush1.bf16.msra.mxu1 %v19011_v34  ;;  %4072 = vmatpush1.bf16.msra.mxu0 %v19008_v41  ;;  %v19072_v34 = vld [vmem:[%s25081_s1 + $0xae0] ss:$12 sps:$4 sm:$0xff]   ;;  %v19078_v41 = vld [vmem:[%s25081_s1 + $0xafc] ss:$12 sps:$4 sm:$0xff]  }
 0x1a3   : > { %4146 = vmatprep.subr.bf16.mxu1 %v20082_v1  ;;  %4073 = vmatprep.subr.bf16.mxu0 %v19014_v42  ;;  %v19079_v42 = vld [vmem:[%s25081_s1 + $0xb00] ss:$12 sps:$4 sm:$0xff]  }
 0x1a4   : > { %14925 = vmatprep.mubr.msk.bf16.mxu1 %vm895_vm1, %v20484_v61  ;;  %14921 = vmatprep.mubr.msk.bf16.mxu0 %vm895_vm1, %v20484_v61  ;;  %v19020_v61 = vld [vmem:[%s25081_s1 + $0x528] ss:$12 sps:$4 sm:$0xff]  }
 0x1a6   : > { %4147 = vmatpush1.bf16.msra.mxu1 %v19015_v43  ;;  %4074 = vmatpush1.bf16.msra.mxu0 %v19012_v16  ;;  %v19076_v43 = vld [vmem:[%s25081_s1 + $0xaf8] ss:$12 sps:$4 sm:$0xff]   ;;  %v19082_v16 = vld [vmem:[%s25081_s1 + $0xb14] ss:$12 sps:$4 sm:$0xff]  }
 0x1a7   : > { %4148 = vmatprep.subr.bf16.mxu1 %v20082_v1  ;;  %4075 = vmatprep.subr.bf16.mxu0 %v19018_v29  ;;  %v19083_v29 = vld [vmem:[%s25081_s1 + $0xb18] ss:$12 sps:$4 sm:$0xff]  }
 0x1a9   : > { %3735 = vmatmul.mubr.bf16.gmra.mrb[28].mxu1 %v20492_v2  ;;  %3668 = vmatmul.mubr.bf16.gmra.mrb[28].mxu0 %v20492_v2  ;;  %v19030_v2 = vld [vmem:[%s25081_s1 + $0x55c] ss:$12 sps:$4 sm:$0xff]  }
 0x1aa   : > { %4149 = vmatpush1.bf16.msra.mxu1 %v19019_v45  ;;  %4076 = vmatpush1.bf16.msra.mxu0 %v19016_v49  ;;  %v19080_v45 = vld [vmem:[%s25081_s1 + $0xb10] ss:$12 sps:$4 sm:$0xff]  }
 0x1ab   : > { %4150 = vmatprep.subr.bf16.mxu1 %v20082_v1  ;;  %4077 = vmatprep.subr.bf16.mxu0 %v19022_v36  ;;  %v19087_v49 = vld [vmem:[%s25081_s1 + $0xb30] ss:$12 sps:$4 sm:$0xff]   ;;  %v20083_v36 = vmov 0.0  }
 0x1ac   : > { %15014 = vmatprep.mubr.msk.bf16.mxu1 %vm895_vm1, %v21629_v35  ;;  %15010 = vmatprep.mubr.msk.bf16.mxu0 %vm895_vm1, %v21629_v35 }
 0x1ae   : > { %4151 = vmatpush1.bf16.msra.mxu1 %v19023_v30  ;;  %4078 = vmatpush1.bf16.msra.mxu0 %v19020_v61 }
 0x1af   : > { %4152 = vmatprep.subr.bf16.mxu1 %v20082_v1  ;;  %4079 = vmatprep.subr.bf16.mxu0 %v19026_v55 }
 0x1b2   : > { %4153 = vmatpush1.bf16.msra.mxu1 %v19027_v8  ;;  %4080 = vmatpush1.bf16.msra.mxu0 %v19024_v5 }
 0x1b3   : > { %4154 = vmatprep.subr.bf16.mxu1 %v20082_v1  ;;  %4081 = vmatprep.subr.bf16.mxu0 %v19030_v2 }
 0x1b6   : > { %4155 = vmatpush1.bf16.msra.mxu1 %v19031_v44  ;;  %4082 = vmatpush1.bf16.msra.mxu0 %v19028_v56 }
 0x1b7   : > { %4156 = vmatprep.subr.bf16.mxu1 %v20082_v1  ;;  %4083 = vmatprep.subr.bf16.mxu0 %v19034_v25 }
 0x1ba   : > { %4157 = vmatpush1.bf16.msra.mxu1 %v19035_v53  ;;  %4084 = vmatpush1.bf16.msra.mxu0 %v19032_v59 }
 0x1bb   : > { %4158 = vmatprep.subr.bf16.mxu1 %v20082_v1  ;;  %4085 = vmatprep.subr.bf16.mxu0 %v19038_v60 }
 0x1be   : > { %4159 = vmatpush1.bf16.msra.mxu1 %v19039_v32  ;;  %4086 = vmatpush1.bf16.msra.mxu0 %v19036_v3 }
 0x1bf   : > { %4515 = vmatprep.subr.bf16.mxu1 %v20082_v1  ;;  %4442 = vmatprep.subr.bf16.mxu0 %v19042_v37  ;;  %v19116_v37 = vld [vmem:[%s25084_s4 + $0x1d0] ss:$12 sps:$4 sm:$0xff]  }
 0x1c1   : > { %4169 = vmatmul.mubr.bf16.vlgmr.msra.gmra.mrb[0].mxu1 %v21690_v47  ;;  %4096 = vmatmul.mubr.bf16.vlgmr.msra.gmra.mrb[0].mxu0 %v21690_v47 }
 0x1c2   : > { %4516 = vmatpush1.bf16.msra.mxu1 %v19043_v38  ;;  %4443 = vmatpush1.bf16.msra.mxu0 %v19040_v0  ;;  %v19120_v38 = vld [vmem:[%s25084_s4 + $0x2a8] ss:$12 sps:$4 sm:$0xff]  }
 0x1c3   : > { %4517 = vmatprep.subr.bf16.mxu1 %v20082_v1  ;;  %4444 = vmatprep.subr.bf16.mxu0 %v19046_v40 }
 0x1c4   : > { %15015 = vmatprep.mubr.msk.bf16.mxu1 %vm895_vm1, %v21704_v4  ;;  %15011 = vmatprep.mubr.msk.bf16.mxu0 %vm895_vm1, %v21704_v4 }
 0x1c6   : > { %4518 = vmatpush1.bf16.msra.mxu1 %v19047_v62  ;;  %4445 = vmatpush1.bf16.msra.mxu0 %v19044_v6  ;;  %v19121_v6 = vld [vmem:[%s25084_s4 + $0x1e8] ss:$12 sps:$4 sm:$0xff]  }
 0x1c7   : > { %4519 = vmatprep.subr.bf16.mxu1 %v20082_v1  ;;  %4446 = vmatprep.subr.bf16.mxu0 %v19050_v11 }
 0x1c9   : > { %4177 = vmatmul.mubr.bf16.gmra.mrb[4].mxu1 %v21726_v12  ;;  %4106 = vmatmul.mubr.bf16.gmra.mrb[4].mxu0 %v21726_v12 }
 0x1ca   : > { %4520 = vmatpush1.bf16.msra.mxu1 %v19051_v54  ;;  %4447 = vmatpush1.bf16.msra.mxu0 %v19048_v10 }
 0x1cb   : > { %4521 = vmatprep.subr.bf16.mxu1 %v20082_v1  ;;  %4448 = vmatprep.subr.bf16.mxu0 %v19054_v15 }
 0x1cc   : > { %15016 = vmatprep.mubr.msk.bf16.mxu1 %vm895_vm1, %v21741_v17  ;;  %15012 = vmatprep.mubr.msk.bf16.mxu0 %vm895_vm1, %v21741_v17 }
 0x1ce   : > { %4522 = vmatpush1.bf16.msra.mxu1 %v19055_v58  ;;  %4449 = vmatpush1.bf16.msra.mxu0 %v19052_v26 }
 0x1cf   : > { %4523 = vmatprep.subr.bf16.mxu1 %v20082_v1  ;;  %4450 = vmatprep.subr.bf16.mxu0 %v19058_v18 }
 0x1d1   : > { %4185 = vmatmul.mubr.bf16.gmra.mrb[8].mxu1 %v21763_v20  ;;  %4116 = vmatmul.mubr.bf16.gmra.mrb[8].mxu0 %v21763_v20 }
 0x1d2   : > { %4524 = vmatpush1.bf16.msra.mxu1 %v19059_v19  ;;  %4451 = vmatpush1.bf16.msra.mxu0 %v19056_v28 }
 0x1d3   : > { %4525 = vmatprep.subr.bf16.mxu1 %v20082_v1  ;;  %4452 = vmatprep.subr.bf16.mxu0 %v19062_v21 }
 0x1d4   : > { %15017 = vmatprep.mubr.msk.bf16.mxu1 %vm895_vm1, %v21723_v7  ;;  %15013 = vmatprep.mubr.msk.bf16.mxu0 %vm895_vm1, %v21723_v7 }
 0x1d6   : > { %4526 = vmatpush1.bf16.msra.mxu1 %v19063_v9  ;;  %4453 = vmatpush1.bf16.msra.mxu0 %v19060_v22 }
 0x1d7   : > { %4527 = vmatprep.subr.bf16.mxu1 %v20082_v1  ;;  %4454 = vmatprep.subr.bf16.mxu0 %v19066_v24 }
 0x1d9   : > { %4193 = vmatmul.mubr.bf16.gmra.mrb[12].mxu1 %v21745_v14  ;;  %4126 = vmatmul.mubr.bf16.gmra.mrb[12].mxu0 %v21745_v14 }
 0x1da   : > { %4528 = vmatpush1.bf16.msra.mxu1 %v19067_v27  ;;  %4455 = vmatpush1.bf16.msra.mxu0 %v19064_v51 }
 0x1db   : > { %4529 = vmatprep.subr.bf16.mxu1 %v20082_v1  ;;  %4456 = vmatprep.subr.bf16.mxu0 %v19070_v31 }
 0x1dc   : > { %15106 = vmatprep.mubr.msk.bf16.mxu1 %vm895_vm1, %v21629_v35  ;;  %15102 = vmatprep.mubr.msk.bf16.mxu0 %vm895_vm1, %v21629_v35 }
 0x1de   : > { %4530 = vmatpush1.bf16.msra.mxu1 %v19071_v48  ;;  %4457 = vmatpush1.bf16.msra.mxu0 %v19068_v23 }
 0x1df   : > { %4531 = vmatprep.subr.bf16.mxu1 %v20082_v1  ;;  %4458 = vmatprep.subr.bf16.mxu0 %v19074_v33 }
 0x1e2   : > { %4532 = vmatpush1.bf16.msra.mxu1 %v19075_v13  ;;  %4459 = vmatpush1.bf16.msra.mxu0 %v19072_v34 }
 0x1e3   : > { %4533 = vmatprep.subr.bf16.mxu1 %v20082_v1  ;;  %4460 = vmatprep.subr.bf16.mxu0 %v19078_v41 }
 0x1e6   : > { %4534 = vmatpush1.bf16.msra.mxu1 %v19079_v42  ;;  %4461 = vmatpush1.bf16.msra.mxu0 %v19076_v43 }
 0x1e7   : > { %4535 = vmatprep.subr.bf16.mxu1 %v20082_v1  ;;  %4462 = vmatprep.subr.bf16.mxu0 %v19082_v16 }
 0x1ea   : > { %4536 = vmatpush1.bf16.msra.mxu1 %v19083_v29  ;;  %4463 = vmatpush1.bf16.msra.mxu0 %v19080_v45 }
 0x1eb   : > { %4537 = vmatprep.subr.bf16.mxu1 %v20082_v1  ;;  %4464 = vmatprep.subr.bf16.mxu0 %v19086_v46 }
 0x1ee   : > { %4538 = vmatpush1.bf16.msra.mxu1 %v19087_v49  ;;  %4465 = vmatpush1.bf16.msra.mxu0 %v19084_v52 }
 0x1ef   : > { %16963 = vmatprep.subr.bf16.mxu1 %v19115_v57 }
 0x1f1   : > { %4548 = vmatmul.mubr.bf16.vlgmr.msra.gmra.mrb[16].mxu1 %v21690_v47  ;;  %4475 = vmatmul.mubr.bf16.vlgmr.msra.gmra.mrb[16].mxu0 %v21690_v47 }
 0x1f2   : > { %15107 = vmatprep.mubr.msk.bf16.mxu1 %vm895_vm1, %v21704_v4  ;;  %15103 = vmatprep.mubr.msk.bf16.mxu0 %vm895_vm1, %v21704_v4 }
 0x1f3   : > { %16964 = vmatpush3.bf16.msra.mxu1 %v19116_v37 }
 0x1f4   : > { %16965 = vmatprep.subr.bf16.mxu1 %v19120_v38 }
 0x1f7   : > { %16966 = vmatpush3.bf16.msra.mxu1 %v19121_v6 }
 0x1f9   : > { %4556 = vmatmul.mubr.bf16.gmra.mrb[20].mxu1 %v21726_v12  ;;  %4485 = vmatmul.mubr.bf16.gmra.mrb[20].mxu0 %v21726_v12 }
 0x1fa   : > { %15108 = vmatprep.mubr.msk.bf16.mxu1 %vm895_vm1, %v21741_v17  ;;  %15104 = vmatprep.mubr.msk.bf16.mxu0 %vm895_vm1, %v21741_v17 }
 0x201   : > { %4564 = vmatmul.mubr.bf16.gmra.mrb[24].mxu1 %v21763_v20  ;;  %4495 = vmatmul.mubr.bf16.gmra.mrb[24].mxu0 %v21763_v20 }
 0x202   : > { %15109 = vmatprep.mubr.msk.bf16.mxu1 %vm895_vm1, %v21723_v7  ;;  %15105 = vmatprep.mubr.msk.bf16.mxu0 %vm895_vm1, %v21723_v7  ;;  %vm13746_vm1 = vcmask 654336  }
 0x209   : > { %4572 = vmatmul.mubr.bf16.gmra.mrb[28].mxu1 %v21745_v14  ;;  %4505 = vmatmul.mubr.bf16.gmra.mrb[28].mxu0 %v21745_v14 }
 0x20a   : > { %4878 = vmatprep.mubr.f32.mxu0 %v20083_v36 }
 0x294   : > { %v4170_v30 = vpop.f32.mrb[0].mxu1  ;;  %v4097_v61 = vpop.f32.mrb[0].mxu0 }
 0x295   : > { %v4172_v35 = vpop.f32.mrb[1].mxu1  ;;  %v4099_v55 = vpop.f32.mrb[1].mxu0 }
 0x296   : > { %v4173_v8 = vpop.f32.mrb[2].mxu1  ;;  %v4101_v5 = vpop.f32.mrb[2].mxu0 }
 0x297   : > { %v4175_v2 = vpop.f32.mrb[3].mxu1  ;;  %v4103_v44 = vpop.f32.mrb[3].mxu0 }
 0x29c   : > { %v4178_v56 = vpop.f32.mrb[4].mxu1  ;;  %v4107_v25 = vpop.f32.mrb[4].mxu0 }
 0x29d   : > { %v4180_v53 = vpop.f32.mrb[5].mxu1  ;;  %v21869_v59 = vpop.f32.mrb[5].mxu0 }
 0x29e   : > { %v21871_v60 = vpop.f32.mrb[6].mxu1  ;;  %v21873_v32 = vpop.f32.mrb[6].mxu0 }
 0x29f   : > { %v4183_v3 = vpop.f32.mrb[7].mxu1  ;;  %v21878_v50 = vpop.f32.mrb[7].mxu0 }
 0x2a4   : > { %v21886_v0 = vpop.f32.mrb[8].mxu1  ;;  %v21888_v39 = vpop.f32.mrb[8].mxu0 }
 0x2a5   : > { %v4188_v47 = vpop.f32.mrb[9].mxu1  ;;  %v21890_v40 = vpop.f32.mrb[9].mxu0 }
 0x2a6   : > { %v21892_v62 = vpop.f32.mrb[10].mxu1  ;;  %v21897_v4 = vpop.f32.mrb[10].mxu0 }
 0x2a7   : > { %v4191_v63 = vpop.f32.mrb[11].mxu1  ;;  %v21899_v11 = vpop.f32.mrb[11].mxu0 }
 0x2ac   : > { %v21901_v54 = vpop.f32.mrb[12].mxu1  ;;  %v21903_v10 = vpop.f32.mrb[12].mxu0 }
 0x2ad   : > { %v4196_v7 = vpop.f32.mrb[13].mxu1  ;;  %v21905_v12 = vpop.f32.mrb[13].mxu0 }
 0x2ae   : > { %v21907_v15 = vpop.f32.mrb[14].mxu1  ;;  %v21909_v58 = vpop.f32.mrb[14].mxu0 }
 0x2af   : > { %v4199_v26 = vpop.f32.mrb[15].mxu1  ;;  %v21911_v17 = vpop.f32.mrb[15].mxu0 }
 0x2c4   : > { %v4549_v14 = vpop.f32.mrb[16].mxu1  ;;  %v4476_v19 = vpop.f32.mrb[16].mxu0 }
 0x2c5   : > { %v4630_v18 = vmax.f32 %v4170_v30, %v4549_v14  ;;  %v4551_v28 = vpop.f32.mrb[17].mxu1  ;;  %v4628_v20 = vmax.f32 %v4097_v61, %v4476_v19  ;;  %v4478_v21 = vpop.f32.mrb[17].mxu0 }
 0x2c6   : > { %v4552_v9 = vpop.f32.mrb[18].mxu1  ;;  %v4629_v22 = vmax.f32 %v4099_v55, %v4478_v21  ;;  %v4480_v27 = vpop.f32.mrb[18].mxu0 }
 0x2c7   : > { %v4633_v24 = vmax.f32 %v4173_v8, %v4552_v9  ;;  %v4554_v51 = vpop.f32.mrb[19].mxu1  ;;  %v4631_v31 = vmax.f32 %v4101_v5, %v4480_v27  ;;  %v4482_v48 = vpop.f32.mrb[19].mxu0  ;;  %v4683_v23 = vrot.slane %v4630_v18, 1  ;;  %v4677_v34 = vrot.slane %v4628_v20, 1 }
 0x2c8   : > { %v4632_v13 = vmax.f32 %v4103_v44, %v4482_v48  ;;  %v4680_v42 = vrot.slane %v4629_v22, 1 }
 0x2c9   : > { %v4684_v33 = vrot.slane %v4633_v24, 1  ;;  %v4678_v41 = vrot.slane %v4631_v31, 1 }
 0x2ca   : > { %v4681_v43 = vrot.slane %v4632_v13, 1 }
 0x2cb   : > { %v4685_v16 = vsel %vm2150_vm3, %v4683_v23, %v4684_v33  ;;  %v4679_v29 = vsel %vm2150_vm3, %v4677_v34, %v4678_v41 }
 0x2cc   : > { %v4557_v45 = vpop.f32.mrb[20].mxu1  ;;  %v4748_v46 = vmax.f32 %v4630_v18, %v4685_v16  ;;  %v4746_v49 = vmax.f32 %v4628_v20, %v4679_v29  ;;  %v4486_v30 = vpop.f32.mrb[20].mxu0  ;;  %v4682_v35 = vsel %vm2150_vm3, %v4680_v42, %v4681_v43 }
 0x2cd   : > { %v21915_v52 = vmax.f32 %v4178_v56, %v4557_v45  ;;  %v4559_v61 = vpop.f32.mrb[21].mxu1  ;;  %v21918_v55 = vmax.f32 %v4107_v25, %v4486_v30  ;;  %v4488_v8 = vpop.f32.mrb[21].mxu0  ;;  %v4747_v2 = vmax.f32 %v4629_v22, %v4682_v35 }
 0x2ce   : > { %v4560_v5 = vpop.f32.mrb[22].mxu1  ;;  %v21922_v53 = vmax.f32 %v21869_v59, %v4488_v8  ;;  %v4490_v57 = vpop.f32.mrb[22].mxu0 }
 0x2cf   : > { %v4690_v44 = vrot.slane %v21915_v52, 1  ;;  %v4639_v3 = vmax.f32 %v21871_v60, %v4560_v5  ;;  %v4562_v37 = vpop.f32.mrb[23].mxu1  ;;  %v4686_v56 = vrot.slane %v21918_v55, 1  ;;  %v4637_v38 = vmax.f32 %v21873_v32, %v4490_v57  ;;  %v4492_v47 = vpop.f32.mrb[23].mxu0 }
 0x2d0   : > { %v4688_v25 = vrot.slane %v21922_v53, 1  ;;  %v4638_v63 = vmax.f32 %v21878_v50, %v4492_v47 }
 0x2d1   : > { %v4696_v6 = vrot.slane %v4639_v3, 1  ;;  %v4691_v7 = vsel %vm2150_vm3, %v4684_v33, %v4690_v44  ;;  %v4687_v26 = vsel %vm2150_vm3, %v4678_v41, %v4686_v56  ;;  %v4692_v59 = vrot.slane %v4637_v38, 1 }
 0x2d2   : > { %v4751_v14 = vmax.f32 %v4633_v24, %v4691_v7  ;;  %v4749_v18 = vmax.f32 %v4631_v31, %v4687_v26  ;;  %v4694_v60 = vrot.slane %v4638_v63, 1  ;;  %v4689_v19 = vsel %vm2150_vm3, %v4681_v43, %v4688_v25 }
 0x2d3   : > { %v4697_v28 = vsel %vm2150_vm3, %v4690_v44, %v4696_v6  ;;  %v4693_v32 = vsel %vm2150_vm3, %v4686_v56, %v4692_v59  ;;  %v4750_v21 = vmax.f32 %v4632_v13, %v4689_v19 }
 0x2d4   : > { %v4565_v20 = vpop.f32.mrb[24].mxu1  ;;  %v21934_v9 = vpack.c.bf16 %v4751_v14, %v4748_v46  ;;  %v4754_v50 = vmax.f32 %v21915_v52, %v4697_v28  ;;  %v4752_v22 = vmax.f32 %v21918_v55, %v4693_v32  ;;  %v4496_v24 = vpop.f32.mrb[24].mxu0  ;;  %v17902_v31 = vpack.c.bf16 %v4749_v18, %v4746_v49 }
 0x2d5   : > { %v21939_v27 = vmax.f32 %v21886_v0, %v4565_v20  ;;  %v4567_v51 = vpop.f32.mrb[25].mxu1  ;;  %v4695_v48 = vsel %vm2150_vm3, %v4688_v25, %v4694_v60  ;;  %v21943_v23 = vmax.f32 %v21888_v39, %v4496_v24  ;;  %v4498_v33 = vpop.f32.mrb[25].mxu0  ;;  %v17900_v13 = vpack.c.bf16 %v4750_v21, %v4747_v2 }
 0x2d6   : > { %v4568_v34 = vpop.f32.mrb[26].mxu1  ;;  %v4753_v41 = vmax.f32 %v21922_v53, %v4695_v48  ;;  %v21948_v43 = vmax.f32 %v21890_v40, %v4498_v33  ;;  %v4500_v16 = vpop.f32.mrb[26].mxu0 }
 0x2d7   : > { %v4702_v42 = vrot.slane %v21939_v27, 1  ;;  %v21951_v0 = vmax.f32 %v21892_v62, %v4568_v34  ;;  %v4570_v29 = vpop.f32.mrb[27].mxu1  ;;  %v4698_v45 = vrot.slane %v21943_v23, 1  ;;  %v21955_v39 = vmax.f32 %v21897_v4, %v4500_v16  ;;  %v4502_v46 = vpop.f32.mrb[27].mxu0  ;;  %17901 = vmatprep.subr.bf16.mxu0 %v17900_v13 }
 0x2d8   : > { %v4700_v49 = vrot.slane %v21948_v43, 1  ;;  %v4644_v30 = vmax.f32 %v21899_v11, %v4502_v46  ;;  %17903 = vmatpush1.bf16.msra.mxu0 %v17902_v31 }
 0x2d9   : > { %v4708_v52 = vrot.slane %v21951_v0, 1  ;;  %v4703_v40 = vsel %vm2150_vm3, %v4696_v6, %v4702_v42  ;;  %v4699_v62 = vsel %vm2150_vm3, %v4692_v59, %v4698_v45  ;;  %v4704_v61 = vrot.slane %v21955_v39, 1 }
 0x2da   : > { %v4757_v35 = vmax.f32 %v4639_v3, %v4703_v40  ;;  %v4755_v55 = vmax.f32 %v4637_v38, %v4699_v62  ;;  %v4706_v8 = vrot.slane %v4644_v30, 1  ;;  %v4701_v4 = vsel %vm2150_vm3, %v4694_v60, %v4700_v49  ;;  %v4772_v40 = vld [vmem:[%s25083_s3 + $0x10] sm:$0xff]  ;;  %v19090_v62 = vld [vmem:[%s25084_s4 + $0x1cc] ss:$12 sps:$4 sm:$0xff]  }
 0x2db   : > { %v4709_v5 = vsel %vm2150_vm3, %v4702_v42, %v4708_v52  ;;  %v4705_v2 = vsel %vm2150_vm3, %v4698_v45, %v4704_v61  ;;  %v4756_v53 = vmax.f32 %v4638_v63, %v4701_v4  ;;  %v19094_v4 = vld [vmem:[%s25084_s4 + $0x1f8] ss:$12 sps:$4 sm:$0xff]  }
 0x2dc   : > { %v4573_v44 = vpop.f32.mrb[28].mxu1  ;;  %v21966_v57 = vpack.c.bf16 %v4757_v35, %v4754_v50  ;;  %v4760_v11 = vmax.f32 %v21939_v27, %v4709_v5  ;;  %v4758_v37 = vmax.f32 %v21943_v23, %v4705_v2  ;;  %v4506_v47 = vpop.f32.mrb[28].mxu0  ;;  %v17906_v38 = vpack.c.bf16 %v4755_v55, %v4752_v22  ;;  %v19093_v35 = vld [vmem:[%s25084_s4 + $0x1e4] ss:$12 sps:$4 sm:$0xff]   ;;  %v19091_v55 = vld [vmem:[%s25084_s4 + $0x1e0] ss:$12 sps:$4 sm:$0xff]  }
 0x2dd   : > { %v4648_v56 = vmax.f32 %v21901_v54, %v4573_v44  ;;  %v4575_v3 = vpop.f32.mrb[29].mxu1  ;;  %v4707_v25 = vsel %vm2150_vm3, %v4700_v49, %v4706_v8  ;;  %v4646_v6 = vmax.f32 %v21903_v10, %v4506_v47  ;;  %v4508_v7 = vpop.f32.mrb[29].mxu0  ;;  %v17904_v59 = vpack.c.bf16 %v4756_v53, %v4753_v41  ;;  %v19099_v5 = vld [vmem:[%s25084_s4 + $0x214] ss:$12 sps:$4 sm:$0xff]   ;;  %v19097_v2 = vld [vmem:[%s25084_s4 + $0x210] ss:$12 sps:$4 sm:$0xff]  }
 0x2de   : > { %v4576_v26 = vpop.f32.mrb[30].mxu1  ;;  %v4759_v63 = vmax.f32 %v21948_v43, %v4707_v25  ;;  %v4647_v18 = vmax.f32 %v21905_v12, %v4508_v7  ;;  %v4510_v19 = vpop.f32.mrb[30].mxu0  ;;  %v19102_v44 = vld [vmem:[%s25084_s4 + $0x22c] ss:$12 sps:$4 sm:$0xff]   ;;  %v19100_v53 = vld [vmem:[%s25084_s4 + $0x228] ss:$12 sps:$4 sm:$0xff]  }
 0x2df   : > { %v4714_v14 = vrot.slane %v4648_v56, 1  ;;  %v4651_v60 = vmax.f32 %v21907_v15, %v4576_v26  ;;  %v4578_v28 = vpop.f32.mrb[31].mxu1  ;;  %v4710_v54 = vrot.slane %v4646_v6, 1  ;;  %v4649_v32 = vmax.f32 %v21909_v58, %v4510_v19  ;;  %v4512_v20 = vpop.f32.mrb[31].mxu0  ;;  %17905 = vmatprep.subr.bf16.mxu0 %v17904_v59  ;;  %v19111_v47 = vld [vmem:[%s25084_s4 + $0x274] ss:$12 sps:$4 sm:$0xff]  }
 0x2e0   : > { %v4712_v21 = vrot.slane %v4647_v18, 1  ;;  %v4650_v50 = vmax.f32 %v21911_v17, %v4512_v20  ;;  %17907 = vmatpush1.bf16.msra.mxu0 %v17906_v38  ;;  %v19109_v3 = vld [vmem:[%s25084_s4 + $0x270] ss:$12 sps:$4 sm:$0xff]   ;;  %v19114_v38 = vld [vmem:[%s25084_s4 + $0x28c] ss:$12 sps:$4 sm:$0xff]  }
 0x2e1   : > { %v4720_v10 = vrot.slane %v4651_v60, 1  ;;  %v4715_v22 = vsel %vm2150_vm3, %v4708_v52, %v4714_v14  ;;  %v4711_v27 = vsel %vm2150_vm3, %v4704_v61, %v4710_v54  ;;  %v4716_v12 = vrot.slane %v4649_v32, 1  ;;  %v4770_v52 = vld [vmem:[%s25083_s3] sm:$0xff]  ;;  %v19088_v61 = vld [vmem:[%s25084_s4 + $0x1c8] ss:$12 sps:$4 sm:$0xff]  }
 0x2e2   : > { %v4763_v15 = vmax.f32 %v21951_v0, %v4715_v22  ;;  %v4761_v24 = vmax.f32 %v21955_v39, %v4711_v27  ;;  %v4718_v31 = vrot.slane %v4650_v50, 1  ;;  %v4713_v17 = vsel %vm2150_vm3, %v4706_v8, %v4712_v21  ;;  %v19096_v8 = vld [vmem:[%s25084_s4 + $0x1fc] ss:$12 sps:$4 sm:$0xff]   ;;  %v19117_v7 = vld [vmem:[%s25084_s4 + $0x2a0] ss:$12 sps:$4 sm:$0xff]  }
 0x2e3   : > { %v4721_v51 = vsel %vm2150_vm3, %v4714_v14, %v4720_v10  ;;  %v4769_v58 = vmax.f32 %v4651_v60, %v4720_v10  ;;  %v4717_v23 = vsel %vm2150_vm3, %v4710_v54, %v4716_v12  ;;  %v4767_v33 = vmax.f32 %v4649_v32, %v4716_v12  ;;  %v19112_v25 = vld [vmem:[%s25084_s4 + $0x288] ss:$12 sps:$4 sm:$0xff]   ;;  %v19125_v59 = vld [vmem:[%s25084_s4 + $0x2c0] ss:$12 sps:$4 sm:$0xff]   ;;  %v19130_v60 = vld [vmem:[%s25084_s4 + $0x2d8] ss:$12 sps:$4 sm:$0xff]  }
 0x2e4   : > { %v4766_v48 = vmax.f32 %v4648_v56, %v4721_v51  ;;  %v4764_v34 = vmax.f32 %v4646_v6, %v4717_v23  ;;  %v4719_v13 = vsel %vm2150_vm3, %v4712_v21, %v4718_v31  ;;  %v4768_v41 = vmax.f32 %v4650_v50, %v4718_v31  ;;  %v19106_v56 = vld [vmem:[%s25084_s4 + $0x258] ss:$12 sps:$4 sm:$0xff]   ;;  %v19124_v26 = vld [vmem:[%s25084_s4 + $0x2bc] ss:$12 sps:$4 sm:$0xff]   ;;  %v19126_v14 = vld [vmem:[%s25084_s4 + $0x200] ss:$12 sps:$4 sm:$0xff]   ;;  %16967 = vmatprep.subr.bf16.mxu1 %v19125_v59 }
 0x2e5   : > { %v4762_v42 = vmax.f32 %v4644_v30, %v4713_v17  ;;  %v4765_v16 = vmax.f32 %v4647_v18, %v4719_v13  ;;  %v17910_v0 = vpack.c.bf16 %v4761_v24, %v4758_v37  ;;  %v17926_v29 = vpack.c.bf16 %v4763_v15, %v4760_v11  ;;  %v4771_v30 = vld [vmem:[%s25083_s3 + $0x8] sm:$0xff]  ;;  %v19119_v6 = vld [vmem:[%s25084_s4 + $0x2a4] ss:$12 sps:$4 sm:$0xff]   ;;  %16968 = vmatpush3.bf16.msra.mxu1 %v19126_v14  ;;  %v19129_v18 = vld [vmem:[%s25084_s4 + $0x2d4] ss:$12 sps:$4 sm:$0xff]  }
 0x2e6   : > { %v17930_v43 = vpack.c.bf16 %v4769_v58, %v4766_v48  ;;  %v17915_v45 = vpack.c.bf16 %v4767_v33, %v4764_v34  ;;  %v19103_v11 = vld [vmem:[%s25084_s4 + $0x240] ss:$12 sps:$4 sm:$0xff]   ;;  %v19108_v37 = vld [vmem:[%s25084_s4 + $0x25c] ss:$12 sps:$4 sm:$0xff]   ;;  %v19131_v28 = vld [vmem:[%s25084_s4 + $0x218] ss:$12 sps:$4 sm:$0xff]   ;;  %16969 = vmatprep.subr.bf16.mxu1 %v19130_v60  ;;  %v4776_v34 = vlaneseq }
 0x2e7   : > { %v17908_v39 = vpack.c.bf16 %v4762_v42, %v4759_v63  ;;  %v17912_v46 = vpack.c.bf16 %v4768_v41, %v4765_v16  ;;  %v19122_v63 = vld [vmem:[%s25084_s4 + $0x2b8] ss:$12 sps:$4 sm:$0xff]   ;;  %v19127_v19 = vld [vmem:[%s25084_s4 + $0x2d0] ss:$12 sps:$4 sm:$0xff]   ;;  %v19132_v20 = vld [vmem:[%s25084_s4 + $0x2e8] ss:$12 sps:$4 sm:$0xff]  }
 0x2e8   : > { %v19134_v54 = vld [vmem:[%s25084_s4 + $0x2ec] ss:$12 sps:$4 sm:$0xff]   ;;  %v19135_v32 = vld [vmem:[%s25084_s4 + $0x2f0] ss:$12 sps:$4 sm:$0xff]   ;;  %v19140_v50 = vld [vmem:[%s25084_s4 + $0x308] ss:$12 sps:$4 sm:$0xff]  }
 0x2e9   : > { %17909 = vmatprep.subr.bf16.mxu0 %v17908_v39  ;;  %16970 = vmatpush3.bf16.msra.mxu1 %v19131_v28  ;;  %v19136_v21 = vld [vmem:[%s25084_s4 + $0x230] ss:$12 sps:$4 sm:$0xff]   ;;  %v19137_v22 = vld [vmem:[%s25084_s4 + $0x300] ss:$12 sps:$4 sm:$0xff]   ;;  %v19141_v27 = vld [vmem:[%s25084_s4 + $0x248] ss:$12 sps:$4 sm:$0xff]  }
 0x2ea   : > { %17911 = vmatpush1.bf16.msra.mxu0 %v17910_v0  ;;  %16971 = vmatprep.subr.bf16.mxu1 %v19135_v32  ;;  %v19139_v10 = vld [vmem:[%s25084_s4 + $0x304] ss:$12 sps:$4 sm:$0xff]   ;;  %v19144_v12 = vld [vmem:[%s25084_s4 + $0x31c] ss:$12 sps:$4 sm:$0xff]   ;;  %v19145_v15 = vld [vmem:[%s25084_s4 + $0x320] ss:$12 sps:$4 sm:$0xff]  }
 0x2eb   : > { %17914 = vmatprep.subr.msk.bf16.mxu0 %vm21988_vm7, %v17912_v46  ;;  %v19142_v24 = vld [vmem:[%s25084_s4 + $0x318] ss:$12 sps:$4 sm:$0xff]   ;;  %v19146_v51 = vld [vmem:[%s25084_s4 + $0x260] ss:$12 sps:$4 sm:$0xff]   ;;  %v19147_v48 = vld [vmem:[%s25084_s4 + $0x330] ss:$12 sps:$4 sm:$0xff]  }
 0x2ec   : > { %v19149_v58 = vld [vmem:[%s25084_s4 + $0x334] ss:$12 sps:$4 sm:$0xff]   ;;  %v19150_v31 = vld [vmem:[%s25084_s4 + $0x338] ss:$12 sps:$4 sm:$0xff]   ;;  %v22165_v17 = vld [vmem:[%s25084_s4 + $0x350] ss:$12 sps:$4 sm:$0xff]  }
 0x2ed   : > { %16972 = vmatpush3.bf16.msra.mxu1 %v19136_v21  ;;  %v19151_v23 = vld [vmem:[%s25084_s4 + $0x278] ss:$12 sps:$4 sm:$0xff]   ;;  %v22168_v13 = vshrl.u32 %v4776_v34, 7  ;;  %v4774_v42 = vld [vmem:[%s25082_s2] sm:$0x7] }
 0x2ee   : > { %17917 = vmatpush1.bf16.msk.msra.mxu0 %vm21988_vm7, %v17915_v45  ;;  %16973 = vmatprep.subr.bf16.mxu1 %v19140_v50  ;;  %v19154_v33 = vld [vmem:[%s25084_s4 + $0x34c] ss:$12 sps:$4 sm:$0xff]  }
 0x2ef   : > { %17919 = vmatprep.subr.bf16.mxu0 %v21934_v9  ;;  %v4778_v41 = vsub.s32 0, %v22168_v13 }
 0x2f1   : > { %15112 = vmatmul.mubr.msk.f32.vlgmr.msra.gmra.mrb[32].mxu0 %vm4791_vm8, %v4770_v52  ;;  %16974 = vmatpush3.bf16.msra.mxu1 %v19141_v27  ;;  %v4779_v16 = vrot.slane %v4774_v42, %v4778_v41 }
 0x2f2   : > { %17921 = vmatpush3.bf16.msra.mxu0 %v21934_v9  ;;  %4884 = vmatprep.mubr.f32.mxu0 %v20083_v36  ;;  %v4773_v9 = vld [vmem:[%s25083_s3 + $0x18] sm:$0x3f] }
 0x2f3   : > { %17923 = vmatprep.subr.bf16.mxu0 %v21966_v57  ;;  %16975 = vmatprep.subr.bf16.mxu1 %v19145_v15 }
 0x2f5   : > { %15113 = vmatmul.mubr.msk.f32.gmra.mrb[34].mxu0 %vm4791_vm8, %v4771_v30  ;;  %16976 = vmatpush3.bf16.msra.mxu1 %v19146_v51 }
 0x2f6   : > { %17925 = vmatpush3.bf16.msra.mxu0 %v21966_v57  ;;  %4890 = vmatprep.mubr.f32.mxu0 %v20083_v36  ;;  %v19105_v57 = vld [vmem:[%s25084_s4 + $0x244] ss:$12 sps:$4 sm:$0xff]  }
 0x2f7   : > { %17927 = vmatprep.subr.bf16.mxu0 %v17926_v29  ;;  %16977 = vmatprep.subr.bf16.mxu1 %v19150_v31 }
 0x2f9   : > { %15114 = vmatmul.mubr.msk.f32.gmra.mrb[36].mxu0 %vm4791_vm8, %v4772_v40  ;;  %16978 = vmatpush3.bf16.msra.mxu1 %v19151_v23 }
 0x2fa   : > { %17929 = vmatpush3.bf16.msra.mxu0 %v17926_v29  ;;  %4896 = vmatprep.mubr.f32.mxu0 %v20083_v36 }
 0x2fb   : > { %17932 = vmatprep.subr.msk.bf16.mxu0 %vm21988_vm7, %v17930_v43  ;;  %17615 = vmatprep.subr.bf16.mxu1 %v22165_v17 }
 0x2fd   : > { %15115 = vmatmul.mubr.msk.f32.gmra.mrb[38].mxu0 %vm4791_vm8, %v4773_v9 }
 0x2fe   : > { %17935 = vmatpush3.bf16.msk.msra.mxu0 %vm21988_vm7, %v17930_v43  ;;  %17609 = vmatprep.mubr.msk.f32.mxu0 %vm4791_vm8, %v4770_v52  ;;  %v4782_v43 = vsub.s32 1, %v22168_v13 }
 0x2ff   : > { %5603 = vmatprep.subr.bf16.mxu0 %v19090_v62 }
 0x300   : > { %v4783_v29 = vrot.slane %v4774_v42, %v4782_v43 }
 0x301   : > { %17610 = vmatmul.mubr.msk.f32.vlgmr.msra.gmra.mrb[40].mxu0 %vm4791_vm8, %v4771_v30 }
 0x302   : > { %17612 = vmatprep.mubr.msk.f32.mxu0 %vm4791_vm8, %v4772_v40  ;;  %5604 = vmatpush1.bf16.msra.mxu0 %v19088_v61 }
 0x303   : > { %5605 = vmatprep.subr.bf16.mxu0 %v19093_v35 }
 0x305   : > { %17613 = vmatmul.mubr.msk.f32.gmra.mrb[42].mxu0 %vm4791_vm8, %v4773_v9 }
 0x306   : > { %5606 = vmatpush1.bf16.msra.mxu0 %v19091_v55 }
 0x307   : > { %5607 = vmatprep.subr.bf16.mxu0 %v19096_v8 }
 0x30a   : > { %5608 = vmatpush1.bf16.msra.mxu0 %v19094_v4 }
 0x30b   : > { %5609 = vmatprep.subr.bf16.mxu0 %v19099_v5  ;;  %v4786_v5 = vsub.s32 2, %v22168_v13 }
 0x30e   : > { %5610 = vmatpush1.bf16.msra.mxu0 %v19097_v2 }
 0x30f   : > { %5611 = vmatprep.subr.bf16.mxu0 %v19102_v44 }
 0x312   : > { %5612 = vmatpush1.bf16.msra.mxu0 %v19100_v53 }
 0x313   : > { %5613 = vmatprep.subr.bf16.mxu0 %v19105_v57 }
 0x316   : > { %5614 = vmatpush1.bf16.msra.mxu0 %v19103_v11 }
 0x317   : > { %5615 = vmatprep.subr.bf16.mxu0 %v19108_v37 }
 0x31a   : > { %5616 = vmatpush1.bf16.msra.mxu0 %v19106_v56 }
 0x31b   : > { %5617 = vmatprep.subr.bf16.mxu0 %v19111_v47 }
 0x31e   : > { %5618 = vmatpush1.bf16.msra.mxu0 %v19109_v3 }
 0x31f   : > { %5619 = vmatprep.subr.bf16.mxu0 %v19114_v38 }
 0x322   : > { %5620 = vmatpush1.bf16.msra.mxu0 %v19112_v25  ;;  %v4787_v25 = vrot.slane %v4774_v42, %v4786_v5 }
 0x323   : > { %5621 = vmatprep.subr.bf16.mxu0 %v19119_v6 }
 0x326   : > { %5622 = vmatpush1.bf16.msra.mxu0 %v19117_v7 }
 0x327   : > { %5623 = vmatprep.subr.bf16.mxu0 %v19124_v26 }
 0x32a   : > { %5624 = vmatpush1.bf16.msra.mxu0 %v19122_v63 }
 0x32b   : > { %5625 = vmatprep.subr.bf16.mxu0 %v19129_v18 }
 0x32e   : > { %5626 = vmatpush1.bf16.msra.mxu0 %v19127_v19 }
 0x32f   : > { %5627 = vmatprep.subr.bf16.mxu0 %v19134_v54 }
 0x332   : > { %5628 = vmatpush1.bf16.msra.mxu0 %v19132_v20 }
 0x333   : > { %5629 = vmatprep.subr.bf16.mxu0 %v19139_v10 }
 0x336   : > { %5630 = vmatpush1.bf16.msra.mxu0 %v19137_v22 }
 0x337   : > { %5631 = vmatprep.subr.bf16.mxu0 %v19144_v12 }
 0x33a   : > { %5632 = vmatpush1.bf16.msra.mxu0 %v19142_v24 }
 0x33b   : > { %5633 = vmatprep.subr.bf16.mxu0 %v19149_v58 }
 0x33e   : > { %5634 = vmatpush1.bf16.msra.mxu0 %v19147_v48 }
 0x33f   : > { %5656 = vmatprep.subr.bf16.mxu0 %v19154_v33 }
 0x3c4   : > { %v4880_v0 = vpop.f32.mrb[32].mxu0 }
 0x3c5   : > { %v4882_v45 = vpop.f32.mrb[33].mxu0  ;;  %v4881_v39 = vadd.f32 %v4880_v0, %v4779_v16 }
 0x3c6   : > { %v4883_v46 = vadd.f32 %v4882_v45, %v4783_v29 }
 0x3c7   : > { %v4988_v9 = vmax.f32 %v4881_v39, 0.0 }
 0x3c8   : > { %v4886_v49 = vpop.f32.mrb[34].mxu0  ;;  %v4989_v61 = vmax.f32 %v4883_v46, 0.0 }
 0x3c9   : > { %v4887_v52 = vadd.f32 %v4886_v49, %v4779_v16  ;;  %v4888_v30 = vpop.f32.mrb[35].mxu0 }
 0x3ca   : > { %v4889_v40 = vadd.f32 %v4888_v30, %v4783_v29 }
 0x3cb   : > { %v4991_v62 = vmax.f32 %v4887_v52, 0.0 }
 0x3cc   : > { %v4992_v35 = vmax.f32 %v4889_v40, 0.0  ;;  %v4892_v55 = vpop.f32.mrb[36].mxu0 }
 0x3cd   : > { %v22179_v8 = vpack.c.bf16 %v4991_v62, %v4988_v9  ;;  %v4894_v4 = vpop.f32.mrb[37].mxu0  ;;  %v4893_v44 = vadd.f32 %v4892_v55, %v4779_v16 }
 0x3ce   : > { %v22182_v2 = vpack.c.bf16 %v4992_v35, %v4989_v61  ;;  %v4895_v53 = vadd.f32 %v4894_v4, %v4783_v29  ;;  %v19152_v35 = vld [vmem:[%s25084_s4 + $0x348] ss:$12 sps:$4 sm:$0xff]  }
 0x3cf   : > { %v5237_v56 = vshrl.u32 %v22179_v8, 16  ;;  %v5239_v47 = vshll.u32 %v22179_v8, 16  ;;  %v4994_v26 = vmax.f32 %v4893_v44, 0.0 }
 0x3d0   : > { %v4898_v57 = vpop.f32.mrb[38].mxu0  ;;  %v5249_v11 = vshrl.u32 %v22182_v2, 16  ;;  %v5251_v37 = vshll.u32 %v22182_v2, 16  ;;  %v4995_v59 = vmax.f32 %v4895_v53, 0.0  ;;  %v19158_v53 = vld [vmem:[%s25084_s4 + $0x364] ss:$12 sps:$4 sm:$0xff]  }
 0x3d1   : > { %v4899_v3 = vadd.f32 %v4898_v57, %v4779_v16  ;;  %v4900_v38 = vpop.f32.mrb[39].mxu0  ;;  %v22194_v28 = vrot.slane %v5237_v56, 1  ;;  %v22196_v54 = vrot.slane %v5239_v47, 2  ;;  %v5241_v15 = vrot.slane %v5239_v47, 1  ;;  %v19159_v57 = vld [vmem:[%s25084_s4 + $0x368] ss:$12 sps:$4 sm:$0xff]  }
 0x3d2   : > { %v4901_v6 = vadd.f32 %v4900_v38, %v4783_v29  ;;  %v22190_v7 = vrot.slane %v5249_v11, 1  ;;  %v22192_v14 = vrot.slane %v5251_v37, 2  ;;  %v5253_v19 = vrot.slane %v5251_v37, 1  ;;  %v19156_v47 = vld [vmem:[%s25084_s4 + $0x360] ss:$12 sps:$4 sm:$0xff]  }
 0x3d3   : > { %v4997_v63 = vmax.f32 %v4899_v3, 0.0  ;;  %v8740_v27 = vor.u32 %v22196_v54, %v22194_v28  ;;  %v5242_v30 = vor.u32 %v5241_v15, %v5237_v56  ;;  %v19160_v3 = vld [vmem:[%s25084_s4 + $0x37c] ss:$12 sps:$4 sm:$0x3f]  }
 0x3d4   : > { %v4998_v18 = vmax.f32 %v4901_v6, 0.0  ;;  %v17611_v60 = vpop.f32.mrb[40].mxu0  ;;  %v8747_v10 = vor.u32 %v22192_v14, %v22190_v7  ;;  %v5254_v48 = vor.u32 %v5253_v19, %v5249_v11  ;;  %v19162_v6 = vld [vmem:[%s25084_s4 + $0x380] ss:$12 sps:$4 sm:$0x3f]  }
 0x3d5   : > { %v22198_v32 = vpack.c.bf16 %v4997_v63, %v4994_v26  ;;  %v4975_v20 = vadd.f32 %v17611_v60, %v4787_v25  ;;  %v4969_v21 = vpop.f32.mrb[41].mxu0  ;;  %v19163_v63 = vld [vmem:[%s25084_s4 + $0x378] ss:$12 sps:$4 sm:$0x3f]   ;;  %v19535_v14 = vld [vmem:[%s25084_s4 + $0x588] ss:$12 sps:$4 sm:$0xff]  }
 0x3d6   : > { %v22202_v50 = vpack.c.bf16 %v4998_v18, %v4995_v59  ;;  %v4970_v22 = vadd.f32 %v4969_v21, %v4787_v25  ;;  %v19540_v7 = vld [vmem:[%s25084_s4 + $0xdcc] ss:$12 sps:$4 sm:$0xff]   ;;  %v19612_v28 = vld [vmem:[%s25084_s4 + $0x6f0] ss:$12 sps:$4 sm:$0xff]  }
 0x3d7   : > { %v4993_v12 = vmax.f32 %v4975_v20, 0.0  ;;  %v5244_v24 = vshll.u32 %v22198_v32, 16  ;;  %v5272_v51 = vshrl.u32 %v22198_v32, 16  ;;  %v19616_v54 = vld [vmem:[%s25084_s4 + $0x70c] ss:$12 sps:$4 sm:$0x3f]  }
 0x3d8   : > { %v4990_v58 = vmax.f32 %v4970_v22, 0.0  ;;  %v17614_v31 = vpop.f32.mrb[42].mxu0  ;;  %v5256_v23 = vshll.u32 %v22202_v50, 16  ;;  %v5275_v33 = vshrl.u32 %v22202_v50, 16 }
 0x3d9   : > { %v4985_v34 = vadd.f32 %v17614_v31, %v4787_v25  ;;  %v4979_v42 = vpop.f32.mrb[43].mxu0  ;;  %v5246_v16 = vrot.slane %v5244_v24, 1  ;;  %v8742_v0 = vrot.slane %v5244_v24, 2  ;;  %v8741_v29 = vrot.slane %v5272_v51, 1  ;;  %v19167_v31 = vld [vmem:[%s25084_s4 + $0xb78] ss:$12 sps:$4 sm:$0xff]  }
 0x3da   : > { %v22210_v45 = vpack.c.bf16 %v4993_v12, %v4990_v58  ;;  %v5258_v39 = vrot.slane %v5256_v23, 1  ;;  %v8749_v46 = vrot.slane %v5256_v23, 2  ;;  %v4980_v49 = vadd.f32 %v4979_v42, %v4787_v25  ;;  %v19168_v23 = vld [vmem:[%s25084_s4 + $0xab8] ss:$12 sps:$4 sm:$0xff]   ;;  %v19172_v42 = vld [vmem:[%s25084_s4 + $0xb90] ss:$12 sps:$4 sm:$0xff]  }
 0x3db   : > { %v4999_v52 = vmax.f32 %v4985_v34, 0.0  ;;  %v8748_v40 = vrot.slane %v5275_v33, 1  ;;  %v22220_v55 = vor.u32 %v8742_v0, %v8741_v29  ;;  %v22225_v4 = vsel %vm636_vm0, %v5242_v30, %v5246_v16  ;;  %v19171_v34 = vld [vmem:[%s25084_s4 + $0xacc] ss:$12 sps:$4 sm:$0xff]   ;;  %v19173_v0 = vld [vmem:[%s25084_s4 + $0xad0] ss:$12 sps:$4 sm:$0xff]  }
 0x3dc   : > { %v22213_v9 = vsel %vm636_vm0, %v5254_v48, %v5258_v39  ;;  %v4996_v62 = vmax.f32 %v4980_v49, 0.0  ;;  %v22215_v61 = vor.u32 %v5275_v33, %v5258_v39  ;;  %v5261_v11 = vshrl.u32 %v22210_v45, 16  ;;  %v19164_v48 = vld [vmem:[%s25084_s4 + $0xab0] ss:$12 sps:$4 sm:$0xff]   ;;  %v19177_v39 = vld [vmem:[%s25084_s4 + $0xba8] ss:$12 sps:$4 sm:$0xff]  }
 0x3dd   : > { %5635 = vmatprep.mubr.bf16.mxu0 %v22213_v9  ;;  %5741 = vmatprep.mubr.bf16.mxu1 %v22213_v9  ;;  %v22227_v44 = vor.u32 %v8749_v46, %v8748_v40  ;;  %v5263_v37 = vshll.u32 %v22210_v45, 16  ;;  %v22264_v22 = vor.u32 %v5272_v51, %v5246_v16  ;;  %v5595_v24 = vsel %vm3840_vm4, %v19163_v63, 0  ;;  %v19166_v51 = vld [vmem:[%s25084_s4 + $0xab4] ss:$12 sps:$4 sm:$0xff]   ;;  %v19176_v29 = vld [vmem:[%s25084_s4 + $0xae4] ss:$12 sps:$4 sm:$0xff]  }
 0x3de   : > { %v22237_v56 = vpack.c.bf16 %v4999_v52, %v4996_v62  ;;  %5636 = vmatmul.mubr.bf16.vlgmr.msra.gmra.mrb[44].mxu0 %v22225_v4  ;;  %5742 = vmatmul.mubr.bf16.vlgmr.msra.gmra.mrb[32].mxu1 %v22225_v4  ;;  %v22249_v25 = vrot.slane %v5261_v11, 1  ;;  %v5601_v58 = vsel %vm3840_vm4, %v19162_v6, 0  ;;  %v19169_v16 = vld [vmem:[%s25084_s4 + $0xac8] ss:$12 sps:$4 sm:$0xff]   ;;  %v19174_v46 = vld [vmem:[%s25084_s4 + $0xae0] ss:$12 sps:$4 sm:$0xff]  }
 0x3df   : > { %5645 = vmatprep.mubr.bf16.mxu0 %v22215_v61  ;;  %5749 = vmatprep.mubr.bf16.mxu1 %v22215_v61  ;;  %v5265_v38 = vrot.slane %v5263_v37, 1  ;;  %v22260_v60 = vrot.slane %v5263_v37, 2  ;;  %v19178_v49 = vld [vmem:[%s25084_s4 + $0xae8] ss:$12 sps:$4 sm:$0xff]   ;;  %v19182_v30 = vld [vmem:[%s25084_s4 + $0xbc0] ss:$12 sps:$4 sm:$0xff]  }
 0x3e0   : > { %5657 = vmatpush1.bf16.msra.mxu0 %v19152_v35  ;;  %17616 = vmatpush3.bf16.msra.mxu1 %v22165_v17  ;;  %v5268_v26 = vshll.u32 %v22237_v56, 16  ;;  %v5278_v59 = vshrl.u32 %v22237_v56, 16  ;;  %v19181_v52 = vld [vmem:[%s25084_s4 + $0xafc] ss:$12 sps:$4 sm:$0xff]   ;;  %v19179_v40 = vld [vmem:[%s25084_s4 + $0xaf8] ss:$12 sps:$4 sm:$0xff]  }
 0x3e1   : > { %5658 = vmatprep.subr.bf16.mxu0 %v19158_v53  ;;  %17617 = vmatprep.subr.bf16.mxu1 %v19159_v57  ;;  %v5266_v18 = vor.u32 %v5265_v38, %v5261_v11  ;;  %v8754_v21 = vor.u32 %v22260_v60, %v22249_v25  ;;  %v19183_v62 = vld [vmem:[%s25084_s4 + $0xb00] ss:$12 sps:$4 sm:$0xff]   ;;  %v19187_v53 = vld [vmem:[%s25084_s4 + $0xbd8] ss:$12 sps:$4 sm:$0xff]   ;;  %v19192_v37 = vld [vmem:[%s25084_s4 + $0xbf0] ss:$12 sps:$4 sm:$0xff]  }
 0x3e2   : > { %v5270_v19 = vrot.slane %v5268_v26, 1  ;;  %v8755_v20 = vrot.slane %v5278_v59, 1  ;;  %v8756_v17 = vrot.slane %v5268_v26, 2  ;;  %v19186_v35 = vld [vmem:[%s25084_s4 + $0xb14] ss:$12 sps:$4 sm:$0xff]  }
 0x3e3   : > { %v19191_v11 = vld [vmem:[%s25084_s4 + $0xb2c] ss:$12 sps:$4 sm:$0xff]   ;;  %v19196_v38 = vld [vmem:[%s25084_s4 + $0xb44] ss:$12 sps:$4 sm:$0xff]   ;;  %v19201_v63 = vld [vmem:[%s25084_s4 + $0xb5c] ss:$12 sps:$4 sm:$0xff]  }
 0x3e4   : > { %5659 = vmatpush1.bf16.msra.mxu0 %v19156_v47  ;;  %17618 = vmatpush3.bf16.msra.mxu1 %v19159_v57  ;;  %v22267_v12 = vsel %vm636_vm0, %v5266_v18, %v5270_v19  ;;  %v22269_v15 = vor.u32 %v8756_v17, %v8755_v20  ;;  %v22292_v33 = vor.u32 %v5278_v59, %v5270_v19  ;;  %v19184_v57 = vld [vmem:[%s25084_s4 + $0xb10] ss:$12 sps:$4 sm:$0xff]   ;;  %v19189_v47 = vld [vmem:[%s25084_s4 + $0xb28] ss:$12 sps:$4 sm:$0xff]   ;;  %v19194_v26 = vld [vmem:[%s25084_s4 + $0xb40] ss:$12 sps:$4 sm:$0xff]  }
 0x3e5   : > { %15330 = vmatprep.subr.msk.bf16.mxu0 %vm3840_vm4, %v19160_v3  ;;  %18554 = vmatprep.subr.msk.bf16.mxu1 %vm3840_vm4, %v19162_v6  ;;  %v19193_v3 = vld [vmem:[%s25084_s4 + $0xb30] ss:$12 sps:$4 sm:$0xff]   ;;  %v19197_v6 = vld [vmem:[%s25084_s4 + $0xc08] ss:$12 sps:$4 sm:$0xff]   ;;  %v19202_v18 = vld [vmem:[%s25084_s4 + $0xc20] ss:$12 sps:$4 sm:$0xff]  }
 0x3e6   : > { %5646 = vmatmul.mubr.bf16.gmra.mrb[48].mxu0 %v22264_v22  ;;  %5750 = vmatmul.mubr.bf16.gmra.mrb[36].mxu1 %v22264_v22  ;;  %v19198_v59 = vld [vmem:[%s25084_s4 + $0xb48] ss:$12 sps:$4 sm:$0xff]   ;;  %v19199_v19 = vld [vmem:[%s25084_s4 + $0xb58] ss:$12 sps:$4 sm:$0xff]   ;;  %v19203_v20 = vld [vmem:[%s25084_s4 + $0xb60] ss:$12 sps:$4 sm:$0xff]  }
 0x3e7   : > { %17621 = vmatprep.mubr.msk.bf16.mxu1 %vm5586_vm9, %v22267_v12  ;;  %5688 = vmatprep.mubr.bf16.mxu0 %v20082_v1  ;;  %v19206_v17 = vld [vmem:[%s25084_s4 + $0xb74] ss:$12 sps:$4 sm:$0xff]   ;;  %vm13660_vm0 = vcmask 64512  }
 0x3e8   : > { %5661 = vmatpush1.bf16.msra.mxu0 %v5595_v24  ;;  %17620 = vmatpush3.bf16.msra.mxu1 %v5601_v58  ;;  %v19207_v24 = vld [vmem:[%s25084_s4 + $0xc38] ss:$12 sps:$4 sm:$0xff]   ;;  %v19204_v58 = vld [vmem:[%s25084_s4 + $0xb70] ss:$12 sps:$4 sm:$0xff]   ;;  %v19620_v25 = vld [vmem:[%s25084_s4 + $0xe40] ss:$12 sps:$4 sm:$0xff]  }
 0x3e9   : > { %6194 = vmatprep.subr.bf16.mxu1 %v19166_v51  ;;  %16996 = vmatprep.subr.bf16.mxu0 %v19167_v31  ;;  %v19210_v51 = vld [vmem:[%s25084_s4 + $0xb8c] ss:$12 sps:$4 sm:$0xff]   ;;  %v19211_v31 = vld [vmem:[%s25084_s4 + $0xc50] ss:$12 sps:$4 sm:$0xff]  }
 0x3ee   : > { %15331 = vmatmul.mubr.msk.bf16.vlgmr.msra.gmra.mrb[44].mxu0 %vm5586_vm9, %v22267_v12  ;;  %17622 = vmatmul.mubr.msk.bf16.vlgmr.msra.gmra.mrb[40].mxu1 %vm5586_vm9, %v22292_v33 }
 0x3ef   : > { %6195 = vmatpush1.bf16.msra.mxu1 %v19164_v48  ;;  %16997 = vmatpush3.bf16.msra.mxu0 %v19168_v23  ;;  %v19208_v48 = vld [vmem:[%s25084_s4 + $0xb88] ss:$12 sps:$4 sm:$0xff]   ;;  %v19214_v23 = vld [vmem:[%s25084_s4 + $0xba4] ss:$12 sps:$4 sm:$0xff]  }
 0x3f0   : > { %6226 = vmatprep.mubr.bf16.mxu1 %v22213_v9  ;;  %6196 = vmatprep.subr.bf16.mxu1 %v19171_v34  ;;  %v19215_v34 = vld [vmem:[%s25084_s4 + $0xc68] ss:$12 sps:$4 sm:$0x3f]  }
 0x3f1   : > { %16998 = vmatprep.subr.bf16.mxu0 %v19172_v42  ;;  %5698 = vmatprep.mubr.bf16.mxu0 %v20082_v1  ;;  %v19212_v42 = vld [vmem:[%s25084_s4 + $0xba0] ss:$12 sps:$4 sm:$0xff]  }
 0x3f3   : > { %6197 = vmatpush1.bf16.msra.mxu1 %v19169_v16  ;;  %16999 = vmatpush3.bf16.msra.mxu0 %v19173_v0  ;;  %v19218_v16 = vld [vmem:[%s25084_s4 + $0xbbc] ss:$12 sps:$4 sm:$0xff]   ;;  %v6192_v0 = vsel %vm3840_vm4, %v19215_v34, 0 }
 0x3f4   : > { %6198 = vmatprep.subr.bf16.mxu1 %v19176_v29  ;;  %17000 = vmatprep.subr.bf16.mxu0 %v19177_v39  ;;  %v19221_v29 = vld [vmem:[%s25084_s4 + $0x4] ss:$12 sps:$4 sm:$0xff]  }
 0x3f5   : > { %v19216_v39 = vld [vmem:[%s25084_s4 + $0xbb8] ss:$12 sps:$4 sm:$0xff]  }
 0x3f6   : > { %15332 = vmatmul.mubr.msk.bf16.gmra.mrb[48].mxu0 %vm5586_vm9, %v22292_v33 }
 0x3f7   : > { %6199 = vmatpush1.bf16.msra.mxu1 %v19174_v46  ;;  %17001 = vmatpush3.bf16.msra.mxu0 %v19178_v49  ;;  %v19224_v46 = vld [vmem:[%s25084_s4 + $0xbd4] ss:$12 sps:$4 sm:$0xff]  }
 0x3f8   : > { %6332 = vmatprep.mubr.bf16.mxu0 %v22213_v9  ;;  %6200 = vmatprep.subr.bf16.mxu1 %v19181_v52  ;;  %v19188_v9 = vld [vmem:[%s25084_s4 + $0xb18] ss:$12 sps:$4 sm:$0xff]   ;;  %v19219_v49 = vld [vmem:[%s25084_s4] ss:$12 sps:$4 sm:$0xff]   ;;  %v19222_v52 = vld [vmem:[%s25084_s4 + $0xbd0] ss:$12 sps:$4 sm:$0xff]  }
 0x3f9   : > { %17002 = vmatprep.subr.bf16.mxu0 %v19182_v30  ;;  %v19227_v30 = vld [vmem:[%s25084_s4 + $0x1c] ss:$12 sps:$4 sm:$0xff]  }
 0x3fb   : > { %6201 = vmatpush1.bf16.msra.mxu1 %v19179_v40  ;;  %17003 = vmatpush3.bf16.msra.mxu0 %v19183_v62  ;;  %v19230_v40 = vld [vmem:[%s25084_s4 + $0xbec] ss:$12 sps:$4 sm:$0xff]  }
 0x3fc   : > { %6202 = vmatprep.subr.bf16.mxu1 %v19186_v35  ;;  %17004 = vmatprep.subr.bf16.mxu0 %v19187_v53  ;;  %v19225_v62 = vld [vmem:[%s25084_s4 + $0x18] ss:$12 sps:$4 sm:$0xff]   ;;  %v19228_v35 = vld [vmem:[%s25084_s4 + $0xbe8] ss:$12 sps:$4 sm:$0xff]  }
 0x3fd   : > { %v19233_v53 = vld [vmem:[%s25084_s4 + $0x34] ss:$12 sps:$4 sm:$0xff]  }
 0x3ff   : > { %6203 = vmatpush1.bf16.msra.mxu1 %v19184_v57  ;;  %17005 = vmatpush3.bf16.msra.mxu0 %v19188_v9  ;;  %v19236_v57 = vld [vmem:[%s25084_s4 + $0xc04] ss:$12 sps:$4 sm:$0xff]  }
 0x400   : > { %6204 = vmatprep.subr.bf16.mxu1 %v19191_v11  ;;  %17006 = vmatprep.subr.bf16.mxu0 %v19192_v37  ;;  %v19231_v9 = vld [vmem:[%s25084_s4 + $0x30] ss:$12 sps:$4 sm:$0xff]   ;;  %v19234_v11 = vld [vmem:[%s25084_s4 + $0xc00] ss:$12 sps:$4 sm:$0xff]  }
 0x401   : > { %v19239_v37 = vld [vmem:[%s25084_s4 + $0x4c] ss:$12 sps:$4 sm:$0xff]  }
 0x403   : > { %6205 = vmatpush1.bf16.msra.mxu1 %v19189_v47  ;;  %17007 = vmatpush3.bf16.msra.mxu0 %v19193_v3  ;;  %v19242_v47 = vld [vmem:[%s25084_s4 + $0xc1c] ss:$12 sps:$4 sm:$0xff]  }
 0x404   : > { %6206 = vmatprep.subr.bf16.mxu1 %v19196_v38  ;;  %17008 = vmatprep.subr.bf16.mxu0 %v19197_v6  ;;  %v19237_v3 = vld [vmem:[%s25084_s4 + $0x48] ss:$12 sps:$4 sm:$0xff]   ;;  %v19240_v38 = vld [vmem:[%s25084_s4 + $0xc18] ss:$12 sps:$4 sm:$0xff]  }
 0x405   : > { %v19245_v6 = vld [vmem:[%s25084_s4 + $0x64] ss:$12 sps:$4 sm:$0xff]  }
 0x407   : > { %6207 = vmatpush1.bf16.msra.mxu1 %v19194_v26  ;;  %17009 = vmatpush3.bf16.msra.mxu0 %v19198_v59  ;;  %v19248_v26 = vld [vmem:[%s25084_s4 + $0xc34] ss:$12 sps:$4 sm:$0xff]  }
 0x408   : > { %6208 = vmatprep.subr.bf16.mxu1 %v19201_v63  ;;  %17010 = vmatprep.subr.bf16.mxu0 %v19202_v18  ;;  %v19243_v59 = vld [vmem:[%s25084_s4 + $0x60] ss:$12 sps:$4 sm:$0xff]   ;;  %v19246_v63 = vld [vmem:[%s25084_s4 + $0xc30] ss:$12 sps:$4 sm:$0xff]  }
 0x409   : > { %v19251_v18 = vld [vmem:[%s25084_s4 + $0x7c] ss:$12 sps:$4 sm:$0xff]  }
 0x40b   : > { %6209 = vmatpush1.bf16.msra.mxu1 %v19199_v19  ;;  %17011 = vmatpush3.bf16.msra.mxu0 %v19203_v20  ;;  %v19254_v19 = vld [vmem:[%s25084_s4 + $0xc4c] ss:$12 sps:$4 sm:$0xff]  }
 0x40c   : > { %6210 = vmatprep.subr.bf16.mxu1 %v19206_v17  ;;  %17625 = vmatprep.subr.bf16.mxu0 %v19207_v24  ;;  %v19249_v20 = vld [vmem:[%s25084_s4 + $0x78] ss:$12 sps:$4 sm:$0xff]   ;;  %v19252_v17 = vld [vmem:[%s25084_s4 + $0xc48] ss:$12 sps:$4 sm:$0xff]  }
 0x40e   : > { %6333 = vmatmul.mubr.bf16.vlgmr.msra.gmra.mrb[52].mxu0 %v22225_v4 }
 0x40f   : > { %6211 = vmatpush1.bf16.msra.mxu1 %v19204_v58  ;;  %6340 = vmatprep.mubr.bf16.mxu0 %v22215_v61  ;;  %v19255_v58 = vld [vmem:[%s25084_s4 + $0x90] ss:$12 sps:$4 sm:$0xff]  }
 0x410   : > { %6212 = vmatprep.subr.bf16.mxu1 %v19210_v51  ;;  %17626 = vmatpush3.bf16.msra.mxu0 %v19207_v24  ;;  %v19257_v24 = vld [vmem:[%s25084_s4 + $0x94] ss:$12 sps:$4 sm:$0xff]   ;;  %v19262_v51 = vld [vmem:[%s25084_s4 + $0xac] ss:$12 sps:$4 sm:$0xff]  }
 0x411   : > { %17627 = vmatprep.subr.bf16.mxu0 %v19211_v31 }
 0x413   : > { %6213 = vmatpush1.bf16.msra.mxu1 %v19208_v48  ;;  %v19267_v48 = vld [vmem:[%s25084_s4 + $0xc8] ss:$12 sps:$4 sm:$0xff]  }
 0x414   : > { %6214 = vmatprep.subr.bf16.mxu1 %v19214_v23  ;;  %17628 = vmatpush3.bf16.msra.mxu0 %v19211_v31  ;;  %v19260_v23 = vld [vmem:[%s25084_s4 + $0xa8] ss:$12 sps:$4 sm:$0xff]  }
 0x415   : > { %18555 = vmatprep.subr.msk.bf16.mxu0 %vm3840_vm4, %v19215_v34  ;;  %v19266_v34 = vld [vmem:[%s25084_s4 + $0xc4] ss:$12 sps:$4 sm:$0xff]  }
 0x416   : > { %6341 = vmatmul.mubr.bf16.gmra.mrb[56].mxu0 %v22264_v22 }
 0x417   : > { %6215 = vmatpush1.bf16.msra.mxu1 %v19212_v42  ;;  %17631 = vmatprep.mubr.msk.bf16.mxu0 %vm5586_vm9, %v22267_v12  ;;  %v19264_v42 = vld [vmem:[%s25084_s4 + $0xc0] ss:$12 sps:$4 sm:$0xff]  }
 0x418   : > { %6216 = vmatprep.subr.bf16.mxu1 %v19218_v16  ;;  %17630 = vmatpush3.bf16.msra.mxu0 %v6192_v0  ;;  %v19271_v16 = vld [vmem:[%s25084_s4 + $0xdc] ss:$12 sps:$4 sm:$0xff]   ;;  %v19272_v0 = vld [vmem:[%s25084_s4 + $0xe0] ss:$12 sps:$4 sm:$0xff]  }
 0x419   : > { %6712 = vmatprep.subr.bf16.mxu0 %v19221_v29  ;;  %v19269_v29 = vld [vmem:[%s25084_s4 + $0xd8] ss:$12 sps:$4 sm:$0xff]  }
 0x41b   : > { %6217 = vmatpush1.bf16.msra.mxu1 %v19216_v39  ;;  %v19273_v39 = vld [vmem:[%s25084_s4 + $0x20] ss:$12 sps:$4 sm:$0xff]  }
 0x41c   : > { %6218 = vmatprep.subr.bf16.mxu1 %v19224_v46  ;;  %v19276_v46 = vld [vmem:[%s25084_s4 + $0xf4] ss:$12 sps:$4 sm:$0xff]  }
 0x41e   : > { %17632 = vmatmul.mubr.msk.bf16.vlgmr.msra.gmra.mrb[60].mxu0 %vm5586_vm9, %v22292_v33 }
 0x41f   : > { %6713 = vmatpush1.bf16.msra.mxu0 %v19219_v49  ;;  %6219 = vmatpush1.bf16.msra.mxu1 %v19222_v52  ;;  %v19274_v49 = vld [vmem:[%s25084_s4 + $0xf0] ss:$12 sps:$4 sm:$0xff]   ;;  %v19278_v52 = vld [vmem:[%s25084_s4 + $0x38] ss:$12 sps:$4 sm:$0xff]  }
 0x420   : > { %6744 = vmatprep.mubr.bf16.mxu0 %v22182_v2  ;;  %6714 = vmatprep.subr.bf16.mxu0 %v19227_v30  ;;  %v19281_v30 = vld [vmem:[%s25084_s4 + $0x10c] ss:$12 sps:$4 sm:$0xff]  }
 0x421   : > { %6220 = vmatprep.subr.bf16.mxu1 %v19230_v40  ;;  %v19282_v40 = vld [vmem:[%s25084_s4 + $0x110] ss:$12 sps:$4 sm:$0xff]  }
 0x423   : > { %6715 = vmatpush1.bf16.msra.mxu0 %v19225_v62  ;;  %6221 = vmatpush1.bf16.msra.mxu1 %v19228_v35  ;;  %v19279_v62 = vld [vmem:[%s25084_s4 + $0x108] ss:$12 sps:$4 sm:$0xff]   ;;  %v19283_v35 = vld [vmem:[%s25084_s4 + $0x50] ss:$12 sps:$4 sm:$0xff]  }
 0x424   : > { %6716 = vmatprep.subr.bf16.mxu0 %v19233_v53  ;;  %6222 = vmatprep.subr.bf16.mxu1 %v19236_v57  ;;  %v19286_v53 = vld [vmem:[%s25084_s4 + $0x124] ss:$12 sps:$4 sm:$0xff]   ;;  %v19284_v57 = vld [vmem:[%s25084_s4 + $0x120] ss:$12 sps:$4 sm:$0xff]  }
 0x427   : > { %6717 = vmatpush1.bf16.msra.mxu0 %v19231_v9  ;;  %6223 = vmatpush1.bf16.msra.mxu1 %v19234_v11  ;;  %v19288_v9 = vld [vmem:[%s25084_s4 + $0x68] ss:$12 sps:$4 sm:$0xff]  }
 0x428   : > { %6718 = vmatprep.subr.bf16.mxu0 %v19239_v37  ;;  %6224 = vmatprep.subr.bf16.mxu1 %v19242_v47  ;;  %v19291_v11 = vld [vmem:[%s25084_s4 + $0x13c] ss:$12 sps:$4 sm:$0xff]   ;;  %v19292_v37 = vld [vmem:[%s25084_s4 + $0x140] ss:$12 sps:$4 sm:$0xff]   ;;  %v19289_v47 = vld [vmem:[%s25084_s4 + $0x138] ss:$12 sps:$4 sm:$0xff]  }
 0x42b   : > { %6719 = vmatpush1.bf16.msra.mxu0 %v19237_v3  ;;  %6225 = vmatpush1.bf16.msra.mxu1 %v19240_v38  ;;  %v19293_v3 = vld [vmem:[%s25084_s4 + $0x80] ss:$12 sps:$4 sm:$0xff]  }
 0x42c   : > { %6720 = vmatprep.subr.bf16.mxu0 %v19245_v6  ;;  %6247 = vmatprep.subr.bf16.mxu1 %v19248_v26  ;;  %v19296_v38 = vld [vmem:[%s25084_s4 + $0x154] ss:$12 sps:$4 sm:$0xff]   ;;  %v19297_v6 = vld [vmem:[%s25084_s4 + $0x158] ss:$12 sps:$4 sm:$0xff]   ;;  %v19294_v26 = vld [vmem:[%s25084_s4 + $0x150] ss:$12 sps:$4 sm:$0xff]  }
 0x42e   : > { %6227 = vmatmul.mubr.bf16.vlgmr.msra.gmra.mrb[44].mxu1 %v22225_v4  ;;  %v19258_v4 = vld [vmem:[%s25084_s4 + $0xc64] ss:$12 sps:$4 sm:$0x3f]  }
 0x42f   : > { %6721 = vmatpush1.bf16.msra.mxu0 %v19243_v59  ;;  %6236 = vmatprep.mubr.bf16.mxu1 %v22215_v61  ;;  %v19263_v61 = vld [vmem:[%s25084_s4 + $0xc60] ss:$12 sps:$4 sm:$0x3f]   ;;  %v19298_v59 = vld [vmem:[%s25084_s4 + $0x98] ss:$12 sps:$4 sm:$0xff]  }
 0x430   : > { %6722 = vmatprep.subr.bf16.mxu0 %v19251_v18  ;;  %6248 = vmatpush1.bf16.msra.mxu1 %v19246_v63  ;;  %v6186_v31 = vsel %vm3840_vm4, %v19263_v61, 0  ;;  %v19301_v63 = vld [vmem:[%s25084_s4 + $0x16c] ss:$12 sps:$4 sm:$0xff]   ;;  %v19302_v18 = vld [vmem:[%s25084_s4 + $0x170] ss:$12 sps:$4 sm:$0xff]  }
 0x431   : > { %6249 = vmatprep.subr.bf16.mxu1 %v19254_v19  ;;  %v19299_v19 = vld [vmem:[%s25084_s4 + $0x168] ss:$12 sps:$4 sm:$0xff]  }
 0x432   : > { %v19310_v61 = vld [vmem:[%s25084_s4 + $0x19c] ss:$12 sps:$4 sm:$0xff]  }
 0x433   : > { %6723 = vmatpush1.bf16.msra.mxu0 %v19249_v20  ;;  %v19303_v20 = vld [vmem:[%s25084_s4 + $0xb0] ss:$12 sps:$4 sm:$0xff]  }
 0x434   : > { %6724 = vmatprep.subr.bf16.mxu0 %v19257_v24  ;;  %6250 = vmatpush1.bf16.msra.mxu1 %v19252_v17  ;;  %v19306_v17 = vld [vmem:[%s25084_s4 + $0x184] ss:$12 sps:$4 sm:$0xff]   ;;  %v19307_v24 = vld [vmem:[%s25084_s4 + $0x188] ss:$12 sps:$4 sm:$0xff]  }
 0x435   : > { %15468 = vmatprep.subr.msk.bf16.mxu1 %vm3840_vm4, %v19258_v4  ;;  %v19304_v4 = vld [vmem:[%s25084_s4 + $0x180] ss:$12 sps:$4 sm:$0xff]  }
 0x436   : > { %6237 = vmatmul.mubr.bf16.gmra.mrb[48].mxu1 %v22264_v22  ;;  %v19268_v22 = vld [vmem:[%s25084_s4 + $0x8] ss:$12 sps:$4 sm:$0xff]  }
 0x437   : > { %6725 = vmatpush1.bf16.msra.mxu0 %v19255_v58  ;;  %6279 = vmatprep.mubr.bf16.mxu1 %v20082_v1  ;;  %v19311_v58 = vld [vmem:[%s25084_s4 + $0x1a0] ss:$12 sps:$4 sm:$0xff]  }
 0x438   : > { %6726 = vmatprep.subr.bf16.mxu0 %v19262_v51  ;;  %6252 = vmatpush1.bf16.msra.mxu1 %v6186_v31  ;;  %v19308_v51 = vld [vmem:[%s25084_s4 + $0x198] ss:$12 sps:$4 sm:$0xff]   ;;  %v19312_v31 = vld [vmem:[%s25084_s4 + $0x1b4] ss:$12 sps:$4 sm:$0x3f]  }
 0x439   : > { %17029 = vmatprep.subr.bf16.mxu1 %v19267_v48  ;;  %v19314_v48 = vld [vmem:[%s25084_s4 + $0x1b8] ss:$12 sps:$4 sm:$0x3f]  }
 0x43b   : > { %6727 = vmatpush1.bf16.msra.mxu0 %v19260_v23  ;;  %v19315_v23 = vld [vmem:[%s25084_s4 + $0x1b0] ss:$12 sps:$4 sm:$0x3f]  }
 0x43c   : > { %6728 = vmatprep.subr.bf16.mxu0 %v19266_v34  ;;  %v6704_v34 = vsel %vm3840_vm4, %v19315_v23, 0  ;;  %v19360_v23 = vld [vmem:[%s25084_s4 + $0x9c0] ss:$12 sps:$4 sm:$0xff]  }
 0x43e   : > { %15469 = vmatmul.mubr.msk.bf16.vlgmr.msra.gmra.mrb[44].mxu1 %vm5586_vm9, %v22267_v12  ;;  %v19277_v12 = vld [vmem:[%s25084_s4 + $0xf8] ss:$12 sps:$4 sm:$0xff]  }
 0x43f   : > { %6729 = vmatpush1.bf16.msra.mxu0 %v19264_v42  ;;  %17030 = vmatpush3.bf16.msra.mxu1 %v19268_v22  ;;  %v6710_v42 = vsel %vm3840_vm4, %v19314_v48, 0  ;;  %v19318_v22 = vld [vmem:[%s25084_s4 + $0x8ec] ss:$12 sps:$4 sm:$0xff]  }
 0x440   : > { %6730 = vmatprep.subr.bf16.mxu0 %v19271_v16  ;;  %17031 = vmatprep.subr.bf16.mxu1 %v19272_v0  ;;  %v19319_v16 = vld [vmem:[%s25084_s4 + $0x9b0] ss:$12 sps:$4 sm:$0xff]   ;;  %v19316_v0 = vld [vmem:[%s25084_s4 + $0x8e8] ss:$12 sps:$4 sm:$0xff]  }
 0x441   : > { %6289 = vmatprep.mubr.bf16.mxu1 %v20082_v1 }
 0x443   : > { %6731 = vmatpush1.bf16.msra.mxu0 %v19269_v29  ;;  %17032 = vmatpush3.bf16.msra.mxu1 %v19273_v39  ;;  %v19320_v29 = vld [vmem:[%s25084_s4 + $0x8f0] ss:$12 sps:$4 sm:$0xff]  }
 0x444   : > { %6732 = vmatprep.subr.bf16.mxu0 %v19276_v46  ;;  %17033 = vmatprep.subr.bf16.mxu1 %v19277_v12  ;;  %v19323_v39 = vld [vmem:[%s25084_s4 + $0x904] ss:$12 sps:$4 sm:$0xff]   ;;  %v19324_v46 = vld [vmem:[%s25084_s4 + $0x9c8] ss:$12 sps:$4 sm:$0xff]   ;;  %v19321_v12 = vld [vmem:[%s25084_s4 + $0x900] ss:$12 sps:$4 sm:$0xff]  }
 0x446   : > { %15470 = vmatmul.mubr.msk.bf16.gmra.mrb[48].mxu1 %vm5586_vm9, %v22292_v33  ;;  %v19287_v33 = vld [vmem:[%s25084_s4 + $0x128] ss:$12 sps:$4 sm:$0xff]  }
 0x447   : > { %6733 = vmatpush1.bf16.msra.mxu0 %v19274_v49  ;;  %17034 = vmatpush3.bf16.msra.mxu1 %v19278_v52  ;;  %v19325_v49 = vld [vmem:[%s25084_s4 + $0x908] ss:$12 sps:$4 sm:$0xff]  }
 0x448   : > { %6850 = vmatprep.mubr.bf16.mxu1 %v22182_v2  ;;  %6734 = vmatprep.subr.bf16.mxu0 %v19281_v30  ;;  %v19328_v52 = vld [vmem:[%s25084_s4 + $0x91c] ss:$12 sps:$4 sm:$0xff]   ;;  %v19329_v30 = vld [vmem:[%s25084_s4 + $0x9e0] ss:$12 sps:$4 sm:$0xff]  }
 0x449   : > { %17035 = vmatprep.subr.bf16.mxu1 %v19282_v40  ;;  %v19326_v40 = vld [vmem:[%s25084_s4 + $0x918] ss:$12 sps:$4 sm:$0xff]  }
 0x44b   : > { %6735 = vmatpush1.bf16.msra.mxu0 %v19279_v62  ;;  %17036 = vmatpush3.bf16.msra.mxu1 %v19283_v35  ;;  %v19330_v62 = vld [vmem:[%s25084_s4 + $0x920] ss:$12 sps:$4 sm:$0xff]  }
 0x44c   : > { %6736 = vmatprep.subr.bf16.mxu0 %v19286_v53  ;;  %17037 = vmatprep.subr.bf16.mxu1 %v19287_v33  ;;  %v19333_v35 = vld [vmem:[%s25084_s4 + $0x934] ss:$12 sps:$4 sm:$0xff]   ;;  %v19334_v53 = vld [vmem:[%s25084_s4 + $0x9f8] ss:$12 sps:$4 sm:$0xff]   ;;  %v19331_v33 = vld [vmem:[%s25084_s4 + $0x930] ss:$12 sps:$4 sm:$0xff]  }
 0x44f   : > { %6737 = vmatpush1.bf16.msra.mxu0 %v19284_v57  ;;  %17038 = vmatpush3.bf16.msra.mxu1 %v19288_v9  ;;  %v19335_v57 = vld [vmem:[%s25084_s4 + $0x938] ss:$12 sps:$4 sm:$0xff]  }
 0x450   : > { %6738 = vmatprep.subr.bf16.mxu0 %v19291_v11  ;;  %17039 = vmatprep.subr.bf16.mxu1 %v19292_v37  ;;  %v19338_v9 = vld [vmem:[%s25084_s4 + $0x94c] ss:$12 sps:$4 sm:$0xff]   ;;  %v19339_v11 = vld [vmem:[%s25084_s4 + $0xa10] ss:$12 sps:$4 sm:$0xff]   ;;  %v19336_v37 = vld [vmem:[%s25084_s4 + $0x948] ss:$12 sps:$4 sm:$0xff]  }
 0x453   : > { %6739 = vmatpush1.bf16.msra.mxu0 %v19289_v47  ;;  %17040 = vmatpush3.bf16.msra.mxu1 %v19293_v3  ;;  %v19340_v47 = vld [vmem:[%s25084_s4 + $0x950] ss:$12 sps:$4 sm:$0xff]  }
 0x454   : > { %6740 = vmatprep.subr.bf16.mxu0 %v19296_v38  ;;  %17041 = vmatprep.subr.bf16.mxu1 %v19297_v6  ;;  %v19343_v3 = vld [vmem:[%s25084_s4 + $0x964] ss:$12 sps:$4 sm:$0xff]   ;;  %v19344_v38 = vld [vmem:[%s25084_s4 + $0xa28] ss:$12 sps:$4 sm:$0xff]   ;;  %v19341_v6 = vld [vmem:[%s25084_s4 + $0x960] ss:$12 sps:$4 sm:$0xff]  }
 0x457   : > { %6741 = vmatpush1.bf16.msra.mxu0 %v19294_v26  ;;  %17042 = vmatpush3.bf16.msra.mxu1 %v19298_v59  ;;  %v19345_v26 = vld [vmem:[%s25084_s4 + $0x968] ss:$12 sps:$4 sm:$0xff]  }
 0x458   : > { %6742 = vmatprep.subr.bf16.mxu0 %v19301_v63  ;;  %17043 = vmatprep.subr.bf16.mxu1 %v19302_v18  ;;  %v19348_v59 = vld [vmem:[%s25084_s4 + $0x97c] ss:$12 sps:$4 sm:$0xff]   ;;  %v19349_v63 = vld [vmem:[%s25084_s4 + $0xa40] ss:$12 sps:$4 sm:$0xff]   ;;  %v19346_v18 = vld [vmem:[%s25084_s4 + $0x978] ss:$12 sps:$4 sm:$0xff]  }
 0x45b   : > { %6743 = vmatpush1.bf16.msra.mxu0 %v19299_v19  ;;  %17044 = vmatpush3.bf16.msra.mxu1 %v19303_v20  ;;  %v19350_v19 = vld [vmem:[%s25084_s4 + $0x980] ss:$12 sps:$4 sm:$0xff]  }
 0x45c   : > { %6765 = vmatprep.subr.bf16.mxu0 %v19306_v17  ;;  %17635 = vmatprep.subr.bf16.mxu1 %v19307_v24  ;;  %v19353_v20 = vld [vmem:[%s25084_s4 + $0x994] ss:$12 sps:$4 sm:$0xff]   ;;  %v19354_v17 = vld [vmem:[%s25084_s4 + $0xa58] ss:$12 sps:$4 sm:$0xff]  }
 0x45e   : > { %6745 = vmatmul.mubr.bf16.vlgmr.msra.gmra.mrb[44].mxu0 %v22179_v8  ;;  %6851 = vmatmul.mubr.bf16.vlgmr.msra.gmra.mrb[52].mxu1 %v22179_v8 }
 0x45f   : > { %6754 = vmatprep.mubr.bf16.mxu0 %v22202_v50  ;;  %6858 = vmatprep.mubr.bf16.mxu1 %v22202_v50 }
 0x460   : > { %6766 = vmatpush1.bf16.msra.mxu0 %v19304_v4  ;;  %17636 = vmatpush3.bf16.msra.mxu1 %v19307_v24  ;;  %v19351_v24 = vld [vmem:[%s25084_s4 + $0x990] ss:$12 sps:$4 sm:$0xff]   ;;  %v19355_v4 = vld [vmem:[%s25084_s4 + $0x998] ss:$12 sps:$4 sm:$0xff]  }
 0x461   : > { %6767 = vmatprep.subr.bf16.mxu0 %v19310_v61  ;;  %17637 = vmatprep.subr.bf16.mxu1 %v19311_v58  ;;  %v19358_v61 = vld [vmem:[%s25084_s4 + $0x9ac] ss:$12 sps:$4 sm:$0xff]  }
 0x464   : > { %6768 = vmatpush1.bf16.msra.mxu0 %v19308_v51  ;;  %17638 = vmatpush3.bf16.msra.mxu1 %v19311_v58  ;;  %v19359_v58 = vld [vmem:[%s25084_s4 + $0xa70] ss:$12 sps:$4 sm:$0xff]   ;;  %v19356_v51 = vld [vmem:[%s25084_s4 + $0x9a8] ss:$12 sps:$4 sm:$0xff]  }
 0x465   : > { %15530 = vmatprep.subr.msk.bf16.mxu0 %vm3840_vm4, %v19312_v31  ;;  %18556 = vmatprep.subr.msk.bf16.mxu1 %vm3840_vm4, %v19314_v48  ;;  %v19362_v31 = vld [vmem:[%s25084_s4 + $0x9c4] ss:$12 sps:$4 sm:$0xff]   ;;  %v19363_v48 = vld [vmem:[%s25084_s4 + $0xa88] ss:$12 sps:$4 sm:$0xff]  }
 0x466   : > { %6755 = vmatmul.mubr.bf16.gmra.mrb[48].mxu0 %v22198_v32  ;;  %6859 = vmatmul.mubr.bf16.gmra.mrb[56].mxu1 %v22198_v32 }
 0x467   : > { %17641 = vmatprep.mubr.msk.bf16.mxu1 %vm5586_vm9, %v22210_v45  ;;  %6797 = vmatprep.mubr.bf16.mxu0 %v20082_v1 }
 0x468   : > { %6770 = vmatpush1.bf16.msra.mxu0 %v6704_v34  ;;  %17640 = vmatpush3.bf16.msra.mxu1 %v6710_v42  ;;  %v19366_v34 = vld [vmem:[%s25084_s4 + $0x9dc] ss:$12 sps:$4 sm:$0xff]   ;;  %v19367_v42 = vld [vmem:[%s25084_s4 + $0xaa0] ss:$12 sps:$4 sm:$0x3f]  }
 0x469   : > { %7226 = vmatprep.subr.bf16.mxu1 %v19318_v22  ;;  %17062 = vmatprep.subr.bf16.mxu0 %v19319_v16  ;;  %v19364_v22 = vld [vmem:[%s25084_s4 + $0x9d8] ss:$12 sps:$4 sm:$0xff]   ;;  %v19370_v16 = vld [vmem:[%s25084_s4 + $0x9f4] ss:$12 sps:$4 sm:$0xff]  }
 0x46e   : > { %15531 = vmatmul.mubr.msk.bf16.vlgmr.msra.gmra.mrb[44].mxu0 %vm5586_vm9, %v22210_v45  ;;  %17642 = vmatmul.mubr.msk.bf16.vlgmr.msra.gmra.mrb[40].mxu1 %vm5586_vm9, %v22237_v56 }
 0x46f   : > { %7227 = vmatpush1.bf16.msra.mxu1 %v19316_v0  ;;  %17063 = vmatpush3.bf16.msra.mxu0 %v19320_v29  ;;  %v7224_v0 = vsel %vm3840_vm4, %v19367_v42, 0  ;;  %v19373_v29 = vld [vmem:[%s25084_s4 + $0x394] ss:$12 sps:$4 sm:$0xff]  }
 0x470   : > { %7258 = vmatprep.mubr.bf16.mxu1 %v22182_v2  ;;  %7228 = vmatprep.subr.bf16.mxu1 %v19323_v39  ;;  %v19368_v39 = vld [vmem:[%s25084_s4 + $0x9f0] ss:$12 sps:$4 sm:$0xff]  }
 0x471   : > { %17064 = vmatprep.subr.bf16.mxu0 %v19324_v46  ;;  %6807 = vmatprep.mubr.bf16.mxu0 %v20082_v1  ;;  %v19376_v46 = vld [vmem:[%s25084_s4 + $0xa0c] ss:$12 sps:$4 sm:$0xff]  }
 0x473   : > { %7229 = vmatpush1.bf16.msra.mxu1 %v19321_v12  ;;  %17065 = vmatpush3.bf16.msra.mxu0 %v19325_v49  ;;  %v19371_v12 = vld [vmem:[%s25084_s4 + $0x390] ss:$12 sps:$4 sm:$0xff]   ;;  %v19374_v49 = vld [vmem:[%s25084_s4 + $0xa08] ss:$12 sps:$4 sm:$0xff]  }
 0x474   : > { %7230 = vmatprep.subr.bf16.mxu1 %v19328_v52  ;;  %17066 = vmatprep.subr.bf16.mxu0 %v19329_v30  ;;  %v22826_v52 = vrot.slane %v22202_v50, 1  ;;  %v19379_v30 = vld [vmem:[%s25084_s4 + $0x3ac] ss:$12 sps:$4 sm:$0xff]  }
 0x476   : > { %15532 = vmatmul.mubr.msk.bf16.gmra.mrb[48].mxu0 %vm5586_vm9, %v22237_v56 }
 0x477   : > { %7231 = vmatpush1.bf16.msra.mxu1 %v19326_v40  ;;  %17067 = vmatpush3.bf16.msra.mxu0 %v19330_v62  ;;  %v7516_v40 = vrot.slane %v22182_v2, 1  ;;  %v19382_v62 = vld [vmem:[%s25084_s4 + $0xa24] ss:$12 sps:$4 sm:$0xff]  }
 0x478   : > { %7364 = vmatprep.mubr.bf16.mxu0 %v22182_v2  ;;  %7232 = vmatprep.subr.bf16.mxu1 %v19333_v35 }
 0x479   : > { %17068 = vmatprep.subr.bf16.mxu0 %v19334_v53  ;;  %v22839_v35 = vsel %vm2150_vm3, %v7516_v40, %v22826_v52  ;;  %v19377_v53 = vld [vmem:[%s25084_s4 + $0x3a8] ss:$12 sps:$4 sm:$0xff]   ;;  %v19416_v40 = vld [vmem:[%s25084_s4 + $0x450] ss:$12 sps:$4 sm:$0xff]  }
 0x47b   : > { %7233 = vmatpush1.bf16.msra.mxu1 %v19331_v33  ;;  %17069 = vmatpush3.bf16.msra.mxu0 %v19335_v57  ;;  %v19380_v33 = vld [vmem:[%s25084_s4 + $0xa20] ss:$12 sps:$4 sm:$0xff]   ;;  %v19385_v57 = vld [vmem:[%s25084_s4 + $0x3c4] ss:$12 sps:$4 sm:$0xff]  }
 0x47c   : > { %7234 = vmatprep.subr.bf16.mxu1 %v19338_v9  ;;  %17070 = vmatprep.subr.bf16.mxu0 %v19339_v11  ;;  %v19388_v9 = vld [vmem:[%s25084_s4 + $0xa3c] ss:$12 sps:$4 sm:$0xff]   ;;  %v19383_v11 = vld [vmem:[%s25084_s4 + $0x3c0] ss:$12 sps:$4 sm:$0xff]  }
 0x47f   : > { %7235 = vmatpush1.bf16.msra.mxu1 %v19336_v37  ;;  %17071 = vmatpush3.bf16.msra.mxu0 %v19340_v47  ;;  %v19386_v37 = vld [vmem:[%s25084_s4 + $0xa38] ss:$12 sps:$4 sm:$0xff]   ;;  %v19391_v47 = vld [vmem:[%s25084_s4 + $0x3dc] ss:$12 sps:$4 sm:$0xff]  }
 0x480   : > { %7236 = vmatprep.subr.bf16.mxu1 %v19343_v3  ;;  %17072 = vmatprep.subr.bf16.mxu0 %v19344_v38  ;;  %v19394_v3 = vld [vmem:[%s25084_s4 + $0xa54] ss:$12 sps:$4 sm:$0xff]   ;;  %v19389_v38 = vld [vmem:[%s25084_s4 + $0x3d8] ss:$12 sps:$4 sm:$0xff]  }
 0x483   : > { %7237 = vmatpush1.bf16.msra.mxu1 %v19341_v6  ;;  %17073 = vmatpush3.bf16.msra.mxu0 %v19345_v26  ;;  %v19392_v6 = vld [vmem:[%s25084_s4 + $0xa50] ss:$12 sps:$4 sm:$0xff]   ;;  %v19397_v26 = vld [vmem:[%s25084_s4 + $0x3f4] ss:$12 sps:$4 sm:$0xff]  }
 0x484   : > { %7238 = vmatprep.subr.bf16.mxu1 %v19348_v59  ;;  %17074 = vmatprep.subr.bf16.mxu0 %v19349_v63  ;;  %v19400_v59 = vld [vmem:[%s25084_s4 + $0xa6c] ss:$12 sps:$4 sm:$0xff]   ;;  %v19395_v63 = vld [vmem:[%s25084_s4 + $0x3f0] ss:$12 sps:$4 sm:$0xff]  }
 0x487   : > { %7239 = vmatpush1.bf16.msra.mxu1 %v19346_v18  ;;  %17075 = vmatpush3.bf16.msra.mxu0 %v19350_v19  ;;  %v19398_v18 = vld [vmem:[%s25084_s4 + $0xa68] ss:$12 sps:$4 sm:$0xff]   ;;  %v19403_v19 = vld [vmem:[%s25084_s4 + $0x40c] ss:$12 sps:$4 sm:$0xff]  }
 0x488   : > { %7240 = vmatprep.subr.bf16.mxu1 %v19353_v20  ;;  %17076 = vmatprep.subr.bf16.mxu0 %v19354_v17  ;;  %v19406_v20 = vld [vmem:[%s25084_s4 + $0xa84] ss:$12 sps:$4 sm:$0xff]   ;;  %v19401_v17 = vld [vmem:[%s25084_s4 + $0x408] ss:$12 sps:$4 sm:$0xff]  }
 0x48b   : > { %7241 = vmatpush1.bf16.msra.mxu1 %v19351_v24  ;;  %17077 = vmatpush3.bf16.msra.mxu0 %v19355_v4  ;;  %v19404_v24 = vld [vmem:[%s25084_s4 + $0xa80] ss:$12 sps:$4 sm:$0xff]   ;;  %v19409_v4 = vld [vmem:[%s25084_s4 + $0x424] ss:$12 sps:$4 sm:$0xff]  }
 0x48c   : > { %7242 = vmatprep.subr.bf16.mxu1 %v19358_v61  ;;  %17645 = vmatprep.subr.bf16.mxu0 %v19359_v58  ;;  %v19410_v61 = vld [vmem:[%s25084_s4 + $0xa9c] ss:$12 sps:$4 sm:$0x3f]  }
 0x48e   : > { %7365 = vmatmul.mubr.bf16.vlgmr.msra.gmra.mrb[64].mxu0 %v22179_v8 }
 0x48f   : > { %7243 = vmatpush1.bf16.msra.mxu1 %v19356_v51  ;;  %7372 = vmatprep.mubr.bf16.mxu0 %v22202_v50  ;;  %v19415_v51 = vld [vmem:[%s25084_s4 + $0xa98] ss:$12 sps:$4 sm:$0x3f]  }
 0x490   : > { %7244 = vmatprep.subr.bf16.mxu1 %v19362_v31  ;;  %17646 = vmatpush3.bf16.msra.mxu0 %v19359_v58 }
 0x491   : > { %17647 = vmatprep.subr.bf16.mxu0 %v19363_v48 }
 0x493   : > { %7245 = vmatpush1.bf16.msra.mxu1 %v19360_v23  ;;  %v19407_v23 = vld [vmem:[%s25084_s4 + $0x420] ss:$12 sps:$4 sm:$0xff]  }
 0x494   : > { %7246 = vmatprep.subr.bf16.mxu1 %v19366_v34  ;;  %17648 = vmatpush3.bf16.msra.mxu0 %v19363_v48 }
 0x495   : > { %18557 = vmatprep.subr.msk.bf16.mxu0 %vm3840_vm4, %v19367_v42 }
 0x496   : > { %7373 = vmatmul.mubr.bf16.gmra.mrb[68].mxu0 %v22198_v32 }
 0x497   : > { %7247 = vmatpush1.bf16.msra.mxu1 %v19364_v22  ;;  %17651 = vmatprep.mubr.msk.bf16.mxu0 %vm5586_vm9, %v22210_v45  ;;  %v19414_v22 = vld [vmem:[%s25084_s4 + $0x43c] ss:$12 sps:$4 sm:$0xff]  }
 0x498   : > { %7248 = vmatprep.subr.bf16.mxu1 %v19370_v16  ;;  %17650 = vmatpush3.bf16.msra.mxu0 %v7224_v0  ;;  %v7218_v0 = vsel %vm3840_vm4, %v19415_v51, 0  ;;  %v19441_v51 = vld [vmem:[%s25084_s4 + $0x4c8] ss:$12 sps:$4 sm:$0xff]  }
 0x499   : > { %7842 = vmatprep.subr.bf16.mxu0 %v19373_v29  ;;  %v19419_v29 = vld [vmem:[%s25084_s4 + $0x458] ss:$12 sps:$4 sm:$0xff]  }
 0x49b   : > { %7249 = vmatpush1.bf16.msra.mxu1 %v19368_v39  ;;  %v19412_v39 = vld [vmem:[%s25084_s4 + $0x438] ss:$12 sps:$4 sm:$0xff]  }
 0x49c   : > { %7250 = vmatprep.subr.bf16.mxu1 %v19376_v46  ;;  %v19418_v46 = vld [vmem:[%s25084_s4 + $0x454] ss:$12 sps:$4 sm:$0xff]  }
 0x49e   : > { %17652 = vmatmul.mubr.msk.bf16.vlgmr.msra.gmra.mrb[60].mxu0 %vm5586_vm9, %v22237_v56 }
 0x49f   : > { %7843 = vmatpush1.bf16.msra.mxu0 %v19371_v12  ;;  %7251 = vmatpush1.bf16.msra.mxu1 %v19374_v49 }
 0x4a0   : > { %7874 = vmatprep.mubr.bf16.mxu0 %v22839_v35  ;;  %7844 = vmatprep.subr.bf16.mxu0 %v19379_v30 }
 0x4a1   : > { %7252 = vmatprep.subr.bf16.mxu1 %v19382_v62 }
 0x4a3   : > { %7845 = vmatpush1.bf16.msra.mxu0 %v19377_v53  ;;  %7253 = vmatpush1.bf16.msra.mxu1 %v19380_v33  ;;  %v19420_v53 = vld [vmem:[%s25084_s4 + $0x398] ss:$12 sps:$4 sm:$0xff]  }
 0x4a4   : > { %7846 = vmatprep.subr.bf16.mxu0 %v19385_v57  ;;  %7254 = vmatprep.subr.bf16.mxu1 %v19388_v9  ;;  %v19423_v57 = vld [vmem:[%s25084_s4 + $0x46c] ss:$12 sps:$4 sm:$0xff]   ;;  %v19424_v9 = vld [vmem:[%s25084_s4 + $0x470] ss:$12 sps:$4 sm:$0xff]  }
 0x4a7   : > { %7847 = vmatpush1.bf16.msra.mxu0 %v19383_v11  ;;  %7255 = vmatpush1.bf16.msra.mxu1 %v19386_v37  ;;  %v19421_v37 = vld [vmem:[%s25084_s4 + $0x468] ss:$12 sps:$4 sm:$0xff]  }
 0x4a8   : > { %7848 = vmatprep.subr.bf16.mxu0 %v19391_v47  ;;  %7256 = vmatprep.subr.bf16.mxu1 %v19394_v3  ;;  %v19425_v47 = vld [vmem:[%s25084_s4 + $0x3b0] ss:$12 sps:$4 sm:$0xff]  }
 0x4a9   : > { %v19428_v3 = vld [vmem:[%s25084_s4 + $0x484] ss:$12 sps:$4 sm:$0xff]  }
 0x4ab   : > { %7849 = vmatpush1.bf16.msra.mxu0 %v19389_v38  ;;  %7257 = vmatpush1.bf16.msra.mxu1 %v19392_v6  ;;  %v19429_v38 = vld [vmem:[%s25084_s4 + $0x488] ss:$12 sps:$4 sm:$0xff]   ;;  %v19426_v6 = vld [vmem:[%s25084_s4 + $0x480] ss:$12 sps:$4 sm:$0xff]  }
 0x4ac   : > { %7850 = vmatprep.subr.bf16.mxu0 %v19397_v26  ;;  %7279 = vmatprep.subr.bf16.mxu1 %v19400_v59  ;;  %v19430_v26 = vld [vmem:[%s25084_s4 + $0x3c8] ss:$12 sps:$4 sm:$0xff]  }
 0x4ad   : > { %v19433_v59 = vld [vmem:[%s25084_s4 + $0x49c] ss:$12 sps:$4 sm:$0xff]  }
 0x4ae   : > { %7259 = vmatmul.mubr.bf16.vlgmr.msra.gmra.mrb[44].mxu1 %v22179_v8 }
 0x4af   : > { %7851 = vmatpush1.bf16.msra.mxu0 %v19395_v63  ;;  %7268 = vmatprep.mubr.bf16.mxu1 %v22202_v50  ;;  %v19434_v63 = vld [vmem:[%s25084_s4 + $0x4a0] ss:$12 sps:$4 sm:$0xff]  }
 0x4b0   : > { %7852 = vmatprep.subr.bf16.mxu0 %v19403_v19  ;;  %7280 = vmatpush1.bf16.msra.mxu1 %v19398_v18  ;;  %v19431_v18 = vld [vmem:[%s25084_s4 + $0x498] ss:$12 sps:$4 sm:$0xff]   ;;  %v19435_v19 = vld [vmem:[%s25084_s4 + $0x3e0] ss:$12 sps:$4 sm:$0xff]  }
 0x4b1   : > { %v16979_v58 = vpop.f32.mrb[32].mxu1  ;;  %7281 = vmatprep.subr.bf16.mxu1 %v19406_v20  ;;  %v19438_v20 = vld [vmem:[%s25084_s4 + $0x4b4] ss:$12 sps:$4 sm:$0xff]  }
 0x4b2   : > { %v16980_v31 = vpop.f32.mrb[33].mxu1 }
 0x4b3   : > { %7853 = vmatpush1.bf16.msra.mxu0 %v19401_v17  ;;  %v22907_v48 = vadd.f32 %v16980_v31, %v16979_v58  ;;  %v16982_v34 = vpop.f32.mrb[34].mxu1  ;;  %v19439_v17 = vld [vmem:[%s25084_s4 + $0x4b8] ss:$12 sps:$4 sm:$0xff]   ;;  %v19444_v58 = vld [vmem:[%s25084_s4 + $0x4d0] ss:$12 sps:$4 sm:$0xff]  }
 0x4b4   : > { %7854 = vmatprep.subr.bf16.mxu0 %v19409_v4  ;;  %7282 = vmatpush1.bf16.msra.mxu1 %v19404_v24  ;;  %v16983_v42 = vpop.f32.mrb[35].mxu1  ;;  %v19436_v24 = vld [vmem:[%s25084_s4 + $0x4b0] ss:$12 sps:$4 sm:$0xff]   ;;  %v19440_v4 = vld [vmem:[%s25084_s4 + $0x3f8] ss:$12 sps:$4 sm:$0xff]  }
 0x4b5   : > { %v22915_v16 = vadd.f32 %v16983_v42, %v16982_v34  ;;  %15592 = vmatprep.subr.msk.bf16.mxu1 %vm3840_vm4, %v19410_v61  ;;  %v19443_v61 = vld [vmem:[%s25084_s4 + $0x4cc] ss:$12 sps:$4 sm:$0xff]   ;;  %v19445_v31 = vld [vmem:[%s25084_s4 + $0x410] ss:$12 sps:$4 sm:$0xff]   ;;  %v19449_v34 = vld [vmem:[%s25084_s4 + $0x4e8] ss:$12 sps:$4 sm:$0xff]  }
 0x4b6   : > { %7269 = vmatmul.mubr.bf16.gmra.mrb[48].mxu1 %v22198_v32  ;;  %v19446_v42 = vld [vmem:[%s25084_s4 + $0x4e0] ss:$12 sps:$4 sm:$0xff]  }
 0x4b7   : > { %7855 = vmatpush1.bf16.msra.mxu0 %v19407_v23  ;;  %7311 = vmatprep.mubr.bf16.mxu1 %v20082_v1  ;;  %v19448_v23 = vld [vmem:[%s25084_s4 + $0x4e4] ss:$12 sps:$4 sm:$0xff]  }
 0x4b8   : > { %7856 = vmatprep.subr.bf16.mxu0 %v19414_v22  ;;  %7284 = vmatpush1.bf16.msra.mxu1 %v7218_v0  ;;  %v19450_v22 = vld [vmem:[%s25084_s4 + $0x428] ss:$12 sps:$4 sm:$0xff]  }
 0x4b9   : > { %v16985_v12 = vpop.f32.mrb[36].mxu1  ;;  %17095 = vmatprep.subr.bf16.mxu1 %v19419_v29  ;;  %v19453_v0 = vld [vmem:[%s25084_s4 + $0x4fc] ss:$12 sps:$4 sm:$0xff]   ;;  %v19454_v29 = vld [vmem:[%s25084_s4 + $0x500] ss:$12 sps:$4 sm:$0xff]  }
 0x4ba   : > { %v16986_v49 = vpop.f32.mrb[37].mxu1 }
 0x4bb   : > { %7857 = vmatpush1.bf16.msra.mxu0 %v19412_v39  ;;  %v22930_v30 = vadd.f32 %v16986_v49, %v16985_v12  ;;  %v16988_v62 = vpop.f32.mrb[38].mxu1  ;;  %v19451_v39 = vld [vmem:[%s25084_s4 + $0x4f8] ss:$12 sps:$4 sm:$0xff]   ;;  %v19458_v12 = vld [vmem:[%s25084_s4 + $0x514] ss:$12 sps:$4 sm:$0xff]  }
 0x4bc   : > { %7858 = vmatprep.subr.bf16.mxu0 %v19418_v46  ;;  %v16989_v33 = vpop.f32.mrb[39].mxu1  ;;  %v19455_v46 = vld [vmem:[%s25084_s4 + $0x440] ss:$12 sps:$4 sm:$0xff]   ;;  %v19459_v49 = vld [vmem:[%s25084_s4 + $0x518] ss:$12 sps:$4 sm:$0xff]  }
 0x4bd   : > { %v22944_v11 = vadd.f32 %v16989_v33, %v16988_v62  ;;  %v7513_v62 = vrot.slane %v22179_v8, 1 }
 0x4be   : > { %15593 = vmatmul.mubr.msk.bf16.vlgmr.msra.gmra.mrb[44].mxu1 %vm5586_vm9, %v22210_v45 }
 0x4bf   : > { %7859 = vmatpush1.bf16.msra.mxu0 %v19416_v40  ;;  %17096 = vmatpush3.bf16.msra.mxu1 %v19420_v53  ;;  %v23037_v40 = vrot.slane %v22198_v32, 1  ;;  %v19456_v53 = vld [vmem:[%s25084_s4 + $0x510] ss:$12 sps:$4 sm:$0xff]  }
 0x4c0   : > { %7860 = vmatprep.subr.bf16.mxu0 %v19423_v57  ;;  %17097 = vmatprep.subr.bf16.mxu1 %v19424_v9  ;;  %v19462_v57 = vld [vmem:[%s25084_s4 + $0x52c] ss:$12 sps:$4 sm:$0xff]   ;;  %v19463_v9 = vld [vmem:[%s25084_s4 + $0x530] ss:$12 sps:$4 sm:$0xff]  }
 0x4c1   : > { %7321 = vmatprep.mubr.bf16.mxu1 %v20082_v1  ;;  %v23045_v33 = vsel %vm2150_vm3, %v7513_v62, %v23037_v40  ;;  %v19477_v62 = vld [vmem:[%s25084_s4 + $0xc98] ss:$12 sps:$4 sm:$0xff]  }
 0x4c3   : > { %7861 = vmatpush1.bf16.msra.mxu0 %v19421_v37  ;;  %17098 = vmatpush3.bf16.msra.mxu1 %v19425_v47  ;;  %v19460_v37 = vld [vmem:[%s25084_s4 + $0x528] ss:$12 sps:$4 sm:$0xff]   ;;  %v19464_v47 = vld [vmem:[%s25084_s4 + $0x544] ss:$12 sps:$4 sm:$0x3f]  }
 0x4c4   : > { %7862 = vmatprep.subr.bf16.mxu0 %v19428_v3  ;;  %17099 = vmatprep.subr.bf16.mxu1 %v19429_v38  ;;  %v19466_v3 = vld [vmem:[%s25084_s4 + $0x548] ss:$12 sps:$4 sm:$0x3f]  }
 0x4c6   : > { %15594 = vmatmul.mubr.msk.bf16.gmra.mrb[48].mxu1 %vm5586_vm9, %v22237_v56 }
 0x4c7   : > { %7863 = vmatpush1.bf16.msra.mxu0 %v19426_v6  ;;  %17100 = vmatpush3.bf16.msra.mxu1 %v19430_v26  ;;  %v19467_v6 = vld [vmem:[%s25084_s4 + $0x540] ss:$12 sps:$4 sm:$0x3f]  }
 0x4c8   : > { %7980 = vmatprep.mubr.bf16.mxu1 %v22839_v35  ;;  %7864 = vmatprep.subr.bf16.mxu0 %v19433_v59  ;;  %v7519_v59 = vrot.slane %v22210_v45, 1 }
 0x4c9   : > { %17101 = vmatprep.subr.bf16.mxu1 %v19434_v63  ;;  %v23071_v63 = vrot.slane %v22237_v56, 1 }
 0x4cb   : > { %7865 = vmatpush1.bf16.msra.mxu0 %v19431_v18  ;;  %17102 = vmatpush3.bf16.msra.mxu1 %v19435_v19 }
 0x4cc   : > { %7866 = vmatprep.subr.bf16.mxu0 %v19438_v20  ;;  %17103 = vmatprep.subr.bf16.mxu1 %v19439_v17 }
 0x4cf   : > { %7867 = vmatpush1.bf16.msra.mxu0 %v19436_v24  ;;  %17104 = vmatpush3.bf16.msra.mxu1 %v19440_v4  ;;  %v7834_v24 = vsel %vm3840_vm4, %v19467_v6, 0  ;;  %v7840_v4 = vsel %vm3840_vm4, %v19466_v3, 0  ;;  %v19487_v6 = vld [vmem:[%s25084_s4 + $0xcc8] ss:$12 sps:$4 sm:$0xff]  }
 0x4d0   : > { %7868 = vmatprep.subr.bf16.mxu0 %v19443_v61  ;;  %17105 = vmatprep.subr.bf16.mxu1 %v19444_v58  ;;  %v19470_v61 = vld [vmem:[%s25084_s4 + $0xc7c] ss:$12 sps:$4 sm:$0xff]   ;;  %v19471_v58 = vld [vmem:[%s25084_s4 + $0xd40] ss:$12 sps:$4 sm:$0xff]  }
 0x4d3   : > { %7869 = vmatpush1.bf16.msra.mxu0 %v19441_v51  ;;  %17106 = vmatpush3.bf16.msra.mxu1 %v19445_v31  ;;  %v23091_v51 = vsel %vm2150_vm3, %v7519_v59, %v23071_v63  ;;  %v19491_v59 = vld [vmem:[%s25084_s4 + $0xda0] ss:$12 sps:$4 sm:$0xff]  }
 0x4d4   : > { %7870 = vmatprep.subr.bf16.mxu0 %v19448_v23  ;;  %17107 = vmatprep.subr.bf16.mxu1 %v19449_v34 }
 0x4d7   : > { %7871 = vmatpush1.bf16.msra.mxu0 %v19446_v42  ;;  %17108 = vmatpush3.bf16.msra.mxu1 %v19450_v22  ;;  %v19468_v42 = vld [vmem:[%s25084_s4 + $0xc78] ss:$12 sps:$4 sm:$0xff]  }
 0x4d8   : > { %7872 = vmatprep.subr.bf16.mxu0 %v19453_v0  ;;  %17109 = vmatprep.subr.bf16.mxu1 %v19454_v29  ;;  %v19472_v0 = vld [vmem:[%s25084_s4 + $0xc80] ss:$12 sps:$4 sm:$0xff]  }
 0x4db   : > { %7873 = vmatpush1.bf16.msra.mxu0 %v19451_v39  ;;  %17110 = vmatpush3.bf16.msra.mxu1 %v19455_v46  ;;  %v19475_v39 = vld [vmem:[%s25084_s4 + $0xc94] ss:$12 sps:$4 sm:$0xff]  }
 0x4dc   : > { %7895 = vmatprep.subr.bf16.mxu0 %v19458_v12  ;;  %17655 = vmatprep.subr.bf16.mxu1 %v19459_v49  ;;  %v19476_v12 = vld [vmem:[%s25084_s4 + $0xd58] ss:$12 sps:$4 sm:$0xff]  }
 0x4de   : > { %7875 = vmatmul.mubr.bf16.vlgmr.msra.gmra.mrb[44].mxu0 %v23045_v33  ;;  %7981 = vmatmul.mubr.bf16.vlgmr.msra.gmra.mrb[60].mxu1 %v23045_v33 }
 0x4df   : > { %7884 = vmatprep.mubr.bf16.mxu0 %v22826_v52  ;;  %7988 = vmatprep.mubr.bf16.mxu1 %v22826_v52 }
 0x4e0   : > { %7896 = vmatpush1.bf16.msra.mxu0 %v19456_v53  ;;  %17656 = vmatpush3.bf16.msra.mxu1 %v19459_v49  ;;  %v19473_v49 = vld [vmem:[%s25084_s4 + $0xc90] ss:$12 sps:$4 sm:$0xff]   ;;  %v19480_v53 = vld [vmem:[%s25084_s4 + $0xcac] ss:$12 sps:$4 sm:$0xff]  }
 0x4e1   : > { %v17012_v38 = vpop.f32.mrb[52].mxu0  ;;  %7897 = vmatprep.subr.bf16.mxu0 %v19462_v57  ;;  %17657 = vmatprep.subr.bf16.mxu1 %v19463_v9  ;;  %v19481_v57 = vld [vmem:[%s25084_s4 + $0xd70] ss:$12 sps:$4 sm:$0xff]  }
 0x4e2   : > { %v17013_v26 = vpop.f32.mrb[53].mxu0 }
 0x4e3   : > { %v23073_v18 = vadd.f32 %v17013_v26, %v17012_v38  ;;  %v17015_v19 = vpop.f32.mrb[54].mxu0  ;;  %v19483_v38 = vld [vmem:[%s25084_s4 + $0xcc0] ss:$12 sps:$4 sm:$0xff]   ;;  %v19490_v26 = vld [vmem:[%s25084_s4 + $0xcdc] ss:$12 sps:$4 sm:$0xff]  }
 0x4e4   : > { %7898 = vmatpush1.bf16.msra.mxu0 %v19460_v37  ;;  %17658 = vmatpush3.bf16.msra.mxu1 %v19463_v9  ;;  %v17016_v20 = vpop.f32.mrb[55].mxu0  ;;  %v19478_v9 = vld [vmem:[%s25084_s4 + $0xca8] ss:$12 sps:$4 sm:$0xff]   ;;  %v19482_v37 = vld [vmem:[%s25084_s4 + $0xcb0] ss:$12 sps:$4 sm:$0xff]  }
 0x4e5   : > { %v23075_v17 = vadd.f32 %v17016_v20, %v17015_v19  ;;  %15730 = vmatprep.subr.msk.bf16.mxu0 %vm3840_vm4, %v19464_v47  ;;  %18558 = vmatprep.subr.msk.bf16.mxu1 %vm3840_vm4, %v19466_v3  ;;  %v19485_v47 = vld [vmem:[%s25084_s4 + $0xcc4] ss:$12 sps:$4 sm:$0xff]   ;;  %v19486_v3 = vld [vmem:[%s25084_s4 + $0xd88] ss:$12 sps:$4 sm:$0xff]  }
 0x4e6   : > { %7885 = vmatmul.mubr.bf16.gmra.mrb[48].mxu0 %v23037_v40  ;;  %7989 = vmatmul.mubr.bf16.gmra.mrb[64].mxu1 %v23037_v40  ;;  %v19488_v19 = vld [vmem:[%s25084_s4 + $0xcd8] ss:$12 sps:$4 sm:$0xff]   ;;  %v19495_v20 = vld [vmem:[%s25084_s4 + $0xcf4] ss:$12 sps:$4 sm:$0xff]  }
 0x4e7   : > { %17661 = vmatprep.mubr.msk.bf16.mxu1 %vm5586_vm9, %v23091_v51  ;;  %7927 = vmatprep.mubr.bf16.mxu0 %v20082_v1 }
 0x4e8   : > { %7900 = vmatpush1.bf16.msra.mxu0 %v7834_v24  ;;  %17660 = vmatpush3.bf16.msra.mxu1 %v7840_v4  ;;  %v19496_v24 = vld [vmem:[%s25084_s4 + $0xdb8] ss:$12 sps:$4 sm:$0xff]   ;;  %v19493_v4 = vld [vmem:[%s25084_s4 + $0xcf0] ss:$12 sps:$4 sm:$0xff]  }
 0x4e9   : > { %v17018_v31 = vpop.f32.mrb[56].mxu0  ;;  %8433 = vmatprep.subr.bf16.mxu1 %v19470_v61  ;;  %17128 = vmatprep.subr.bf16.mxu0 %v19471_v58  ;;  %v19497_v61 = vld [vmem:[%s25084_s4 + $0xcf8] ss:$12 sps:$4 sm:$0xff]  }
 0x4ea   : > { %v17019_v23 = vpop.f32.mrb[57].mxu0  ;;  %v19500_v58 = vld [vmem:[%s25084_s4 + $0xd0c] ss:$12 sps:$4 sm:$0xff]  }
 0x4eb   : > { %v23096_v34 = vadd.f32 %v17019_v23, %v17018_v31  ;;  %v17021_v22 = vpop.f32.mrb[58].mxu0  ;;  %v19501_v31 = vld [vmem:[%s25084_s4 + $0xdd0] ss:$12 sps:$4 sm:$0xff]   ;;  %v19498_v23 = vld [vmem:[%s25084_s4 + $0xd08] ss:$12 sps:$4 sm:$0xff]  }
 0x4ec   : > { %v17022_v29 = vpop.f32.mrb[59].mxu0 }
 0x4ed   : > { %v23107_v46 = vadd.f32 %v17022_v29, %v17021_v22  ;;  %v19505_v22 = vld [vmem:[%s25084_s4 + $0xd24] ss:$12 sps:$4 sm:$0xff]   ;;  %v19503_v29 = vld [vmem:[%s25084_s4 + $0xd20] ss:$12 sps:$4 sm:$0xff]  }
 0x4ee   : > { %15731 = vmatmul.mubr.msk.bf16.vlgmr.msra.gmra.mrb[44].mxu0 %vm5586_vm9, %v23091_v51  ;;  %17662 = vmatmul.mubr.msk.bf16.vlgmr.msra.gmra.mrb[40].mxu1 %vm5586_vm9, %v23071_v63 }
 0x4ef   : > { %8434 = vmatpush1.bf16.msra.mxu1 %v19468_v42  ;;  %17129 = vmatpush3.bf16.msra.mxu0 %v19472_v0  ;;  %v19502_v42 = vld [vmem:[%s25084_s4 + $0xd10] ss:$12 sps:$4 sm:$0xff]   ;;  %v19506_v0 = vld [vmem:[%s25084_s4 + $0xde8] ss:$12 sps:$4 sm:$0xff]  }
 0x4f0   : > { %8465 = vmatprep.mubr.bf16.mxu1 %v22839_v35  ;;  %8435 = vmatprep.subr.bf16.mxu1 %v19475_v39  ;;  %v19507_v39 = vld [vmem:[%s25084_s4 + $0xd28] ss:$12 sps:$4 sm:$0xff]  }
 0x4f1   : > { %17130 = vmatprep.subr.bf16.mxu0 %v19476_v12  ;;  %7937 = vmatprep.mubr.bf16.mxu0 %v20082_v1  ;;  %v19510_v12 = vld [vmem:[%s25084_s4 + $0xd3c] ss:$12 sps:$4 sm:$0xff]  }
 0x4f3   : > { %8436 = vmatpush1.bf16.msra.mxu1 %v19473_v49  ;;  %17131 = vmatpush3.bf16.msra.mxu0 %v19477_v62  ;;  %v19511_v49 = vld [vmem:[%s25084_s4 + $0xe00] ss:$12 sps:$4 sm:$0xff]   ;;  %v19508_v62 = vld [vmem:[%s25084_s4 + $0xd38] ss:$12 sps:$4 sm:$0xff]  }
 0x4f4   : > { %8437 = vmatprep.subr.bf16.mxu1 %v19480_v53  ;;  %17132 = vmatprep.subr.bf16.mxu0 %v19481_v57  ;;  %v19514_v53 = vld [vmem:[%s25084_s4 + $0xd54] ss:$12 sps:$4 sm:$0xff]   ;;  %v19515_v57 = vld [vmem:[%s25084_s4 + $0xe18] ss:$12 sps:$4 sm:$0xff]  }
 0x4f6   : > { %15732 = vmatmul.mubr.msk.bf16.gmra.mrb[48].mxu0 %vm5586_vm9, %v23071_v63 }
 0x4f7   : > { %8438 = vmatpush1.bf16.msra.mxu1 %v19478_v9  ;;  %17133 = vmatpush3.bf16.msra.mxu0 %v19482_v37  ;;  %v19512_v9 = vld [vmem:[%s25084_s4 + $0xd50] ss:$12 sps:$4 sm:$0xff]   ;;  %v19518_v37 = vld [vmem:[%s25084_s4 + $0xd6c] ss:$12 sps:$4 sm:$0xff]  }
 0x4f8   : > { %8571 = vmatprep.mubr.bf16.mxu0 %v22839_v35  ;;  %8439 = vmatprep.subr.bf16.mxu1 %v19485_v47  ;;  %v19492_v35 = vld [vmem:[%s25084_s4 + $0xce0] ss:$12 sps:$4 sm:$0xff]   ;;  %v19519_v47 = vld [vmem:[%s25084_s4 + $0xe30] ss:$12 sps:$4 sm:$0x3f]  }
 0x4f9   : > { %17134 = vmatprep.subr.bf16.mxu0 %v19486_v3  ;;  %v19516_v3 = vld [vmem:[%s25084_s4 + $0xd68] ss:$12 sps:$4 sm:$0xff]  }
 0x4fb   : > { %8440 = vmatpush1.bf16.msra.mxu1 %v19483_v38  ;;  %17135 = vmatpush3.bf16.msra.mxu0 %v19487_v6  ;;  %v19522_v38 = vld [vmem:[%s25084_s4 + $0xd84] ss:$12 sps:$4 sm:$0xff]   ;;  %v8431_v6 = vsel %vm3840_vm4, %v19519_v47, 0 }
 0x4fc   : > { %8441 = vmatprep.subr.bf16.mxu1 %v19490_v26  ;;  %17136 = vmatprep.subr.bf16.mxu0 %v19491_v59  ;;  %v19525_v26 = vld [vmem:[%s25084_s4 + $0x55c] ss:$12 sps:$4 sm:$0xff]   ;;  %v19520_v59 = vld [vmem:[%s25084_s4 + $0xd80] ss:$12 sps:$4 sm:$0xff]  }
 0x4ff   : > { %8442 = vmatpush1.bf16.msra.mxu1 %v19488_v19  ;;  %17137 = vmatpush3.bf16.msra.mxu0 %v19492_v35  ;;  %v19528_v19 = vld [vmem:[%s25084_s4 + $0xd9c] ss:$12 sps:$4 sm:$0xff]   ;;  %v19523_v35 = vld [vmem:[%s25084_s4 + $0x558] ss:$12 sps:$4 sm:$0xff]  }
 0x500   : > { %8443 = vmatprep.subr.bf16.mxu1 %v19495_v20  ;;  %17138 = vmatprep.subr.bf16.mxu0 %v19496_v24  ;;  %v19526_v20 = vld [vmem:[%s25084_s4 + $0xd98] ss:$12 sps:$4 sm:$0xff]   ;;  %v19531_v24 = vld [vmem:[%s25084_s4 + $0x574] ss:$12 sps:$4 sm:$0xff]  }
 0x503   : > { %8444 = vmatpush1.bf16.msra.mxu1 %v19493_v4  ;;  %17139 = vmatpush3.bf16.msra.mxu0 %v19497_v61  ;;  %v19534_v4 = vld [vmem:[%s25084_s4 + $0xdb4] ss:$12 sps:$4 sm:$0xff]   ;;  %v23264_v61 = vsel %vm2987_vm2, %v8747_v10, %v22227_v44 }
 0x504   : > { %8445 = vmatprep.subr.bf16.mxu1 %v19500_v58  ;;  %17140 = vmatprep.subr.bf16.mxu0 %v19501_v31  ;;  %v19529_v58 = vld [vmem:[%s25084_s4 + $0x570] ss:$12 sps:$4 sm:$0xff]   ;;  %v19538_v10 = vld [vmem:[%s25084_s4 + $0xdc8] ss:$12 sps:$4 sm:$0xff]  }
 0x505   : > { %v19532_v31 = vld [vmem:[%s25084_s4 + $0xdb0] ss:$12 sps:$4 sm:$0xff]  }
 0x507   : > { %8446 = vmatpush1.bf16.msra.mxu1 %v19498_v23  ;;  %17141 = vmatpush3.bf16.msra.mxu0 %v19502_v42  ;;  %v19537_v23 = vld [vmem:[%s25084_s4 + $0x58c] ss:$12 sps:$4 sm:$0xff]   ;;  %v19543_v42 = vld [vmem:[%s25084_s4 + $0x5a4] ss:$12 sps:$4 sm:$0xff]  }
 0x508   : > { %8447 = vmatprep.subr.bf16.mxu1 %v19505_v22  ;;  %17142 = vmatprep.subr.bf16.mxu0 %v19506_v0  ;;  %v19546_v22 = vld [vmem:[%s25084_s4 + $0xde4] ss:$12 sps:$4 sm:$0xff]   ;;  %v19541_v0 = vld [vmem:[%s25084_s4 + $0x5a0] ss:$12 sps:$4 sm:$0xff]  }
 0x50b   : > { %8448 = vmatpush1.bf16.msra.mxu1 %v19503_v29  ;;  %17143 = vmatpush3.bf16.msra.mxu0 %v19507_v39  ;;  %v19544_v29 = vld [vmem:[%s25084_s4 + $0xde0] ss:$12 sps:$4 sm:$0xff]   ;;  %v19549_v39 = vld [vmem:[%s25084_s4 + $0x5bc] ss:$12 sps:$4 sm:$0xff]  }
 0x50c   : > { %8449 = vmatprep.subr.bf16.mxu1 %v19510_v12  ;;  %17665 = vmatprep.subr.bf16.mxu0 %v19511_v49  ;;  %v19552_v12 = vld [vmem:[%s25084_s4 + $0xdfc] ss:$12 sps:$4 sm:$0xff]  }
 0x50e   : > { %8572 = vmatmul.mubr.bf16.vlgmr.msra.gmra.mrb[72].mxu0 %v23045_v33 }
 0x50f   : > { %8450 = vmatpush1.bf16.msra.mxu1 %v19508_v62  ;;  %8579 = vmatprep.mubr.bf16.mxu0 %v22826_v52  ;;  %v19550_v62 = vld [vmem:[%s25084_s4 + $0xdf8] ss:$12 sps:$4 sm:$0xff]  }
 0x510   : > { %8451 = vmatprep.subr.bf16.mxu1 %v19514_v53  ;;  %17666 = vmatpush3.bf16.msra.mxu0 %v19511_v49  ;;  %v19547_v49 = vld [vmem:[%s25084_s4 + $0x5b8] ss:$12 sps:$4 sm:$0xff]   ;;  %v19555_v53 = vld [vmem:[%s25084_s4 + $0x5d4] ss:$12 sps:$4 sm:$0xff]  }
 0x511   : > { %17667 = vmatprep.subr.bf16.mxu0 %v19515_v57 }
 0x513   : > { %8452 = vmatpush1.bf16.msra.mxu1 %v19512_v9  ;;  %v19553_v9 = vld [vmem:[%s25084_s4 + $0x5d0] ss:$12 sps:$4 sm:$0xff]  }
 0x514   : > { %8453 = vmatprep.subr.bf16.mxu1 %v19518_v37  ;;  %17668 = vmatpush3.bf16.msra.mxu0 %v19515_v57  ;;  %v19558_v57 = vld [vmem:[%s25084_s4 + $0xe14] ss:$12 sps:$4 sm:$0xff]   ;;  %v19561_v37 = vld [vmem:[%s25084_s4 + $0x5ec] ss:$12 sps:$4 sm:$0xff]  }
 0x515   : > { %18559 = vmatprep.subr.msk.bf16.mxu0 %vm3840_vm4, %v19519_v47  ;;  %v19556_v47 = vld [vmem:[%s25084_s4 + $0xe10] ss:$12 sps:$4 sm:$0xff]  }
 0x516   : > { %8580 = vmatmul.mubr.bf16.gmra.mrb[76].mxu0 %v23037_v40 }
 0x517   : > { %8454 = vmatpush1.bf16.msra.mxu1 %v19516_v3  ;;  %17671 = vmatprep.mubr.msk.bf16.mxu0 %vm5586_vm9, %v23091_v51 }
 0x518   : > { %8455 = vmatprep.subr.bf16.mxu1 %v19522_v38  ;;  %17670 = vmatpush3.bf16.msra.mxu0 %v8431_v6 }
 0x519   : > { %9079 = vmatprep.subr.bf16.mxu0 %v19525_v26  ;;  %v19559_v26 = vld [vmem:[%s25084_s4 + $0x5e8] ss:$12 sps:$4 sm:$0xff]  }
 0x51b   : > { %8456 = vmatpush1.bf16.msra.mxu1 %v19520_v59 }
 0x51c   : > { %8457 = vmatprep.subr.bf16.mxu1 %v19528_v19 }
 0x51e   : > { %17672 = vmatmul.mubr.msk.bf16.vlgmr.msra.gmra.mrb[60].mxu0 %vm5586_vm9, %v23071_v63 }
 0x51f   : > { %9080 = vmatpush1.bf16.msra.mxu0 %v19523_v35  ;;  %8458 = vmatpush1.bf16.msra.mxu1 %v19526_v20  ;;  %v19566_v35 = vld [vmem:[%s25084_s4 + $0x604] ss:$12 sps:$4 sm:$0xff]  }
 0x520   : > { %9111 = vmatprep.mubr.bf16.mxu0 %v23264_v61  ;;  %9081 = vmatprep.subr.bf16.mxu0 %v19531_v24 }
 0x521   : > { %8459 = vmatprep.subr.bf16.mxu1 %v19534_v4 }
 0x523   : > { %9082 = vmatpush1.bf16.msra.mxu0 %v19529_v58  ;;  %8460 = vmatpush1.bf16.msra.mxu1 %v19532_v31  ;;  %v19571_v58 = vld [vmem:[%s25084_s4 + $0x620] ss:$12 sps:$4 sm:$0xff]  }
 0x524   : > { %9083 = vmatprep.subr.bf16.mxu0 %v19537_v23  ;;  %8461 = vmatprep.subr.bf16.mxu1 %v19540_v7  ;;  %v19570_v23 = vld [vmem:[%s25084_s4 + $0x61c] ss:$12 sps:$4 sm:$0xff]  }
 0x527   : > { %9084 = vmatpush1.bf16.msra.mxu0 %v19535_v14  ;;  %8462 = vmatpush1.bf16.msra.mxu1 %v19538_v10 }
 0x528   : > { %9085 = vmatprep.subr.bf16.mxu0 %v19543_v42  ;;  %8463 = vmatprep.subr.bf16.mxu1 %v19546_v22  ;;  %v19572_v42 = vld [vmem:[%s25084_s4 + $0x560] ss:$12 sps:$4 sm:$0xff]  }
 0x52b   : > { %9086 = vmatpush1.bf16.msra.mxu0 %v19541_v0  ;;  %8464 = vmatpush1.bf16.msra.mxu1 %v19544_v29  ;;  %v19575_v0 = vld [vmem:[%s25084_s4 + $0x634] ss:$12 sps:$4 sm:$0xff]   ;;  %v19576_v29 = vld [vmem:[%s25084_s4 + $0x638] ss:$12 sps:$4 sm:$0xff]  }
 0x52c   : > { %9087 = vmatprep.subr.bf16.mxu0 %v19549_v39  ;;  %8486 = vmatprep.subr.bf16.mxu1 %v19552_v12 }
 0x52e   : > { %8466 = vmatmul.mubr.bf16.vlgmr.msra.gmra.mrb[44].mxu1 %v23045_v33  ;;  %v19562_v33 = vld [vmem:[%s25084_s4 + $0xe2c] ss:$12 sps:$4 sm:$0x3f]  }
 0x52f   : > { %9088 = vmatpush1.bf16.msra.mxu0 %v19547_v49  ;;  %8475 = vmatprep.mubr.bf16.mxu1 %v22826_v52  ;;  %v19567_v52 = vld [vmem:[%s25084_s4 + $0xe28] ss:$12 sps:$4 sm:$0x3f]  }
 0x530   : > { %9089 = vmatprep.subr.bf16.mxu0 %v19555_v53  ;;  %8487 = vmatpush1.bf16.msra.mxu1 %v19550_v62  ;;  %v8425_v4 = vsel %vm3840_vm4, %v19567_v52, 0  ;;  %v19573_v62 = vld [vmem:[%s25084_s4 + $0x630] ss:$12 sps:$4 sm:$0xff]   ;;  %v19577_v53 = vld [vmem:[%s25084_s4 + $0x578] ss:$12 sps:$4 sm:$0xff]  }
 0x531   : > { %v17045_v3 = vpop.f32.mrb[52].mxu1  ;;  %8488 = vmatprep.subr.bf16.mxu1 %v19558_v57  ;;  %v19582_v57 = vld [vmem:[%s25084_s4 + $0x590] ss:$12 sps:$4 sm:$0xff]   ;;  %v19588_v52 = vld [vmem:[%s25084_s4 + $0x678] ss:$12 sps:$4 sm:$0xff]  }
 0x532   : > { %v17046_v38 = vpop.f32.mrb[53].mxu1 }
 0x533   : > { %9090 = vmatpush1.bf16.msra.mxu0 %v19553_v9  ;;  %v17047_v6 = vadd.f32 %v17046_v38, %v17045_v3  ;;  %v17048_v59 = vpop.f32.mrb[54].mxu1  ;;  %v19585_v9 = vld [vmem:[%s25084_s4 + $0x664] ss:$12 sps:$4 sm:$0xff]   ;;  %v19590_v3 = vld [vmem:[%s25084_s4 + $0x67c] ss:$12 sps:$4 sm:$0xff]  }
 0x534   : > { %9091 = vmatprep.subr.bf16.mxu0 %v19561_v37  ;;  %8489 = vmatpush1.bf16.msra.mxu1 %v19556_v47  ;;  %v17049_v19 = vpop.f32.mrb[55].mxu1  ;;  %v19586_v37 = vld [vmem:[%s25084_s4 + $0x668] ss:$12 sps:$4 sm:$0xff]   ;;  %v19583_v47 = vld [vmem:[%s25084_s4 + $0x660] ss:$12 sps:$4 sm:$0xff]  }
 0x535   : > { %v23339_v20 = vadd.f32 %v17047_v6, %v22907_v48  ;;  %v17050_v24 = vadd.f32 %v17049_v19, %v17048_v59  ;;  %15868 = vmatprep.subr.msk.bf16.mxu1 %vm3840_vm4, %v19562_v33  ;;  %v19564_v48 = vld [vmem:[%s25084_s4 + $0x600] ss:$12 sps:$4 sm:$0xff]   ;;  %v19587_v33 = vld [vmem:[%s25084_s4 + $0x5a8] ss:$12 sps:$4 sm:$0xff]   ;;  %v19593_v59 = vld [vmem:[%s25084_s4 + $0x690] ss:$12 sps:$4 sm:$0xff]  }
 0x536   : > { %8476 = vmatmul.mubr.bf16.gmra.mrb[48].mxu1 %v23037_v40  ;;  %v19592_v38 = vld [vmem:[%s25084_s4 + $0x5c0] ss:$12 sps:$4 sm:$0xff]   ;;  %v19597_v19 = vld [vmem:[%s25084_s4 + $0x5d8] ss:$12 sps:$4 sm:$0xff]  }
 0x537   : > { %9092 = vmatpush1.bf16.msra.mxu0 %v19559_v26  ;;  %v23348_v31 = vadd.f32 %v17050_v24, %v22915_v16  ;;  %8518 = vmatprep.mubr.bf16.mxu1 %v20082_v1  ;;  %v19568_v16 = vld [vmem:[%s25084_s4 + $0x618] ss:$12 sps:$4 sm:$0xff]   ;;  %v19595_v6 = vld [vmem:[%s25084_s4 + $0x694] ss:$12 sps:$4 sm:$0xff]   ;;  %v19601_v24 = vld [vmem:[%s25084_s4 + $0x6b0] ss:$12 sps:$4 sm:$0xff]  }
 0x538   : > { %9093 = vmatprep.subr.bf16.mxu0 %v19566_v35  ;;  %8491 = vmatpush1.bf16.msra.mxu1 %v8425_v4  ;;  %v19596_v26 = vld [vmem:[%s25084_s4 + $0x698] ss:$12 sps:$4 sm:$0xff]   ;;  %v19598_v4 = vld [vmem:[%s25084_s4 + $0x6a8] ss:$12 sps:$4 sm:$0xff]  }
 0x539   : > { %v17051_v7 = vpop.f32.mrb[56].mxu1  ;;  %17161 = vmatprep.subr.bf16.mxu1 %v19571_v58  ;;  %v19600_v35 = vld [vmem:[%s25084_s4 + $0x6ac] ss:$12 sps:$4 sm:$0xff]   ;;  %v19602_v58 = vld [vmem:[%s25084_s4 + $0x5f0] ss:$12 sps:$4 sm:$0xff]  }
 0x53a   : > { %v17052_v14 = vpop.f32.mrb[57].mxu1 }
 0x53b   : > { %9094 = vmatpush1.bf16.msra.mxu0 %v19564_v48  ;;  %v17053_v40 = vadd.f32 %v17052_v14, %v17051_v7  ;;  %v17054_v10 = vpop.f32.mrb[58].mxu1  ;;  %v19605_v48 = vld [vmem:[%s25084_s4 + $0x6c4] ss:$12 sps:$4 sm:$0xff]   ;;  %v19603_v7 = vld [vmem:[%s25084_s4 + $0x6c0] ss:$12 sps:$4 sm:$0xff]  }
 0x53c   : > { %9095 = vmatprep.subr.bf16.mxu0 %v19570_v23  ;;  %v17055_v22 = vpop.f32.mrb[59].mxu1  ;;  %v19606_v23 = vld [vmem:[%s25084_s4 + $0x6c8] ss:$12 sps:$4 sm:$0xff]  }
 0x53d   : > { %v23370_v39 = vadd.f32 %v17053_v40, %v22930_v30  ;;  %v17056_v12 = vadd.f32 %v17055_v22, %v17054_v10  ;;  %v19580_v30 = vld [vmem:[%s25084_s4 + $0x64c] ss:$12 sps:$4 sm:$0xff]   ;;  %v19607_v14 = vld [vmem:[%s25084_s4 + $0x608] ss:$12 sps:$4 sm:$0xff]  }
 0x53e   : > { %15869 = vmatmul.mubr.msk.bf16.vlgmr.msra.gmra.mrb[44].mxu1 %vm5586_vm9, %v23091_v51  ;;  %v19581_v51 = vld [vmem:[%s25084_s4 + $0x650] ss:$12 sps:$4 sm:$0xff]   ;;  %v19608_v10 = vld [vmem:[%s25084_s4 + $0x6d8] ss:$12 sps:$4 sm:$0xff]   ;;  %v19614_v22 = vld [vmem:[%s25084_s4 + $0x6f4] ss:$12 sps:$4 sm:$0xff]  }
 0x53f   : > { %9096 = vmatpush1.bf16.msra.mxu0 %v19568_v16  ;;  %17162 = vmatpush3.bf16.msra.mxu1 %v19572_v42  ;;  %v23375_v49 = vadd.f32 %v17056_v12, %v22944_v11  ;;  %v19578_v11 = vld [vmem:[%s25084_s4 + $0x648] ss:$12 sps:$4 sm:$0xff]   ;;  %v19611_v16 = vld [vmem:[%s25084_s4 + $0x6e0] ss:$12 sps:$4 sm:$0xff]   ;;  %v23473_v42 = vsel %vm2987_vm2, %v8740_v27, %v22220_v55 }
 0x540   : > { %9097 = vmatprep.subr.bf16.mxu0 %v19575_v0  ;;  %17163 = vmatprep.subr.bf16.mxu1 %v19576_v29  ;;  %v19610_v40 = vld [vmem:[%s25084_s4 + $0x6dc] ss:$12 sps:$4 sm:$0xff]   ;;  %v19615_v0 = vld [vmem:[%s25084_s4 + $0x6f8] ss:$12 sps:$4 sm:$0xff]  }
 0x541   : > { %8528 = vmatprep.mubr.bf16.mxu1 %v20082_v1  ;;  %v19618_v27 = vld [vmem:[%s25084_s4 + $0x710] ss:$12 sps:$4 sm:$0x3f]   ;;  %v19619_v12 = vld [vmem:[%s25084_s4 + $0x708] ss:$12 sps:$4 sm:$0x3f]  }
 0x543   : > { %9098 = vmatpush1.bf16.msra.mxu0 %v19573_v62  ;;  %17164 = vmatpush3.bf16.msra.mxu1 %v19577_v53 }
 0x544   : > { %9099 = vmatprep.subr.bf16.mxu0 %v19580_v30  ;;  %17165 = vmatprep.subr.bf16.mxu1 %v19581_v51 }
 0x546   : > { %15870 = vmatmul.mubr.msk.bf16.gmra.mrb[48].mxu1 %vm5586_vm9, %v23071_v63  ;;  %v19591_v63 = vld [vmem:[%s25084_s4 + $0x680] ss:$12 sps:$4 sm:$0xff]  }
 0x547   : > { %9100 = vmatpush1.bf16.msra.mxu0 %v19578_v11  ;;  %17166 = vmatpush3.bf16.msra.mxu1 %v19582_v57 }
 0x548   : > { %9217 = vmatprep.mubr.bf16.mxu1 %v23264_v61  ;;  %9101 = vmatprep.subr.bf16.mxu0 %v19585_v9  ;;  %v9071_v9 = vsel %vm3840_vm4, %v19619_v12, 0  ;;  %v19653_v12 = vld [vmem:[%s25084_s4 + $0xf98] ss:$12 sps:$4 sm:$0xff]  }
 0x549   : > { %17167 = vmatprep.subr.bf16.mxu1 %v19586_v37  ;;  %v9077_v37 = vsel %vm3840_vm4, %v19618_v27, 0 }
 0x54b   : > { %9102 = vmatpush1.bf16.msra.mxu0 %v19583_v47  ;;  %17168 = vmatpush3.bf16.msra.mxu1 %v19587_v33  ;;  %v19622_v47 = vld [vmem:[%s25084_s4 + $0xe44] ss:$12 sps:$4 sm:$0xff]   ;;  %v19623_v33 = vld [vmem:[%s25084_s4 + $0xf08] ss:$12 sps:$4 sm:$0xff]  }
 0x54c   : > { %9103 = vmatprep.subr.bf16.mxu0 %v19590_v3  ;;  %17169 = vmatprep.subr.bf16.mxu1 %v19591_v63 }
 0x54f   : > { %9104 = vmatpush1.bf16.msra.mxu0 %v19588_v52  ;;  %17170 = vmatpush3.bf16.msra.mxu1 %v19592_v38 }
 0x550   : > { %9105 = vmatprep.subr.bf16.mxu0 %v19595_v6  ;;  %17171 = vmatprep.subr.bf16.mxu1 %v19596_v26  ;;  %v19627_v6 = vld [vmem:[%s25084_s4 + $0xe5c] ss:$12 sps:$4 sm:$0xff]  }
 0x553   : > { %9106 = vmatpush1.bf16.msra.mxu0 %v19593_v59  ;;  %17172 = vmatpush3.bf16.msra.mxu1 %v19597_v19  ;;  %v19628_v19 = vld [vmem:[%s25084_s4 + $0xf20] ss:$12 sps:$4 sm:$0xff]  }
 0x554   : > { %9107 = vmatprep.subr.bf16.mxu0 %v19600_v35  ;;  %17173 = vmatprep.subr.bf16.mxu1 %v19601_v24  ;;  %v19629_v24 = vld [vmem:[%s25084_s4 + $0xe60] ss:$12 sps:$4 sm:$0xff]  }
 0x557   : > { %9108 = vmatpush1.bf16.msra.mxu0 %v19598_v4  ;;  %17174 = vmatpush3.bf16.msra.mxu1 %v19602_v58  ;;  %v19632_v4 = vld [vmem:[%s25084_s4 + $0xe74] ss:$12 sps:$4 sm:$0xff]   ;;  %v19630_v58 = vld [vmem:[%s25084_s4 + $0xe70] ss:$12 sps:$4 sm:$0xff]  }
 0x558   : > { %9109 = vmatprep.subr.bf16.mxu0 %v19605_v48  ;;  %17175 = vmatprep.subr.bf16.mxu1 %v19606_v23  ;;  %v19634_v48 = vld [vmem:[%s25084_s4 + $0xe78] ss:$12 sps:$4 sm:$0xff]  }
 0x559   : > { %v19637_v23 = vld [vmem:[%s25084_s4 + $0xe8c] ss:$12 sps:$4 sm:$0xff]  }
 0x55b   : > { %9110 = vmatpush1.bf16.msra.mxu0 %v19603_v7  ;;  %17176 = vmatpush3.bf16.msra.mxu1 %v19607_v14  ;;  %v19638_v7 = vld [vmem:[%s25084_s4 + $0xf50] ss:$12 sps:$4 sm:$0xff]   ;;  %v19635_v14 = vld [vmem:[%s25084_s4 + $0xe88] ss:$12 sps:$4 sm:$0xff]  }
 0x55c   : > { %9132 = vmatprep.subr.bf16.mxu0 %v19610_v40  ;;  %17675 = vmatprep.subr.bf16.mxu1 %v19611_v16  ;;  %v19639_v40 = vld [vmem:[%s25084_s4 + $0xe90] ss:$12 sps:$4 sm:$0xff]  }
 0x55e   : > { %9112 = vmatmul.mubr.bf16.vlgmr.msra.gmra.mrb[44].mxu0 %v23473_v42  ;;  %9218 = vmatmul.mubr.bf16.vlgmr.msra.gmra.mrb[68].mxu1 %v23473_v42 }
 0x55f   : > { %9121 = vmatprep.mubr.bf16.mxu0 %v22227_v44  ;;  %9225 = vmatprep.mubr.bf16.mxu1 %v22227_v44 }
 0x560   : > { %9133 = vmatpush1.bf16.msra.mxu0 %v19608_v10  ;;  %17676 = vmatpush3.bf16.msra.mxu1 %v19611_v16  ;;  %v19642_v16 = vld [vmem:[%s25084_s4 + $0xea4] ss:$12 sps:$4 sm:$0xff]   ;;  %v19643_v10 = vld [vmem:[%s25084_s4 + $0xf68] ss:$12 sps:$4 sm:$0xff]  }
 0x561   : > { %v17078_v29 = vpop.f32.mrb[64].mxu0  ;;  %9134 = vmatprep.subr.bf16.mxu0 %v19614_v22  ;;  %17677 = vmatprep.subr.bf16.mxu1 %v19615_v0  ;;  %v19640_v22 = vld [vmem:[%s25084_s4 + $0xea0] ss:$12 sps:$4 sm:$0xff]  }
 0x562   : > { %v17079_v62 = vpop.f32.mrb[65].mxu0 }
 0x563   : > { %v17080_v53 = vadd.f32 %v17079_v62, %v17078_v29  ;;  %v17081_v30 = vpop.f32.mrb[66].mxu0  ;;  %v19652_v29 = vld [vmem:[%s25084_s4 + $0xed4] ss:$12 sps:$4 sm:$0xff]   ;;  %v19650_v62 = vld [vmem:[%s25084_s4 + $0xed0] ss:$12 sps:$4 sm:$0xff]  }
 0x564   : > { %9135 = vmatpush1.bf16.msra.mxu0 %v19612_v28  ;;  %17678 = vmatpush3.bf16.msra.mxu1 %v19615_v0  ;;  %v17082_v51 = vpop.f32.mrb[67].mxu0  ;;  %v19647_v0 = vld [vmem:[%s25084_s4 + $0xebc] ss:$12 sps:$4 sm:$0xff]   ;;  %v19648_v28 = vld [vmem:[%s25084_s4 + $0xf80] ss:$12 sps:$4 sm:$0xff]  }
 0x565   : > { %v23498_v11 = vadd.f32 %v17080_v53, %v23073_v18  ;;  %v17083_v57 = vadd.f32 %v17082_v51, %v17081_v30  ;;  %16006 = vmatprep.subr.msk.bf16.mxu0 %vm3840_vm4, %v19616_v54  ;;  %18560 = vmatprep.subr.msk.bf16.mxu1 %vm3840_vm4, %v19618_v27  ;;  %v23517_v18 = vsel %vm2987_vm2, %v8754_v21, %v22269_v15  ;;  %v19624_v21 = vld [vmem:[%s25084_s4 + $0xe48] ss:$12 sps:$4 sm:$0xff]   ;;  %v19645_v54 = vld [vmem:[%s25084_s4 + $0xeb8] ss:$12 sps:$4 sm:$0xff]   ;;  %v19649_v27 = vld [vmem:[%s25084_s4 + $0xec0] ss:$12 sps:$4 sm:$0xff]  }
 0x566   : > { %9122 = vmatmul.mubr.bf16.gmra.mrb[48].mxu0 %v22220_v55  ;;  %9226 = vmatmul.mubr.bf16.gmra.mrb[72].mxu1 %v22220_v55  ;;  %v19654_v53 = vld [vmem:[%s25084_s4 + $0xed8] ss:$12 sps:$4 sm:$0xff]   ;;  %v19658_v51 = vld [vmem:[%s25084_s4 + $0xfb0] ss:$12 sps:$4 sm:$0xff]   ;;  %vm14085_vm2 = vcmask 408576  }
 0x567   : > { %v23520_v3 = vadd.f32 %v17083_v57, %v23075_v17  ;;  %17681 = vmatprep.mubr.msk.bf16.mxu1 %vm5586_vm9, %v23517_v18  ;;  %9164 = vmatprep.mubr.bf16.mxu0 %v20082_v1  ;;  %v19657_v30 = vld [vmem:[%s25084_s4 + $0xeec] ss:$12 sps:$4 sm:$0xff]   ;;  %v19655_v57 = vld [vmem:[%s25084_s4 + $0xee8] ss:$12 sps:$4 sm:$0xff]  }
 0x568   : > { %9137 = vmatpush1.bf16.msra.mxu0 %v9071_v9  ;;  %17680 = vmatpush3.bf16.msra.mxu1 %v9077_v37  ;;  %v19659_v9 = vld [vmem:[%s25084_s4 + $0xef0] ss:$12 sps:$4 sm:$0xff]  }
 0x569   : > { %v17084_v63 = vpop.f32.mrb[68].mxu0  ;;  %9670 = vmatprep.subr.bf16.mxu1 %v19622_v47  ;;  %17194 = vmatprep.subr.bf16.mxu0 %v19623_v33  ;;  %v19662_v37 = vld [vmem:[%s25084_s4 + $0xf04] ss:$12 sps:$4 sm:$0xff]   ;;  %v19663_v47 = vld [vmem:[%s25084_s4 + $0xfc8] ss:$12 sps:$4 sm:$0xff]  }
 0x56a   : > { %v17085_v52 = vpop.f32.mrb[69].mxu0  ;;  %v19660_v33 = vld [vmem:[%s25084_s4 + $0xf00] ss:$12 sps:$4 sm:$0xff]  }
 0x56b   : > { %v17086_v38 = vadd.f32 %v17085_v52, %v17084_v63  ;;  %v17087_v60 = vpop.f32.mrb[70].mxu0  ;;  %v19666_v63 = vld [vmem:[%s25084_s4 + $0xf1c] ss:$12 sps:$4 sm:$0xff]   ;;  %v19667_v52 = vld [vmem:[%s25084_s4 + $0xfe0] ss:$12 sps:$4 sm:$0xff]  }
 0x56c   : > { %v17088_v17 = vpop.f32.mrb[71].mxu0 }
 0x56d   : > { %v23535_v26 = vadd.f32 %v17086_v38, %v23096_v34  ;;  %v17089_v59 = vadd.f32 %v17088_v17, %v17087_v60  ;;  %v19625_v34 = vld [vmem:[%s25084_s4 + $0xe58] ss:$12 sps:$4 sm:$0xff]  }
 0x56e   : > { %16007 = vmatmul.mubr.msk.bf16.vlgmr.msra.gmra.mrb[44].mxu0 %vm5586_vm9, %v23517_v18  ;;  %17682 = vmatmul.mubr.msk.bf16.vlgmr.msra.gmra.mrb[40].mxu1 %vm5586_vm9, %v22269_v15  ;;  %v19664_v38 = vld [vmem:[%s25084_s4 + $0xf18] ss:$12 sps:$4 sm:$0xff]  }
 0x56f   : > { %9671 = vmatpush1.bf16.msra.mxu1 %v19620_v25  ;;  %17195 = vmatpush3.bf16.msra.mxu0 %v19624_v21  ;;  %v23545_v35 = vadd.f32 %v17089_v59, %v23107_v46  ;;  %v19633_v46 = vld [vmem:[%s25084_s4 + $0xf38] ss:$12 sps:$4 sm:$0xff]   ;;  %v19670_v25 = vld [vmem:[%s25084_s4 + $0xf34] ss:$12 sps:$4 sm:$0xff]   ;;  %v19668_v21 = vld [vmem:[%s25084_s4 + $0xf30] ss:$12 sps:$4 sm:$0xff]  }
 0x570   : > { %9702 = vmatprep.mubr.bf16.mxu1 %v23264_v61  ;;  %9672 = vmatprep.subr.bf16.mxu1 %v19627_v6  ;;  %v19671_v60 = vld [vmem:[%s25084_s4 + $0xff8] ss:$12 sps:$4 sm:$0x3f]  }
 0x571   : > { %17196 = vmatprep.subr.bf16.mxu0 %v19628_v19  ;;  %9174 = vmatprep.mubr.bf16.mxu0 %v20082_v1  ;;  %v19674_v17 = vld [vmem:[%s25084_s4 + $0xf4c] ss:$12 sps:$4 sm:$0xff]   ;;  %v9668_v6 = vsel %vm3840_vm4, %v19671_v60, 0  ;;  %v19677_v59 = vld [vmem:[%s25084_s4 + $0x724] ss:$12 sps:$4 sm:$0xff]  }
 0x572   : > { %v19672_v19 = vld [vmem:[%s25084_s4 + $0xf48] ss:$12 sps:$4 sm:$0xff]  }
 0x573   : > { %9673 = vmatpush1.bf16.msra.mxu1 %v19625_v34  ;;  %17197 = vmatpush3.bf16.msra.mxu0 %v19629_v24  ;;  %v19680_v34 = vld [vmem:[%s25084_s4 + $0xf64] ss:$12 sps:$4 sm:$0xff]   ;;  %v19675_v24 = vld [vmem:[%s25084_s4 + $0x720] ss:$12 sps:$4 sm:$0xff]  }
 0x574   : > { %9674 = vmatprep.subr.bf16.mxu1 %v19632_v4  ;;  %17198 = vmatprep.subr.bf16.mxu0 %v19633_v46  ;;  %v19678_v4 = vld [vmem:[%s25084_s4 + $0xf60] ss:$12 sps:$4 sm:$0xff]   ;;  %v23683_v46 = vrot.slane %v22202_v50, 2 }
 0x576   : > { %16008 = vmatmul.mubr.msk.bf16.gmra.mrb[48].mxu0 %vm5586_vm9, %v22269_v15 }
 0x577   : > { %9675 = vmatpush1.bf16.msra.mxu1 %v19630_v58  ;;  %17199 = vmatpush3.bf16.msra.mxu0 %v19634_v48  ;;  %v19683_v58 = vld [vmem:[%s25084_s4 + $0x73c] ss:$12 sps:$4 sm:$0xff]   ;;  %v9978_v48 = vrot.slane %v22182_v2, 2  ;;  %v19684_v2 = vld [vmem:[%s25084_s4 + $0xf78] ss:$12 sps:$4 sm:$0xff]  }
 0x578   : > { %9808 = vmatprep.mubr.bf16.mxu0 %v23264_v61  ;;  %9676 = vmatprep.subr.bf16.mxu1 %v19637_v23  ;;  %v19644_v61 = vld [vmem:[%s25084_s4 + $0xea8] ss:$12 sps:$4 sm:$0xff]  }
 0x579   : > { %17200 = vmatprep.subr.bf16.mxu0 %v19638_v7  ;;  %v19686_v23 = vld [vmem:[%s25084_s4 + $0xf7c] ss:$12 sps:$4 sm:$0xff]   ;;  %v23696_v50 = vsel %vm3840_vm4, %v9978_v48, %v23683_v46  ;;  %v19681_v7 = vld [vmem:[%s25084_s4 + $0x738] ss:$12 sps:$4 sm:$0xff]  }
 0x57a   : > { %v19727_v48 = vld [vmem:[%s25084_s4 + $0x7fc] ss:$12 sps:$4 sm:$0xff]  }
 0x57b   : > { %9677 = vmatpush1.bf16.msra.mxu1 %v19635_v14  ;;  %17201 = vmatpush3.bf16.msra.mxu0 %v19639_v40  ;;  %v19689_v14 = vld [vmem:[%s25084_s4 + $0x754] ss:$12 sps:$4 sm:$0xff]  }
 0x57c   : > { %9678 = vmatprep.subr.bf16.mxu1 %v19642_v16  ;;  %17202 = vmatprep.subr.bf16.mxu0 %v19643_v10  ;;  %v19692_v40 = vld [vmem:[%s25084_s4 + $0xf94] ss:$12 sps:$4 sm:$0xff]   ;;  %v19687_v16 = vld [vmem:[%s25084_s4 + $0x750] ss:$12 sps:$4 sm:$0xff]  }
 0x57d   : > { %v19690_v10 = vld [vmem:[%s25084_s4 + $0xf90] ss:$12 sps:$4 sm:$0xff]  }
 0x57f   : > { %9679 = vmatpush1.bf16.msra.mxu1 %v19640_v22  ;;  %17203 = vmatpush3.bf16.msra.mxu0 %v19644_v61  ;;  %v19695_v22 = vld [vmem:[%s25084_s4 + $0x76c] ss:$12 sps:$4 sm:$0xff]  }
 0x580   : > { %9680 = vmatprep.subr.bf16.mxu1 %v19647_v0  ;;  %17204 = vmatprep.subr.bf16.mxu0 %v19648_v28  ;;  %v19698_v61 = vld [vmem:[%s25084_s4 + $0xfac] ss:$12 sps:$4 sm:$0xff]   ;;  %v19693_v0 = vld [vmem:[%s25084_s4 + $0x768] ss:$12 sps:$4 sm:$0xff]  }
 0x581   : > { %v19696_v28 = vld [vmem:[%s25084_s4 + $0xfa8] ss:$12 sps:$4 sm:$0xff]  }
 0x583   : > { %9681 = vmatpush1.bf16.msra.mxu1 %v19645_v54  ;;  %17205 = vmatpush3.bf16.msra.mxu0 %v19649_v27  ;;  %v19701_v54 = vld [vmem:[%s25084_s4 + $0x784] ss:$12 sps:$4 sm:$0xff]  }
 0x584   : > { %9682 = vmatprep.subr.bf16.mxu1 %v19652_v29  ;;  %17206 = vmatprep.subr.bf16.mxu0 %v19653_v12  ;;  %v19704_v27 = vld [vmem:[%s25084_s4 + $0xfc4] ss:$12 sps:$4 sm:$0xff]   ;;  %v19699_v29 = vld [vmem:[%s25084_s4 + $0x780] ss:$12 sps:$4 sm:$0xff]  }
 0x585   : > { %v19702_v12 = vld [vmem:[%s25084_s4 + $0xfc0] ss:$12 sps:$4 sm:$0xff]  }
 0x587   : > { %9683 = vmatpush1.bf16.msra.mxu1 %v19650_v62  ;;  %17207 = vmatpush3.bf16.msra.mxu0 %v19654_v53  ;;  %v19707_v62 = vld [vmem:[%s25084_s4 + $0x79c] ss:$12 sps:$4 sm:$0xff]  }
 0x588   : > { %9684 = vmatprep.subr.bf16.mxu1 %v19657_v30  ;;  %17208 = vmatprep.subr.bf16.mxu0 %v19658_v51  ;;  %v19710_v53 = vld [vmem:[%s25084_s4 + $0xfdc] ss:$12 sps:$4 sm:$0xff]   ;;  %v19705_v30 = vld [vmem:[%s25084_s4 + $0x798] ss:$12 sps:$4 sm:$0xff]  }
 0x589   : > { %v19708_v51 = vld [vmem:[%s25084_s4 + $0xfd8] ss:$12 sps:$4 sm:$0xff]  }
 0x58b   : > { %9685 = vmatpush1.bf16.msra.mxu1 %v19655_v57  ;;  %17209 = vmatpush3.bf16.msra.mxu0 %v19659_v9  ;;  %v19713_v57 = vld [vmem:[%s25084_s4 + $0x7b4] ss:$12 sps:$4 sm:$0xff]  }
 0x58c   : > { %9686 = vmatprep.subr.bf16.mxu1 %v19662_v37  ;;  %17685 = vmatprep.subr.bf16.mxu0 %v19663_v47 }
 0x58e   : > { %9809 = vmatmul.mubr.bf16.vlgmr.msra.gmra.mrb[80].mxu0 %v23473_v42 }
 0x58f   : > { %9687 = vmatpush1.bf16.msra.mxu1 %v19660_v33  ;;  %9816 = vmatprep.mubr.bf16.mxu0 %v22227_v44  ;;  %v19711_v33 = vld [vmem:[%s25084_s4 + $0x7b0] ss:$12 sps:$4 sm:$0xff]  }
 0x590   : > { %9688 = vmatprep.subr.bf16.mxu1 %v19666_v63  ;;  %17686 = vmatpush3.bf16.msra.mxu0 %v19663_v47 }
 0x591   : > { %17687 = vmatprep.subr.bf16.mxu0 %v19667_v52 }
 0x593   : > { %9689 = vmatpush1.bf16.msra.mxu1 %v19664_v38  ;;  %v19718_v38 = vld [vmem:[%s25084_s4 + $0x7cc] ss:$12 sps:$4 sm:$0xff]  }
 0x594   : > { %9690 = vmatprep.subr.bf16.mxu1 %v19670_v25  ;;  %17688 = vmatpush3.bf16.msra.mxu0 %v19667_v52 }
 0x595   : > { %18561 = vmatprep.subr.msk.bf16.mxu0 %vm3840_vm4, %v19671_v60 }
 0x596   : > { %9817 = vmatmul.mubr.bf16.gmra.mrb[84].mxu0 %v22220_v55 }
 0x597   : > { %9691 = vmatpush1.bf16.msra.mxu1 %v19668_v21  ;;  %17691 = vmatprep.mubr.msk.bf16.mxu0 %vm5586_vm9, %v23517_v18 }
 0x598   : > { %9692 = vmatprep.subr.bf16.mxu1 %v19674_v17  ;;  %17690 = vmatpush3.bf16.msra.mxu0 %v9668_v6  ;;  %v19723_v17 = vld [vmem:[%s25084_s4 + $0x7e8] ss:$12 sps:$4 sm:$0xff]  }
 0x599   : > { %10304 = vmatprep.subr.bf16.mxu0 %v19677_v59  ;;  %v19722_v59 = vld [vmem:[%s25084_s4 + $0x7e4] ss:$12 sps:$4 sm:$0xff]  }
 0x59b   : > { %9693 = vmatpush1.bf16.msra.mxu1 %v19672_v19 }
 0x59c   : > { %9694 = vmatprep.subr.bf16.mxu1 %v19680_v34 }
 0x59e   : > { %17692 = vmatmul.mubr.msk.bf16.vlgmr.msra.gmra.mrb[60].mxu0 %vm5586_vm9, %v22269_v15 }
 0x59f   : > { %10305 = vmatpush1.bf16.msra.mxu0 %v19675_v24  ;;  %9695 = vmatpush1.bf16.msra.mxu1 %v19678_v4  ;;  %v19724_v4 = vld [vmem:[%s25084_s4 + $0x728] ss:$12 sps:$4 sm:$0xff]  }
 0x5a0   : > { %10336 = vmatprep.mubr.bf16.mxu0 %v23696_v50  ;;  %10306 = vmatprep.subr.bf16.mxu0 %v19683_v58 }
 0x5a1   : > { %9696 = vmatprep.subr.bf16.mxu1 %v19686_v23  ;;  %v19728_v23 = vld [vmem:[%s25084_s4 + $0x800] ss:$12 sps:$4 sm:$0xff]  }
 0x5a3   : > { %10307 = vmatpush1.bf16.msra.mxu0 %v19681_v7  ;;  %9697 = vmatpush1.bf16.msra.mxu1 %v19684_v2 }
 0x5a4   : > { %10308 = vmatprep.subr.bf16.mxu0 %v19689_v14  ;;  %9698 = vmatprep.subr.bf16.mxu1 %v19692_v40  ;;  %v19725_v40 = vld [vmem:[%s25084_s4 + $0x7f8] ss:$12 sps:$4 sm:$0xff]  }
 0x5a7   : > { %10309 = vmatpush1.bf16.msra.mxu0 %v19687_v16  ;;  %9699 = vmatpush1.bf16.msra.mxu1 %v19690_v10  ;;  %v19729_v16 = vld [vmem:[%s25084_s4 + $0x740] ss:$12 sps:$4 sm:$0xff]   ;;  %v19734_v10 = vld [vmem:[%s25084_s4 + $0x758] ss:$12 sps:$4 sm:$0xff]  }
 0x5a8   : > { %10310 = vmatprep.subr.bf16.mxu0 %v19695_v22  ;;  %9700 = vmatprep.subr.bf16.mxu1 %v19698_v61  ;;  %v19737_v22 = vld [vmem:[%s25084_s4 + $0x82c] ss:$12 sps:$4 sm:$0xff]   ;;  %v19738_v61 = vld [vmem:[%s25084_s4 + $0x830] ss:$12 sps:$4 sm:$0xff]  }
 0x5ab   : > { %10311 = vmatpush1.bf16.msra.mxu0 %v19693_v0  ;;  %9701 = vmatpush1.bf16.msra.mxu1 %v19696_v28  ;;  %v19735_v0 = vld [vmem:[%s25084_s4 + $0x828] ss:$12 sps:$4 sm:$0xff]   ;;  %v19739_v28 = vld [vmem:[%s25084_s4 + $0x770] ss:$12 sps:$4 sm:$0xff]  }
 0x5ac   : > { %10312 = vmatprep.subr.bf16.mxu0 %v19701_v54  ;;  %9723 = vmatprep.subr.bf16.mxu1 %v19704_v27  ;;  %v19742_v54 = vld [vmem:[%s25084_s4 + $0x844] ss:$12 sps:$4 sm:$0xff]   ;;  %v19740_v27 = vld [vmem:[%s25084_s4 + $0x840] ss:$12 sps:$4 sm:$0xff]  }
 0x5ae   : > { %9703 = vmatmul.mubr.bf16.vlgmr.msra.gmra.mrb[44].mxu1 %v23473_v42  ;;  %v19714_v42 = vld [vmem:[%s25084_s4 + $0xff4] ss:$12 sps:$4 sm:$0x3f]  }
 0x5af   : > { %10313 = vmatpush1.bf16.msra.mxu0 %v19699_v29  ;;  %9712 = vmatprep.mubr.bf16.mxu1 %v22227_v44  ;;  %v19719_v44 = vld [vmem:[%s25084_s4 + $0xff0] ss:$12 sps:$4 sm:$0x3f]   ;;  %v19744_v29 = vld [vmem:[%s25084_s4 + $0x788] ss:$12 sps:$4 sm:$0xff]  }
 0x5b0   : > { %10314 = vmatprep.subr.bf16.mxu0 %v19707_v62  ;;  %9724 = vmatpush1.bf16.msra.mxu1 %v19702_v12  ;;  %v9662_v21 = vsel %vm3840_vm4, %v19719_v44, 0  ;;  %v19747_v12 = vld [vmem:[%s25084_s4 + $0x85c] ss:$12 sps:$4 sm:$0xff]   ;;  %v19748_v62 = vld [vmem:[%s25084_s4 + $0x860] ss:$12 sps:$4 sm:$0xff]  }
 0x5b1   : > { %v17111_v9 = vpop.f32.mrb[60].mxu1  ;;  %9725 = vmatprep.subr.bf16.mxu1 %v19710_v53  ;;  %v19745_v53 = vld [vmem:[%s25084_s4 + $0x858] ss:$12 sps:$4 sm:$0xff]  }
 0x5b2   : > { %v17112_v37 = vpop.f32.mrb[61].mxu1  ;;  %v19757_v44 = vld [vmem:[%s25084_s4 + $0x88c] ss:$12 sps:$4 sm:$0xff]  }
 0x5b3   : > { %10315 = vmatpush1.bf16.msra.mxu0 %v19705_v30  ;;  %v17113_v47 = vadd.f32 %v17112_v37, %v17111_v9  ;;  %v17114_v63 = vpop.f32.mrb[62].mxu1  ;;  %v19749_v30 = vld [vmem:[%s25084_s4 + $0x7a0] ss:$12 sps:$4 sm:$0xff]   ;;  %v19754_v9 = vld [vmem:[%s25084_s4 + $0x7b8] ss:$12 sps:$4 sm:$0xff]  }
 0x5b4   : > { %10316 = vmatprep.subr.bf16.mxu0 %v19713_v57  ;;  %9726 = vmatpush1.bf16.msra.mxu1 %v19708_v51  ;;  %v17115_v52 = vpop.f32.mrb[63].mxu1  ;;  %v19752_v51 = vld [vmem:[%s25084_s4 + $0x874] ss:$12 sps:$4 sm:$0xff]   ;;  %v19753_v57 = vld [vmem:[%s25084_s4 + $0x878] ss:$12 sps:$4 sm:$0xff]  }
 0x5b5   : > { %v23771_v25 = vadd.f32 %v23339_v20, %v17113_v47  ;;  %v17116_v60 = vadd.f32 %v17115_v52, %v17114_v63  ;;  %16144 = vmatprep.subr.msk.bf16.mxu1 %vm3840_vm4, %v19714_v42  ;;  %v19716_v20 = vld [vmem:[%s25084_s4 + $0x7c8] ss:$12 sps:$4 sm:$0xff]   ;;  %v19750_v42 = vld [vmem:[%s25084_s4 + $0x870] ss:$12 sps:$4 sm:$0xff]  }
 0x5b6   : > { %9713 = vmatmul.mubr.bf16.gmra.mrb[48].mxu1 %v22220_v55  ;;  %v19758_v37 = vld [vmem:[%s25084_s4 + $0x890] ss:$12 sps:$4 sm:$0xff]   ;;  %v19755_v47 = vld [vmem:[%s25084_s4 + $0x888] ss:$12 sps:$4 sm:$0xff]  }
 0x5b7   : > { %10317 = vmatpush1.bf16.msra.mxu0 %v19711_v33  ;;  %v23780_v6 = vadd.f32 %v23348_v31, %v17116_v60  ;;  %9755 = vmatprep.mubr.bf16.mxu1 %v20082_v1  ;;  %v19720_v31 = vld [vmem:[%s25084_s4 + $0x7e0] ss:$12 sps:$4 sm:$0xff]   ;;  %v19759_v33 = vld [vmem:[%s25084_s4 + $0x7d0] ss:$12 sps:$4 sm:$0xff]   ;;  %v19763_v52 = vld [vmem:[%s25084_s4 + $0x8a8] ss:$12 sps:$4 sm:$0xff]  }
 0x5b8   : > { %10318 = vmatprep.subr.bf16.mxu0 %v19718_v38  ;;  %9728 = vmatpush1.bf16.msra.mxu1 %v9662_v21  ;;  %v19762_v63 = vld [vmem:[%s25084_s4 + $0x8a4] ss:$12 sps:$4 sm:$0xff]   ;;  %v23898_v38 = vrot.slane %v22198_v32, 2  ;;  %v9975_v60 = vrot.slane %v22179_v8, 2  ;;  %v19760_v21 = vld [vmem:[%s25084_s4 + $0x8a0] ss:$12 sps:$4 sm:$0xff]  }
 0x5b9   : > { %v17117_v19 = vpop.f32.mrb[64].mxu1  ;;  %17227 = vmatprep.subr.bf16.mxu1 %v19723_v17  ;;  %v19767_v32 = vld [vmem:[%s25084_s4 + $0x8c0] ss:$12 sps:$4 sm:$0xff]   ;;  %v19764_v8 = vld [vmem:[%s25084_s4 + $0x8b8] ss:$12 sps:$4 sm:$0xff]  }
 0x5ba   : > { %v17118_v34 = vpop.f32.mrb[65].mxu1  ;;  %v23906_v17 = vsel %vm3840_vm4, %v9975_v60, %v23898_v38  ;;  %v19797_v60 = vld [vmem:[%s25084_s4 + $0x1080] ss:$12 sps:$4 sm:$0xff]  }
 0x5bb   : > { %10319 = vmatpush1.bf16.msra.mxu0 %v19716_v20  ;;  %v17119_v55 = vadd.f32 %v17118_v34, %v17117_v19  ;;  %v17120_v24 = vpop.f32.mrb[66].mxu1  ;;  %v19766_v20 = vld [vmem:[%s25084_s4 + $0x8bc] ss:$12 sps:$4 sm:$0xff]   ;;  %v19770_v19 = vld [vmem:[%s25084_s4 + $0x8d8] ss:$12 sps:$4 sm:$0x3f]  }
 0x5bc   : > { %10320 = vmatprep.subr.bf16.mxu0 %v19722_v59  ;;  %v17121_v58 = vpop.f32.mrb[67].mxu1  ;;  %v19768_v59 = vld [vmem:[%s25084_s4 + $0x8d4] ss:$12 sps:$4 sm:$0x3f]  }
 0x5bd   : > { %v23802_v7 = vadd.f32 %v23370_v39, %v17119_v55  ;;  %v17122_v2 = vadd.f32 %v17121_v58, %v17120_v24  ;;  %v19732_v39 = vld [vmem:[%s25084_s4 + $0x814] ss:$12 sps:$4 sm:$0xff]   ;;  %v19771_v55 = vld [vmem:[%s25084_s4 + $0x8d0] ss:$12 sps:$4 sm:$0x3f]   ;;  %v9981_v24 = vrot.slane %v22210_v45, 2 }
 0x5be   : > { %16145 = vmatmul.mubr.msk.bf16.vlgmr.msra.gmra.mrb[44].mxu1 %vm5586_vm9, %v23517_v18  ;;  %v19733_v18 = vld [vmem:[%s25084_s4 + $0x818] ss:$12 sps:$4 sm:$0xff]   ;;  %v10302_v45 = vsel %vm3840_vm4, %v19770_v19, 0 }
 0x5bf   : > { %10321 = vmatpush1.bf16.msra.mxu0 %v19720_v31  ;;  %17228 = vmatpush3.bf16.msra.mxu1 %v19724_v4  ;;  %v23807_v14 = vadd.f32 %v23375_v49, %v17122_v2  ;;  %v19730_v49 = vld [vmem:[%s25084_s4 + $0x810] ss:$12 sps:$4 sm:$0xff]   ;;  %v23932_v4 = vrot.slane %v22237_v56, 2  ;;  %v19774_v56 = vld [vmem:[%s25084_s4 + $0x100c] ss:$12 sps:$4 sm:$0xff]  }
 0x5c0   : > { %10322 = vmatprep.subr.bf16.mxu0 %v19727_v48  ;;  %17229 = vmatprep.subr.bf16.mxu1 %v19728_v23 }
 0x5c1   : > { %9765 = vmatprep.mubr.bf16.mxu1 %v20082_v1 }
 0x5c3   : > { %10323 = vmatpush1.bf16.msra.mxu0 %v19725_v40  ;;  %17230 = vmatpush3.bf16.msra.mxu1 %v19729_v16  ;;  %v10296_v16 = vsel %vm3840_vm4, %v19771_v55, 0  ;;  %v19807_v55 = vld [vmem:[%s25084_s4 + $0x10b0] ss:$12 sps:$4 sm:$0xff]  }
 0x5c4   : > { %10324 = vmatprep.subr.bf16.mxu0 %v19732_v39  ;;  %17231 = vmatprep.subr.bf16.mxu1 %v19733_v18  ;;  %v19775_v39 = vld [vmem:[%s25084_s4 + $0x10d0] ss:$12 sps:$4 sm:$0xff]  }
 0x5c6   : > { %16146 = vmatmul.mubr.msk.bf16.gmra.mrb[48].mxu1 %vm5586_vm9, %v22269_v15  ;;  %v19743_v15 = vld [vmem:[%s25084_s4 + $0x848] ss:$12 sps:$4 sm:$0xff]  }
 0x5c7   : > { %10325 = vmatpush1.bf16.msra.mxu0 %v19730_v49  ;;  %17232 = vmatpush3.bf16.msra.mxu1 %v19734_v10 }
 0x5c8   : > { %10442 = vmatprep.mubr.bf16.mxu1 %v23696_v50  ;;  %10326 = vmatprep.subr.bf16.mxu0 %v19737_v22 }
 0x5c9   : > { %17233 = vmatprep.subr.bf16.mxu1 %v19738_v61  ;;  %v19772_v61 = vld [vmem:[%s25084_s4 + $0x1008] ss:$12 sps:$4 sm:$0xff]  }
 0x5cb   : > { %10327 = vmatpush1.bf16.msra.mxu0 %v19735_v0  ;;  %17234 = vmatpush3.bf16.msra.mxu1 %v19739_v28 }
 0x5cc   : > { %10328 = vmatprep.subr.bf16.mxu0 %v19742_v54  ;;  %17235 = vmatprep.subr.bf16.mxu1 %v19743_v15  ;;  %v19779_v54 = vld [vmem:[%s25084_s4 + $0x1024] ss:$12 sps:$4 sm:$0xff]  }
 0x5cf   : > { %10329 = vmatpush1.bf16.msra.mxu0 %v19740_v27  ;;  %17236 = vmatpush3.bf16.msra.mxu1 %v19744_v29  ;;  %v19780_v29 = vld [vmem:[%s25084_s4 + $0x10e8] ss:$12 sps:$4 sm:$0xff]  }
 0x5d0   : > { %10330 = vmatprep.subr.bf16.mxu0 %v19747_v12  ;;  %17237 = vmatprep.subr.bf16.mxu1 %v19748_v62  ;;  %v19781_v62 = vld [vmem:[%s25084_s4 + $0x1028] ss:$12 sps:$4 sm:$0xff]  }
 0x5d3   : > { %10331 = vmatpush1.bf16.msra.mxu0 %v19745_v53  ;;  %17238 = vmatpush3.bf16.msra.mxu1 %v19749_v30  ;;  %v19784_v53 = vld [vmem:[%s25084_s4 + $0x103c] ss:$12 sps:$4 sm:$0xff]   ;;  %v19782_v30 = vld [vmem:[%s25084_s4 + $0x1038] ss:$12 sps:$4 sm:$0xff]  }
 0x5d4   : > { %10332 = vmatprep.subr.bf16.mxu0 %v19752_v51  ;;  %17239 = vmatprep.subr.bf16.mxu1 %v19753_v57  ;;  %v19786_v51 = vld [vmem:[%s25084_s4 + $0x1040] ss:$12 sps:$4 sm:$0xff]  }
 0x5d5   : > { %v19789_v57 = vld [vmem:[%s25084_s4 + $0x1054] ss:$12 sps:$4 sm:$0xff]  }
 0x5d7   : > { %10333 = vmatpush1.bf16.msra.mxu0 %v19750_v42  ;;  %17240 = vmatpush3.bf16.msra.mxu1 %v19754_v9  ;;  %v19790_v42 = vld [vmem:[%s25084_s4 + $0x1118] ss:$12 sps:$4 sm:$0xff]   ;;  %v19787_v9 = vld [vmem:[%s25084_s4 + $0x1050] ss:$12 sps:$4 sm:$0xff]  }
 0x5d8   : > { %10334 = vmatprep.subr.bf16.mxu0 %v19757_v44  ;;  %17241 = vmatprep.subr.bf16.mxu1 %v19758_v37  ;;  %v19791_v44 = vld [vmem:[%s25084_s4 + $0x1058] ss:$12 sps:$4 sm:$0xff]  }
 0x5d9   : > { %v19794_v37 = vld [vmem:[%s25084_s4 + $0x106c] ss:$12 sps:$4 sm:$0xff]  }
 0x5db   : > { %10335 = vmatpush1.bf16.msra.mxu0 %v19755_v47  ;;  %17242 = vmatpush3.bf16.msra.mxu1 %v19759_v33  ;;  %v19795_v47 = vld [vmem:[%s25084_s4 + $0x1130] ss:$12 sps:$4 sm:$0xff]   ;;  %v19792_v33 = vld [vmem:[%s25084_s4 + $0x1068] ss:$12 sps:$4 sm:$0xff]  }
 0x5dc   : > { %10357 = vmatprep.subr.bf16.mxu0 %v19762_v63  ;;  %17695 = vmatprep.subr.bf16.mxu1 %v19763_v52  ;;  %v19799_v63 = vld [vmem:[%s25084_s4 + $0x1084] ss:$12 sps:$4 sm:$0xff]  }
 0x5de   : > { %10337 = vmatmul.mubr.bf16.vlgmr.msra.gmra.mrb[44].mxu0 %v23906_v17  ;;  %10443 = vmatmul.mubr.bf16.vlgmr.msra.gmra.mrb[76].mxu1 %v23906_v17 }
 0x5df   : > { %10346 = vmatprep.mubr.bf16.mxu0 %v23683_v46  ;;  %10450 = vmatprep.mubr.bf16.mxu1 %v23683_v46 }
 0x5e0   : > { %10358 = vmatpush1.bf16.msra.mxu0 %v19760_v21  ;;  %17696 = vmatpush3.bf16.msra.mxu1 %v19763_v52  ;;  %v19800_v52 = vld [vmem:[%s25084_s4 + $0x1148] ss:$12 sps:$4 sm:$0xff]  }
 0x5e1   : > { %v17144_v34 = vpop.f32.mrb[72].mxu0  ;;  %10359 = vmatprep.subr.bf16.mxu0 %v19766_v20  ;;  %17697 = vmatprep.subr.bf16.mxu1 %v19767_v32  ;;  %v19801_v21 = vld [vmem:[%s25084_s4 + $0x1088] ss:$12 sps:$4 sm:$0xff]  }
 0x5e2   : > { %v17145_v31 = vpop.f32.mrb[73].mxu0  ;;  %v19804_v20 = vld [vmem:[%s25084_s4 + $0x109c] ss:$12 sps:$4 sm:$0xff]  }
 0x5e3   : > { %v17146_v58 = vadd.f32 %v17145_v31, %v17144_v34  ;;  %v17147_v48 = vpop.f32.mrb[74].mxu0  ;;  %v19810_v34 = vld [vmem:[%s25084_s4 + $0x1178] ss:$12 sps:$4 sm:$0xff]  }
 0x5e4   : > { %10360 = vmatpush1.bf16.msra.mxu0 %v19764_v8  ;;  %17698 = vmatpush3.bf16.msra.mxu1 %v19767_v32  ;;  %v17148_v23 = vpop.f32.mrb[75].mxu0  ;;  %v19805_v32 = vld [vmem:[%s25084_s4 + $0x1160] ss:$12 sps:$4 sm:$0xff]   ;;  %v19802_v8 = vld [vmem:[%s25084_s4 + $0x1098] ss:$12 sps:$4 sm:$0xff]  }
 0x5e5   : > { %v23935_v2 = vadd.f32 %v23498_v11, %v17146_v58  ;;  %v17149_v40 = vadd.f32 %v17148_v23, %v17147_v48  ;;  %16282 = vmatprep.subr.msk.bf16.mxu0 %vm3840_vm4, %v19768_v59  ;;  %18562 = vmatprep.subr.msk.bf16.mxu1 %vm3840_vm4, %v19770_v19  ;;  %v23951_v11 = vsel %vm3840_vm4, %v9981_v24, %v23932_v4  ;;  %v19806_v59 = vld [vmem:[%s25084_s4 + $0x10a0] ss:$12 sps:$4 sm:$0xff]   ;;  %v19811_v31 = vld [vmem:[%s25084_s4 + $0x10b8] ss:$12 sps:$4 sm:$0xff]   ;;  %v19818_v58 = vld [vmem:[%s25084_s4 + $0x1190] ss:$12 sps:$4 sm:$0xff]  }
 0x5e6   : > { %10347 = vmatmul.mubr.bf16.gmra.mrb[48].mxu0 %v23898_v38  ;;  %10451 = vmatmul.mubr.bf16.gmra.mrb[80].mxu1 %v23898_v38  ;;  %v19809_v19 = vld [vmem:[%s25084_s4 + $0x10b4] ss:$12 sps:$4 sm:$0xff]   ;;  %v19814_v24 = vld [vmem:[%s25084_s4 + $0x10cc] ss:$12 sps:$4 sm:$0xff]   ;;  %v19817_v23 = vld [vmem:[%s25084_s4 + $0x10e4] ss:$12 sps:$4 sm:$0xff]  }
 0x5e7   : > { %v23954_v18 = vadd.f32 %v23520_v3, %v17149_v40  ;;  %17701 = vmatprep.mubr.msk.bf16.mxu1 %vm5586_vm9, %v23951_v11  ;;  %10389 = vmatprep.mubr.bf16.mxu0 %v20082_v1  ;;  %v19776_v3 = vld [vmem:[%s25084_s4 + $0x1010] ss:$12 sps:$4 sm:$0xff]   ;;  %v19812_v48 = vld [vmem:[%s25084_s4 + $0x10c8] ss:$12 sps:$4 sm:$0xff]  }
 0x5e8   : > { %10362 = vmatpush1.bf16.msra.mxu0 %v10296_v16  ;;  %17700 = vmatpush3.bf16.msra.mxu1 %v10302_v45  ;;  %v19822_v40 = vld [vmem:[%s25084_s4 + $0x11a8] ss:$12 sps:$4 sm:$0xff]   ;;  %v19815_v16 = vld [vmem:[%s25084_s4 + $0x10e0] ss:$12 sps:$4 sm:$0xff]  }
 0x5e9   : > { %v17150_v49 = vpop.f32.mrb[76].mxu0  ;;  %10895 = vmatprep.subr.bf16.mxu1 %v19774_v56  ;;  %17260 = vmatprep.subr.bf16.mxu0 %v19775_v39  ;;  %v19821_v45 = vld [vmem:[%s25084_s4 + $0x10fc] ss:$12 sps:$4 sm:$0xff]   ;;  %v19826_v56 = vld [vmem:[%s25084_s4 + $0x11c0] ss:$12 sps:$4 sm:$0x3f]  }
 0x5ea   : > { %v17151_v10 = vpop.f32.mrb[77].mxu0  ;;  %v19819_v39 = vld [vmem:[%s25084_s4 + $0x10f8] ss:$12 sps:$4 sm:$0xff]  }
 0x5eb   : > { %v17152_v22 = vadd.f32 %v17151_v10, %v17150_v49  ;;  %v17153_v0 = vpop.f32.mrb[78].mxu0  ;;  %v19825_v49 = vld [vmem:[%s25084_s4 + $0x1114] ss:$12 sps:$4 sm:$0xff]   ;;  %v10893_v10 = vsel %vm3840_vm4, %v19826_v56, 0 }
 0x5ec   : > { %v17154_v28 = vpop.f32.mrb[79].mxu0 }
 0x5ed   : > { %v23969_v15 = vadd.f32 %v23535_v26, %v17152_v22  ;;  %v17155_v27 = vadd.f32 %v17154_v28, %v17153_v0  ;;  %v19777_v26 = vld [vmem:[%s25084_s4 + $0x1020] ss:$12 sps:$4 sm:$0xff]   ;;  %v19823_v22 = vld [vmem:[%s25084_s4 + $0x1110] ss:$12 sps:$4 sm:$0xff]   ;;  %v19827_v0 = vld [vmem:[%s25084_s4 + $0x1128] ss:$12 sps:$4 sm:$0xff]  }
 0x5ee   : > { %16283 = vmatmul.mubr.msk.bf16.vlgmr.msra.gmra.mrb[44].mxu0 %vm5586_vm9, %v23951_v11  ;;  %17702 = vmatmul.mubr.msk.bf16.vlgmr.msra.gmra.mrb[40].mxu1 %vm5586_vm9, %v23932_v4  ;;  %v19830_v28 = vld [vmem:[%s25084_s4 + $0x1140] ss:$12 sps:$4 sm:$0xff]  }
 0x5ef   : > { %10896 = vmatpush1.bf16.msra.mxu1 %v19772_v61  ;;  %17261 = vmatpush3.bf16.msra.mxu0 %v19776_v3  ;;  %v23979_v12 = vadd.f32 %v23545_v35, %v17155_v27  ;;  %v19785_v35 = vld [vmem:[%s25084_s4 + $0x1100] ss:$12 sps:$4 sm:$0xff]   ;;  %v19832_v3 = vld [vmem:[%s25084_s4 + $0x1144] ss:$12 sps:$4 sm:$0xff]  }
 0x5f0   : > { %10927 = vmatprep.mubr.bf16.mxu1 %v23696_v50  ;;  %10897 = vmatprep.subr.bf16.mxu1 %v19779_v54  ;;  %v19829_v61 = vld [vmem:[%s25084_s4 + $0x112c] ss:$12 sps:$4 sm:$0xff]   ;;  %v19835_v54 = vld [vmem:[%s25084_s4 + $0x115c] ss:$12 sps:$4 sm:$0xff]  }
 0x5f1   : > { %17262 = vmatprep.subr.bf16.mxu0 %v19780_v29  ;;  %10399 = vmatprep.mubr.bf16.mxu0 %v20082_v1  ;;  %v19833_v27 = vld [vmem:[%s25084_s4 + $0x1158] ss:$12 sps:$4 sm:$0xff]   ;;  %v19838_v29 = vld [vmem:[%s25084_s4 + $0x1174] ss:$12 sps:$4 sm:$0xff]  }
 0x5f3   : > { %10898 = vmatpush1.bf16.msra.mxu1 %v19777_v26  ;;  %17263 = vmatpush3.bf16.msra.mxu0 %v19781_v62  ;;  %v19836_v26 = vld [vmem:[%s25084_s4 + $0x1170] ss:$12 sps:$4 sm:$0xff]   ;;  %v19841_v62 = vld [vmem:[%s25084_s4 + $0x118c] ss:$12 sps:$4 sm:$0xff]  }
 0x5f4   : > { %10899 = vmatprep.subr.bf16.mxu1 %v19784_v53  ;;  %17264 = vmatprep.subr.bf16.mxu0 %v19785_v35  ;;  %v19839_v53 = vld [vmem:[%s25084_s4 + $0x1188] ss:$12 sps:$4 sm:$0xff]   ;;  %v19844_v35 = vld [vmem:[%s25084_s4 + $0x11a4] ss:$12 sps:$4 sm:$0xff]  }
 0x5f6   : > { %16284 = vmatmul.mubr.msk.bf16.gmra.mrb[48].mxu0 %vm5586_vm9, %v23932_v4 }
 0x5f7   : > { %10900 = vmatpush1.bf16.msra.mxu1 %v19782_v30  ;;  %17265 = vmatpush3.bf16.msra.mxu0 %v19786_v51  ;;  %v19842_v30 = vld [vmem:[%s25084_s4 + $0x11a0] ss:$12 sps:$4 sm:$0xff]   ;;  %v19845_v51 = vld [vmem:[%s25084_s4 + $0x11bc] ss:$12 sps:$4 sm:$0x3f]  }
 0x5f8   : > { %11033 = vmatprep.mubr.bf16.mxu0 %v23696_v50  ;;  %10901 = vmatprep.subr.bf16.mxu1 %v19789_v57  ;;  %v19796_v50 = vld [vmem:[%s25084_s4 + $0x1070] ss:$12 sps:$4 sm:$0xff]   ;;  %v19847_v57 = vld [vmem:[%s25084_s4 + $0x11b8] ss:$12 sps:$4 sm:$0x3f]  }
 0x5f9   : > { %17266 = vmatprep.subr.bf16.mxu0 %v19790_v42 }
 0x5fb   : > { %10902 = vmatpush1.bf16.msra.mxu1 %v19787_v9  ;;  %17267 = vmatpush3.bf16.msra.mxu0 %v19791_v44 }
 0x5fc   : > { %10903 = vmatprep.subr.bf16.mxu1 %v19794_v37  ;;  %17268 = vmatprep.subr.bf16.mxu0 %v19795_v47  ;;  %v10887_v37 = vsel %vm3840_vm4, %v19847_v57, 0 }
 0x5ff   : > { %10904 = vmatpush1.bf16.msra.mxu1 %v19792_v33  ;;  %17269 = vmatpush3.bf16.msra.mxu0 %v19796_v50 }
 0x600   : > { %10905 = vmatprep.subr.bf16.mxu1 %v19799_v63  ;;  %17270 = vmatprep.subr.bf16.mxu0 %v19800_v52 }
 0x603   : > { %10906 = vmatpush1.bf16.msra.mxu1 %v19797_v60  ;;  %17271 = vmatpush3.bf16.msra.mxu0 %v19801_v21 }
 0x604   : > { %10907 = vmatprep.subr.bf16.mxu1 %v19804_v20  ;;  %17272 = vmatprep.subr.bf16.mxu0 %v19805_v32 }
 0x607   : > { %10908 = vmatpush1.bf16.msra.mxu1 %v19802_v8  ;;  %17273 = vmatpush3.bf16.msra.mxu0 %v19806_v59 }
 0x608   : > { %10909 = vmatprep.subr.bf16.mxu1 %v19809_v19  ;;  %17274 = vmatprep.subr.bf16.mxu0 %v19810_v34 }
 0x60b   : > { %10910 = vmatpush1.bf16.msra.mxu1 %v19807_v55  ;;  %17275 = vmatpush3.bf16.msra.mxu0 %v19811_v31 }
 0x60c   : > { %10911 = vmatprep.subr.bf16.mxu1 %v19814_v24  ;;  %17705 = vmatprep.subr.bf16.mxu0 %v19818_v58 }
 0x60e   : > { %11034 = vmatmul.mubr.bf16.vlgmr.msra.gmra.mrb[88].mxu0 %v23906_v17 }
 0x60f   : > { %10912 = vmatpush1.bf16.msra.mxu1 %v19812_v48  ;;  %11041 = vmatprep.mubr.bf16.mxu0 %v23683_v46 }
 0x610   : > { %10913 = vmatprep.subr.bf16.mxu1 %v19817_v23  ;;  %17706 = vmatpush3.bf16.msra.mxu0 %v19818_v58 }
 0x611   : > { %17707 = vmatprep.subr.bf16.mxu0 %v19822_v40 }
 0x613   : > { %10914 = vmatpush1.bf16.msra.mxu1 %v19815_v16 }
 0x614   : > { %10915 = vmatprep.subr.bf16.mxu1 %v19821_v45  ;;  %17708 = vmatpush3.bf16.msra.mxu0 %v19822_v40 }
 0x615   : > { %18563 = vmatprep.subr.msk.bf16.mxu0 %vm3840_vm4, %v19826_v56 }
 0x616   : > { %11042 = vmatmul.mubr.bf16.gmra.mrb[92].mxu0 %v23898_v38 }
 0x617   : > { %10916 = vmatpush1.bf16.msra.mxu1 %v19819_v39  ;;  %17711 = vmatprep.mubr.msk.bf16.mxu0 %vm5586_vm9, %v23951_v11  ;;  %v19849_v39 = vld [vmem:[%s25087_s7 + $0x84] sm:$0xff]  }
 0x618   : > { %10917 = vmatprep.subr.bf16.mxu1 %v19825_v49  ;;  %17710 = vmatpush3.bf16.msra.mxu0 %v10893_v10 }
 0x61b   : > { %10918 = vmatpush1.bf16.msra.mxu1 %v19823_v22  ;;  %v19851_v22 = vld [vmem:[%s25087_s7 + $0x8c] sm:$0xff]  }
 0x61c   : > { %10919 = vmatprep.subr.bf16.mxu1 %v19829_v61  ;;  %v19852_v61 = vld [vmem:[%s25087_s7 + $0xd4] sm:$0xff]  }
 0x61e   : > { %17712 = vmatmul.mubr.msk.bf16.vlgmr.msra.gmra.mrb[60].mxu0 %vm5586_vm9, %v23932_v4 }
 0x61f   : > { %10920 = vmatpush1.bf16.msra.mxu1 %v19827_v0  ;;  %11292 = vmatprep.mubr.f32.mxu0 %v20083_v36 }
 0x620   : > { %10921 = vmatprep.subr.bf16.mxu1 %v19832_v3 }
 0x623   : > { %10922 = vmatpush1.bf16.msra.mxu1 %v19830_v28 }
 0x624   : > { %10923 = vmatprep.subr.bf16.mxu1 %v19835_v54 }
 0x627   : > { %10924 = vmatpush1.bf16.msra.mxu1 %v19833_v27  ;;  %v19853_v27 = vld [vmem:[%s25087_s7 + $0x94] sm:$0xff]  }
 0x628   : > { %10925 = vmatprep.subr.bf16.mxu1 %v19838_v29 }
 0x62b   : > { %10926 = vmatpush1.bf16.msra.mxu1 %v19836_v26  ;;  %v19854_v26 = vld [vmem:[%s25087_s7 + $0xdc] sm:$0xff]  }
 0x62c   : > { %10948 = vmatprep.subr.bf16.mxu1 %v19841_v62 }
 0x62e   : > { %10928 = vmatmul.mubr.bf16.vlgmr.msra.gmra.mrb[44].mxu1 %v23906_v17 }
 0x62f   : > { %10937 = vmatprep.mubr.bf16.mxu1 %v23683_v46  ;;  %10949 = vmatpush1.bf16.msra.mxu1 %v19839_v53 }
 0x630   : > { %10950 = vmatprep.subr.bf16.mxu1 %v19844_v35 }
 0x631   : > { %v17177_v42 = vpop.f32.mrb[68].mxu1 }
 0x632   : > { %v17178_v9 = vpop.f32.mrb[69].mxu1 }
 0x633   : > { %v17179_v44 = vadd.f32 %v17178_v9, %v17177_v42  ;;  %v17180_v17 = vpop.f32.mrb[70].mxu1  ;;  %10951 = vmatpush1.bf16.msra.mxu1 %v19842_v30  ;;  %v19855_v30 = vld [vmem:[%s25087_s7 + $0x9c] sm:$0xff]  }
 0x634   : > { %v17181_v46 = vpop.f32.mrb[71].mxu1  ;;  %16420 = vmatprep.subr.msk.bf16.mxu1 %vm3840_vm4, %v19845_v51 }
 0x635   : > { %v18032_v47 = vadd.f32 %v23771_v25, %v17179_v44  ;;  %v17182_v33 = vadd.f32 %v17181_v46, %v17180_v17 }
 0x636   : > { %10938 = vmatmul.mubr.bf16.gmra.mrb[48].mxu1 %v23898_v38 }
 0x637   : > { %v18042_v50 = vadd.f32 %v23780_v6, %v17182_v33  ;;  %10953 = vmatpush1.bf16.msra.mxu1 %v10887_v37  ;;  %10980 = vmatprep.mubr.bf16.mxu1 %v20082_v1 }
 0x639   : > { %v17183_v63 = vpop.f32.mrb[72].mxu1 }
 0x63a   : > { %v17184_v52 = vpop.f32.mrb[73].mxu1 }
 0x63b   : > { %v17185_v60 = vadd.f32 %v17184_v52, %v17183_v63  ;;  %v17186_v21 = vpop.f32.mrb[74].mxu1 }
 0x63c   : > { %v17187_v20 = vpop.f32.mrb[75].mxu1 }
 0x63d   : > { %v18027_v32 = vadd.f32 %v23802_v7, %v17185_v60  ;;  %v17188_v8 = vadd.f32 %v17187_v20, %v17186_v21 }
 0x63e   : > { %16421 = vmatmul.mubr.msk.bf16.vlgmr.msra.gmra.mrb[44].mxu1 %vm5586_vm9, %v23951_v11 }
 0x63f   : > { %v18037_v25 = vadd.f32 %v23807_v14, %v17188_v8  ;;  %10990 = vmatprep.mubr.bf16.mxu1 %v20082_v1 }
 0x646   : > { %16422 = vmatmul.mubr.msk.bf16.gmra.mrb[48].mxu1 %vm5586_vm9, %v23932_v4 }
 0x661   : > { %v17210_v6 = vpop.f32.mrb[80].mxu0 }
 0x662   : > { %v17211_v38 = vpop.f32.mrb[81].mxu0 }
 0x663   : > { %v17212_v59 = vadd.f32 %v17211_v38, %v17210_v6  ;;  %v17213_v19 = vpop.f32.mrb[82].mxu0 }
 0x664   : > { %v17214_v34 = vpop.f32.mrb[83].mxu0 }
 0x665   : > { %v24165_v55 = vadd.f32 %v23935_v2, %v17212_v59  ;;  %v17215_v7 = vadd.f32 %v17214_v34, %v17213_v19 }
 0x667   : > { %v24168_v31 = vadd.f32 %v23954_v18, %v17215_v7  ;;  %v19848_v18 = vld [vmem:[%s25087_s7 + $0xc4] sm:$0xff]  }
 0x668   : > { %17299 = vmatprep.subr.bf16.mxu1 %v19848_v18 }
 0x669   : > { %v17216_v11 = vpop.f32.mrb[84].mxu0  ;;  %17300 = vmatpush3.bf16.msra.mxu1 %v19849_v39 }
 0x66a   : > { %v17217_v24 = vpop.f32.mrb[85].mxu0 }
 0x66b   : > { %v17218_v14 = vadd.f32 %v17217_v24, %v17216_v11  ;;  %v17219_v58 = vpop.f32.mrb[86].mxu0 }
 0x66c   : > { %v17220_v1 = vpop.f32.mrb[87].mxu0 }
 0x66d   : > { %v24171_v48 = vadd.f32 %v23969_v15, %v17218_v14  ;;  %v17221_v4 = vadd.f32 %v17220_v1, %v17219_v58  ;;  %v19850_v15 = vld [vmem:[%s25087_s7 + $0xcc] sm:$0xff]  }
 0x66e   : > { %17301 = vmatprep.subr.bf16.mxu1 %v19850_v15 }
 0x66f   : > { %v24174_v23 = vadd.f32 %v23979_v12, %v17221_v4  ;;  %17302 = vmatpush3.bf16.msra.mxu1 %v19851_v22 }
 0x670   : > { %17303 = vmatprep.subr.bf16.mxu1 %v19852_v61 }
 0x673   : > { %17304 = vmatpush3.bf16.msra.mxu1 %v19853_v27 }
 0x674   : > { %17305 = vmatprep.subr.bf16.mxu1 %v19854_v26 }
 0x677   : > { %17306 = vmatpush3.bf16.msra.mxu1 %v19855_v30 }
 0x6b1   : > { %v17243_v40 = vpop.f32.mrb[76].mxu1 }
 0x6b2   : > { %v17244_v16 = vpop.f32.mrb[77].mxu1 }
 0x6b3   : > { %v17245_v2 = vadd.f32 %v17244_v16, %v17243_v40  ;;  %v17246_v45 = vpop.f32.mrb[78].mxu1 }
 0x6b4   : > { %v17247_v56 = vpop.f32.mrb[79].mxu1 }
 0x6b5   : > { %v17248_v49 = vadd.f32 %v17247_v56, %v17246_v45  ;;  %v18033_v12 = vadd.f32 %v18032_v47, %v17245_v2 }
 0x6b7   : > { %v18043_v10 = vadd.f32 %v18042_v50, %v17248_v49 }
 0x6b9   : > { %v17249_v0 = vpop.f32.mrb[80].mxu1 }
 0x6ba   : > { %v17250_v3 = vpop.f32.mrb[81].mxu1 }
 0x6bb   : > { %v17251_v28 = vadd.f32 %v17250_v3, %v17249_v0  ;;  %v17252_v54 = vpop.f32.mrb[82].mxu1 }
 0x6bc   : > { %v17253_v29 = vpop.f32.mrb[83].mxu1 }
 0x6bd   : > { %v17254_v62 = vadd.f32 %v17253_v29, %v17252_v54  ;;  %v18028_v53 = vadd.f32 %v18027_v32, %v17251_v28 }
 0x6bf   : > { %v18038_v35 = vadd.f32 %v18037_v25, %v17254_v62 }
 0x6c1   : > { %v10391_v51 = vpop.f32.mrb[44].mxu0  ;;  %v17703_v57 = vpop.f32.mrb[40].mxu1 }
 0x6c2   : > { %v18029_v42 = vadd.f32 %v18028_v53, %v17703_v57  ;;  %v10393_v9 = vpop.f32.mrb[45].mxu0  ;;  %v10493_v44 = vpop.f32.mrb[41].mxu1 }
 0x6c3   : > { %v18034_v17 = vadd.f32 %v18033_v12, %v10493_v44  ;;  %v10395_v46 = vpop.f32.mrb[46].mxu0  ;;  %v17704_v37 = vpop.f32.mrb[42].mxu1 }
 0x6c4   : > { %v18039_v47 = vadd.f32 %v18038_v35, %v17704_v37  ;;  %v10397_v33 = vpop.f32.mrb[47].mxu0  ;;  %v10496_v50 = vpop.f32.mrb[43].mxu1 }
 0x6c5   : > { %v18044_v63 = vadd.f32 %v18043_v10, %v10496_v50 }
 0x6c9   : > { %v10401_v52 = vpop.f32.mrb[48].mxu0 }
 0x6ca   : > { %v24200_v60 = vpop.f32.mrb[49].mxu0 }
 0x6cb   : > { %v24202_v21 = vpop.f32.mrb[50].mxu0 }
 0x6cc   : > { %v24204_v20 = vpop.f32.mrb[51].mxu0 }
 0x6e1   : > { %v17276_v32 = vpop.f32.mrb[88].mxu0 }
 0x6e2   : > { %v17277_v8 = vpop.f32.mrb[89].mxu0 }
 0x6e3   : > { %v17278_v25 = vadd.f32 %v17277_v8, %v17276_v32  ;;  %v17279_v6 = vpop.f32.mrb[90].mxu0 }
 0x6e4   : > { %v17280_v38 = vpop.f32.mrb[91].mxu0 }
 0x6e5   : > { %v17281_v59 = vadd.f32 %v17280_v38, %v17279_v6  ;;  %v18053_v19 = vadd.f32 %v24165_v55, %v17278_v25 }
 0x6e7   : > { %v18063_v34 = vadd.f32 %v24168_v31, %v17281_v59 }
 0x6e9   : > { %v17282_v7 = vpop.f32.mrb[92].mxu0 }
 0x6ea   : > { %v17283_v11 = vpop.f32.mrb[93].mxu0 }
 0x6eb   : > { %v17284_v24 = vadd.f32 %v17283_v11, %v17282_v7  ;;  %v17285_v14 = vpop.f32.mrb[94].mxu0 }
 0x6ec   : > { %v17286_v58 = vpop.f32.mrb[95].mxu0 }
 0x6ed   : > { %v17287_v1 = vadd.f32 %v17286_v58, %v17285_v14  ;;  %v18048_v4 = vadd.f32 %v24171_v48, %v17284_v24 }
 0x6ef   : > { %v18058_v40 = vadd.f32 %v24174_v23, %v17287_v1 }
 0x6f1   : > { %v17713_v16 = vpop.f32.mrb[60].mxu0 }
 0x6f2   : > { %v18049_v2 = vadd.f32 %v18048_v4, %v17713_v16  ;;  %v11084_v45 = vpop.f32.mrb[61].mxu0 }
 0x6f3   : > { %v18054_v56 = vadd.f32 %v18053_v19, %v11084_v45  ;;  %v17714_v18 = vpop.f32.mrb[62].mxu0 }
 0x6f4   : > { %v11131_v39 = vmax.f32 %v18029_v42, %v18049_v2  ;;  %v18059_v15 = vadd.f32 %v18058_v40, %v17714_v18  ;;  %v11087_v55 = vpop.f32.mrb[63].mxu0 }
 0x6f5   : > { %v11125_v49 = vmax.f32 %v18034_v17, %v18054_v56  ;;  %v18064_v31 = vadd.f32 %v18063_v34, %v11087_v55 }
 0x6f6   : > { %v11134_v12 = vmax.f32 %v18039_v47, %v18059_v15  ;;  %v11160_v22 = vrot.slane %v11131_v39, 1 }
 0x6f7   : > { %v11128_v10 = vmax.f32 %v18044_v63, %v18064_v31  ;;  %v11153_v0 = vrot.slane %v11125_v49, 1  ;;  %v11193_v31 = vld [vmem:[%s25086_s6 + $0x8] sm:$0x1f] }
 0x6f8   : > { %v11166_v61 = vrot.slane %v11134_v12, 1 }
 0x6f9   : > { %v11154_v3 = vrot.slane %v11128_v10, 1 }
 0x6fa   : > { %v11167_v48 = vsel %vm2150_vm3, %v11160_v22, %v11166_v61  ;;  %v11191_v28 = vmax.f32 %v11134_v12, %v11166_v61  ;;  %v19856_v12 = vld [vmem:[%s25087_s7 + $0xe4] sm:$0xff]   ;;  %v19859_v61 = vld [vmem:[%s25087_s7 + $0xac] sm:$0xff]  }
 0x6fb   : > { %v11188_v23 = vmax.f32 %v11131_v39, %v11167_v48  ;;  %v11161_v54 = vsel %vm2150_vm3, %v11154_v3, %v11160_v22  ;;  %v11155_v27 = vsel %vm2150_vm3, %v11153_v0, %v11154_v3  ;;  %17307 = vmatprep.subr.bf16.mxu1 %v19856_v12  ;;  %v19858_v22 = vld [vmem:[%s25087_s7 + $0xec] sm:$0xff]   ;;  %v19860_v0 = vld [vmem:[%s25087_s7 + $0xf4] sm:$0xff]   ;;  %v19862_v48 = vld [vmem:[%s25087_s7 + $0xfc] sm:$0xff]  }
 0x6fc   : > { %v11185_v29 = vmax.f32 %v11128_v10, %v11161_v54  ;;  %v11182_v26 = vmax.f32 %v11125_v49, %v11155_v27  ;;  %v11192_v49 = vld [vmem:[%s25086_s6] sm:$0xff]  ;;  %v19861_v3 = vld [vmem:[%s25087_s7 + $0xb4] sm:$0xff]  }
 0x6fd   : > { %v17950_v62 = vpack.c.bf16 %v11191_v28, %v11188_v23  ;;  %v19857_v10 = vld [vmem:[%s25087_s7 + $0xa4] sm:$0xff]   ;;  %v19863_v28 = vld [vmem:[%s25087_s7 + $0xbc] sm:$0xff]   ;;  %v19873_v12 = vld [vmem:[%s25087_s7 + $0x50] sm:$0xff]  }
 0x6fe   : > { %v17946_v53 = vpack.c.bf16 %v11185_v29, %v11182_v26  ;;  %17308 = vmatpush3.bf16.msra.mxu1 %v19857_v10  ;;  %v19864_v23 = vld [vmem:[%s25087_s7 + $0x104] ss:$0 sps:$4 sm:$0x33]   ;;  %v19867_v29 = vld [vmem:[%s25087_s7 + $0x358] sm:$0xff]   ;;  %v11194_v26 = vld [vmem:[%s25085_s5] sm:$0x7] }
 0x6ff   : > { %17309 = vmatprep.subr.bf16.mxu1 %v19858_v22  ;;  %v19865_v54 = vld [vmem:[%s25087_s7 + $0x40] sm:$0xff]   ;;  %v11618_v27 = vsel %vm11616_vm13, %v19864_v23, 0  ;;  %v19874_v22 = vld [vmem:[%s25087_s7 + $0x10] sm:$0xff]  }
 0x700   : > { %v19872_v10 = vld [vmem:[%s25087_s7 + $0x320] sm:$0xff]  }
 0x701   : > { %v19881_v23 = vld [vmem:[%s25087_s7 + $0x60] sm:$0xff]  }
 0x702   : > { %17310 = vmatpush3.bf16.msra.mxu1 %v19859_v61  ;;  %v19875_v61 = vld [vmem:[%s25087_s7 + $0x368] sm:$0xff]  }
 0x703   : > { %17311 = vmatprep.subr.bf16.mxu1 %v19860_v0  ;;  %v19877_v0 = vld [vmem:[%s25087_s7 + $0x58] sm:$0xff]  }
 0x706   : > { %17312 = vmatpush3.bf16.msra.mxu1 %v19861_v3  ;;  %v19876_v3 = vld [vmem:[%s25087_s7 + $0x328] sm:$0xff]  }
 0x707   : > { %17313 = vmatprep.subr.bf16.mxu1 %v19862_v48  ;;  %v19878_v48 = vld [vmem:[%s25087_s7 + $0x18] sm:$0xff]  }
 0x70a   : > { %17314 = vmatpush3.bf16.msra.mxu1 %v19863_v28  ;;  %v19879_v28 = vld [vmem:[%s25087_s7 + $0x370] sm:$0xff]  }
 0x70b   : > { %17347 = vmatprep.subr.bf16.mxu1 %v19865_v54  ;;  %v19880_v54 = vld [vmem:[%s25087_s7 + $0x330] sm:$0xff]  }
 0x711   : > { %v10982_v35 = vpop.f32.mrb[44].mxu1 }
 0x712   : > { %v11123_v30 = vmax.f32 %v10391_v51, %v10982_v35  ;;  %v10984_v57 = vpop.f32.mrb[45].mxu1  ;;  %v11203_v35 = vrot.slane %v11194_v26, %v4782_v43 }
 0x713   : > { %v11124_v42 = vmax.f32 %v10393_v9, %v10984_v57  ;;  %v10986_v44 = vpop.f32.mrb[46].mxu1 }
 0x714   : > { %v11126_v17 = vmax.f32 %v10395_v46, %v10986_v44  ;;  %v10988_v37 = vpop.f32.mrb[47].mxu1  ;;  %v11147_v50 = vrot.slane %v11123_v30, 1 }
 0x715   : > { %v11127_v47 = vmax.f32 %v10397_v33, %v10988_v37  ;;  %v11150_v32 = vrot.slane %v11124_v42, 1 }
 0x716   : > { %v11148_v63 = vrot.slane %v11126_v17, 1 }
 0x717   : > { %v11151_v8 = vrot.slane %v11127_v47, 1 }
 0x718   : > { %v11149_v25 = vsel %vm2150_vm3, %v11147_v50, %v11148_v63 }
 0x719   : > { %v11180_v6 = vmax.f32 %v11123_v30, %v11149_v25  ;;  %v10992_v38 = vpop.f32.mrb[48].mxu1  ;;  %v11152_v59 = vsel %vm2150_vm3, %v11150_v32, %v11151_v8 }
 0x71a   : > { %v11129_v19 = vmax.f32 %v10401_v52, %v10992_v38  ;;  %v10994_v34 = vpop.f32.mrb[49].mxu1  ;;  %v11181_v7 = vmax.f32 %v11124_v42, %v11152_v59 }
 0x71b   : > { %v11130_v51 = vmax.f32 %v24200_v60, %v10994_v34  ;;  %v10996_v9 = vpop.f32.mrb[50].mxu1 }
 0x71c   : > { %v11156_v11 = vrot.slane %v11129_v19, 1  ;;  %v11132_v46 = vmax.f32 %v24202_v21, %v10996_v9  ;;  %v10998_v33 = vpop.f32.mrb[51].mxu1 }
 0x71d   : > { %v11158_v24 = vrot.slane %v11130_v51, 1  ;;  %v11133_v14 = vmax.f32 %v24204_v20, %v10998_v33 }
 0x71e   : > { %v11157_v58 = vsel %vm2150_vm3, %v11148_v63, %v11156_v11  ;;  %v11162_v1 = vrot.slane %v11132_v46, 1 }
 0x71f   : > { %v11183_v4 = vmax.f32 %v11126_v17, %v11157_v58  ;;  %v11164_v40 = vrot.slane %v11133_v14, 1  ;;  %v11159_v16 = vsel %vm2150_vm3, %v11151_v8, %v11158_v24 }
 0x720   : > { %v11163_v52 = vsel %vm2150_vm3, %v11156_v11, %v11162_v1  ;;  %v11189_v2 = vmax.f32 %v11132_v46, %v11162_v1  ;;  %v11184_v45 = vmax.f32 %v11127_v47, %v11159_v16  ;;  %v11207_v47 = vrot.slane %v11194_v26, %v4786_v5  ;;  %v19866_v16 = vld [vmem:[%s25087_s7] sm:$0xff]  }
 0x721   : > { %v11186_v60 = vmax.f32 %v11129_v19, %v11163_v52  ;;  %v11165_v56 = vsel %vm2150_vm3, %v11158_v24, %v11164_v40  ;;  %v11190_v21 = vmax.f32 %v11133_v14, %v11164_v40  ;;  %v17938_v18 = vpack.c.bf16 %v11183_v4, %v11180_v6 }
 0x722   : > { %v11187_v39 = vmax.f32 %v11130_v51, %v11165_v56  ;;  %v17936_v15 = vpack.c.bf16 %v11184_v45, %v11181_v7 }
 0x723   : > { %v17943_v20 = vpack.c.bf16 %v11189_v2, %v11186_v60  ;;  %v19869_v60 = vld [vmem:[%s25087_s7 + $0x48] sm:$0xff]  }
 0x724   : > { %v17940_v55 = vpack.c.bf16 %v11190_v21, %v11187_v39  ;;  %17937 = vmatprep.subr.bf16.mxu0 %v17936_v15  ;;  %v19868_v15 = vld [vmem:[%s25087_s7 + $0x318] sm:$0xff]  }
 0x725   : > { %17939 = vmatpush1.bf16.msra.mxu0 %v17938_v18 }
 0x726   : > { %17942 = vmatprep.subr.msk.bf16.mxu0 %vm17941_vm11, %v17940_v55  ;;  %v19870_v55 = vld [vmem:[%s25087_s7 + $0x8] sm:$0xff]  }
 0x729   : > { %17945 = vmatpush1.bf16.msk.msra.mxu0 %vm17941_vm11, %v17943_v20 }
 0x72a   : > { %17947 = vmatprep.subr.bf16.mxu0 %v17946_v53 }
 0x72c   : > { %16427 = vmatmul.mubr.msk.f32.vlgmr.msra.gmra.mrb[96].mxu0 %vm11211_vm12, %v11192_v49 }
 0x72d   : > { %17949 = vmatpush3.bf16.msra.mxu0 %v17946_v53  ;;  %11298 = vmatprep.mubr.f32.mxu0 %v20083_v36 }
 0x72e   : > { %17952 = vmatprep.subr.msk.bf16.mxu0 %vm17941_vm11, %v17950_v62 }
 0x730   : > { %16428 = vmatmul.mubr.msk.f32.gmra.mrb[98].mxu0 %vm11211_vm12, %v11193_v31 }
 0x731   : > { %17955 = vmatpush3.bf16.msk.msra.mxu0 %vm17941_vm11, %v17950_v62  ;;  %17723 = vmatprep.mubr.msk.f32.mxu0 %vm11211_vm12, %v11192_v49  ;;  %v11199_v62 = vrot.slane %v11194_v26, %v4778_v41  ;;  %v19871_v49 = vld [vmem:[%s25087_s7 + $0x360] sm:$0xff]   ;;  %v19885_v26 = vld [vmem:[%s25087_s7 + $0x68] sm:$0xff]  }
 0x732   : > { %17726 = vmatprep.subr.bf16.mxu0 %v20083_v36 }
 0x734   : > { %17724 = vmatmul.mubr.msk.f32.vlgmr.msra.gmra.mrb[100].mxu0 %vm11211_vm12, %v11193_v31 }
 0x735   : > { %17727 = vmatpush3.bf16.msra.mxu0 %v11618_v27  ;;  %17728 = vmatprep.mubr.msk.bf16.mxu0 %vm20085_vm14, %v20083_v36  ;;  %v19882_v27 = vld [vmem:[%s25087_s7 + $0x20] sm:$0xff]  }
 0x736   : > { %17323 = vmatprep.subr.bf16.mxu0 %v19867_v29  ;;  %v19883_v29 = vld [vmem:[%s25087_s7 + $0x378] sm:$0xff]  }
 0x7ff   : > { %v11294_v53 = vpop.f32.mrb[96].mxu0 }
 0x800   : > { %v11296_v30 = vpop.f32.mrb[97].mxu0  ;;  %v11295_v57 = vadd.f32 %v11294_v53, %v11199_v62  ;;  %v19886_v53 = vld [vmem:[%s25087_s7 + $0x28] sm:$0xff]  }
 0x801   : > { %v11297_v42 = vadd.f32 %v11296_v30, %v11203_v35  ;;  %v19889_v30 = vld [vmem:[%s25087_s7 + $0x70] sm:$0xff]  }
 0x802   : > { %v11380_v63 = vmax.f32 %v11295_v57, 0.0  ;;  %v19888_v57 = vld [vmem:[%s25087_s7 + $0x340] sm:$0xff]  }
 0x803   : > { %v11300_v44 = vpop.f32.mrb[98].mxu0  ;;  %v11381_v8 = vmax.f32 %v11297_v42, 0.0  ;;  %v19890_v42 = vld [vmem:[%s25087_s7 + $0x30] sm:$0xff]  }
 0x804   : > { %v11301_v17 = vadd.f32 %v11300_v44, %v11199_v62  ;;  %v11302_v37 = vpop.f32.mrb[99].mxu0  ;;  %v19884_v62 = vld [vmem:[%s25087_s7 + $0x338] sm:$0xff]   ;;  %v19891_v44 = vld [vmem:[%s25087_s7 + $0x388] sm:$0xff]  }
 0x805   : > { %v11303_v50 = vadd.f32 %v11302_v37, %v11203_v35  ;;  %v19887_v35 = vld [vmem:[%s25087_s7 + $0x380] sm:$0xff]   ;;  %v19892_v37 = vld [vmem:[%s25087_s7 + $0x348] sm:$0xff]  }
 0x806   : > { %v11383_v32 = vmax.f32 %v11301_v17, 0.0  ;;  %v19893_v17 = vld [vmem:[%s25087_s7 + $0x78] sm:$0xff]  }
 0x807   : > { %v11384_v25 = vmax.f32 %v11303_v50, 0.0  ;;  %v17725_v6 = vpop.f32.mrb[100].mxu0  ;;  %v19895_v50 = vld [vmem:[%s25087_s7 + $0x390] sm:$0xff]  }
 0x808   : > { %v24276_v41 = vpack.c.bf16 %v11383_v32, %v11380_v63  ;;  %v11377_v38 = vadd.f32 %v17725_v6, %v11207_v47  ;;  %v11371_v59 = vpop.f32.mrb[101].mxu0  ;;  %v19897_v63 = vld [vmem:[%s25087_s7 + $0x314] ss:$0 sps:$4 sm:$0x33]   ;;  %v19898_v6 = vld [vmem:[%s25087_s7 + $0x148] sm:$0xff]  }
 0x809   : > { %v24278_v43 = vpack.c.bf16 %v11384_v25, %v11381_v8  ;;  %v11372_v19 = vadd.f32 %v11371_v59, %v11207_v47  ;;  %v19894_v47 = vld [vmem:[%s25087_s7 + $0x38] sm:$0xff]   ;;  %v19896_v32 = vld [vmem:[%s25087_s7 + $0x350] sm:$0xff]   ;;  %v12206_v25 = vsel %vm11616_vm13, %v19897_v63, 0  ;;  %v19900_v59 = vld [vmem:[%s25087_s7 + $0x108] sm:$0xff]  }
 0x80a   : > { %v11385_v34 = vmax.f32 %v11377_v38, 0.0  ;;  %v11491_v7 = vshrl.u32 %v24276_v41, 16  ;;  %v11493_v51 = vshll.u32 %v24276_v41, 16  ;;  %v19899_v8 = vld [vmem:[%s25087_s7 + $0x398] ss:$0 sps:$4 sm:$0x33]  }
 0x80b   : > { %v11382_v13 = vmax.f32 %v11372_v19, 0.0  ;;  %v11498_v5 = vshrl.u32 %v24278_v43, 16  ;;  %v11500_v9 = vshll.u32 %v24278_v43, 16  ;;  %v11836_v38 = vsel %vm11616_vm13, %v19899_v8, 0  ;;  %v19946_v63 = vld [vmem:[%s25087_s7 + $0x1ec] sm:$0xff]  }
 0x80c   : > { %v11495_v11 = vrot.slane %v11493_v51, 1  ;;  %v12775_v46 = vrot.slane %v11491_v7, 1  ;;  %v12776_v33 = vrot.slane %v11493_v51, 2  ;;  %v19903_v19 = vld [vmem:[%s25087_s7 + $0x80] ss:$0 sps:$4 sm:$0x33]  }
 0x80d   : > { %v24284_v24 = vpack.c.bf16 %v11385_v34, %v11382_v13  ;;  %v11502_v14 = vrot.slane %v11500_v9, 1  ;;  %v12778_v58 = vrot.slane %v11498_v5, 1  ;;  %v12779_v1 = vrot.slane %v11500_v9, 2  ;;  %v19901_v34 = vld [vmem:[%s25087_s7 + $0x150] sm:$0xff]   ;;  %v19904_v9 = vld [vmem:[%s25087_s7 + $0x158] sm:$0xff]  }
 0x80e   : > { %v24286_v4 = vor.u32 %v12776_v33, %v12775_v46  ;;  %v24293_v45 = vor.u32 %v11495_v11, %v11491_v7  ;;  %v12328_v7 = vrot.slane %v24278_v43, 1  ;;  %v19902_v51 = vld [vmem:[%s25087_s7 + $0x110] sm:$0xff]   ;;  %v12022_v13 = vsel %vm11616_vm13, %v19903_v19, 0  ;;  %v19905_v11 = vld [vmem:[%s25087_s7 + $0x118] sm:$0xff]   ;;  %v19908_v46 = vld [vmem:[%s25087_s7 + $0x160] sm:$0xff]  }
 0x80f   : > { %v11503_v40 = vor.u32 %v11502_v14, %v11498_v5  ;;  %v11505_v52 = vshrl.u32 %v24284_v24, 16  ;;  %v11507_v2 = vshll.u32 %v24284_v24, 16  ;;  %v24298_v56 = vor.u32 %v12779_v1, %v12778_v58  ;;  %v19906_v5 = vld [vmem:[%s25087_s7 + $0x2d4] sm:$0xff]   ;;  %v19909_v14 = vld [vmem:[%s25087_s7 + $0x120] sm:$0xff]   ;;  %v19912_v1 = vld [vmem:[%s25087_s7 + $0x168] sm:$0xff]  }
 0x810   : > { %v19907_v33 = vld [vmem:[%s25087_s7 + $0x294] sm:$0xff]   ;;  %v19910_v58 = vld [vmem:[%s25087_s7 + $0x2dc] sm:$0xff]   ;;  %v19947_v8 = vld [vmem:[%s25087_s7 + $0x1ac] sm:$0xff]  }
 0x811   : > { %11652 = vmatprep.mubr.bf16.mxu1 %v11503_v40  ;;  %v11509_v21 = vrot.slane %v11507_v2, 1  ;;  %v12781_v18 = vrot.slane %v11505_v52, 1  ;;  %v12782_v39 = vrot.slane %v11507_v2, 2  ;;  %v19916_v2 = vld [vmem:[%s25087_s7 + $0x170] sm:$0xff]  }
 0x812   : > { %11653 = vmatmul.mubr.bf16.vlgmr.msra.gmra.mrb[84].mxu1 %v24293_v45  ;;  %v19952_v19 = vld [vmem:[%s25087_s7 + $0x3f4] sm:$0xff]  }
 0x813   : > { %17348 = vmatpush3.bf16.msra.mxu1 %v19866_v16  ;;  %12056 = vmatprep.mubr.bf16.mxu1 %v24278_v43  ;;  %v24305_v20 = vor.u32 %v11509_v21, %v11505_v52  ;;  %v24313_v31 = vor.u32 %v12782_v39, %v12781_v18  ;;  %v19913_v16 = vld [vmem:[%s25087_s7 + $0x128] sm:$0xff]   ;;  %v19920_v18 = vld [vmem:[%s25087_s7 + $0x178] sm:$0xff]  }
 0x814   : > { %17349 = vmatprep.subr.bf16.mxu1 %v19869_v60  ;;  %v19914_v52 = vld [vmem:[%s25087_s7 + $0x2e4] sm:$0xff]   ;;  %v19917_v60 = vld [vmem:[%s25087_s7 + $0x130] sm:$0xff]  }
 0x815   : > { %17729 = vmatmul.mubr.msk.bf16.vlgmr.msra.gmra.mrb[104].mxu0 %vm11612_vm15, %v24305_v20  ;;  %v19918_v21 = vld [vmem:[%s25087_s7 + $0x2ec] sm:$0xff]  }
 0x816   : > { %17324 = vmatpush3.bf16.msra.mxu0 %v19868_v15  ;;  %11870 = vmatprep.mubr.bf16.mxu0 %v11503_v40  ;;  %v19911_v40 = vld [vmem:[%s25087_s7 + $0x29c] sm:$0xff]   ;;  %v19919_v39 = vld [vmem:[%s25087_s7 + $0x2ac] sm:$0xff]  }
 0x817   : > { %17350 = vmatpush3.bf16.msra.mxu1 %v19870_v55  ;;  %17325 = vmatprep.subr.bf16.mxu0 %v19871_v49  ;;  %v19921_v15 = vld [vmem:[%s25087_s7 + $0x138] sm:$0xff]   ;;  %v19924_v55 = vld [vmem:[%s25087_s7 + $0x180] sm:$0xff]  }
 0x818   : > { %17351 = vmatprep.subr.bf16.mxu1 %v19873_v12  ;;  %v19923_v49 = vld [vmem:[%s25087_s7 + $0x2b4] sm:$0xff]   ;;  %v19925_v12 = vld [vmem:[%s25087_s7 + $0x140] sm:$0xff]  }
 0x81a   : > { %17326 = vmatpush3.bf16.msra.mxu0 %v19872_v10  ;;  %v19926_v10 = vld [vmem:[%s25087_s7 + $0x2fc] sm:$0xff]  }
 0x81b   : > { %17352 = vmatpush3.bf16.msra.mxu1 %v19874_v22  ;;  %17327 = vmatprep.subr.bf16.mxu0 %v19875_v61  ;;  %v19930_v22 = vld [vmem:[%s25087_s7 + $0x41c] ss:$0 sps:$4 sm:$0x33]  }
 0x81c   : > { %17353 = vmatprep.subr.bf16.mxu1 %v19877_v0  ;;  %v19927_v61 = vld [vmem:[%s25087_s7 + $0x2bc] sm:$0xff]   ;;  %v19928_v0 = vld [vmem:[%s25087_s7 + $0x304] sm:$0xff]  }
 0x81e   : > { %17328 = vmatpush3.bf16.msra.mxu0 %v19876_v3  ;;  %v12327_v3 = vrot.slane %v24276_v41, 1 }
 0x81f   : > { %17354 = vmatpush3.bf16.msra.mxu1 %v19878_v48  ;;  %17329 = vmatprep.subr.bf16.mxu0 %v19879_v28  ;;  %v12653_v48 = vsel %vm11616_vm13, %v19930_v22, 0  ;;  %v19932_v28 = vld [vmem:[%s25087_s7 + $0x1cc] sm:$0xff]  }
 0x820   : > { %17355 = vmatprep.subr.bf16.mxu1 %v19881_v23  ;;  %v19929_v23 = vld [vmem:[%s25087_s7 + $0x2c4] sm:$0xff]  }
 0x821   : > { %v19977_v22 = vld [vmem:[%s25087_s7 + $0x228] sm:$0xff]  }
 0x822   : > { %17330 = vmatpush3.bf16.msra.mxu0 %v19880_v54  ;;  %v19931_v54 = vld [vmem:[%s25087_s7 + $0x30c] sm:$0xff]  }
 0x823   : > { %17356 = vmatpush3.bf16.msra.mxu1 %v19882_v27  ;;  %17331 = vmatprep.subr.bf16.mxu0 %v19883_v29  ;;  %v19933_v27 = vld [vmem:[%s25087_s7 + $0x2cc] sm:$0xff]  }
 0x824   : > { %17357 = vmatprep.subr.bf16.mxu1 %v19885_v26  ;;  %v19934_v29 = vld [vmem:[%s25087_s7 + $0x18c] sm:$0xff]   ;;  %v19937_v26 = vld [vmem:[%s25087_s7 + $0x188] ss:$0 sps:$4 sm:$0x33]  }
 0x826   : > { %17332 = vmatpush3.bf16.msra.mxu0 %v19884_v62  ;;  %v12329_v62 = vrot.slane %v24284_v24, 1 }
 0x827   : > { %17358 = vmatpush3.bf16.msra.mxu1 %v19886_v53  ;;  %17333 = vmatprep.subr.bf16.mxu0 %v19887_v35  ;;  %v19935_v53 = vld [vmem:[%s25087_s7 + $0x1d4] sm:$0xff]  }
 0x828   : > { %17359 = vmatprep.subr.bf16.mxu1 %v19889_v30  ;;  %v19936_v35 = vld [vmem:[%s25087_s7 + $0x194] sm:$0xff]   ;;  %v12435_v30 = vsel %vm11616_vm13, %v19937_v26, 0  ;;  %v19989_v26 = vld [vmem:[%s25087_s7 + $0x240] sm:$0xff]  }
 0x82a   : > { %17334 = vmatpush3.bf16.msra.mxu0 %v19888_v57  ;;  %v19940_v57 = vld [vmem:[%s25087_s7 + $0x3dc] sm:$0xff]  }
 0x82b   : > { %17360 = vmatpush3.bf16.msra.mxu1 %v19890_v42  ;;  %17335 = vmatprep.subr.bf16.mxu0 %v19891_v44  ;;  %v19938_v42 = vld [vmem:[%s25087_s7 + $0x1dc] sm:$0xff]  }
 0x82c   : > { %17361 = vmatprep.subr.bf16.mxu1 %v19893_v17  ;;  %v19939_v44 = vld [vmem:[%s25087_s7 + $0x19c] sm:$0xff]   ;;  %v19942_v17 = vld [vmem:[%s25087_s7 + $0x1e4] sm:$0xff]  }
 0x82e   : > { %17336 = vmatpush3.bf16.msra.mxu0 %v19892_v37  ;;  %v19941_v37 = vld [vmem:[%s25087_s7 + $0x39c] sm:$0xff]  }
 0x82f   : > { %17362 = vmatpush3.bf16.msra.mxu1 %v19894_v47  ;;  %17337 = vmatprep.subr.bf16.mxu0 %v19895_v50  ;;  %v19943_v47 = vld [vmem:[%s25087_s7 + $0x1a4] sm:$0xff]  }
 0x830   : > { %17744 = vmatprep.subr.bf16.mxu1 %v20083_v36  ;;  %v19944_v50 = vld [vmem:[%s25087_s7 + $0x3e4] sm:$0xff]  }
 0x832   : > { %17338 = vmatpush3.bf16.msra.mxu0 %v19896_v32  ;;  %12057 = vmatmul.mubr.bf16.vlgmr.msra.gmra.mrb[88].mxu1 %v24276_v41  ;;  %v19945_v32 = vld [vmem:[%s25087_s7 + $0x3a4] sm:$0xff]  }
 0x833   : > { %17745 = vmatpush3.bf16.msra.mxu1 %v12206_v25  ;;  %17732 = vmatprep.subr.bf16.mxu0 %v20083_v36  ;;  %v19948_v25 = vld [vmem:[%s25087_s7 + $0x3ec] sm:$0xff]  }
 0x834   : > { %17746 = vmatprep.mubr.msk.bf16.mxu1 %vm20085_vm14, %v20083_v36  ;;  %17395 = vmatprep.subr.bf16.mxu1 %v19898_v6  ;;  %v19950_v6 = vld [vmem:[%s25087_s7 + $0x1f4] sm:$0xff]  }
 0x835   : > { %11871 = vmatmul.mubr.bf16.vlgmr.msra.gmra.mrb[108].mxu0 %v24293_v45  ;;  %v19915_v45 = vld [vmem:[%s25087_s7 + $0x2a4] sm:$0xff]  }
 0x836   : > { %17733 = vmatpush3.bf16.msra.mxu0 %v11836_v38  ;;  %17734 = vmatprep.mubr.msk.bf16.mxu0 %vm20085_vm14, %v20083_v36  ;;  %v19949_v38 = vld [vmem:[%s25087_s7 + $0x3ac] sm:$0xff]  }
 0x837   : > { %17738 = vmatprep.subr.bf16.mxu0 %v20083_v36 }
 0x83a   : > { %17747 = vmatmul.mubr.msk.bf16.vlgmr.msra.gmra.mrb[92].mxu1 %vm11612_vm15, %v24284_v24 }
 0x83b   : > { %17396 = vmatpush3.bf16.msra.mxu1 %v19900_v59  ;;  %12469 = vmatprep.mubr.bf16.mxu1 %v12328_v7  ;;  %v19951_v59 = vld [vmem:[%s25087_s7 + $0x1b4] sm:$0xff]  }
 0x83c   : > { %17397 = vmatprep.subr.bf16.mxu1 %v19901_v34  ;;  %v19954_v34 = vld [vmem:[%s25087_s7 + $0x1fc] sm:$0xff]  }
 0x83d   : > { %17735 = vmatmul.mubr.msk.bf16.vlgmr.msra.gmra.mrb[112].mxu0 %vm11612_vm15, %v24305_v20  ;;  %v19922_v20 = vld [vmem:[%s25087_s7 + $0x2f4] sm:$0xff]  }
 0x83e   : > { %17739 = vmatpush3.bf16.msra.mxu0 %v12022_v13  ;;  %17740 = vmatprep.mubr.msk.bf16.mxu0 %vm20085_vm14, %v20083_v36  ;;  %v19956_v13 = vld [vmem:[%s25087_s7 + $0x3fc] sm:$0xff]  }
 0x83f   : > { %17398 = vmatpush3.bf16.msra.mxu1 %v19902_v51  ;;  %17371 = vmatprep.subr.bf16.mxu0 %v19906_v5  ;;  %v19955_v51 = vld [vmem:[%s25087_s7 + $0x1bc] sm:$0xff]   ;;  %v19958_v5 = vld [vmem:[%s25087_s7 + $0x204] sm:$0xff]  }
 0x840   : > { %17399 = vmatprep.subr.bf16.mxu1 %v19904_v9  ;;  %v19957_v9 = vld [vmem:[%s25087_s7 + $0x3bc] sm:$0xff]  }
 0x843   : > { %17400 = vmatpush3.bf16.msra.mxu1 %v19905_v11  ;;  %v19959_v11 = vld [vmem:[%s25087_s7 + $0x1c4] sm:$0xff]  }
 0x844   : > { %17401 = vmatprep.subr.bf16.mxu1 %v19908_v46  ;;  %v19960_v46 = vld [vmem:[%s25087_s7 + $0x404] sm:$0xff]  }
 0x845   : > { %17741 = vmatmul.mubr.msk.bf16.vlgmr.msra.gmra.mrb[104].mxu0 %vm11612_vm15, %v24284_v24 }
 0x846   : > { %17372 = vmatpush3.bf16.msra.mxu0 %v19907_v33  ;;  %12240 = vmatprep.mubr.bf16.mxu0 %v24278_v43  ;;  %v19964_v33 = vld [vmem:[%s25087_s7 + $0x4a0] ss:$0 sps:$4 sm:$0x33]  }
 0x847   : > { %17402 = vmatpush3.bf16.msra.mxu1 %v19909_v14  ;;  %17373 = vmatprep.subr.bf16.mxu0 %v19910_v58  ;;  %v19961_v14 = vld [vmem:[%s25087_s7 + $0x3c4] sm:$0xff]   ;;  %v19962_v58 = vld [vmem:[%s25087_s7 + $0x40c] sm:$0xff]  }
 0x848   : > { %17403 = vmatprep.subr.bf16.mxu1 %v19912_v1  ;;  %v13107_v1 = vsel %vm11616_vm13, %v19964_v33, 0  ;;  %v20017_v33 = vld [vmem:[%s25087_s7 + $0x4dc] sm:$0xff]  }
 0x84a   : > { %17374 = vmatpush3.bf16.msra.mxu0 %v19911_v40  ;;  %v19966_v40 = vld [vmem:[%s25087_s7 + $0x250] sm:$0xff]  }
 0x84b   : > { %17404 = vmatpush3.bf16.msra.mxu1 %v19913_v16  ;;  %17375 = vmatprep.subr.bf16.mxu0 %v19914_v52  ;;  %v19963_v16 = vld [vmem:[%s25087_s7 + $0x3cc] sm:$0xff]   ;;  %v19965_v52 = vld [vmem:[%s25087_s7 + $0x414] sm:$0xff]  }
 0x84c   : > { %17405 = vmatprep.subr.bf16.mxu1 %v19916_v2  ;;  %v19967_v2 = vld [vmem:[%s25087_s7 + $0x3d4] sm:$0xff]  }
 0x84e   : > { %17376 = vmatpush3.bf16.msra.mxu0 %v19915_v45  ;;  %v19968_v45 = vld [vmem:[%s25087_s7 + $0x210] sm:$0xff]  }
 0x84f   : > { %17406 = vmatpush3.bf16.msra.mxu1 %v19917_v60  ;;  %17377 = vmatprep.subr.bf16.mxu0 %v19918_v21  ;;  %v19971_v60 = vld [vmem:[%s25087_s7 + $0x20c] ss:$0 sps:$4 sm:$0x33]   ;;  %v19969_v21 = vld [vmem:[%s25087_s7 + $0x258] sm:$0xff]  }
 0x850   : > { %17407 = vmatprep.subr.bf16.mxu1 %v19920_v18  ;;  %v13230_v18 = vrot.slane %v24278_v43, 2  ;;  %v20008_v43 = vld [vmem:[%s25087_s7 + $0x4fc] sm:$0xff]  }
 0x852   : > { %17378 = vmatpush3.bf16.msra.mxu0 %v19919_v39  ;;  %v19970_v39 = vld [vmem:[%s25087_s7 + $0x218] sm:$0xff]  }
 0x853   : > { %17408 = vmatpush3.bf16.msra.mxu1 %v19921_v15  ;;  %17379 = vmatprep.subr.bf16.mxu0 %v19922_v20  ;;  %v12889_v15 = vsel %vm11616_vm13, %v19971_v60, 0  ;;  %v19974_v20 = vld [vmem:[%s25087_s7 + $0x460] sm:$0xff]  }
 0x854   : > { %17409 = vmatprep.subr.bf16.mxu1 %v19924_v55  ;;  %v19972_v55 = vld [vmem:[%s25087_s7 + $0x260] sm:$0xff]  }
 0x856   : > { %17380 = vmatpush3.bf16.msra.mxu0 %v19923_v49  ;;  %v19973_v49 = vld [vmem:[%s25087_s7 + $0x220] sm:$0xff]  }
 0x857   : > { %17410 = vmatpush3.bf16.msra.mxu1 %v19925_v12  ;;  %17381 = vmatprep.subr.bf16.mxu0 %v19926_v10  ;;  %v19976_v12 = vld [vmem:[%s25087_s7 + $0x268] sm:$0xff]   ;;  %v19975_v10 = vld [vmem:[%s25087_s7 + $0x420] sm:$0xff]  }
 0x858   : > { %17756 = vmatprep.subr.bf16.mxu1 %v20083_v36 }
 0x85a   : > { %17382 = vmatpush3.bf16.msra.mxu0 %v19927_v61  ;;  %12470 = vmatmul.mubr.bf16.vlgmr.msra.gmra.mrb[96].mxu1 %v12327_v3  ;;  %v19978_v61 = vld [vmem:[%s25087_s7 + $0x468] sm:$0xff]  }
 0x85b   : > { %17383 = vmatprep.subr.bf16.mxu0 %v19928_v0  ;;  %17757 = vmatpush3.bf16.msra.mxu1 %v12653_v48  ;;  %v19980_v0 = vld [vmem:[%s25087_s7 + $0x270] sm:$0xff]  }
 0x85c   : > { %17758 = vmatprep.mubr.msk.bf16.mxu1 %vm20085_vm14, %v20083_v36  ;;  %17443 = vmatprep.subr.bf16.mxu1 %v19932_v28  ;;  %v19981_v48 = vld [vmem:[%s25087_s7 + $0x230] sm:$0xff]  }
 0x85d   : > { %v19982_v28 = vld [vmem:[%s25087_s7 + $0x470] sm:$0xff]  }
 0x85e   : > { %17384 = vmatpush3.bf16.msra.mxu0 %v19929_v23  ;;  %v19985_v23 = vld [vmem:[%s25087_s7 + $0x238] sm:$0xff]  }
 0x85f   : > { %17385 = vmatprep.subr.bf16.mxu0 %v19931_v54  ;;  %v19986_v54 = vld [vmem:[%s25087_s7 + $0x478] sm:$0xff]  }
 0x862   : > { %17386 = vmatpush3.bf16.msra.mxu0 %v19933_v27  ;;  %17759 = vmatmul.mubr.msk.bf16.vlgmr.msra.gmra.mrb[92].mxu1 %vm11612_vm15, %v12329_v62  ;;  %v19988_v27 = vld [vmem:[%s25087_s7 + $0x280] sm:$0xff]  }
 0x863   : > { %17444 = vmatpush3.bf16.msra.mxu1 %v19934_v29  ;;  %12923 = vmatprep.mubr.bf16.mxu1 %v24298_v56  ;;  %v19987_v29 = vld [vmem:[%s25087_s7 + $0x438] sm:$0xff]  }
 0x864   : > { %17445 = vmatprep.subr.bf16.mxu1 %v19935_v53  ;;  %17750 = vmatprep.subr.bf16.mxu0 %v20083_v36  ;;  %v19992_v53 = vld [vmem:[%s25087_s7 + $0x288] sm:$0xff]  }
 0x865   : > { %12241 = vmatmul.mubr.bf16.vlgmr.msra.gmra.mrb[116].mxu0 %v24276_v41 }
 0x866   : > { %17751 = vmatpush3.bf16.msra.mxu0 %v12435_v30  ;;  %17752 = vmatprep.mubr.msk.bf16.mxu0 %vm20085_vm14, %v20083_v36  ;;  %v19993_v30 = vld [vmem:[%s25087_s7 + $0x248] sm:$0xff]  }
 0x867   : > { %17446 = vmatpush3.bf16.msra.mxu1 %v19936_v35  ;;  %17419 = vmatprep.subr.bf16.mxu0 %v19940_v57  ;;  %v19991_v35 = vld [vmem:[%s25087_s7 + $0x440] sm:$0xff]   ;;  %v19994_v57 = vld [vmem:[%s25087_s7 + $0x488] sm:$0xff]  }
 0x868   : > { %17447 = vmatprep.subr.bf16.mxu1 %v19938_v42  ;;  %v19998_v42 = vld [vmem:[%s25087_s7 + $0x524] ss:$0 sps:$4 sm:$0x33]  }
 0x86b   : > { %17448 = vmatpush3.bf16.msra.mxu1 %v19939_v44  ;;  %v19995_v44 = vld [vmem:[%s25087_s7 + $0x448] sm:$0xff]  }
 0x86c   : > { %17449 = vmatprep.subr.bf16.mxu1 %v19942_v17  ;;  %v19996_v17 = vld [vmem:[%s25087_s7 + $0x490] sm:$0xff]  }
 0x86d   : > { %17753 = vmatmul.mubr.msk.bf16.vlgmr.msra.gmra.mrb[104].mxu0 %vm11612_vm15, %v12329_v62  ;;  %v19990_v62 = vld [vmem:[%s25087_s7 + $0x480] sm:$0xff]  }
 0x86e   : > { %17420 = vmatpush3.bf16.msra.mxu0 %v19941_v37  ;;  %12687 = vmatprep.mubr.bf16.mxu0 %v12328_v7  ;;  %v19953_v7 = vld [vmem:[%s25087_s7 + $0x3b4] sm:$0xff]   ;;  %v13229_v37 = vrot.slane %v24276_v41, 2 }
 0x86f   : > { %17450 = vmatpush3.bf16.msra.mxu1 %v19943_v47  ;;  %17421 = vmatprep.subr.bf16.mxu0 %v19944_v50  ;;  %v13555_v47 = vsel %vm11616_vm13, %v19998_v42, 0  ;;  %v19997_v50 = vld [vmem:[%s25087_s7 + $0x450] sm:$0xff]   ;;  %v20000_v41 = vld [vmem:[%s25087_s7 + $0x458] sm:$0xff]  }
 0x870   : > { %17451 = vmatprep.subr.bf16.mxu1 %v19946_v63  ;;  %v19999_v63 = vld [vmem:[%s25087_s7 + $0x498] sm:$0xff]  }
 0x872   : > { %17422 = vmatpush3.bf16.msra.mxu0 %v19945_v32  ;;  %v20001_v32 = vld [vmem:[%s25087_s7 + $0x290] ss:$0 sps:$4 sm:$0x33]  }
 0x873   : > { %17452 = vmatpush3.bf16.msra.mxu1 %v19947_v8  ;;  %17423 = vmatprep.subr.bf16.mxu0 %v19948_v25  ;;  %v13231_v8 = vrot.slane %v24284_v24, 2  ;;  %v13337_v25 = vsel %vm11616_vm13, %v20001_v32, 0  ;;  %v20003_v24 = vld [vmem:[%s25087_s7 + $0x4a4] sm:$0xff]  }
 0x874   : > { %17453 = vmatprep.subr.bf16.mxu1 %v19950_v6  ;;  %v20002_v6 = vld [vmem:[%s25087_s7 + $0x4e4] sm:$0xff]  }
 0x876   : > { %17424 = vmatpush3.bf16.msra.mxu0 %v19949_v38  ;;  %v20004_v38 = vld [vmem:[%s25087_s7 + $0x4ec] sm:$0xff]  }
 0x877   : > { %17454 = vmatpush3.bf16.msra.mxu1 %v19951_v59  ;;  %17425 = vmatprep.subr.bf16.mxu0 %v19952_v19  ;;  %v20006_v59 = vld [vmem:[%s25087_s7 + $0x4f4] sm:$0xff]  }
 0x878   : > { %17455 = vmatprep.subr.bf16.mxu1 %v19954_v34  ;;  %v20007_v19 = vld [vmem:[%s25087_s7 + $0x4b4] sm:$0xff]   ;;  %v20009_v34 = vld [vmem:[%s25087_s7 + $0x4bc] sm:$0xff]  }
 0x87a   : > { %17426 = vmatpush3.bf16.msra.mxu0 %v19953_v7  ;;  %v20010_v7 = vld [vmem:[%s25087_s7 + $0x504] sm:$0xff]  }
 0x87b   : > { %17456 = vmatpush3.bf16.msra.mxu1 %v19955_v51  ;;  %17427 = vmatprep.subr.bf16.mxu0 %v19956_v13  ;;  %v20011_v51 = vld [vmem:[%s25087_s7 + $0x4c4] sm:$0xff]   ;;  %v20012_v13 = vld [vmem:[%s25087_s7 + $0x50c] sm:$0xff]  }
 0x87c   : > { %17457 = vmatprep.subr.bf16.mxu1 %v19958_v5  ;;  %v20013_v5 = vld [vmem:[%s25087_s7 + $0x4cc] sm:$0xff]  }
 0x87e   : > { %17428 = vmatpush3.bf16.msra.mxu0 %v19957_v9  ;;  %v20014_v9 = vld [vmem:[%s25087_s7 + $0x514] sm:$0xff]  }
 0x87f   : > { %17458 = vmatpush3.bf16.msra.mxu1 %v19959_v11  ;;  %17429 = vmatprep.subr.bf16.mxu0 %v19960_v46  ;;  %v20015_v11 = vld [vmem:[%s25087_s7 + $0x4d4] sm:$0xff]   ;;  %v20016_v46 = vld [vmem:[%s25087_s7 + $0x51c] sm:$0xff]  }
 0x880   : > { %17768 = vmatprep.subr.bf16.mxu1 %v20083_v36 }
 0x882   : > { %17430 = vmatpush3.bf16.msra.mxu0 %v19961_v14  ;;  %12924 = vmatmul.mubr.bf16.vlgmr.msra.gmra.mrb[100].mxu1 %v24286_v4 }
 0x883   : > { %17431 = vmatprep.subr.bf16.mxu0 %v19962_v58  ;;  %17769 = vmatpush3.bf16.msra.mxu1 %v13107_v1 }
 0x884   : > { %17770 = vmatprep.mubr.msk.bf16.mxu1 %vm20085_vm14, %v20083_v36  ;;  %17491 = vmatprep.subr.bf16.mxu1 %v19966_v40 }
 0x886   : > { %17432 = vmatpush3.bf16.msra.mxu0 %v19963_v16 }
 0x887   : > { %17433 = vmatprep.subr.bf16.mxu0 %v19965_v52 }
 0x88a   : > { %17434 = vmatpush3.bf16.msra.mxu0 %v19967_v2  ;;  %17771 = vmatmul.mubr.msk.bf16.vlgmr.msra.gmra.mrb[92].mxu1 %vm11612_vm15, %v24313_v31 }
 0x88b   : > { %17492 = vmatpush3.bf16.msra.mxu1 %v19968_v45  ;;  %13371 = vmatprep.mubr.bf16.mxu1 %v13230_v18 }
 0x88c   : > { %17493 = vmatprep.subr.bf16.mxu1 %v19969_v21  ;;  %17762 = vmatprep.subr.bf16.mxu0 %v20083_v36 }
 0x88d   : > { %12688 = vmatmul.mubr.bf16.vlgmr.msra.gmra.mrb[120].mxu0 %v12327_v3  ;;  %v19979_v3 = vld [vmem:[%s25087_s7 + $0x428] sm:$0xff]  }
 0x88e   : > { %17763 = vmatpush3.bf16.msra.mxu0 %v12889_v15  ;;  %17764 = vmatprep.mubr.msk.bf16.mxu0 %vm20085_vm14, %v20083_v36 }
 0x88f   : > { %17494 = vmatpush3.bf16.msra.mxu1 %v19970_v39  ;;  %17467 = vmatprep.subr.bf16.mxu0 %v19974_v20 }
 0x890   : > { %17495 = vmatprep.subr.bf16.mxu1 %v19972_v55 }
 0x893   : > { %17496 = vmatpush3.bf16.msra.mxu1 %v19973_v49 }
 0x894   : > { %17497 = vmatprep.subr.bf16.mxu1 %v19976_v12 }
 0x895   : > { %17765 = vmatmul.mubr.msk.bf16.vlgmr.msra.gmra.mrb[104].mxu0 %vm11612_vm15, %v24313_v31  ;;  %v19984_v31 = vld [vmem:[%s25087_s7 + $0x278] sm:$0xff]  }
 0x896   : > { %17468 = vmatpush3.bf16.msra.mxu0 %v19975_v10  ;;  %13141 = vmatprep.mubr.bf16.mxu0 %v24298_v56  ;;  %v19983_v56 = vld [vmem:[%s25087_s7 + $0x430] sm:$0xff]  }
 0x897   : > { %17498 = vmatpush3.bf16.msra.mxu1 %v19977_v22  ;;  %17469 = vmatprep.subr.bf16.mxu0 %v19978_v61 }
 0x898   : > { %17499 = vmatprep.subr.bf16.mxu1 %v19980_v0 }
 0x89a   : > { %17470 = vmatpush3.bf16.msra.mxu0 %v19979_v3 }
 0x89b   : > { %17500 = vmatpush3.bf16.msra.mxu1 %v19981_v48  ;;  %17471 = vmatprep.subr.bf16.mxu0 %v19982_v28 }
 0x89c   : > { %17501 = vmatprep.subr.bf16.mxu1 %v19984_v31 }
 0x89e   : > { %17472 = vmatpush3.bf16.msra.mxu0 %v19983_v56 }
 0x89f   : > { %17502 = vmatpush3.bf16.msra.mxu1 %v19985_v23  ;;  %17473 = vmatprep.subr.bf16.mxu0 %v19986_v54 }
 0x8a0   : > { %17503 = vmatprep.subr.bf16.mxu1 %v19988_v27 }
 0x8a2   : > { %17474 = vmatpush3.bf16.msra.mxu0 %v19987_v29 }
 0x8a3   : > { %17504 = vmatpush3.bf16.msra.mxu1 %v19989_v26  ;;  %17475 = vmatprep.subr.bf16.mxu0 %v19990_v62 }
 0x8a4   : > { %17505 = vmatprep.subr.bf16.mxu1 %v19992_v53 }
 0x8a6   : > { %17476 = vmatpush3.bf16.msra.mxu0 %v19991_v35 }
 0x8a7   : > { %17506 = vmatpush3.bf16.msra.mxu1 %v19993_v30  ;;  %17477 = vmatprep.subr.bf16.mxu0 %v19994_v57 }
 0x8a8   : > { %17780 = vmatprep.subr.bf16.mxu1 %v20083_v36 }
 0x8aa   : > { %17478 = vmatpush3.bf16.msra.mxu0 %v19995_v44  ;;  %13372 = vmatmul.mubr.bf16.vlgmr.msra.gmra.mrb[104].mxu1 %v13229_v37 }
 0x8ab   : > { %17479 = vmatprep.subr.bf16.mxu0 %v19996_v17  ;;  %17781 = vmatpush3.bf16.msra.mxu1 %v13555_v47 }
 0x8ac   : > { %17782 = vmatprep.mubr.msk.bf16.mxu1 %vm20085_vm14, %v20083_v36  ;;  %17786 = vmatprep.subr.mxu1 %v20083_v36 }
 0x8ae   : > { %17480 = vmatpush3.bf16.msra.mxu0 %v19997_v50 }
 0x8af   : > { %17481 = vmatprep.subr.bf16.mxu0 %v19999_v63  ;;  %v20086_v63 = vmov 0.0|0.0  }
 0x8b2   : > { %17482 = vmatpush3.bf16.msra.mxu0 %v20000_v41  ;;  %17783 = vmatmul.mubr.msk.bf16.vlgmr.msra.gmra.mrb[92].mxu1 %vm11612_vm15, %v13231_v8 }
 0x8b3   : > { %17774 = vmatprep.subr.bf16.mxu0 %v20083_v36  ;;  %17788 = vmatprep.mubr.msk.f32.mxu1 %vm20085_vm14, %v20083_v36 }
 0x8b5   : > { %13142 = vmatmul.mubr.bf16.vlgmr.msra.gmra.mrb[124].mxu0 %v24286_v4  ;;  %v20005_v4 = vld [vmem:[%s25087_s7 + $0x4ac] sm:$0xff]  }
 0x8b6   : > { %17775 = vmatpush3.bf16.msra.mxu0 %v13337_v25  ;;  %17776 = vmatprep.mubr.msk.bf16.mxu0 %vm20085_vm14, %v20083_v36 }
 0x8b7   : > { %17515 = vmatprep.subr.bf16.mxu0 %v20002_v6 }
 0x8bd   : > { %17777 = vmatmul.mubr.msk.bf16.vlgmr.msra.gmra.mrb[104].mxu0 %vm11612_vm15, %v13231_v8 }
 0x8be   : > { %17516 = vmatpush3.bf16.msra.mxu0 %v20003_v24  ;;  %13589 = vmatprep.mubr.bf16.mxu0 %v13230_v18 }
 0x8bf   : > { %17517 = vmatprep.subr.bf16.mxu0 %v20004_v38 }
 0x8c2   : > { %17518 = vmatpush3.bf16.msra.mxu0 %v20005_v4 }
 0x8c3   : > { %17519 = vmatprep.subr.bf16.mxu0 %v20006_v59 }
 0x8c6   : > { %17520 = vmatpush3.bf16.msra.mxu0 %v20007_v19 }
 0x8c7   : > { %17521 = vmatprep.subr.bf16.mxu0 %v20008_v43 }
 0x8ca   : > { %17522 = vmatpush3.bf16.msra.mxu0 %v20009_v34 }
 0x8cb   : > { %17523 = vmatprep.subr.bf16.mxu0 %v20010_v7 }
 0x8ce   : > { %17524 = vmatpush3.bf16.msra.mxu0 %v20011_v51 }
 0x8cf   : > { %17525 = vmatprep.subr.bf16.mxu0 %v20012_v13 }
 0x8d2   : > { %17526 = vmatpush3.bf16.msra.mxu0 %v20013_v5 }
 0x8d3   : > { %17527 = vmatprep.subr.bf16.mxu0 %v20014_v9 }
 0x8d6   : > { %17528 = vmatpush3.bf16.msra.mxu0 %v20015_v11 }
 0x8d7   : > { %17529 = vmatprep.subr.bf16.mxu0 %v20016_v46 }
 0x8da   : > { %17530 = vmatpush3.bf16.msra.mxu0 %v20017_v33 }
 0x8db   : > { %18016 = vmatprep.subr.bf16.mxu0 %v20086_v63 }
 0x8dd   : > { %13590 = vmatmul.mubr.bf16.vlgmr.msra.gmra.mrb[128].mxu0 %v13229_v37 }
 0x8de   : > { %17897 = vmatprep.mubr.msk.f32.mxu0 %vm20085_vm14, %v20083_v36 }
 0x8e5   : > { %v17315_v14 = vpop.f32.mrb[84].mxu1 }
 0x8e6   : > { %v17316_v58 = vpop.f32.mrb[85].mxu1 }
 0x8e7   : > { %v17317_v1 = vadd.f32 %v17316_v58, %v17315_v14  ;;  %v17318_v40 = vpop.f32.mrb[86].mxu1 }
 0x8e8   : > { %v17319_v16 = vpop.f32.mrb[87].mxu1 }
 0x8e9   : > { %v17320_v52 = vadd.f32 %v17319_v16, %v17318_v40 }
 0x905   : > { %v17363_v2 = vpop.f32.mrb[88].mxu1 }
 0x906   : > { %v17364_v45 = vpop.f32.mrb[89].mxu1 }
 0x907   : > { %v17365_v60 = vadd.f32 %v17364_v45, %v17363_v2  ;;  %v17366_v21 = vpop.f32.mrb[90].mxu1 }
 0x908   : > { %v17339_v18 = vpop.f32.mrb[108].mxu0  ;;  %v17367_v39 = vpop.f32.mrb[91].mxu1 }
 0x909   : > { %v18065_v15 = vadd.f32 %v17365_v60, %v17317_v1  ;;  %v17368_v20 = vadd.f32 %v17367_v39, %v17366_v21  ;;  %v17340_v55 = vpop.f32.mrb[109].mxu0 }
 0x90a   : > { %v17341_v49 = vadd.f32 %v17340_v55, %v17339_v18  ;;  %v17342_v12 = vpop.f32.mrb[110].mxu0 }
 0x90b   : > { %v18070_v10 = vadd.f32 %v17368_v20, %v17320_v52  ;;  %v17343_v22 = vpop.f32.mrb[111].mxu0 }
 0x90c   : > { %v17344_v61 = vadd.f32 %v17343_v22, %v17342_v12 }
 0x910   : > { %v11913_v0 = vpop.f32.mrb[112].mxu0 }
 0x911   : > { %v11914_v3 = vadd.f32 %v17341_v49, %v11913_v0  ;;  %v17736_v48 = vpop.f32.mrb[113].mxu0 }
 0x912   : > { %v11916_v28 = vpop.f32.mrb[114].mxu0 }
 0x913   : > { %v11917_v31 = vadd.f32 %v17344_v61, %v11916_v28  ;;  %v17737_v56 = vpop.f32.mrb[115].mxu0 }
 0x92d   : > { %v17411_v23 = vpop.f32.mrb[96].mxu1 }
 0x92e   : > { %v17412_v54 = vpop.f32.mrb[97].mxu1 }
 0x92f   : > { %v17413_v27 = vadd.f32 %v17412_v54, %v17411_v23  ;;  %v17414_v29 = vpop.f32.mrb[98].mxu1 }
 0x930   : > { %v17415_v26 = vpop.f32.mrb[99].mxu1 }
 0x931   : > { %v18066_v62 = vadd.f32 %v18065_v15, %v17413_v27  ;;  %v17416_v53 = vadd.f32 %v17415_v26, %v17414_v29 }
 0x933   : > { %v18071_v35 = vadd.f32 %v18070_v10, %v17416_v53 }
 0x938   : > { %v17387_v30 = vpop.f32.mrb[116].mxu0 }
 0x939   : > { %v17388_v57 = vpop.f32.mrb[117].mxu0 }
 0x93a   : > { %v17389_v42 = vadd.f32 %v17388_v57, %v17387_v30  ;;  %v17390_v44 = vpop.f32.mrb[118].mxu0 }
 0x93b   : > { %v17391_v17 = vpop.f32.mrb[119].mxu0 }
 0x93c   : > { %v12243_v37 = vadd.f32 %v17389_v42, %v11914_v3  ;;  %v17392_v47 = vadd.f32 %v17391_v17, %v17390_v44  ;;  %v13736_v42 = vld [vmem:[%s25090_s10] sm:$0xff]  ;;  %v13737_v44 = vld [vmem:[%s25090_s10 + $0x8] sm:$0xff] }
 0x93e   : > { %v12246_v50 = vadd.f32 %v17392_v47, %v11917_v31  ;;  %v13652_v47 = vld [vmem:[%s25089_s9] sm:$0xf] }
 0x955   : > { %v17459_v41 = vpop.f32.mrb[100].mxu1 }
 0x956   : > { %v17460_v32 = vpop.f32.mrb[101].mxu1 }
 0x957   : > { %v17461_v8 = vadd.f32 %v17460_v32, %v17459_v41  ;;  %v17462_v25 = vpop.f32.mrb[102].mxu1  ;;  %v13738_v41 = vld [vmem:[%s25090_s10 + $0x10] sm:$0xff]  ;;  %v13739_v32 = vld [vmem:[%s25090_s10 + $0x18] sm:$0xff] }
 0x958   : > { %v17463_v6 = vpop.f32.mrb[103].mxu1 }
 0x959   : > { %v18067_v24 = vadd.f32 %v18066_v62, %v17461_v8  ;;  %v17464_v38 = vadd.f32 %v17463_v6, %v17462_v25  ;;  %v17960_v8 = vpack.c.bf16 %v13739_v32, %v13738_v41  ;;  %v13740_v25 = vld [vmem:[%s25090_s10 + $0x20] sm:$0xff]  ;;  %v13741_v6 = vld [vmem:[%s25090_s10 + $0x28] sm:$0xff]  ;;  %v16939_v41 = vld [vmem:[%s25090_s10 + $0x118] sm:$0xff] }
 0x95b   : > { %v18072_v4 = vadd.f32 %v18071_v35, %v17464_v38  ;;  %v13742_v38 = vld [vmem:[%s25090_s10 + $0x30] sm:$0xff] }
 0x960   : > { %v17435_v59 = vpop.f32.mrb[120].mxu0 }
 0x961   : > { %v17436_v19 = vpop.f32.mrb[121].mxu0 }
 0x962   : > { %v17437_v43 = vadd.f32 %v17436_v19, %v17435_v59  ;;  %v17438_v34 = vpop.f32.mrb[122].mxu0  ;;  %v13744_v19 = vld [vmem:[%s25090_s10 + $0x40] sm:$0xff] }
 0x963   : > { %v17439_v7 = vpop.f32.mrb[123].mxu0 }
 0x964   : > { %v18077_v51 = vadd.f32 %v17437_v43, %v12243_v37  ;;  %v17440_v13 = vadd.f32 %v17439_v7, %v17438_v34  ;;  %v13745_v43 = vld [vmem:[%s25090_s10 + $0x48] sm:$0xff]  ;;  %v14077_v7 = vld [vmem:[%s25092_s12] sm:$0xff] }
 0x965   : > { %v17969_v34 = vpack.c.bf16 %v13745_v43, %v13744_v19  ;;  %v14081_v19 = vld [vmem:[%s25092_s12 + $0x20] sm:$0xff]  ;;  %v14082_v43 = vld [vmem:[%s25092_s12 + $0x28] sm:$0xff] }
 0x966   : > { %v18083_v5 = vadd.f32 %v17440_v13, %v12246_v50  ;;  %v17957_v50 = vpack.c.bf16 %v13737_v44, %v13736_v42  ;;  %v14079_v13 = vld [vmem:[%s25092_s12 + $0x10] sm:$0xff] }
 0x97d   : > { %v17507_v9 = vpop.f32.mrb[104].mxu1 }
 0x97e   : > { %v17508_v11 = vpop.f32.mrb[105].mxu1 }
 0x97f   : > { %v17509_v46 = vadd.f32 %v17508_v11, %v17507_v9  ;;  %v17510_v33 = vpop.f32.mrb[106].mxu1  ;;  %v14080_v9 = vld [vmem:[%s25092_s12 + $0x18] sm:$0xff] }
 0x980   : > { %v17511_v14 = vpop.f32.mrb[107].mxu1  ;;  %v18020_v11 = vpack.c.bf16 %v14080_v9, %v14079_v13 }
 0x981   : > { %v17512_v58 = vadd.f32 %v17511_v14, %v17510_v33  ;;  %v18068_v1 = vadd.f32 %v18067_v24, %v17509_v46  ;;  %v17963_v24 = vpack.c.bf16 %v13741_v6, %v13740_v25  ;;  %v16909_v46 = vld [vmem:[%s25088_s8] ss:$0 sm:$0xff]  ;;  %v16912_v33 = vld [vmem:[%s25090_s10 + $0x50] sm:$0xff]  ;;  %v16913_v14 = vld [vmem:[%s25090_s10 + $0x58] sm:$0xff] }
 0x982   : > { %v16941_v25 = vld [vmem:[%s25090_s10 + $0x128] sm:$0xff] }
 0x983   : > { %v18073_v40 = vadd.f32 %v18072_v4, %v17512_v58  ;;  %v13743_v4 = vld [vmem:[%s25090_s10 + $0x38] sm:$0xff] }
 0x984   : > { %v17966_v59 = vpack.c.bf16 %v13743_v4, %v13742_v38  ;;  %v16943_v38 = vld [vmem:[%s25090_s10 + $0x138] sm:$0xff] }
 0x985   : > { %v13632_v16 = vpop.f32.mrb[92].mxu1 }
 0x986   : > { %v17784_v52 = vpop.f32.mrb[93].mxu1 }
 0x987   : > { %v13635_v2 = vpop.f32.mrb[94].mxu1 }
 0x988   : > { %v17483_v45 = vpop.f32.mrb[124].mxu0  ;;  %v17785_v60 = vpop.f32.mrb[95].mxu1 }
 0x989   : > { %v17484_v21 = vpop.f32.mrb[125].mxu0 }
 0x98a   : > { %v17485_v18 = vadd.f32 %v17484_v21, %v17483_v45  ;;  %v17486_v39 = vpop.f32.mrb[126].mxu0  ;;  %v16915_v45 = vld [vmem:[%s25090_s10 + $0x68] sm:$0xff]  ;;  %v16916_v21 = vld [vmem:[%s25090_s10 + $0x70] sm:$0xff] }
 0x98b   : > { %v17487_v15 = vpop.f32.mrb[127].mxu0 }
 0x98c   : > { %v18078_v20 = vadd.f32 %v18077_v51, %v17485_v18  ;;  %v17488_v55 = vadd.f32 %v17487_v15, %v17486_v39  ;;  %v14078_v51 = vld [vmem:[%s25092_s12 + $0x8] sm:$0xff]  ;;  %v16917_v18 = vld [vmem:[%s25090_s10 + $0x78] sm:$0xff]  ;;  %v16918_v15 = vld [vmem:[%s25090_s10 + $0x80] sm:$0xff] }
 0x98d   : > { %v17978_v39 = vpack.c.bf16 %v16917_v18, %v16916_v21 }
 0x98e   : > { %v18084_v49 = vadd.f32 %v18083_v5, %v17488_v55  ;;  %v18017_v5 = vpack.c.bf16 %v14078_v51, %v14077_v7  ;;  %v13735_v7 = vld [vmem:[%s25091_s11] sm:$0x1] }
 0x990   : > { %v13414_v12 = vpop.f32.mrb[104].mxu0  ;;  %18018 = vmatpush3.bf16.msra.mxu0 %v18017_v5 }
 0x991   : > { %v18069_v10 = vadd.f32 %v18068_v1, %v13414_v12  ;;  %v17778_v22 = vpop.f32.mrb[105].mxu0  ;;  %18019 = vmatprep.subr.bf16.mxu0 %v20086_v63  ;;  %v16921_v12 = vld [vmem:[%s25090_s10 + $0x98] sm:$0xff] }
 0x992   : > { %v13417_v61 = vpop.f32.mrb[106].mxu0  ;;  %v16923_v22 = vld [vmem:[%s25090_s10 + $0xa0] sm:$0xff] }
 0x993   : > { %v18074_v0 = vadd.f32 %v18073_v40, %v13417_v61  ;;  %v17779_v3 = vpop.f32.mrb[107].mxu0  ;;  %v16924_v61 = vld [vmem:[%s25090_s10 + $0xa8] sm:$0xff] }
 0x994   : > { %18021 = vmatpush3.bf16.msra.mxu0 %v18020_v11 }
 0x995   : > { %18022 = vmatprep.subr.bf16.mxu0 %v20086_v63 }
 0x9b0   : > { %v17531_v48 = vpop.f32.mrb[128].mxu0 }
 0x9b1   : > { %v17532_v28 = vpop.f32.mrb[129].mxu0 }
 0x9b2   : > { %v17533_v31 = vadd.f32 %v17532_v28, %v17531_v48  ;;  %v17534_v56 = vpop.f32.mrb[130].mxu0  ;;  %v16925_v48 = vld [vmem:[%s25090_s10 + $0xb0] sm:$0xff]  ;;  %v16926_v28 = vld [vmem:[%s25090_s10 + $0xb8] sm:$0xff] }
 0x9b3   : > { %v17535_v23 = vpop.f32.mrb[131].mxu0 }
 0x9b4   : > { %v18079_v54 = vadd.f32 %v18078_v20, %v17533_v31  ;;  %v17536_v27 = vadd.f32 %v17535_v23, %v17534_v56  ;;  %v16919_v20 = vld [vmem:[%s25090_s10 + $0x88] sm:$0xff]  ;;  %v17990_v31 = vpack.c.bf16 %v16926_v28, %v16925_v48  ;;  %v16927_v56 = vld [vmem:[%s25090_s10 + $0xc0] sm:$0xff] }
 0x9b5   : > { %v17981_v55 = vpack.c.bf16 %v16919_v20, %v16918_v15  ;;  %v16928_v23 = vld [vmem:[%s25090_s10 + $0xc8] sm:$0xff] }
 0x9b6   : > { %v18080_v29 = vadd.f32 %v18079_v54, %v13632_v16  ;;  %v18085_v26 = vadd.f32 %v18084_v49, %v17536_v27  ;;  %v17972_v16 = vpack.c.bf16 %v16913_v14, %v16912_v33  ;;  %v16920_v49 = vld [vmem:[%s25090_s10 + $0x90] sm:$0xff]  ;;  %v17993_v54 = vpack.c.bf16 %v16928_v23, %v16927_v56 }
 0x9b7   : > { %v16929_v27 = vld [vmem:[%s25090_s10 + $0xd0] sm:$0xff] }
 0x9b8   : > { %v13643_v62 = vmax.f32 %v18069_v10, %v18080_v29  ;;  %v18086_v53 = vadd.f32 %v18085_v26, %v13635_v2  ;;  %v16914_v2 = vld [vmem:[%s25090_s10 + $0x60] sm:$0xff]  ;;  %v17984_v10 = vpack.c.bf16 %v16921_v12, %v16920_v49  ;;  %v16930_v29 = vld [vmem:[%s25090_s10 + $0xd8] sm:$0xff] }
 0x9b9   : > { %v17975_v60 = vpack.c.bf16 %v16915_v45, %v16914_v2  ;;  %v17996_v26 = vpack.c.bf16 %v16930_v29, %v16929_v27 }
 0x9ba   : > { %v13644_v35 = vmax.f32 %v18074_v0, %v18086_v53  ;;  %v13647_v30 = vrot.slane %v13643_v62, 1  ;;  %v17987_v0 = vpack.c.bf16 %v16924_v61, %v16923_v22  ;;  %v16932_v53 = vld [vmem:[%s25090_s10 + $0xe8] sm:$0xff] }
 0x9bc   : > { %v13648_v57 = vrot.slane %v13644_v35, 1 }
 0x9be   : > { %v13649_v17 = vsel %vm2150_vm3, %v13647_v30, %v13648_v57  ;;  %v16934_v30 = vld [vmem:[%s25090_s10 + $0xf0] sm:$0xff]  ;;  %v16935_v57 = vld [vmem:[%s25090_s10 + $0xf8] sm:$0xff]  ;;  %vm14162_vm3 = vcmask 155648  }
 0x9bf   : > { %v13651_v37 = vmax.f32 %v13643_v62, %v13649_v17  ;;  %v16931_v62 = vld [vmem:[%s25090_s10 + $0xe0] sm:$0xff]  ;;  %v18002_v42 = vpack.c.bf16 %v16935_v57, %v16934_v30 }
 0x9c0   : > { %v17999_v35 = vpack.c.bf16 %v16932_v53, %v16931_v62  ;;  %v16936_v17 = vld [vmem:[%s25090_s10 + $0x100] sm:$0xff] }
 0x9c1   : > { %17787 = vmatpush3.msra.mxu1 %v13651_v37  ;;  %v16937_v37 = vld [vmem:[%s25090_s10 + $0x108] sm:$0xff] }
 0x9c2   : > { %17789 = vmatmul.mubr.msk.f32.vlgmr.msra.gmra.mrb[108].mxu1 %vm13660_vm0, %v13652_v47  ;;  %17956 = vmatprep.subr.bf16.mxu1 %v20086_v63  ;;  %v18005_v47 = vpack.c.bf16 %v16937_v37, %v16936_v17 }
 0x9c3   : > { %17958 = vmatpush3.bf16.msra.mxu1 %v17957_v50  ;;  %17811 = vmatprep.mubr.msk.f32.mxu1 %vm20085_vm14, %v20083_v36  ;;  %v16938_v50 = vld [vmem:[%s25090_s10 + $0x110] sm:$0xff] }
 0x9c4   : > { %17959 = vmatprep.subr.bf16.mxu1 %v20086_v63  ;;  %v18008_v32 = vpack.c.bf16 %v16939_v41, %v16938_v50 }
 0x9c7   : > { %17961 = vmatpush3.bf16.msra.mxu1 %v17960_v8  ;;  %v16940_v8 = vld [vmem:[%s25090_s10 + $0x120] sm:$0xff] }
 0x9c8   : > { %17962 = vmatprep.subr.bf16.mxu1 %v20086_v63  ;;  %v18011_v6 = vpack.c.bf16 %v16941_v25, %v16940_v8 }
 0x9cb   : > { %17964 = vmatpush3.bf16.msra.mxu1 %v17963_v24  ;;  %v16942_v24 = vld [vmem:[%s25090_s10 + $0x130] sm:$0xff] }
 0x9cc   : > { %17965 = vmatprep.subr.bf16.mxu1 %v20086_v63  ;;  %v18014_v4 = vpack.c.bf16 %v16943_v38, %v16942_v24 }
 0x9cf   : > { %17967 = vmatpush3.bf16.msra.mxu1 %v17966_v59 }
 0x9d0   : > { %17968 = vmatprep.subr.bf16.mxu1 %v20086_v63 }
 0x9d3   : > { %17970 = vmatpush3.bf16.msra.mxu1 %v17969_v34  ;;  %v18023_v34 = vpack.c.bf16 %v14082_v43, %v14081_v19 }
 0x9d4   : > { %17971 = vmatprep.subr.bf16.mxu1 %v20086_v63 }
 0x9d5   : > { %18024 = vmatpush3.bf16.msra.mxu0 %v18023_v34 }
 0x9d6   : > { %17895 = vmatprep.subr.mxu0 %v20083_v36 }
 0xa95   : > { %v13730_v58 = vpop.f32.mrb[108].mxu1 }
 0xa96   : > { %v13731_v1 = vadd.f32 %v16909_v46, %v13730_v58  ;;  %v17790_v40 = vpop.f32.mrb[109].mxu1 }
 0xa98   : > { %v24902_v52 = vmax.f32 %v13731_v1, 0.0 }
 0xa9a   : > { %17812 = vmatmul.mubr.msk.f32.vlgmr.msra.gmra.mrb[110].mxu1 %vm13746_vm1, %v24902_v52  ;;  %v13832_v3 = vrot.slane %v24902_v52, 1  ;;  %v13917_v44 = vrot.slane %v24902_v52, 2  ;;  %v14002_v59 = vrot.slane %v24902_v52, 3 }
 0xa9b   : > { %17973 = vmatpush3.bf16.msra.mxu1 %v17972_v16  ;;  %17834 = vmatprep.mubr.msk.f32.mxu1 %vm20085_vm14, %v20083_v36 }
 0xa9c   : > { %17974 = vmatprep.subr.bf16.mxu1 %v20086_v63 }
 0xa9f   : > { %17976 = vmatpush3.bf16.msra.mxu1 %v17975_v60 }
 0xaa0   : > { %17977 = vmatprep.subr.bf16.mxu1 %v20086_v63 }
 0xaa3   : > { %17979 = vmatpush3.bf16.msra.mxu1 %v17978_v39 }
 0xaa4   : > { %17980 = vmatprep.subr.bf16.mxu1 %v20086_v63 }
 0xaa7   : > { %17982 = vmatpush3.bf16.msra.mxu1 %v17981_v55 }
 0xaa8   : > { %17983 = vmatprep.subr.bf16.mxu1 %v20086_v63 }
 0xaab   : > { %17985 = vmatpush3.bf16.msra.mxu1 %v17984_v10 }
 0xaac   : > { %17986 = vmatprep.subr.bf16.mxu1 %v20086_v63 }
 0xaae   : > { %17835 = vmatmul.mubr.msk.f32.vlgmr.msra.gmra.mrb[110].mxu1 %vm13746_vm1, %v13832_v3 }
 0xaaf   : > { %17988 = vmatpush3.bf16.msra.mxu1 %v17987_v0  ;;  %17857 = vmatprep.mubr.msk.f32.mxu1 %vm20085_vm14, %v20083_v36 }
 0xab0   : > { %17989 = vmatprep.subr.bf16.mxu1 %v20086_v63 }
 0xab3   : > { %17991 = vmatpush3.bf16.msra.mxu1 %v17990_v31 }
 0xab4   : > { %17992 = vmatprep.subr.bf16.mxu1 %v20086_v63 }
 0xab7   : > { %17994 = vmatpush3.bf16.msra.mxu1 %v17993_v54 }
 0xab8   : > { %17995 = vmatprep.subr.bf16.mxu1 %v20086_v63 }
 0xabb   : > { %17997 = vmatpush3.bf16.msra.mxu1 %v17996_v26 }
 0xabc   : > { %17998 = vmatprep.subr.bf16.mxu1 %v20086_v63 }
 0xabf   : > { %18000 = vmatpush3.bf16.msra.mxu1 %v17999_v35 }
 0xac0   : > { %18001 = vmatprep.subr.bf16.mxu1 %v20086_v63 }
 0xac2   : > { %17858 = vmatmul.mubr.msk.f32.vlgmr.msra.gmra.mrb[110].mxu1 %vm13746_vm1, %v13917_v44 }
 0xac3   : > { %18003 = vmatpush3.bf16.msra.mxu1 %v18002_v42  ;;  %17880 = vmatprep.mubr.msk.f32.mxu1 %vm20085_vm14, %v20083_v36  ;;  %v14084_v36 = vld [vmem:[%s25093_s13] sm:$0x1] }
 0xac4   : > { %18004 = vmatprep.subr.bf16.mxu1 %v20086_v63 }
 0xac7   : > { %18006 = vmatpush3.bf16.msra.mxu1 %v18005_v47 }
 0xac8   : > { %18007 = vmatprep.subr.bf16.mxu1 %v20086_v63 }
 0xacb   : > { %18009 = vmatpush3.bf16.msra.mxu1 %v18008_v32 }
 0xacc   : > { %18010 = vmatprep.subr.bf16.mxu1 %v20086_v63 }
 0xacf   : > { %18012 = vmatpush3.bf16.msra.mxu1 %v18011_v6 }
 0xad0   : > { %18013 = vmatprep.subr.bf16.mxu1 %v20086_v63  ;;  %v14083_v63 = vld [vmem:[%s25092_s12 + $0x30] sm:$0x3] }
 0xad1   : > { %17896 = vmatpush3.msk.msra.mxu0 %vm11616_vm13, %v14083_v63 }
 0xad3   : > { %18015 = vmatpush3.bf16.msra.mxu1 %v18014_v4 }
 0xad6   : > { %17881 = vmatmul.mubr.msk.f32.vlgmr.msra.gmra.mrb[110].mxu1 %vm13746_vm1, %v14002_v59 }
 0xba9   : > { %v14071_v51 = vpop.f32.mrb[110].mxu1 }
 0xbaa   : > { %v18087_v13 = vadd.f32 %v14071_v51, %v13735_v7  ;;  %v17882_v5 = vpop.f32.mrb[111].mxu1 }
 0xbac   : > { %v14076_v9 = vmax.f32 %v18087_v13, 0.0 }
 0xbae   : > { %17898 = vmatmul.mubr.msk.f32.vlgmr.msra.gmra.mrb[102].mxu0 %vm14085_vm2, %v14076_v9 }
 0xc81   : > { %v14158_v11 = vpop.f32.mrb[102].mxu0 }
 0xc82   : > { %v14159_v46 = vadd.f32 %v14158_v11, %v14084_v36  ;;  %v17899_v33 = vpop.f32.mrb[103].mxu0 }
 0xc84   : > { %14163 = vst.msk [vmem:[%s459_s20] sm:$0x1] %vm14162_vm3, %v14159_v46 }
 0xc85   : > { %20031 = shalt.err (!%p20028_p3)
}
 0xc86   : > { %s20032_s26 = scalar_lea.hbm %s25038_s24, 16  ;;  %s20036_s21 = scalar_lea.hbm %s25094_s14, 32 }
 0xc87   : > { %p20033_p4 = scmp.ne.s32.totalorder %s25038_s24, %s20032_s26  ;;  %p20037_p9 = scmp.lt.u32.totalorder %s25038_s24, %s25094_s14 }
 0xc88   : > { %p20038_p10 = scmp.lt.u32.totalorder %s20036_s21, %s20032_s26  ;;  %p20040_p12 = scmp.lt.u32.totalorder %s20032_s26, %s25038_s24 }
 0xc89   : > { %p20034_p7 = pnand %p20033_p4, %p20201_p5 }
 0xc8a   : > { %p20039_p11 = por %p20038_p10, %p20037_p9 }
 0xc8b   : > { %p20035_p8 = pneg %p20034_p7 }
 0xc8c   : > { %p20041_p13 = por %p20040_p12, %p20039_p11 }
 0xc8e   : > { %p20042_p0 = pnand %p20041_p13, %p20035_p8 }
 0xc90   : > { %20045 = shalt.err (!%p20042_p0)
}
 0xc91   : > { %18564 = dma.vmem_to_hbm [thread:$0]  (%p20201_p5), %s25040_s22, 16, %s25038_s24, %s14165_s28  }
 0xc92 PF: > { %p18570_p1 = scmp.ge.s32.totalorder %s20080_s16, 2  ;;  %s14189_s27 = sand.u32 1, %s20068_s29  }
 0xc93   : > { %s14190_s19 = scalar_lea.sflag [#allocation3], %s14189_s27 }
 0xc94   : > { %p18567_p2 = pnand %p18570_p1, %p20205_p6 }
 0xc96   : > { %20063 = dma.done.wait (!%p18567_p2), %s14190_s19, 16  }
 0xc97   : > { %20065 = vsyncadd (!%p18567_p2), %s14190_s19, 4294967280  ;;  %s25108_s16 = sld [smem:[#allocation6_spill]]  ;;  %s25109_s26 = sld [smem:[#allocation5_spill]] }
 0xc98   : > { %s25110_s15 = sld [smem:[#allocation7_spill]]  ;;  %s25111_s29 = smov %s20072_s30 }
 0xc9d   : > { %p24_p3 = scmp.ge.s32.totalorder %s25108_s16, 4   ;;  %s25112_s30 = smov %s25109_s26 }
 0xc9f   :  { %26 = sbr.rel (!%p24_p3) target bundleno = 3 (0x3), region = 141 }
 0xca6   :  { %14194 = vsyncpa [#allocation3], 1 }
 0xca7   :  { %14196 = vsyncpa [#allocation3 + $0x1], 1 }

</bundles_post_ra>
